<compile_context>
chip_gen: v7x
topology: tpu7x:2x2x1
jax: 0.10.0
libtpu: 0.0.40
codegen_flags: <defaults>
</compile_context>

<pallas_src>
import functools

import numpy as np
import jax
import jax.numpy as jnp
from jax import lax
from jax.experimental import pallas as pl
from jax.experimental.pallas import tpu as pltpu


# ----------------------------------------------------------------------------
# Layer configuration mirroring Discriminator.__init__
#   (cin, cout, stride, layer_norm, lrelu) -- kernel=3, pad=1 everywhere.
# ----------------------------------------------------------------------------
LAYER_CFG = [
    (3,   32,  1, False, True),   # init_stage
    (32,  64,  2, False, True),   # middle_stage[0]
    (64,  128, 1, True,  True),   # middle_stage[1]
    (128, 128, 2, False, True),   # middle_stage[2]
    (128, 256, 1, True,  True),   # middle_stage[3]
    (256, 256, 1, True,  True),   # last_stage[0]
    (256, 1,   1, False, False),  # last_stage[1]
]

KERNEL = 3
PAD = 1
GN_EPS = 1e-5


def _pad_spec(stride):
    # Reproduces ConvLReLU padding logic: (pad_top, pad_bottom, pad_left, pad_right)
    if (KERNEL - stride) % 2 == 0:
        return (PAD, PAD, PAD, PAD)
    return (PAD, KERNEL - stride - PAD, PAD, KERNEL - stride - PAD)


# ----------------------------------------------------------------------------
# Pallas kernel: fused (3x3 conv + bias [+ GroupNorm(1)] [+ LeakyReLU]) / sample
# ----------------------------------------------------------------------------
def _conv_layer_kernel(x_ref, w_ref, b_ref, g_ref, bt_ref, m_ref, o_ref, *,
                       taps, n_rows, layer_norm, lrelu, inv_count, eps):
    """One sample, one layer.

    x_ref : (1, P, Lin, Cin) bf16 -- flattened padded activation (P spatial phases)
    w_ref : (9, Cin, Cout)   bf16 -- per-tap weight matrices (t = kh*3 + kw)
    b_ref, g_ref, bt_ref : (1, Cout) f32 -- conv bias / GN gamma / GN beta
    m_ref : (n_rows, 1) f32 -- 1.0 on valid output positions, 0.0 on wrap columns
    o_ref : (1, n_rows, Cout)
    """
    acc = None
    for t, (phase, off) in enumerate(taps):
        xs = x_ref[0, phase, off:off + n_rows, :]            # (n_rows, Cin) bf16
        part = jnp.dot(xs, w_ref[t], preferred_element_type=jnp.float32)
        acc = part if acc is None else acc + part
    y = acc + b_ref[...]                                     # (n_rows, Cout) f32

    if layer_norm:
        # GroupNorm(num_groups=1): stats over all valid (H, W, C) of this sample.
        m = m_ref[...]                                       # (n_rows, 1)
        mu = jnp.sum(y * m) * inv_count
        d = y - mu
        var = jnp.sum(d * d * m) * inv_count
        y = d * lax.rsqrt(var + eps)
        y = y * g_ref[...] + bt_ref[...]

    if lrelu:
        y = jnp.where(y > 0, y, 0.2 * y)

    o_ref[0] = y.astype(o_ref.dtype)


def conv_lrelu_pallas(x, wt, b2, g2, bt2, *, stride, layer_norm, lrelu,
                      out_dtype):
    """One fused ConvLReLU layer.

    x  : (N, H, W, Cin) bf16 NHWC activation
    wt : (9, Cin, Cout) bf16 per-tap weights (t = kh*3 + kw)
    b2, g2, bt2 : (1, Cout) f32
    """
    N, H, W, Cin = x.shape
    Cout = wt.shape[-1]
    pad_t, pad_b, pad_l, pad_r = _pad_spec(stride)

    if stride == 1:
        xp = jnp.pad(x, ((0, 0), (pad_t, pad_b), (pad_l, pad_r), (0, 0)))
        Hq, Wq = xp.shape[1], xp.shape[2]
        Ho, Wo, Wrow = Hq - KERNEL + 1, Wq - KERNEL + 1, Wq
        num_phases = 1
        q = xp.reshape(N, 1, Hq * Wq, Cin)
        taps = [(0, dh * Wrow + dw)
                for dh in range(KERNEL) for dw in range(KERNEL)]
    else:  # stride == 2: 4 even/odd spatial phases (space-to-depth, no inflation)
        xp = jnp.pad(x, ((0, 0), (pad_t, pad_b + 1), (pad_l, pad_r + 1), (0, 0)))
        Hq, Wq = xp.shape[1], xp.shape[2]
        assert Hq % 2 == 0 and Wq % 2 == 0, "stride-2 layers need even spatial dims"
        Ho, Wo = Hq // 2 - 1, Wq // 2 - 1
        Wrow = Wo + 1
        num_phases = 4
        q = xp.reshape(N, Ho + 1, 2, Wo + 1, 2, Cin)
        q = jnp.transpose(q, (0, 2, 4, 1, 3, 5)).reshape(
            N, 4, (Ho + 1) * (Wo + 1), Cin)
        taps = [((kh % 2) * 2 + (kw % 2), (kh // 2) * Wrow + (kw // 2))
                for kh in range(KERNEL) for kw in range(KERNEL)]

    L = Ho * Wrow                        # rows computed per sample (incl. wrap cols)
    Lin = q.shape[2]
    slack = max(off for _, off in taps) + L - Lin
    if slack > 0:                        # zero slack rows so tap slices stay in-bounds
        q = jnp.pad(q, ((0, 0), (0, 0), (0, slack), (0, 0)))
    Lin = q.shape[2]
    q = q.astype(jnp.bfloat16)

    # validity mask: 1.0 on real output columns, 0.0 on wrap columns (sliced off below)
    cols = np.arange(L, dtype=np.int32) % Wrow
    mask = jnp.asarray((cols < Wo).astype(np.float32).reshape(L, 1))

    kernel = functools.partial(
        _conv_layer_kernel, taps=tuple(taps), n_rows=L,
        layer_norm=layer_norm, lrelu=lrelu,
        inv_count=1.0 / float(Ho * Wo * Cout), eps=GN_EPS)

    out = pl.pallas_call(
        kernel,
        out_shape=jax.ShapeDtypeStruct((N, L, Cout), out_dtype),
        grid_spec=pltpu.PrefetchScalarGridSpec(
            num_scalar_prefetch=0,
            grid=(N,),
            in_specs=[
                pl.BlockSpec((1, num_phases, Lin, Cin), lambda n: (n, 0, 0, 0)),
                pl.BlockSpec((KERNEL * KERNEL, Cin, Cout), lambda n: (0, 0, 0)),
                pl.BlockSpec((1, Cout), lambda n: (0, 0)),
                pl.BlockSpec((1, Cout), lambda n: (0, 0)),
                pl.BlockSpec((1, Cout), lambda n: (0, 0)),
                pl.BlockSpec((L, 1), lambda n: (0, 0)),
            ],
            out_specs=pl.BlockSpec((1, L, Cout), lambda n: (n, 0, 0)),
        ),
        compiler_params=pltpu.CompilerParams(
            dimension_semantics=("parallel",),
            vmem_limit_bytes=32 * 1024 * 1024),
    )(q, wt, b2, g2, bt2, mask)

    # drop wrap columns (free reshape + slice at the XLA level)
    out = out.reshape(N, Ho, Wrow, Cout)[:, :, :Wo, :]
    return out


# ----------------------------------------------------------------------------
# Parameter setup (plain-JAX glue): deterministic init + spectral norm
# ----------------------------------------------------------------------------
def _spectral_normalize(w_oihw, key, n_power_iterations=1, eps=1e-12):
    # Mirrors torch.nn.utils.spectral_norm: power iteration on W.reshape(Cout,-1)
    cout = w_oihw.shape[0]
    wm = w_oihw.reshape(cout, -1)
    u = jax.random.normal(key, (cout,), jnp.float32)
    u = u / (jnp.linalg.norm(u) + eps)
    v = None
    for _ in range(n_power_iterations):
        v = wm.T @ u
        v = v / (jnp.linalg.norm(v) + eps)
        u = wm @ v
        u = u / (jnp.linalg.norm(u) + eps)
    sigma = u @ (wm @ v)
    return w_oihw / sigma


def init_params(key):
    """Deterministic parameters mirroring Discriminator.__init__ (f32, OIHW)."""
    params = []
    for (cin, cout, _stride, _ln, _lr) in LAYER_CFG:
        key, kw_, kb_, ku_ = jax.random.split(key, 4)
        w = 0.02 * jax.random.normal(kw_, (cout, cin, KERNEL, KERNEL),
                                     jnp.float32)   # normal_(mean=0, std=0.02)
        w = _spectral_normalize(w, ku_)
        bound = 1.0 / np.sqrt(cin * KERNEL * KERNEL)
        b = jax.random.uniform(kb_, (cout,), jnp.float32, -bound, bound)
        gamma = jnp.ones((cout,), jnp.float32)       # GroupNorm affine defaults
        beta = jnp.zeros((cout,), jnp.float32)
        params.append((w, b, gamma, beta))
    return params


def prepare_params(params):
    """Repack params for the Pallas kernels: bf16 per-tap weights, (1, Cout) rows."""
    prepped = []
    for (w, b, g, bt), (cin, cout, *_rest) in zip(params, LAYER_CFG):
        wt = jnp.transpose(w, (2, 3, 1, 0)).reshape(
            KERNEL * KERNEL, cin, cout).astype(jnp.bfloat16)
        prepped.append((wt, b.reshape(1, cout), g.reshape(1, cout),
                        bt.reshape(1, cout)))
    return prepped


# ----------------------------------------------------------------------------
# Full Discriminator forward (Pallas) and pure-JAX reference
# ----------------------------------------------------------------------------
def discriminator_forward(x_nchw, prepped):
    x = jnp.transpose(x_nchw, (0, 2, 3, 1)).astype(jnp.bfloat16)   # NCHW -> NHWC
    n_layers = len(LAYER_CFG)
    for li, ((wt, b2, g2, bt2), (_ci, _co, stride, ln, lr)) in enumerate(
            zip(prepped, LAYER_CFG)):
        out_dtype = jnp.float32 if li == n_layers - 1 else jnp.bfloat16
        x = conv_lrelu_pallas(x, wt, b2, g2, bt2, stride=stride,
                              layer_norm=ln, lrelu=lr, out_dtype=out_dtype)
    return jnp.transpose(x, (0, 3, 1, 2))                          # NHWC -> NCHW


def reference_forward(x_nchw, params):
    """Pure-JAX reference using the same bf16 weight/activation quantization
    points as the kernels (accumulation and GN math in f32)."""
    n_layers = len(LAYER_CFG)
    x = x_nchw.astype(jnp.bfloat16)
    for li, ((w, b, g, bt), (_ci, _co, stride, ln, lr)) in enumerate(
            zip(params, LAYER_CFG)):
        pad_t, pad_b, pad_l, pad_r = _pad_spec(stride)
        xp = jnp.pad(x, ((0, 0), (0, 0), (pad_t, pad_b), (pad_l, pad_r)))
        y = lax.conv_general_dilated(
            xp, w.astype(jnp.bfloat16), (stride, stride), 'VALID',
            dimension_numbers=('NCHW', 'OIHW', 'NCHW'),
            preferred_element_type=jnp.float32)
        y = y + b.reshape(1, -1, 1, 1)
        if ln:
            mu = jnp.mean(y, axis=(1, 2, 3), keepdims=True)
            var = jnp.mean((y - mu) ** 2, axis=(1, 2, 3), keepdims=True)
            y = (y - mu) * lax.rsqrt(var + GN_EPS)
            y = y * g.reshape(1, -1, 1, 1) + bt.reshape(1, -1, 1, 1)
        if lr:
            y = jnp.where(y > 0, y, 0.2 * y)
        x = y.astype(jnp.float32) if li == n_layers - 1 else y.astype(jnp.bfloat16)
    return x


if __name__ == "__main__":
    key = jax.random.PRNGKey(0)
    kx, kp = jax.random.split(key)
    x = jax.random.normal(kx, (2, 3, 16, 16), jnp.float32)   # NCHW input
    params = init_params(kp)
    prepped = prepare_params(params)

    fwd = jax.jit(discriminator_forward)
    out = jax.block_until_ready(fwd(x, prepped))
    assert out.shape == (2, 1, 4, 4), out.shape

    ref = jax.block_until_ready(reference_forward(x, params))
    np.testing.assert_allclose(np.asarray(out, dtype=np.float32),
                               np.asarray(ref, dtype=np.float32),
                               atol=2e-2, rtol=2e-2)
    print("KERNEL_OK")
</pallas_src>

<mosaic_0001>
module attributes {stable_mosaic.version = 11 : i64} {
  func.func @_conv_layer_kernel(%arg0: i32, %arg1: memref<1x1x326x3xbf16, #tpu.memory_space<vmem>>, %arg2: memref<9x3x32xbf16, #tpu.memory_space<vmem>>, %arg3: memref<1x32xf32, #tpu.memory_space<vmem>>, %arg4: memref<1x32xf32, #tpu.memory_space<vmem>>, %arg5: memref<1x32xf32, #tpu.memory_space<vmem>>, %arg6: memref<288x1xf32, #tpu.memory_space<vmem>>, %arg7: memref<1x288x32xbf16, #tpu.memory_space<vmem>>) attributes {dimension_semantics = [#tpu.dimension_semantics<parallel>], iteration_bounds = array<i64: 2>, scalar_prefetch = 0 : i64, scratch_operands = 0 : i64, tpu.core_type = #tpu.core_type<tc>, window_params = [{transform_indices = @transform_0, window_bounds = array<i64: 1, 1, 326, 3>}, {pipeline_mode = #tpu.pipeline_mode<synchronous>, transform_indices = @transform_1, window_bounds = array<i64: 9, 3, 32>}, {pipeline_mode = #tpu.pipeline_mode<synchronous>, transform_indices = @transform_2, window_bounds = array<i64: 1, 32>}, {pipeline_mode = #tpu.pipeline_mode<synchronous>, transform_indices = @transform_3, window_bounds = array<i64: 1, 32>}, {pipeline_mode = #tpu.pipeline_mode<synchronous>, transform_indices = @transform_4, window_bounds = array<i64: 1, 32>}, {pipeline_mode = #tpu.pipeline_mode<synchronous>, transform_indices = @transform_5, window_bounds = array<i64: 288, 1>}, {transform_indices = @transform_6, window_bounds = array<i64: 1, 288, 32>}]} {
    %c0 = arith.constant 0 : index
    %c0_0 = arith.constant 0 : index
    %c0_1 = arith.constant 0 : index
    %c0_2 = arith.constant 0 : index
    %0 = vector.load %arg1[%c0, %c0_0, %c0_1, %c0_2] : memref<1x1x326x3xbf16, #tpu.memory_space<vmem>>, vector<1x1x288x3xbf16>
    %1 = vector.shape_cast %0 : vector<1x1x288x3xbf16> to vector<288x3xbf16>
    %c0_3 = arith.constant 0 : index
    %c0_4 = arith.constant 0 : index
    %c0_5 = arith.constant 0 : index
    %2 = vector.load %arg2[%c0_3, %c0_4, %c0_5] : memref<9x3x32xbf16, #tpu.memory_space<vmem>>, vector<1x3x32xbf16>
    %3 = vector.shape_cast %2 : vector<1x3x32xbf16> to vector<3x32xbf16>
    %cst = arith.constant dense<0.000000e+00> : vector<288x32xf32>
    %4 = tpu.matmul %1, %3, %cst {dimension_numbers = #tpu.dot_dimension_numbers<[1], [0], [0], [1], [0, 0, 1, 1], [], []>} : vector<288x3xbf16>, vector<3x32xbf16>, vector<288x32xf32> -> vector<288x32xf32>
    %c0_6 = arith.constant 0 : index
    %c0_7 = arith.constant 0 : index
    %c1 = arith.constant 1 : index
    %c0_8 = arith.constant 0 : index
    %5 = vector.load %arg1[%c0_6, %c0_7, %c1, %c0_8] : memref<1x1x326x3xbf16, #tpu.memory_space<vmem>>, vector<1x1x288x3xbf16>
    %6 = vector.shape_cast %5 : vector<1x1x288x3xbf16> to vector<288x3xbf16>
    %c1_9 = arith.constant 1 : index
    %c0_10 = arith.constant 0 : index
    %c0_11 = arith.constant 0 : index
    %7 = vector.load %arg2[%c1_9, %c0_10, %c0_11] : memref<9x3x32xbf16, #tpu.memory_space<vmem>>, vector<1x3x32xbf16>
    %8 = vector.shape_cast %7 : vector<1x3x32xbf16> to vector<3x32xbf16>
    %cst_12 = arith.constant dense<0.000000e+00> : vector<288x32xf32>
    %9 = tpu.matmul %6, %8, %cst_12 {dimension_numbers = #tpu.dot_dimension_numbers<[1], [0], [0], [1], [0, 0, 1, 1], [], []>} : vector<288x3xbf16>, vector<3x32xbf16>, vector<288x32xf32> -> vector<288x32xf32>
    %10 = arith.addf %4, %9 : vector<288x32xf32>
    %c0_13 = arith.constant 0 : index
    %c0_14 = arith.constant 0 : index
    %c2 = arith.constant 2 : index
    %c0_15 = arith.constant 0 : index
    %11 = vector.load %arg1[%c0_13, %c0_14, %c2, %c0_15] : memref<1x1x326x3xbf16, #tpu.memory_space<vmem>>, vector<1x1x288x3xbf16>
    %12 = vector.shape_cast %11 : vector<1x1x288x3xbf16> to vector<288x3xbf16>
    %c2_16 = arith.constant 2 : index
    %c0_17 = arith.constant 0 : index
    %c0_18 = arith.constant 0 : index
    %13 = vector.load %arg2[%c2_16, %c0_17, %c0_18] : memref<9x3x32xbf16, #tpu.memory_space<vmem>>, vector<1x3x32xbf16>
    %14 = vector.shape_cast %13 : vector<1x3x32xbf16> to vector<3x32xbf16>
    %cst_19 = arith.constant dense<0.000000e+00> : vector<288x32xf32>
    %15 = tpu.matmul %12, %14, %cst_19 {dimension_numbers = #tpu.dot_dimension_numbers<[1], [0], [0], [1], [0, 0, 1, 1], [], []>} : vector<288x3xbf16>, vector<3x32xbf16>, vector<288x32xf32> -> vector<288x32xf32>
    %16 = arith.addf %10, %15 : vector<288x32xf32>
    %c0_20 = arith.constant 0 : index
    %c0_21 = arith.constant 0 : index
    %c18 = arith.constant 18 : index
    %c0_22 = arith.constant 0 : index
    %17 = vector.load %arg1[%c0_20, %c0_21, %c18, %c0_22] : memref<1x1x326x3xbf16, #tpu.memory_space<vmem>>, vector<1x1x288x3xbf16>
    %18 = vector.shape_cast %17 : vector<1x1x288x3xbf16> to vector<288x3xbf16>
    %c3 = arith.constant 3 : index
    %c0_23 = arith.constant 0 : index
    %c0_24 = arith.constant 0 : index
    %19 = vector.load %arg2[%c3, %c0_23, %c0_24] : memref<9x3x32xbf16, #tpu.memory_space<vmem>>, vector<1x3x32xbf16>
    %20 = vector.shape_cast %19 : vector<1x3x32xbf16> to vector<3x32xbf16>
    %cst_25 = arith.constant dense<0.000000e+00> : vector<288x32xf32>
    %21 = tpu.matmul %18, %20, %cst_25 {dimension_numbers = #tpu.dot_dimension_numbers<[1], [0], [0], [1], [0, 0, 1, 1], [], []>} : vector<288x3xbf16>, vector<3x32xbf16>, vector<288x32xf32> -> vector<288x32xf32>
    %22 = arith.addf %16, %21 : vector<288x32xf32>
    %c0_26 = arith.constant 0 : index
    %c0_27 = arith.constant 0 : index
    %c19 = arith.constant 19 : index
    %c0_28 = arith.constant 0 : index
    %23 = vector.load %arg1[%c0_26, %c0_27, %c19, %c0_28] : memref<1x1x326x3xbf16, #tpu.memory_space<vmem>>, vector<1x1x288x3xbf16>
    %24 = vector.shape_cast %23 : vector<1x1x288x3xbf16> to vector<288x3xbf16>
    %c4 = arith.constant 4 : index
    %c0_29 = arith.constant 0 : index
    %c0_30 = arith.constant 0 : index
    %25 = vector.load %arg2[%c4, %c0_29, %c0_30] : memref<9x3x32xbf16, #tpu.memory_space<vmem>>, vector<1x3x32xbf16>
    %26 = vector.shape_cast %25 : vector<1x3x32xbf16> to vector<3x32xbf16>
    %cst_31 = arith.constant dense<0.000000e+00> : vector<288x32xf32>
    %27 = tpu.matmul %24, %26, %cst_31 {dimension_numbers = #tpu.dot_dimension_numbers<[1], [0], [0], [1], [0, 0, 1, 1], [], []>} : vector<288x3xbf16>, vector<3x32xbf16>, vector<288x32xf32> -> vector<288x32xf32>
    %28 = arith.addf %22, %27 : vector<288x32xf32>
    %c0_32 = arith.constant 0 : index
    %c0_33 = arith.constant 0 : index
    %c20 = arith.constant 20 : index
    %c0_34 = arith.constant 0 : index
    %29 = vector.load %arg1[%c0_32, %c0_33, %c20, %c0_34] : memref<1x1x326x3xbf16, #tpu.memory_space<vmem>>, vector<1x1x288x3xbf16>
    %30 = vector.shape_cast %29 : vector<1x1x288x3xbf16> to vector<288x3xbf16>
    %c5 = arith.constant 5 : index
    %c0_35 = arith.constant 0 : index
    %c0_36 = arith.constant 0 : index
    %31 = vector.load %arg2[%c5, %c0_35, %c0_36] : memref<9x3x32xbf16, #tpu.memory_space<vmem>>, vector<1x3x32xbf16>
    %32 = vector.shape_cast %31 : vector<1x3x32xbf16> to vector<3x32xbf16>
    %cst_37 = arith.constant dense<0.000000e+00> : vector<288x32xf32>
    %33 = tpu.matmul %30, %32, %cst_37 {dimension_numbers = #tpu.dot_dimension_numbers<[1], [0], [0], [1], [0, 0, 1, 1], [], []>} : vector<288x3xbf16>, vector<3x32xbf16>, vector<288x32xf32> -> vector<288x32xf32>
    %34 = arith.addf %28, %33 : vector<288x32xf32>
    %c0_38 = arith.constant 0 : index
    %c0_39 = arith.constant 0 : index
    %c36 = arith.constant 36 : index
    %c0_40 = arith.constant 0 : index
    %35 = vector.load %arg1[%c0_38, %c0_39, %c36, %c0_40] : memref<1x1x326x3xbf16, #tpu.memory_space<vmem>>, vector<1x1x288x3xbf16>
    %36 = vector.shape_cast %35 : vector<1x1x288x3xbf16> to vector<288x3xbf16>
    %c6 = arith.constant 6 : index
    %c0_41 = arith.constant 0 : index
    %c0_42 = arith.constant 0 : index
    %37 = vector.load %arg2[%c6, %c0_41, %c0_42] : memref<9x3x32xbf16, #tpu.memory_space<vmem>>, vector<1x3x32xbf16>
    %38 = vector.shape_cast %37 : vector<1x3x32xbf16> to vector<3x32xbf16>
    %cst_43 = arith.constant dense<0.000000e+00> : vector<288x32xf32>
    %39 = tpu.matmul %36, %38, %cst_43 {dimension_numbers = #tpu.dot_dimension_numbers<[1], [0], [0], [1], [0, 0, 1, 1], [], []>} : vector<288x3xbf16>, vector<3x32xbf16>, vector<288x32xf32> -> vector<288x32xf32>
    %40 = arith.addf %34, %39 : vector<288x32xf32>
    %c0_44 = arith.constant 0 : index
    %c0_45 = arith.constant 0 : index
    %c37 = arith.constant 37 : index
    %c0_46 = arith.constant 0 : index
    %41 = vector.load %arg1[%c0_44, %c0_45, %c37, %c0_46] : memref<1x1x326x3xbf16, #tpu.memory_space<vmem>>, vector<1x1x288x3xbf16>
    %42 = vector.shape_cast %41 : vector<1x1x288x3xbf16> to vector<288x3xbf16>
    %c7 = arith.constant 7 : index
    %c0_47 = arith.constant 0 : index
    %c0_48 = arith.constant 0 : index
    %43 = vector.load %arg2[%c7, %c0_47, %c0_48] : memref<9x3x32xbf16, #tpu.memory_space<vmem>>, vector<1x3x32xbf16>
    %44 = vector.shape_cast %43 : vector<1x3x32xbf16> to vector<3x32xbf16>
    %cst_49 = arith.constant dense<0.000000e+00> : vector<288x32xf32>
    %45 = tpu.matmul %42, %44, %cst_49 {dimension_numbers = #tpu.dot_dimension_numbers<[1], [0], [0], [1], [0, 0, 1, 1], [], []>} : vector<288x3xbf16>, vector<3x32xbf16>, vector<288x32xf32> -> vector<288x32xf32>
    %46 = arith.addf %40, %45 : vector<288x32xf32>
    %c0_50 = arith.constant 0 : index
    %c0_51 = arith.constant 0 : index
    %c38 = arith.constant 38 : index
    %c0_52 = arith.constant 0 : index
    %47 = vector.load %arg1[%c0_50, %c0_51, %c38, %c0_52] : memref<1x1x326x3xbf16, #tpu.memory_space<vmem>>, vector<1x1x288x3xbf16>
    %48 = vector.shape_cast %47 : vector<1x1x288x3xbf16> to vector<288x3xbf16>
    %c8 = arith.constant 8 : index
    %c0_53 = arith.constant 0 : index
    %c0_54 = arith.constant 0 : index
    %49 = vector.load %arg2[%c8, %c0_53, %c0_54] : memref<9x3x32xbf16, #tpu.memory_space<vmem>>, vector<1x3x32xbf16>
    %50 = vector.shape_cast %49 : vector<1x3x32xbf16> to vector<3x32xbf16>
    %cst_55 = arith.constant dense<0.000000e+00> : vector<288x32xf32>
    %51 = tpu.matmul %48, %50, %cst_55 {dimension_numbers = #tpu.dot_dimension_numbers<[1], [0], [0], [1], [0, 0, 1, 1], [], []>} : vector<288x3xbf16>, vector<3x32xbf16>, vector<288x32xf32> -> vector<288x32xf32>
    %52 = arith.addf %46, %51 : vector<288x32xf32>
    %c0_56 = arith.constant 0 : index
    %c0_57 = arith.constant 0 : index
    %53 = vector.load %arg3[%c0_56, %c0_57] : memref<1x32xf32, #tpu.memory_space<vmem>>, vector<1x32xf32>
    %54 = vector.broadcast %53 : vector<1x32xf32> to vector<288x32xf32>
    %55 = arith.addf %52, %54 : vector<288x32xf32>
    %cst_58 = arith.constant 0.000000e+00 : f32
    %56 = vector.broadcast %cst_58 : f32 to vector<288x32xf32>
    %57 = arith.cmpf ogt, %55, %56 : vector<288x32xf32>
    %cst_59 = arith.constant 2.000000e-01 : f32
    %58 = vector.broadcast %cst_59 : f32 to vector<288x32xf32>
    %59 = arith.mulf %58, %55 : vector<288x32xf32>
    %60 = arith.select %57, %55, %59 : vector<288x32xi1>, vector<288x32xf32>
    %61 = arith.truncf %60 : vector<288x32xf32> to vector<288x32xbf16>
    %c0_60 = arith.constant 0 : index
    %c0_61 = arith.constant 0 : index
    %c0_62 = arith.constant 0 : index
    %62 = vector.load %arg7[%c0_60, %c0_61, %c0_62] : memref<1x288x32xbf16, #tpu.memory_space<vmem>>, vector<1x288x32xbf16>
    %63 = vector.shape_cast %62 : vector<1x288x32xbf16> to vector<288x32xbf16>
    %64 = vector.shape_cast %61 : vector<288x32xbf16> to vector<1x288x32xbf16>
    tpu.vector_store %arg7[%c0_60, %c0_61, %c0_62], %64 {strides = array<i32>} : memref<1x288x32xbf16, #tpu.memory_space<vmem>>, vector<1x288x32xbf16>,
    return
  }
  func.func @transform_0(%arg0: i32) -> (i32, i32, i32, i32) {
    %c0_i32 = arith.constant 0 : i32
    %c0_i32_0 = arith.constant 0 : i32
    %c0_i32_1 = arith.constant 0 : i32
    %c0_i32_2 = arith.constant 0 : i32
    return %arg0, %c0_i32, %c0_i32_0, %c0_i32_1 : i32, i32, i32, i32
  }
  func.func @transform_1(%arg0: i32) -> (i32, i32, i32) {
    %c0_i32 = arith.constant 0 : i32
    %c0_i32_0 = arith.constant 0 : i32
    %c0_i32_1 = arith.constant 0 : i32
    %c0_i32_2 = arith.constant 0 : i32
    return %c0_i32, %c0_i32_0, %c0_i32_1 : i32, i32, i32
  }
  func.func @transform_2(%arg0: i32) -> (i32, i32) {
    %c0_i32 = arith.constant 0 : i32
    %c0_i32_0 = arith.constant 0 : i32
    %c0_i32_1 = arith.constant 0 : i32
    return %c0_i32, %c0_i32_0 : i32, i32
  }
  func.func @transform_3(%arg0: i32) -> (i32, i32) {
    %c0_i32 = arith.constant 0 : i32
    %c0_i32_0 = arith.constant 0 : i32
    %c0_i32_1 = arith.constant 0 : i32
    return %c0_i32, %c0_i32_0 : i32, i32
  }
  func.func @transform_4(%arg0: i32) -> (i32, i32) {
    %c0_i32 = arith.constant 0 : i32
    %c0_i32_0 = arith.constant 0 : i32
    %c0_i32_1 = arith.constant 0 : i32
    return %c0_i32, %c0_i32_0 : i32, i32
  }
  func.func @transform_5(%arg0: i32) -> (i32, i32) {
    %c0_i32 = arith.constant 0 : i32
    %c0_i32_0 = arith.constant 0 : i32
    %c0_i32_1 = arith.constant 0 : i32
    return %c0_i32, %c0_i32_0 : i32, i32
  }
  func.func @transform_6(%arg0: i32) -> (i32, i32, i32) {
    %c0_i32 = arith.constant 0 : i32
    %c0_i32_0 = arith.constant 0 : i32
    %c0_i32_1 = arith.constant 0 : i32
    return %arg0, %c0_i32, %c0_i32_0 : i32, i32, i32
  }
}

module attributes {stable_mosaic.version = 11 : i64} {
  func.func @_conv_layer_kernel(%arg0: i32, %arg1: memref<1x4x82x32xbf16, #tpu.memory_space<vmem>>, %arg2: memref<9x32x64xbf16, #tpu.memory_space<vmem>>, %arg3: memref<1x64xf32, #tpu.memory_space<vmem>>, %arg4: memref<1x64xf32, #tpu.memory_space<vmem>>, %arg5: memref<1x64xf32, #tpu.memory_space<vmem>>, %arg6: memref<72x1xf32, #tpu.memory_space<vmem>>, %arg7: memref<1x72x64xbf16, #tpu.memory_space<vmem>>) attributes {dimension_semantics = [#tpu.dimension_semantics<parallel>], iteration_bounds = array<i64: 2>, scalar_prefetch = 0 : i64, scratch_operands = 0 : i64, tpu.core_type = #tpu.core_type<tc>, window_params = [{transform_indices = @transform_0, window_bounds = array<i64: 1, 4, 82, 32>}, {pipeline_mode = #tpu.pipeline_mode<synchronous>, transform_indices = @transform_1, window_bounds = array<i64: 9, 32, 64>}, {pipeline_mode = #tpu.pipeline_mode<synchronous>, transform_indices = @transform_2, window_bounds = array<i64: 1, 64>}, {pipeline_mode = #tpu.pipeline_mode<synchronous>, transform_indices = @transform_3, window_bounds = array<i64: 1, 64>}, {pipeline_mode = #tpu.pipeline_mode<synchronous>, transform_indices = @transform_4, window_bounds = array<i64: 1, 64>}, {pipeline_mode = #tpu.pipeline_mode<synchronous>, transform_indices = @transform_5, window_bounds = array<i64: 72, 1>}, {transform_indices = @transform_6, window_bounds = array<i64: 1, 72, 64>}]} {
    %c0 = arith.constant 0 : index
    %c0_0 = arith.constant 0 : index
    %c0_1 = arith.constant 0 : index
    %c0_2 = arith.constant 0 : index
    %0 = vector.load %arg1[%c0, %c0_0, %c0_1, %c0_2] : memref<1x4x82x32xbf16, #tpu.memory_space<vmem>>, vector<1x1x72x32xbf16>
    %1 = vector.shape_cast %0 : vector<1x1x72x32xbf16> to vector<72x32xbf16>
    %c0_3 = arith.constant 0 : index
    %c0_4 = arith.constant 0 : index
    %c0_5 = arith.constant 0 : index
    %2 = vector.load %arg2[%c0_3, %c0_4, %c0_5] : memref<9x32x64xbf16, #tpu.memory_space<vmem>>, vector<1x32x64xbf16>
    %3 = vector.shape_cast %2 : vector<1x32x64xbf16> to vector<32x64xbf16>
    %cst = arith.constant dense<0.000000e+00> : vector<72x64xf32>
    %4 = tpu.matmul %1, %3, %cst {dimension_numbers = #tpu.dot_dimension_numbers<[1], [0], [0], [1], [0, 0, 1, 1], [], []>} : vector<72x32xbf16>, vector<32x64xbf16>, vector<72x64xf32> -> vector<72x64xf32>
    %c0_6 = arith.constant 0 : index
    %c1 = arith.constant 1 : index
    %c0_7 = arith.constant 0 : index
    %c0_8 = arith.constant 0 : index
    %5 = vector.load %arg1[%c0_6, %c1, %c0_7, %c0_8] : memref<1x4x82x32xbf16, #tpu.memory_space<vmem>>, vector<1x1x72x32xbf16>
    %6 = vector.shape_cast %5 : vector<1x1x72x32xbf16> to vector<72x32xbf16>
    %c1_9 = arith.constant 1 : index
    %c0_10 = arith.constant 0 : index
    %c0_11 = arith.constant 0 : index
    %7 = vector.load %arg2[%c1_9, %c0_10, %c0_11] : memref<9x32x64xbf16, #tpu.memory_space<vmem>>, vector<1x32x64xbf16>
    %8 = vector.shape_cast %7 : vector<1x32x64xbf16> to vector<32x64xbf16>
    %cst_12 = arith.constant dense<0.000000e+00> : vector<72x64xf32>
    %9 = tpu.matmul %6, %8, %cst_12 {dimension_numbers = #tpu.dot_dimension_numbers<[1], [0], [0], [1], [0, 0, 1, 1], [], []>} : vector<72x32xbf16>, vector<32x64xbf16>, vector<72x64xf32> -> vector<72x64xf32>
    %10 = arith.addf %4, %9 : vector<72x64xf32>
    %c0_13 = arith.constant 0 : index
    %c0_14 = arith.constant 0 : index
    %c1_15 = arith.constant 1 : index
    %c0_16 = arith.constant 0 : index
    %11 = vector.load %arg1[%c0_13, %c0_14, %c1_15, %c0_16] : memref<1x4x82x32xbf16, #tpu.memory_space<vmem>>, vector<1x1x72x32xbf16>
    %12 = vector.shape_cast %11 : vector<1x1x72x32xbf16> to vector<72x32xbf16>
    %c2 = arith.constant 2 : index
    %c0_17 = arith.constant 0 : index
    %c0_18 = arith.constant 0 : index
    %13 = vector.load %arg2[%c2, %c0_17, %c0_18] : memref<9x32x64xbf16, #tpu.memory_space<vmem>>, vector<1x32x64xbf16>
    %14 = vector.shape_cast %13 : vector<1x32x64xbf16> to vector<32x64xbf16>
    %cst_19 = arith.constant dense<0.000000e+00> : vector<72x64xf32>
    %15 = tpu.matmul %12, %14, %cst_19 {dimension_numbers = #tpu.dot_dimension_numbers<[1], [0], [0], [1], [0, 0, 1, 1], [], []>} : vector<72x32xbf16>, vector<32x64xbf16>, vector<72x64xf32> -> vector<72x64xf32>
    %16 = arith.addf %10, %15 : vector<72x64xf32>
    %c0_20 = arith.constant 0 : index
    %c2_21 = arith.constant 2 : index
    %c0_22 = arith.constant 0 : index
    %c0_23 = arith.constant 0 : index
    %17 = vector.load %arg1[%c0_20, %c2_21, %c0_22, %c0_23] : memref<1x4x82x32xbf16, #tpu.memory_space<vmem>>, vector<1x1x72x32xbf16>
    %18 = vector.shape_cast %17 : vector<1x1x72x32xbf16> to vector<72x32xbf16>
    %c3 = arith.constant 3 : index
    %c0_24 = arith.constant 0 : index
    %c0_25 = arith.constant 0 : index
    %19 = vector.load %arg2[%c3, %c0_24, %c0_25] : memref<9x32x64xbf16, #tpu.memory_space<vmem>>, vector<1x32x64xbf16>
    %20 = vector.shape_cast %19 : vector<1x32x64xbf16> to vector<32x64xbf16>
    %cst_26 = arith.constant dense<0.000000e+00> : vector<72x64xf32>
    %21 = tpu.matmul %18, %20, %cst_26 {dimension_numbers = #tpu.dot_dimension_numbers<[1], [0], [0], [1], [0, 0, 1, 1], [], []>} : vector<72x32xbf16>, vector<32x64xbf16>, vector<72x64xf32> -> vector<72x64xf32>
    %22 = arith.addf %16, %21 : vector<72x64xf32>
    %c0_27 = arith.constant 0 : index
    %c3_28 = arith.constant 3 : index
    %c0_29 = arith.constant 0 : index
    %c0_30 = arith.constant 0 : index
    %23 = vector.load %arg1[%c0_27, %c3_28, %c0_29, %c0_30] : memref<1x4x82x32xbf16, #tpu.memory_space<vmem>>, vector<1x1x72x32xbf16>
    %24 = vector.shape_cast %23 : vector<1x1x72x32xbf16> to vector<72x32xbf16>
    %c4 = arith.constant 4 : index
    %c0_31 = arith.constant 0 : index
    %c0_32 = arith.constant 0 : index
    %25 = vector.load %arg2[%c4, %c0_31, %c0_32] : memref<9x32x64xbf16, #tpu.memory_space<vmem>>, vector<1x32x64xbf16>
    %26 = vector.shape_cast %25 : vector<1x32x64xbf16> to vector<32x64xbf16>
    %cst_33 = arith.constant dense<0.000000e+00> : vector<72x64xf32>
    %27 = tpu.matmul %24, %26, %cst_33 {dimension_numbers = #tpu.dot_dimension_numbers<[1], [0], [0], [1], [0, 0, 1, 1], [], []>} : vector<72x32xbf16>, vector<32x64xbf16>, vector<72x64xf32> -> vector<72x64xf32>
    %28 = arith.addf %22, %27 : vector<72x64xf32>
    %c0_34 = arith.constant 0 : index
    %c2_35 = arith.constant 2 : index
    %c1_36 = arith.constant 1 : index
    %c0_37 = arith.constant 0 : index
    %29 = vector.load %arg1[%c0_34, %c2_35, %c1_36, %c0_37] : memref<1x4x82x32xbf16, #tpu.memory_space<vmem>>, vector<1x1x72x32xbf16>
    %30 = vector.shape_cast %29 : vector<1x1x72x32xbf16> to vector<72x32xbf16>
    %c5 = arith.constant 5 : index
    %c0_38 = arith.constant 0 : index
    %c0_39 = arith.constant 0 : index
    %31 = vector.load %arg2[%c5, %c0_38, %c0_39] : memref<9x32x64xbf16, #tpu.memory_space<vmem>>, vector<1x32x64xbf16>
    %32 = vector.shape_cast %31 : vector<1x32x64xbf16> to vector<32x64xbf16>
    %cst_40 = arith.constant dense<0.000000e+00> : vector<72x64xf32>
    %33 = tpu.matmul %30, %32, %cst_40 {dimension_numbers = #tpu.dot_dimension_numbers<[1], [0], [0], [1], [0, 0, 1, 1], [], []>} : vector<72x32xbf16>, vector<32x64xbf16>, vector<72x64xf32> -> vector<72x64xf32>
    %34 = arith.addf %28, %33 : vector<72x64xf32>
    %c0_41 = arith.constant 0 : index
    %c0_42 = arith.constant 0 : index
    %c9 = arith.constant 9 : index
    %c0_43 = arith.constant 0 : index
    %35 = vector.load %arg1[%c0_41, %c0_42, %c9, %c0_43] : memref<1x4x82x32xbf16, #tpu.memory_space<vmem>>, vector<1x1x72x32xbf16>
    %36 = vector.shape_cast %35 : vector<1x1x72x32xbf16> to vector<72x32xbf16>
    %c6 = arith.constant 6 : index
    %c0_44 = arith.constant 0 : index
    %c0_45 = arith.constant 0 : index
    %37 = vector.load %arg2[%c6, %c0_44, %c0_45] : memref<9x32x64xbf16, #tpu.memory_space<vmem>>, vector<1x32x64xbf16>
    %38 = vector.shape_cast %37 : vector<1x32x64xbf16> to vector<32x64xbf16>
    %cst_46 = arith.constant dense<0.000000e+00> : vector<72x64xf32>
    %39 = tpu.matmul %36, %38, %cst_46 {dimension_numbers = #tpu.dot_dimension_numbers<[1], [0], [0], [1], [0, 0, 1, 1], [], []>} : vector<72x32xbf16>, vector<32x64xbf16>, vector<72x64xf32> -> vector<72x64xf32>
    %40 = arith.addf %34, %39 : vector<72x64xf32>
    %c0_47 = arith.constant 0 : index
    %c1_48 = arith.constant 1 : index
    %c9_49 = arith.constant 9 : index
    %c0_50 = arith.constant 0 : index
    %41 = vector.load %arg1[%c0_47, %c1_48, %c9_49, %c0_50] : memref<1x4x82x32xbf16, #tpu.memory_space<vmem>>, vector<1x1x72x32xbf16>
    %42 = vector.shape_cast %41 : vector<1x1x72x32xbf16> to vector<72x32xbf16>
    %c7 = arith.constant 7 : index
    %c0_51 = arith.constant 0 : index
    %c0_52 = arith.constant 0 : index
    %43 = vector.load %arg2[%c7, %c0_51, %c0_52] : memref<9x32x64xbf16, #tpu.memory_space<vmem>>, vector<1x32x64xbf16>
    %44 = vector.shape_cast %43 : vector<1x32x64xbf16> to vector<32x64xbf16>
    %cst_53 = arith.constant dense<0.000000e+00> : vector<72x64xf32>
    %45 = tpu.matmul %42, %44, %cst_53 {dimension_numbers = #tpu.dot_dimension_numbers<[1], [0], [0], [1], [0, 0, 1, 1], [], []>} : vector<72x32xbf16>, vector<32x64xbf16>, vector<72x64xf32> -> vector<72x64xf32>
    %46 = arith.addf %40, %45 : vector<72x64xf32>
    %c0_54 = arith.constant 0 : index
    %c0_55 = arith.constant 0 : index
    %c10 = arith.constant 10 : index
    %c0_56 = arith.constant 0 : index
    %47 = vector.load %arg1[%c0_54, %c0_55, %c10, %c0_56] : memref<1x4x82x32xbf16, #tpu.memory_space<vmem>>, vector<1x1x72x32xbf16>
    %48 = vector.shape_cast %47 : vector<1x1x72x32xbf16> to vector<72x32xbf16>
    %c8 = arith.constant 8 : index
    %c0_57 = arith.constant 0 : index
    %c0_58 = arith.constant 0 : index
    %49 = vector.load %arg2[%c8, %c0_57, %c0_58] : memref<9x32x64xbf16, #tpu.memory_space<vmem>>, vector<1x32x64xbf16>
    %50 = vector.shape_cast %49 : vector<1x32x64xbf16> to vector<32x64xbf16>
    %cst_59 = arith.constant dense<0.000000e+00> : vector<72x64xf32>
    %51 = tpu.matmul %48, %50, %cst_59 {dimension_numbers = #tpu.dot_dimension_numbers<[1], [0], [0], [1], [0, 0, 1, 1], [], []>} : vector<72x32xbf16>, vector<32x64xbf16>, vector<72x64xf32> -> vector<72x64xf32>
    %52 = arith.addf %46, %51 : vector<72x64xf32>
    %c0_60 = arith.constant 0 : index
    %c0_61 = arith.constant 0 : index
    %53 = vector.load %arg3[%c0_60, %c0_61] : memref<1x64xf32, #tpu.memory_space<vmem>>, vector<1x64xf32>
    %54 = vector.broadcast %53 : vector<1x64xf32> to vector<72x64xf32>
    %55 = arith.addf %52, %54 : vector<72x64xf32>
    %cst_62 = arith.constant 0.000000e+00 : f32
    %56 = vector.broadcast %cst_62 : f32 to vector<72x64xf32>
    %57 = arith.cmpf ogt, %55, %56 : vector<72x64xf32>
    %cst_63 = arith.constant 2.000000e-01 : f32
    %58 = vector.broadcast %cst_63 : f32 to vector<72x64xf32>
    %59 = arith.mulf %58, %55 : vector<72x64xf32>
    %60 = arith.select %57, %55, %59 : vector<72x64xi1>, vector<72x64xf32>
    %61 = arith.truncf %60 : vector<72x64xf32> to vector<72x64xbf16>
    %c0_64 = arith.constant 0 : index
    %c0_65 = arith.constant 0 : index
    %c0_66 = arith.constant 0 : index
    %62 = vector.load %arg7[%c0_64, %c0_65, %c0_66] : memref<1x72x64xbf16, #tpu.memory_space<vmem>>, vector<1x72x64xbf16>
    %63 = vector.shape_cast %62 : vector<1x72x64xbf16> to vector<72x64xbf16>
    %64 = vector.shape_cast %61 : vector<72x64xbf16> to vector<1x72x64xbf16>
    tpu.vector_store %arg7[%c0_64, %c0_65, %c0_66], %64 {strides = array<i32>} : memref<1x72x64xbf16, #tpu.memory_space<vmem>>, vector<1x72x64xbf16>,
    return
  }
  func.func @transform_0(%arg0: i32) -> (i32, i32, i32, i32) {
    %c0_i32 = arith.constant 0 : i32
    %c0_i32_0 = arith.constant 0 : i32
    %c0_i32_1 = arith.constant 0 : i32
    %c0_i32_2 = arith.constant 0 : i32
    return %arg0, %c0_i32, %c0_i32_0, %c0_i32_1 : i32, i32, i32, i32
  }
  func.func @transform_1(%arg0: i32) -> (i32, i32, i32) {
    %c0_i32 = arith.constant 0 : i32
    %c0_i32_0 = arith.constant 0 : i32
    %c0_i32_1 = arith.constant 0 : i32
    %c0_i32_2 = arith.constant 0 : i32
    return %c0_i32, %c0_i32_0, %c0_i32_1 : i32, i32, i32
  }
  func.func @transform_2(%arg0: i32) -> (i32, i32) {
    %c0_i32 = arith.constant 0 : i32
    %c0_i32_0 = arith.constant 0 : i32
    %c0_i32_1 = arith.constant 0 : i32
    return %c0_i32, %c0_i32_0 : i32, i32
  }
  func.func @transform_3(%arg0: i32) -> (i32, i32) {
    %c0_i32 = arith.constant 0 : i32
    %c0_i32_0 = arith.constant 0 : i32
    %c0_i32_1 = arith.constant 0 : i32
    return %c0_i32, %c0_i32_0 : i32, i32
  }
  func.func @transform_4(%arg0: i32) -> (i32, i32) {
    %c0_i32 = arith.constant 0 : i32
    %c0_i32_0 = arith.constant 0 : i32
    %c0_i32_1 = arith.constant 0 : i32
    return %c0_i32, %c0_i32_0 : i32, i32
  }
  func.func @transform_5(%arg0: i32) -> (i32, i32) {
    %c0_i32 = arith.constant 0 : i32
    %c0_i32_0 = arith.constant 0 : i32
    %c0_i32_1 = arith.constant 0 : i32
    return %c0_i32, %c0_i32_0 : i32, i32
  }
  func.func @transform_6(%arg0: i32) -> (i32, i32, i32) {
    %c0_i32 = arith.constant 0 : i32
    %c0_i32_0 = arith.constant 0 : i32
    %c0_i32_1 = arith.constant 0 : i32
    return %arg0, %c0_i32, %c0_i32_0 : i32, i32, i32
  }
}

module attributes {stable_mosaic.version = 11 : i64} {
  func.func @_conv_layer_kernel(%arg0: i32, %arg1: memref<1x1x102x64xbf16, #tpu.memory_space<vmem>>, %arg2: memref<9x64x128xbf16, #tpu.memory_space<vmem>>, %arg3: memref<1x128xf32, #tpu.memory_space<vmem>>, %arg4: memref<1x128xf32, #tpu.memory_space<vmem>>, %arg5: memref<1x128xf32, #tpu.memory_space<vmem>>, %arg6: memref<80x1xf32, #tpu.memory_space<vmem>>, %arg7: memref<1x80x128xbf16, #tpu.memory_space<vmem>>) attributes {dimension_semantics = [#tpu.dimension_semantics<parallel>], iteration_bounds = array<i64: 2>, scalar_prefetch = 0 : i64, scratch_operands = 0 : i64, tpu.core_type = #tpu.core_type<tc>, window_params = [{transform_indices = @transform_0, window_bounds = array<i64: 1, 1, 102, 64>}, {pipeline_mode = #tpu.pipeline_mode<synchronous>, transform_indices = @transform_1, window_bounds = array<i64: 9, 64, 128>}, {pipeline_mode = #tpu.pipeline_mode<synchronous>, transform_indices = @transform_2, window_bounds = array<i64: 1, 128>}, {pipeline_mode = #tpu.pipeline_mode<synchronous>, transform_indices = @transform_3, window_bounds = array<i64: 1, 128>}, {pipeline_mode = #tpu.pipeline_mode<synchronous>, transform_indices = @transform_4, window_bounds = array<i64: 1, 128>}, {pipeline_mode = #tpu.pipeline_mode<synchronous>, transform_indices = @transform_5, window_bounds = array<i64: 80, 1>}, {transform_indices = @transform_6, window_bounds = array<i64: 1, 80, 128>}]} {
    %c0 = arith.constant 0 : index
    %c0_0 = arith.constant 0 : index
    %c0_1 = arith.constant 0 : index
    %c0_2 = arith.constant 0 : index
    %0 = vector.load %arg1[%c0, %c0_0, %c0_1, %c0_2] : memref<1x1x102x64xbf16, #tpu.memory_space<vmem>>, vector<1x1x80x64xbf16>
    %1 = vector.shape_cast %0 : vector<1x1x80x64xbf16> to vector<80x64xbf16>
    %c0_3 = arith.constant 0 : index
    %c0_4 = arith.constant 0 : index
    %c0_5 = arith.constant 0 : index
    %2 = vector.load %arg2[%c0_3, %c0_4, %c0_5] : memref<9x64x128xbf16, #tpu.memory_space<vmem>>, vector<1x64x128xbf16>
    %3 = vector.shape_cast %2 : vector<1x64x128xbf16> to vector<64x128xbf16>
    %cst = arith.constant dense<0.000000e+00> : vector<80x128xf32>
    %4 = tpu.matmul %1, %3, %cst {dimension_numbers = #tpu.dot_dimension_numbers<[1], [0], [0], [1], [0, 0, 1, 1], [], []>} : vector<80x64xbf16>, vector<64x128xbf16>, vector<80x128xf32> -> vector<80x128xf32>
    %c0_6 = arith.constant 0 : index
    %c0_7 = arith.constant 0 : index
    %c1 = arith.constant 1 : index
    %c0_8 = arith.constant 0 : index
    %5 = vector.load %arg1[%c0_6, %c0_7, %c1, %c0_8] : memref<1x1x102x64xbf16, #tpu.memory_space<vmem>>, vector<1x1x80x64xbf16>
    %6 = vector.shape_cast %5 : vector<1x1x80x64xbf16> to vector<80x64xbf16>
    %c1_9 = arith.constant 1 : index
    %c0_10 = arith.constant 0 : index
    %c0_11 = arith.constant 0 : index
    %7 = vector.load %arg2[%c1_9, %c0_10, %c0_11] : memref<9x64x128xbf16, #tpu.memory_space<vmem>>, vector<1x64x128xbf16>
    %8 = vector.shape_cast %7 : vector<1x64x128xbf16> to vector<64x128xbf16>
    %cst_12 = arith.constant dense<0.000000e+00> : vector<80x128xf32>
    %9 = tpu.matmul %6, %8, %cst_12 {dimension_numbers = #tpu.dot_dimension_numbers<[1], [0], [0], [1], [0, 0, 1, 1], [], []>} : vector<80x64xbf16>, vector<64x128xbf16>, vector<80x128xf32> -> vector<80x128xf32>
    %10 = arith.addf %4, %9 : vector<80x128xf32>
    %c0_13 = arith.constant 0 : index
    %c0_14 = arith.constant 0 : index
    %c2 = arith.constant 2 : index
    %c0_15 = arith.constant 0 : index
    %11 = vector.load %arg1[%c0_13, %c0_14, %c2, %c0_15] : memref<1x1x102x64xbf16, #tpu.memory_space<vmem>>, vector<1x1x80x64xbf16>
    %12 = vector.shape_cast %11 : vector<1x1x80x64xbf16> to vector<80x64xbf16>
    %c2_16 = arith.constant 2 : index
    %c0_17 = arith.constant 0 : index
    %c0_18 = arith.constant 0 : index
    %13 = vector.load %arg2[%c2_16, %c0_17, %c0_18] : memref<9x64x128xbf16, #tpu.memory_space<vmem>>, vector<1x64x128xbf16>
    %14 = vector.shape_cast %13 : vector<1x64x128xbf16> to vector<64x128xbf16>
    %cst_19 = arith.constant dense<0.000000e+00> : vector<80x128xf32>
    %15 = tpu.matmul %12, %14, %cst_19 {dimension_numbers = #tpu.dot_dimension_numbers<[1], [0], [0], [1], [0, 0, 1, 1], [], []>} : vector<80x64xbf16>, vector<64x128xbf16>, vector<80x128xf32> -> vector<80x128xf32>
    %16 = arith.addf %10, %15 : vector<80x128xf32>
    %c0_20 = arith.constant 0 : index
    %c0_21 = arith.constant 0 : index
    %c10 = arith.constant 10 : index
    %c0_22 = arith.constant 0 : index
    %17 = vector.load %arg1[%c0_20, %c0_21, %c10, %c0_22] : memref<1x1x102x64xbf16, #tpu.memory_space<vmem>>, vector<1x1x80x64xbf16>
    %18 = vector.shape_cast %17 : vector<1x1x80x64xbf16> to vector<80x64xbf16>
    %c3 = arith.constant 3 : index
    %c0_23 = arith.constant 0 : index
    %c0_24 = arith.constant 0 : index
    %19 = vector.load %arg2[%c3, %c0_23, %c0_24] : memref<9x64x128xbf16, #tpu.memory_space<vmem>>, vector<1x64x128xbf16>
    %20 = vector.shape_cast %19 : vector<1x64x128xbf16> to vector<64x128xbf16>
    %cst_25 = arith.constant dense<0.000000e+00> : vector<80x128xf32>
    %21 = tpu.matmul %18, %20, %cst_25 {dimension_numbers = #tpu.dot_dimension_numbers<[1], [0], [0], [1], [0, 0, 1, 1], [], []>} : vector<80x64xbf16>, vector<64x128xbf16>, vector<80x128xf32> -> vector<80x128xf32>
    %22 = arith.addf %16, %21 : vector<80x128xf32>
    %c0_26 = arith.constant 0 : index
    %c0_27 = arith.constant 0 : index
    %c11 = arith.constant 11 : index
    %c0_28 = arith.constant 0 : index
    %23 = vector.load %arg1[%c0_26, %c0_27, %c11, %c0_28] : memref<1x1x102x64xbf16, #tpu.memory_space<vmem>>, vector<1x1x80x64xbf16>
    %24 = vector.shape_cast %23 : vector<1x1x80x64xbf16> to vector<80x64xbf16>
    %c4 = arith.constant 4 : index
    %c0_29 = arith.constant 0 : index
    %c0_30 = arith.constant 0 : index
    %25 = vector.load %arg2[%c4, %c0_29, %c0_30] : memref<9x64x128xbf16, #tpu.memory_space<vmem>>, vector<1x64x128xbf16>
    %26 = vector.shape_cast %25 : vector<1x64x128xbf16> to vector<64x128xbf16>
    %cst_31 = arith.constant dense<0.000000e+00> : vector<80x128xf32>
    %27 = tpu.matmul %24, %26, %cst_31 {dimension_numbers = #tpu.dot_dimension_numbers<[1], [0], [0], [1], [0, 0, 1, 1], [], []>} : vector<80x64xbf16>, vector<64x128xbf16>, vector<80x128xf32> -> vector<80x128xf32>
    %28 = arith.addf %22, %27 : vector<80x128xf32>
    %c0_32 = arith.constant 0 : index
    %c0_33 = arith.constant 0 : index
    %c12 = arith.constant 12 : index
    %c0_34 = arith.constant 0 : index
    %29 = vector.load %arg1[%c0_32, %c0_33, %c12, %c0_34] : memref<1x1x102x64xbf16, #tpu.memory_space<vmem>>, vector<1x1x80x64xbf16>
    %30 = vector.shape_cast %29 : vector<1x1x80x64xbf16> to vector<80x64xbf16>
    %c5 = arith.constant 5 : index
    %c0_35 = arith.constant 0 : index
    %c0_36 = arith.constant 0 : index
    %31 = vector.load %arg2[%c5, %c0_35, %c0_36] : memref<9x64x128xbf16, #tpu.memory_space<vmem>>, vector<1x64x128xbf16>
    %32 = vector.shape_cast %31 : vector<1x64x128xbf16> to vector<64x128xbf16>
    %cst_37 = arith.constant dense<0.000000e+00> : vector<80x128xf32>
    %33 = tpu.matmul %30, %32, %cst_37 {dimension_numbers = #tpu.dot_dimension_numbers<[1], [0], [0], [1], [0, 0, 1, 1], [], []>} : vector<80x64xbf16>, vector<64x128xbf16>, vector<80x128xf32> -> vector<80x128xf32>
    %34 = arith.addf %28, %33 : vector<80x128xf32>
    %c0_38 = arith.constant 0 : index
    %c0_39 = arith.constant 0 : index
    %c20 = arith.constant 20 : index
    %c0_40 = arith.constant 0 : index
    %35 = vector.load %arg1[%c0_38, %c0_39, %c20, %c0_40] : memref<1x1x102x64xbf16, #tpu.memory_space<vmem>>, vector<1x1x80x64xbf16>
    %36 = vector.shape_cast %35 : vector<1x1x80x64xbf16> to vector<80x64xbf16>
    %c6 = arith.constant 6 : index
    %c0_41 = arith.constant 0 : index
    %c0_42 = arith.constant 0 : index
    %37 = vector.load %arg2[%c6, %c0_41, %c0_42] : memref<9x64x128xbf16, #tpu.memory_space<vmem>>, vector<1x64x128xbf16>
    %38 = vector.shape_cast %37 : vector<1x64x128xbf16> to vector<64x128xbf16>
    %cst_43 = arith.constant dense<0.000000e+00> : vector<80x128xf32>
    %39 = tpu.matmul %36, %38, %cst_43 {dimension_numbers = #tpu.dot_dimension_numbers<[1], [0], [0], [1], [0, 0, 1, 1], [], []>} : vector<80x64xbf16>, vector<64x128xbf16>, vector<80x128xf32> -> vector<80x128xf32>
    %40 = arith.addf %34, %39 : vector<80x128xf32>
    %c0_44 = arith.constant 0 : index
    %c0_45 = arith.constant 0 : index
    %c21 = arith.constant 21 : index
    %c0_46 = arith.constant 0 : index
    %41 = vector.load %arg1[%c0_44, %c0_45, %c21, %c0_46] : memref<1x1x102x64xbf16, #tpu.memory_space<vmem>>, vector<1x1x80x64xbf16>
    %42 = vector.shape_cast %41 : vector<1x1x80x64xbf16> to vector<80x64xbf16>
    %c7 = arith.constant 7 : index
    %c0_47 = arith.constant 0 : index
    %c0_48 = arith.constant 0 : index
    %43 = vector.load %arg2[%c7, %c0_47, %c0_48] : memref<9x64x128xbf16, #tpu.memory_space<vmem>>, vector<1x64x128xbf16>
    %44 = vector.shape_cast %43 : vector<1x64x128xbf16> to vector<64x128xbf16>
    %cst_49 = arith.constant dense<0.000000e+00> : vector<80x128xf32>
    %45 = tpu.matmul %42, %44, %cst_49 {dimension_numbers = #tpu.dot_dimension_numbers<[1], [0], [0], [1], [0, 0, 1, 1], [], []>} : vector<80x64xbf16>, vector<64x128xbf16>, vector<80x128xf32> -> vector<80x128xf32>
    %46 = arith.addf %40, %45 : vector<80x128xf32>
    %c0_50 = arith.constant 0 : index
    %c0_51 = arith.constant 0 : index
    %c22 = arith.constant 22 : index
    %c0_52 = arith.constant 0 : index
    %47 = vector.load %arg1[%c0_50, %c0_51, %c22, %c0_52] : memref<1x1x102x64xbf16, #tpu.memory_space<vmem>>, vector<1x1x80x64xbf16>
    %48 = vector.shape_cast %47 : vector<1x1x80x64xbf16> to vector<80x64xbf16>
    %c8 = arith.constant 8 : index
    %c0_53 = arith.constant 0 : index
    %c0_54 = arith.constant 0 : index
    %49 = vector.load %arg2[%c8, %c0_53, %c0_54] : memref<9x64x128xbf16, #tpu.memory_space<vmem>>, vector<1x64x128xbf16>
    %50 = vector.shape_cast %49 : vector<1x64x128xbf16> to vector<64x128xbf16>
    %cst_55 = arith.constant dense<0.000000e+00> : vector<80x128xf32>
    %51 = tpu.matmul %48, %50, %cst_55 {dimension_numbers = #tpu.dot_dimension_numbers<[1], [0], [0], [1], [0, 0, 1, 1], [], []>} : vector<80x64xbf16>, vector<64x128xbf16>, vector<80x128xf32> -> vector<80x128xf32>
    %52 = arith.addf %46, %51 : vector<80x128xf32>
    %c0_56 = arith.constant 0 : index
    %c0_57 = arith.constant 0 : index
    %53 = vector.load %arg3[%c0_56, %c0_57] : memref<1x128xf32, #tpu.memory_space<vmem>>, vector<1x128xf32>
    %54 = vector.broadcast %53 : vector<1x128xf32> to vector<80x128xf32>
    %55 = arith.addf %52, %54 : vector<80x128xf32>
    %c0_58 = arith.constant 0 : index
    %c0_59 = arith.constant 0 : index
    %56 = vector.load %arg6[%c0_58, %c0_59] : memref<80x1xf32, #tpu.memory_space<vmem>>, vector<80x1xf32>
    %57 = vector.broadcast %56 : vector<80x1xf32> to vector<80x128xf32>
    %58 = arith.mulf %55, %57 : vector<80x128xf32>
    %59 = vector.shape_cast %58 : vector<80x128xf32> to vector<1x80x128xf32>
    %cst_60 = arith.constant dense<0.000000e+00> : vector<1xf32>
    %60 = vector.multi_reduction <add>, %59, %cst_60 [1, 2] : vector<1x80x128xf32> to vector<1xf32>
    %61 = vector.shape_cast %60 : vector<1xf32> to vector<1x1x1xf32>
    %62 = vector.extract %61[0, 0, 0] : f32 from vector<1x1x1xf32>
    %cst_61 = arith.constant 1.22070313E-4 : f32
    %63 = arith.mulf %62, %cst_61 : f32
    %64 = vector.broadcast %63 : f32 to vector<80x128xf32>
    %65 = arith.subf %55, %64 : vector<80x128xf32>
    %66 = arith.mulf %65, %65 : vector<80x128xf32>
    %67 = vector.broadcast %56 : vector<80x1xf32> to vector<80x128xf32>
    %68 = arith.mulf %66, %67 : vector<80x128xf32>
    %69 = vector.shape_cast %68 : vector<80x128xf32> to vector<1x80x128xf32>
    %cst_62 = arith.constant dense<0.000000e+00> : vector<1xf32>
    %70 = vector.multi_reduction <add>, %69, %cst_62 [1, 2] : vector<1x80x128xf32> to vector<1xf32>
    %71 = vector.shape_cast %70 : vector<1xf32> to vector<1x1x1xf32>
    %72 = vector.extract %71[0, 0, 0] : f32 from vector<1x1x1xf32>
    %cst_63 = arith.constant 1.22070313E-4 : f32
    %73 = arith.mulf %72, %cst_63 : f32
    %cst_64 = arith.constant 9.99999974E-6 : f32
    %74 = arith.addf %73, %cst_64 : f32
    %75 = math.rsqrt %74 : f32
    %76 = vector.broadcast %75 : f32 to vector<80x128xf32>
    %77 = arith.mulf %65, %76 : vector<80x128xf32>
    %c0_65 = arith.constant 0 : index
    %c0_66 = arith.constant 0 : index
    %78 = vector.load %arg4[%c0_65, %c0_66] : memref<1x128xf32, #tpu.memory_space<vmem>>, vector<1x128xf32>
    %79 = vector.broadcast %78 : vector<1x128xf32> to vector<80x128xf32>
    %80 = arith.mulf %77, %79 : vector<80x128xf32>
    %c0_67 = arith.constant 0 : index
    %c0_68 = arith.constant 0 : index
    %81 = vector.load %arg5[%c0_67, %c0_68] : memref<1x128xf32, #tpu.memory_space<vmem>>, vector<1x128xf32>
    %82 = vector.broadcast %81 : vector<1x128xf32> to vector<80x128xf32>
    %83 = arith.addf %80, %82 : vector<80x128xf32>
    %cst_69 = arith.constant 0.000000e+00 : f32
    %84 = vector.broadcast %cst_69 : f32 to vector<80x128xf32>
    %85 = arith.cmpf ogt, %83, %84 : vector<80x128xf32>
    %cst_70 = arith.constant 2.000000e-01 : f32
    %86 = vector.broadcast %cst_70 : f32 to vector<80x128xf32>
    %87 = arith.mulf %86, %83 : vector<80x128xf32>
    %88 = arith.select %85, %83, %87 : vector<80x128xi1>, vector<80x128xf32>
    %89 = arith.truncf %88 : vector<80x128xf32> to vector<80x128xbf16>
    %c0_71 = arith.constant 0 : index
    %c0_72 = arith.constant 0 : index
    %c0_73 = arith.constant 0 : index
    %90 = vector.load %arg7[%c0_71, %c0_72, %c0_73] : memref<1x80x128xbf16, #tpu.memory_space<vmem>>, vector<1x80x128xbf16>
    %91 = vector.shape_cast %90 : vector<1x80x128xbf16> to vector<80x128xbf16>
    %92 = vector.shape_cast %89 : vector<80x128xbf16> to vector<1x80x128xbf16>
    tpu.vector_store %arg7[%c0_71, %c0_72, %c0_73], %92 {strides = array<i32>} : memref<1x80x128xbf16, #tpu.memory_space<vmem>>, vector<1x80x128xbf16>,
    return
  }
  func.func @transform_0(%arg0: i32) -> (i32, i32, i32, i32) {
    %c0_i32 = arith.constant 0 : i32
    %c0_i32_0 = arith.constant 0 : i32
    %c0_i32_1 = arith.constant 0 : i32
    %c0_i32_2 = arith.constant 0 : i32
    return %arg0, %c0_i32, %c0_i32_0, %c0_i32_1 : i32, i32, i32, i32
  }
  func.func @transform_1(%arg0: i32) -> (i32, i32, i32) {
    %c0_i32 = arith.constant 0 : i32
    %c0_i32_0 = arith.constant 0 : i32
    %c0_i32_1 = arith.constant 0 : i32
    %c0_i32_2 = arith.constant 0 : i32
    return %c0_i32, %c0_i32_0, %c0_i32_1 : i32, i32, i32
  }
  func.func @transform_2(%arg0: i32) -> (i32, i32) {
    %c0_i32 = arith.constant 0 : i32
    %c0_i32_0 = arith.constant 0 : i32
    %c0_i32_1 = arith.constant 0 : i32
    return %c0_i32, %c0_i32_0 : i32, i32
  }
  func.func @transform_3(%arg0: i32) -> (i32, i32) {
    %c0_i32 = arith.constant 0 : i32
    %c0_i32_0 = arith.constant 0 : i32
    %c0_i32_1 = arith.constant 0 : i32
    return %c0_i32, %c0_i32_0 : i32, i32
  }
  func.func @transform_4(%arg0: i32) -> (i32, i32) {
    %c0_i32 = arith.constant 0 : i32
    %c0_i32_0 = arith.constant 0 : i32
    %c0_i32_1 = arith.constant 0 : i32
    return %c0_i32, %c0_i32_0 : i32, i32
  }
  func.func @transform_5(%arg0: i32) -> (i32, i32) {
    %c0_i32 = arith.constant 0 : i32
    %c0_i32_0 = arith.constant 0 : i32
    %c0_i32_1 = arith.constant 0 : i32
    return %c0_i32, %c0_i32_0 : i32, i32
  }
  func.func @transform_6(%arg0: i32) -> (i32, i32, i32) {
    %c0_i32 = arith.constant 0 : i32
    %c0_i32_0 = arith.constant 0 : i32
    %c0_i32_1 = arith.constant 0 : i32
    return %arg0, %c0_i32, %c0_i32_0 : i32, i32, i32
  }
}

module attributes {stable_mosaic.version = 11 : i64} {
  func.func @_conv_layer_kernel(%arg0: i32, %arg1: memref<1x4x26x128xbf16, #tpu.memory_space<vmem>>, %arg2: memref<9x128x128xbf16, #tpu.memory_space<vmem>>, %arg3: memref<1x128xf32, #tpu.memory_space<vmem>>, %arg4: memref<1x128xf32, #tpu.memory_space<vmem>>, %arg5: memref<1x128xf32, #tpu.memory_space<vmem>>, %arg6: memref<20x1xf32, #tpu.memory_space<vmem>>, %arg7: memref<1x20x128xbf16, #tpu.memory_space<vmem>>) attributes {dimension_semantics = [#tpu.dimension_semantics<parallel>], iteration_bounds = array<i64: 2>, scalar_prefetch = 0 : i64, scratch_operands = 0 : i64, tpu.core_type = #tpu.core_type<tc>, window_params = [{transform_indices = @transform_0, window_bounds = array<i64: 1, 4, 26, 128>}, {pipeline_mode = #tpu.pipeline_mode<synchronous>, transform_indices = @transform_1, window_bounds = array<i64: 9, 128, 128>}, {pipeline_mode = #tpu.pipeline_mode<synchronous>, transform_indices = @transform_2, window_bounds = array<i64: 1, 128>}, {pipeline_mode = #tpu.pipeline_mode<synchronous>, transform_indices = @transform_3, window_bounds = array<i64: 1, 128>}, {pipeline_mode = #tpu.pipeline_mode<synchronous>, transform_indices = @transform_4, window_bounds = array<i64: 1, 128>}, {pipeline_mode = #tpu.pipeline_mode<synchronous>, transform_indices = @transform_5, window_bounds = array<i64: 20, 1>}, {transform_indices = @transform_6, window_bounds = array<i64: 1, 20, 128>}]} {
    %c0 = arith.constant 0 : index
    %c0_0 = arith.constant 0 : index
    %c0_1 = arith.constant 0 : index
    %c0_2 = arith.constant 0 : index
    %0 = vector.load %arg1[%c0, %c0_0, %c0_1, %c0_2] : memref<1x4x26x128xbf16, #tpu.memory_space<vmem>>, vector<1x1x20x128xbf16>
    %1 = vector.shape_cast %0 : vector<1x1x20x128xbf16> to vector<20x128xbf16>
    %c0_3 = arith.constant 0 : index
    %c0_4 = arith.constant 0 : index
    %c0_5 = arith.constant 0 : index
    %2 = vector.load %arg2[%c0_3, %c0_4, %c0_5] : memref<9x128x128xbf16, #tpu.memory_space<vmem>>, vector<1x128x128xbf16>
    %3 = vector.shape_cast %2 : vector<1x128x128xbf16> to vector<128x128xbf16>
    %cst = arith.constant dense<0.000000e+00> : vector<20x128xf32>
    %4 = tpu.matmul %1, %3, %cst {dimension_numbers = #tpu.dot_dimension_numbers<[1], [0], [0], [1], [0, 0, 1, 1], [], []>} : vector<20x128xbf16>, vector<128x128xbf16>, vector<20x128xf32> -> vector<20x128xf32>
    %c0_6 = arith.constant 0 : index
    %c1 = arith.constant 1 : index
    %c0_7 = arith.constant 0 : index
    %c0_8 = arith.constant 0 : index
    %5 = vector.load %arg1[%c0_6, %c1, %c0_7, %c0_8] : memref<1x4x26x128xbf16, #tpu.memory_space<vmem>>, vector<1x1x20x128xbf16>
    %6 = vector.shape_cast %5 : vector<1x1x20x128xbf16> to vector<20x128xbf16>
    %c1_9 = arith.constant 1 : index
    %c0_10 = arith.constant 0 : index
    %c0_11 = arith.constant 0 : index
    %7 = vector.load %arg2[%c1_9, %c0_10, %c0_11] : memref<9x128x128xbf16, #tpu.memory_space<vmem>>, vector<1x128x128xbf16>
    %8 = vector.shape_cast %7 : vector<1x128x128xbf16> to vector<128x128xbf16>
    %cst_12 = arith.constant dense<0.000000e+00> : vector<20x128xf32>
    %9 = tpu.matmul %6, %8, %cst_12 {dimension_numbers = #tpu.dot_dimension_numbers<[1], [0], [0], [1], [0, 0, 1, 1], [], []>} : vector<20x128xbf16>, vector<128x128xbf16>, vector<20x128xf32> -> vector<20x128xf32>
    %10 = arith.addf %4, %9 : vector<20x128xf32>
    %c0_13 = arith.constant 0 : index
    %c0_14 = arith.constant 0 : index
    %c1_15 = arith.constant 1 : index
    %c0_16 = arith.constant 0 : index
    %11 = vector.load %arg1[%c0_13, %c0_14, %c1_15, %c0_16] : memref<1x4x26x128xbf16, #tpu.memory_space<vmem>>, vector<1x1x20x128xbf16>
    %12 = vector.shape_cast %11 : vector<1x1x20x128xbf16> to vector<20x128xbf16>
    %c2 = arith.constant 2 : index
    %c0_17 = arith.constant 0 : index
    %c0_18 = arith.constant 0 : index
    %13 = vector.load %arg2[%c2, %c0_17, %c0_18] : memref<9x128x128xbf16, #tpu.memory_space<vmem>>, vector<1x128x128xbf16>
    %14 = vector.shape_cast %13 : vector<1x128x128xbf16> to vector<128x128xbf16>
    %cst_19 = arith.constant dense<0.000000e+00> : vector<20x128xf32>
    %15 = tpu.matmul %12, %14, %cst_19 {dimension_numbers = #tpu.dot_dimension_numbers<[1], [0], [0], [1], [0, 0, 1, 1], [], []>} : vector<20x128xbf16>, vector<128x128xbf16>, vector<20x128xf32> -> vector<20x128xf32>
    %16 = arith.addf %10, %15 : vector<20x128xf32>
    %c0_20 = arith.constant 0 : index
    %c2_21 = arith.constant 2 : index
    %c0_22 = arith.constant 0 : index
    %c0_23 = arith.constant 0 : index
    %17 = vector.load %arg1[%c0_20, %c2_21, %c0_22, %c0_23] : memref<1x4x26x128xbf16, #tpu.memory_space<vmem>>, vector<1x1x20x128xbf16>
    %18 = vector.shape_cast %17 : vector<1x1x20x128xbf16> to vector<20x128xbf16>
    %c3 = arith.constant 3 : index
    %c0_24 = arith.constant 0 : index
    %c0_25 = arith.constant 0 : index
    %19 = vector.load %arg2[%c3, %c0_24, %c0_25] : memref<9x128x128xbf16, #tpu.memory_space<vmem>>, vector<1x128x128xbf16>
    %20 = vector.shape_cast %19 : vector<1x128x128xbf16> to vector<128x128xbf16>
    %cst_26 = arith.constant dense<0.000000e+00> : vector<20x128xf32>
    %21 = tpu.matmul %18, %20, %cst_26 {dimension_numbers = #tpu.dot_dimension_numbers<[1], [0], [0], [1], [0, 0, 1, 1], [], []>} : vector<20x128xbf16>, vector<128x128xbf16>, vector<20x128xf32> -> vector<20x128xf32>
    %22 = arith.addf %16, %21 : vector<20x128xf32>
    %c0_27 = arith.constant 0 : index
    %c3_28 = arith.constant 3 : index
    %c0_29 = arith.constant 0 : index
    %c0_30 = arith.constant 0 : index
    %23 = vector.load %arg1[%c0_27, %c3_28, %c0_29, %c0_30] : memref<1x4x26x128xbf16, #tpu.memory_space<vmem>>, vector<1x1x20x128xbf16>
    %24 = vector.shape_cast %23 : vector<1x1x20x128xbf16> to vector<20x128xbf16>
    %c4 = arith.constant 4 : index
    %c0_31 = arith.constant 0 : index
    %c0_32 = arith.constant 0 : index
    %25 = vector.load %arg2[%c4, %c0_31, %c0_32] : memref<9x128x128xbf16, #tpu.memory_space<vmem>>, vector<1x128x128xbf16>
    %26 = vector.shape_cast %25 : vector<1x128x128xbf16> to vector<128x128xbf16>
    %cst_33 = arith.constant dense<0.000000e+00> : vector<20x128xf32>
    %27 = tpu.matmul %24, %26, %cst_33 {dimension_numbers = #tpu.dot_dimension_numbers<[1], [0], [0], [1], [0, 0, 1, 1], [], []>} : vector<20x128xbf16>, vector<128x128xbf16>, vector<20x128xf32> -> vector<20x128xf32>
    %28 = arith.addf %22, %27 : vector<20x128xf32>
    %c0_34 = arith.constant 0 : index
    %c2_35 = arith.constant 2 : index
    %c1_36 = arith.constant 1 : index
    %c0_37 = arith.constant 0 : index
    %29 = vector.load %arg1[%c0_34, %c2_35, %c1_36, %c0_37] : memref<1x4x26x128xbf16, #tpu.memory_space<vmem>>, vector<1x1x20x128xbf16>
    %30 = vector.shape_cast %29 : vector<1x1x20x128xbf16> to vector<20x128xbf16>
    %c5 = arith.constant 5 : index
    %c0_38 = arith.constant 0 : index
    %c0_39 = arith.constant 0 : index
    %31 = vector.load %arg2[%c5, %c0_38, %c0_39] : memref<9x128x128xbf16, #tpu.memory_space<vmem>>, vector<1x128x128xbf16>
    %32 = vector.shape_cast %31 : vector<1x128x128xbf16> to vector<128x128xbf16>
    %cst_40 = arith.constant dense<0.000000e+00> : vector<20x128xf32>
    %33 = tpu.matmul %30, %32, %cst_40 {dimension_numbers = #tpu.dot_dimension_numbers<[1], [0], [0], [1], [0, 0, 1, 1], [], []>} : vector<20x128xbf16>, vector<128x128xbf16>, vector<20x128xf32> -> vector<20x128xf32>
    %34 = arith.addf %28, %33 : vector<20x128xf32>
    %c0_41 = arith.constant 0 : index
    %c0_42 = arith.constant 0 : index
    %c5_43 = arith.constant 5 : index
    %c0_44 = arith.constant 0 : index
    %35 = vector.load %arg1[%c0_41, %c0_42, %c5_43, %c0_44] : memref<1x4x26x128xbf16, #tpu.memory_space<vmem>>, vector<1x1x20x128xbf16>
    %36 = vector.shape_cast %35 : vector<1x1x20x128xbf16> to vector<20x128xbf16>
    %c6 = arith.constant 6 : index
    %c0_45 = arith.constant 0 : index
    %c0_46 = arith.constant 0 : index
    %37 = vector.load %arg2[%c6, %c0_45, %c0_46] : memref<9x128x128xbf16, #tpu.memory_space<vmem>>, vector<1x128x128xbf16>
    %38 = vector.shape_cast %37 : vector<1x128x128xbf16> to vector<128x128xbf16>
    %cst_47 = arith.constant dense<0.000000e+00> : vector<20x128xf32>
    %39 = tpu.matmul %36, %38, %cst_47 {dimension_numbers = #tpu.dot_dimension_numbers<[1], [0], [0], [1], [0, 0, 1, 1], [], []>} : vector<20x128xbf16>, vector<128x128xbf16>, vector<20x128xf32> -> vector<20x128xf32>
    %40 = arith.addf %34, %39 : vector<20x128xf32>
    %c0_48 = arith.constant 0 : index
    %c1_49 = arith.constant 1 : index
    %c5_50 = arith.constant 5 : index
    %c0_51 = arith.constant 0 : index
    %41 = vector.load %arg1[%c0_48, %c1_49, %c5_50, %c0_51] : memref<1x4x26x128xbf16, #tpu.memory_space<vmem>>, vector<1x1x20x128xbf16>
    %42 = vector.shape_cast %41 : vector<1x1x20x128xbf16> to vector<20x128xbf16>
    %c7 = arith.constant 7 : index
    %c0_52 = arith.constant 0 : index
    %c0_53 = arith.constant 0 : index
    %43 = vector.load %arg2[%c7, %c0_52, %c0_53] : memref<9x128x128xbf16, #tpu.memory_space<vmem>>, vector<1x128x128xbf16>
    %44 = vector.shape_cast %43 : vector<1x128x128xbf16> to vector<128x128xbf16>
    %cst_54 = arith.constant dense<0.000000e+00> : vector<20x128xf32>
    %45 = tpu.matmul %42, %44, %cst_54 {dimension_numbers = #tpu.dot_dimension_numbers<[1], [0], [0], [1], [0, 0, 1, 1], [], []>} : vector<20x128xbf16>, vector<128x128xbf16>, vector<20x128xf32> -> vector<20x128xf32>
    %46 = arith.addf %40, %45 : vector<20x128xf32>
    %c0_55 = arith.constant 0 : index
    %c0_56 = arith.constant 0 : index
    %c6_57 = arith.constant 6 : index
    %c0_58 = arith.constant 0 : index
    %47 = vector.load %arg1[%c0_55, %c0_56, %c6_57, %c0_58] : memref<1x4x26x128xbf16, #tpu.memory_space<vmem>>, vector<1x1x20x128xbf16>
    %48 = vector.shape_cast %47 : vector<1x1x20x128xbf16> to vector<20x128xbf16>
    %c8 = arith.constant 8 : index
    %c0_59 = arith.constant 0 : index
    %c0_60 = arith.constant 0 : index
    %49 = vector.load %arg2[%c8, %c0_59, %c0_60] : memref<9x128x128xbf16, #tpu.memory_space<vmem>>, vector<1x128x128xbf16>
    %50 = vector.shape_cast %49 : vector<1x128x128xbf16> to vector<128x128xbf16>
    %cst_61 = arith.constant dense<0.000000e+00> : vector<20x128xf32>
    %51 = tpu.matmul %48, %50, %cst_61 {dimension_numbers = #tpu.dot_dimension_numbers<[1], [0], [0], [1], [0, 0, 1, 1], [], []>} : vector<20x128xbf16>, vector<128x128xbf16>, vector<20x128xf32> -> vector<20x128xf32>
    %52 = arith.addf %46, %51 : vector<20x128xf32>
    %c0_62 = arith.constant 0 : index
    %c0_63 = arith.constant 0 : index
    %53 = vector.load %arg3[%c0_62, %c0_63] : memref<1x128xf32, #tpu.memory_space<vmem>>, vector<1x128xf32>
    %54 = vector.broadcast %53 : vector<1x128xf32> to vector<20x128xf32>
    %55 = arith.addf %52, %54 : vector<20x128xf32>
    %cst_64 = arith.constant 0.000000e+00 : f32
    %56 = vector.broadcast %cst_64 : f32 to vector<20x128xf32>
    %57 = arith.cmpf ogt, %55, %56 : vector<20x128xf32>
    %cst_65 = arith.constant 2.000000e-01 : f32
    %58 = vector.broadcast %cst_65 : f32 to vector<20x128xf32>
    %59 = arith.mulf %58, %55 : vector<20x128xf32>
    %60 = arith.select %57, %55, %59 : vector<20x128xi1>, vector<20x128xf32>
    %61 = arith.truncf %60 : vector<20x128xf32> to vector<20x128xbf16>
    %c0_66 = arith.constant 0 : index
    %c0_67 = arith.constant 0 : index
    %c0_68 = arith.constant 0 : index
    %62 = vector.load %arg7[%c0_66, %c0_67, %c0_68] : memref<1x20x128xbf16, #tpu.memory_space<vmem>>, vector<1x20x128xbf16>
    %63 = vector.shape_cast %62 : vector<1x20x128xbf16> to vector<20x128xbf16>
    %64 = vector.shape_cast %61 : vector<20x128xbf16> to vector<1x20x128xbf16>
    tpu.vector_store %arg7[%c0_66, %c0_67, %c0_68], %64 {strides = array<i32>} : memref<1x20x128xbf16, #tpu.memory_space<vmem>>, vector<1x20x128xbf16>,
    return
  }
  func.func @transform_0(%arg0: i32) -> (i32, i32, i32, i32) {
    %c0_i32 = arith.constant 0 : i32
    %c0_i32_0 = arith.constant 0 : i32
    %c0_i32_1 = arith.constant 0 : i32
    %c0_i32_2 = arith.constant 0 : i32
    return %arg0, %c0_i32, %c0_i32_0, %c0_i32_1 : i32, i32, i32, i32
  }
  func.func @transform_1(%arg0: i32) -> (i32, i32, i32) {
    %c0_i32 = arith.constant 0 : i32
    %c0_i32_0 = arith.constant 0 : i32
    %c0_i32_1 = arith.constant 0 : i32
    %c0_i32_2 = arith.constant 0 : i32
    return %c0_i32, %c0_i32_0, %c0_i32_1 : i32, i32, i32
  }
  func.func @transform_2(%arg0: i32) -> (i32, i32) {
    %c0_i32 = arith.constant 0 : i32
    %c0_i32_0 = arith.constant 0 : i32
    %c0_i32_1 = arith.constant 0 : i32
    return %c0_i32, %c0_i32_0 : i32, i32
  }
  func.func @transform_3(%arg0: i32) -> (i32, i32) {
    %c0_i32 = arith.constant 0 : i32
    %c0_i32_0 = arith.constant 0 : i32
    %c0_i32_1 = arith.constant 0 : i32
    return %c0_i32, %c0_i32_0 : i32, i32
  }
  func.func @transform_4(%arg0: i32) -> (i32, i32) {
    %c0_i32 = arith.constant 0 : i32
    %c0_i32_0 = arith.constant 0 : i32
    %c0_i32_1 = arith.constant 0 : i32
    return %c0_i32, %c0_i32_0 : i32, i32
  }
  func.func @transform_5(%arg0: i32) -> (i32, i32) {
    %c0_i32 = arith.constant 0 : i32
    %c0_i32_0 = arith.constant 0 : i32
    %c0_i32_1 = arith.constant 0 : i32
    return %c0_i32, %c0_i32_0 : i32, i32
  }
  func.func @transform_6(%arg0: i32) -> (i32, i32, i32) {
    %c0_i32 = arith.constant 0 : i32
    %c0_i32_0 = arith.constant 0 : i32
    %c0_i32_1 = arith.constant 0 : i32
    return %arg0, %c0_i32, %c0_i32_0 : i32, i32, i32
  }
}

module attributes {stable_mosaic.version = 11 : i64} {
  func.func @_conv_layer_kernel(%arg0: i32, %arg1: memref<1x1x38x128xbf16, #tpu.memory_space<vmem>>, %arg2: memref<9x128x256xbf16, #tpu.memory_space<vmem>>, %arg3: memref<1x256xf32, #tpu.memory_space<vmem>>, %arg4: memref<1x256xf32, #tpu.memory_space<vmem>>, %arg5: memref<1x256xf32, #tpu.memory_space<vmem>>, %arg6: memref<24x1xf32, #tpu.memory_space<vmem>>, %arg7: memref<1x24x256xbf16, #tpu.memory_space<vmem>>) attributes {dimension_semantics = [#tpu.dimension_semantics<parallel>], iteration_bounds = array<i64: 2>, scalar_prefetch = 0 : i64, scratch_operands = 0 : i64, tpu.core_type = #tpu.core_type<tc>, window_params = [{transform_indices = @transform_0, window_bounds = array<i64: 1, 1, 38, 128>}, {pipeline_mode = #tpu.pipeline_mode<synchronous>, transform_indices = @transform_1, window_bounds = array<i64: 9, 128, 256>}, {pipeline_mode = #tpu.pipeline_mode<synchronous>, transform_indices = @transform_2, window_bounds = array<i64: 1, 256>}, {pipeline_mode = #tpu.pipeline_mode<synchronous>, transform_indices = @transform_3, window_bounds = array<i64: 1, 256>}, {pipeline_mode = #tpu.pipeline_mode<synchronous>, transform_indices = @transform_4, window_bounds = array<i64: 1, 256>}, {pipeline_mode = #tpu.pipeline_mode<synchronous>, transform_indices = @transform_5, window_bounds = array<i64: 24, 1>}, {transform_indices = @transform_6, window_bounds = array<i64: 1, 24, 256>}]} {
    %c0 = arith.constant 0 : index
    %c0_0 = arith.constant 0 : index
    %c0_1 = arith.constant 0 : index
    %c0_2 = arith.constant 0 : index
    %0 = vector.load %arg1[%c0, %c0_0, %c0_1, %c0_2] : memref<1x1x38x128xbf16, #tpu.memory_space<vmem>>, vector<1x1x24x128xbf16>
    %1 = vector.shape_cast %0 : vector<1x1x24x128xbf16> to vector<24x128xbf16>
    %c0_3 = arith.constant 0 : index
    %c0_4 = arith.constant 0 : index
    %c0_5 = arith.constant 0 : index
    %2 = vector.load %arg2[%c0_3, %c0_4, %c0_5] : memref<9x128x256xbf16, #tpu.memory_space<vmem>>, vector<1x128x256xbf16>
    %3 = vector.shape_cast %2 : vector<1x128x256xbf16> to vector<128x256xbf16>
    %cst = arith.constant dense<0.000000e+00> : vector<24x256xf32>
    %4 = tpu.matmul %1, %3, %cst {dimension_numbers = #tpu.dot_dimension_numbers<[1], [0], [0], [1], [0, 0, 1, 1], [], []>} : vector<24x128xbf16>, vector<128x256xbf16>, vector<24x256xf32> -> vector<24x256xf32>
    %c0_6 = arith.constant 0 : index
    %c0_7 = arith.constant 0 : index
    %c1 = arith.constant 1 : index
    %c0_8 = arith.constant 0 : index
    %5 = vector.load %arg1[%c0_6, %c0_7, %c1, %c0_8] : memref<1x1x38x128xbf16, #tpu.memory_space<vmem>>, vector<1x1x24x128xbf16>
    %6 = vector.shape_cast %5 : vector<1x1x24x128xbf16> to vector<24x128xbf16>
    %c1_9 = arith.constant 1 : index
    %c0_10 = arith.constant 0 : index
    %c0_11 = arith.constant 0 : index
    %7 = vector.load %arg2[%c1_9, %c0_10, %c0_11] : memref<9x128x256xbf16, #tpu.memory_space<vmem>>, vector<1x128x256xbf16>
    %8 = vector.shape_cast %7 : vector<1x128x256xbf16> to vector<128x256xbf16>
    %cst_12 = arith.constant dense<0.000000e+00> : vector<24x256xf32>
    %9 = tpu.matmul %6, %8, %cst_12 {dimension_numbers = #tpu.dot_dimension_numbers<[1], [0], [0], [1], [0, 0, 1, 1], [], []>} : vector<24x128xbf16>, vector<128x256xbf16>, vector<24x256xf32> -> vector<24x256xf32>
    %10 = arith.addf %4, %9 : vector<24x256xf32>
    %c0_13 = arith.constant 0 : index
    %c0_14 = arith.constant 0 : index
    %c2 = arith.constant 2 : index
    %c0_15 = arith.constant 0 : index
    %11 = vector.load %arg1[%c0_13, %c0_14, %c2, %c0_15] : memref<1x1x38x128xbf16, #tpu.memory_space<vmem>>, vector<1x1x24x128xbf16>
    %12 = vector.shape_cast %11 : vector<1x1x24x128xbf16> to vector<24x128xbf16>
    %c2_16 = arith.constant 2 : index
    %c0_17 = arith.constant 0 : index
    %c0_18 = arith.constant 0 : index
    %13 = vector.load %arg2[%c2_16, %c0_17, %c0_18] : memref<9x128x256xbf16, #tpu.memory_space<vmem>>, vector<1x128x256xbf16>
    %14 = vector.shape_cast %13 : vector<1x128x256xbf16> to vector<128x256xbf16>
    %cst_19 = arith.constant dense<0.000000e+00> : vector<24x256xf32>
    %15 = tpu.matmul %12, %14, %cst_19 {dimension_numbers = #tpu.dot_dimension_numbers<[1], [0], [0], [1], [0, 0, 1, 1], [], []>} : vector<24x128xbf16>, vector<128x256xbf16>, vector<24x256xf32> -> vector<24x256xf32>
    %16 = arith.addf %10, %15 : vector<24x256xf32>
    %c0_20 = arith.constant 0 : index
    %c0_21 = arith.constant 0 : index
    %c6 = arith.constant 6 : index
    %c0_22 = arith.constant 0 : index
    %17 = vector.load %arg1[%c0_20, %c0_21, %c6, %c0_22] : memref<1x1x38x128xbf16, #tpu.memory_space<vmem>>, vector<1x1x24x128xbf16>
    %18 = vector.shape_cast %17 : vector<1x1x24x128xbf16> to vector<24x128xbf16>
    %c3 = arith.constant 3 : index
    %c0_23 = arith.constant 0 : index
    %c0_24 = arith.constant 0 : index
    %19 = vector.load %arg2[%c3, %c0_23, %c0_24] : memref<9x128x256xbf16, #tpu.memory_space<vmem>>, vector<1x128x256xbf16>
    %20 = vector.shape_cast %19 : vector<1x128x256xbf16> to vector<128x256xbf16>
    %cst_25 = arith.constant dense<0.000000e+00> : vector<24x256xf32>
    %21 = tpu.matmul %18, %20, %cst_25 {dimension_numbers = #tpu.dot_dimension_numbers<[1], [0], [0], [1], [0, 0, 1, 1], [], []>} : vector<24x128xbf16>, vector<128x256xbf16>, vector<24x256xf32> -> vector<24x256xf32>
    %22 = arith.addf %16, %21 : vector<24x256xf32>
    %c0_26 = arith.constant 0 : index
    %c0_27 = arith.constant 0 : index
    %c7 = arith.constant 7 : index
    %c0_28 = arith.constant 0 : index
    %23 = vector.load %arg1[%c0_26, %c0_27, %c7, %c0_28] : memref<1x1x38x128xbf16, #tpu.memory_space<vmem>>, vector<1x1x24x128xbf16>
    %24 = vector.shape_cast %23 : vector<1x1x24x128xbf16> to vector<24x128xbf16>
    %c4 = arith.constant 4 : index
    %c0_29 = arith.constant 0 : index
    %c0_30 = arith.constant 0 : index
    %25 = vector.load %arg2[%c4, %c0_29, %c0_30] : memref<9x128x256xbf16, #tpu.memory_space<vmem>>, vector<1x128x256xbf16>
    %26 = vector.shape_cast %25 : vector<1x128x256xbf16> to vector<128x256xbf16>
    %cst_31 = arith.constant dense<0.000000e+00> : vector<24x256xf32>
    %27 = tpu.matmul %24, %26, %cst_31 {dimension_numbers = #tpu.dot_dimension_numbers<[1], [0], [0], [1], [0, 0, 1, 1], [], []>} : vector<24x128xbf16>, vector<128x256xbf16>, vector<24x256xf32> -> vector<24x256xf32>
    %28 = arith.addf %22, %27 : vector<24x256xf32>
    %c0_32 = arith.constant 0 : index
    %c0_33 = arith.constant 0 : index
    %c8 = arith.constant 8 : index
    %c0_34 = arith.constant 0 : index
    %29 = vector.load %arg1[%c0_32, %c0_33, %c8, %c0_34] : memref<1x1x38x128xbf16, #tpu.memory_space<vmem>>, vector<1x1x24x128xbf16>
    %30 = vector.shape_cast %29 : vector<1x1x24x128xbf16> to vector<24x128xbf16>
    %c5 = arith.constant 5 : index
    %c0_35 = arith.constant 0 : index
    %c0_36 = arith.constant 0 : index
    %31 = vector.load %arg2[%c5, %c0_35, %c0_36] : memref<9x128x256xbf16, #tpu.memory_space<vmem>>, vector<1x128x256xbf16>
    %32 = vector.shape_cast %31 : vector<1x128x256xbf16> to vector<128x256xbf16>
    %cst_37 = arith.constant dense<0.000000e+00> : vector<24x256xf32>
    %33 = tpu.matmul %30, %32, %cst_37 {dimension_numbers = #tpu.dot_dimension_numbers<[1], [0], [0], [1], [0, 0, 1, 1], [], []>} : vector<24x128xbf16>, vector<128x256xbf16>, vector<24x256xf32> -> vector<24x256xf32>
    %34 = arith.addf %28, %33 : vector<24x256xf32>
    %c0_38 = arith.constant 0 : index
    %c0_39 = arith.constant 0 : index
    %c12 = arith.constant 12 : index
    %c0_40 = arith.constant 0 : index
    %35 = vector.load %arg1[%c0_38, %c0_39, %c12, %c0_40] : memref<1x1x38x128xbf16, #tpu.memory_space<vmem>>, vector<1x1x24x128xbf16>
    %36 = vector.shape_cast %35 : vector<1x1x24x128xbf16> to vector<24x128xbf16>
    %c6_41 = arith.constant 6 : index
    %c0_42 = arith.constant 0 : index
    %c0_43 = arith.constant 0 : index
    %37 = vector.load %arg2[%c6_41, %c0_42, %c0_43] : memref<9x128x256xbf16, #tpu.memory_space<vmem>>, vector<1x128x256xbf16>
    %38 = vector.shape_cast %37 : vector<1x128x256xbf16> to vector<128x256xbf16>
    %cst_44 = arith.constant dense<0.000000e+00> : vector<24x256xf32>
    %39 = tpu.matmul %36, %38, %cst_44 {dimension_numbers = #tpu.dot_dimension_numbers<[1], [0], [0], [1], [0, 0, 1, 1], [], []>} : vector<24x128xbf16>, vector<128x256xbf16>, vector<24x256xf32> -> vector<24x256xf32>
    %40 = arith.addf %34, %39 : vector<24x256xf32>
    %c0_45 = arith.constant 0 : index
    %c0_46 = arith.constant 0 : index
    %c13 = arith.constant 13 : index
    %c0_47 = arith.constant 0 : index
    %41 = vector.load %arg1[%c0_45, %c0_46, %c13, %c0_47] : memref<1x1x38x128xbf16, #tpu.memory_space<vmem>>, vector<1x1x24x128xbf16>
    %42 = vector.shape_cast %41 : vector<1x1x24x128xbf16> to vector<24x128xbf16>
    %c7_48 = arith.constant 7 : index
    %c0_49 = arith.constant 0 : index
    %c0_50 = arith.constant 0 : index
    %43 = vector.load %arg2[%c7_48, %c0_49, %c0_50] : memref<9x128x256xbf16, #tpu.memory_space<vmem>>, vector<1x128x256xbf16>
    %44 = vector.shape_cast %43 : vector<1x128x256xbf16> to vector<128x256xbf16>
    %cst_51 = arith.constant dense<0.000000e+00> : vector<24x256xf32>
    %45 = tpu.matmul %42, %44, %cst_51 {dimension_numbers = #tpu.dot_dimension_numbers<[1], [0], [0], [1], [0, 0, 1, 1], [], []>} : vector<24x128xbf16>, vector<128x256xbf16>, vector<24x256xf32> -> vector<24x256xf32>
    %46 = arith.addf %40, %45 : vector<24x256xf32>
    %c0_52 = arith.constant 0 : index
    %c0_53 = arith.constant 0 : index
    %c14 = arith.constant 14 : index
    %c0_54 = arith.constant 0 : index
    %47 = vector.load %arg1[%c0_52, %c0_53, %c14, %c0_54] : memref<1x1x38x128xbf16, #tpu.memory_space<vmem>>, vector<1x1x24x128xbf16>
    %48 = vector.shape_cast %47 : vector<1x1x24x128xbf16> to vector<24x128xbf16>
    %c8_55 = arith.constant 8 : index
    %c0_56 = arith.constant 0 : index
    %c0_57 = arith.constant 0 : index
    %49 = vector.load %arg2[%c8_55, %c0_56, %c0_57] : memref<9x128x256xbf16, #tpu.memory_space<vmem>>, vector<1x128x256xbf16>
    %50 = vector.shape_cast %49 : vector<1x128x256xbf16> to vector<128x256xbf16>
    %cst_58 = arith.constant dense<0.000000e+00> : vector<24x256xf32>
    %51 = tpu.matmul %48, %50, %cst_58 {dimension_numbers = #tpu.dot_dimension_numbers<[1], [0], [0], [1], [0, 0, 1, 1], [], []>} : vector<24x128xbf16>, vector<128x256xbf16>, vector<24x256xf32> -> vector<24x256xf32>
    %52 = arith.addf %46, %51 : vector<24x256xf32>
    %c0_59 = arith.constant 0 : index
    %c0_60 = arith.constant 0 : index
    %53 = vector.load %arg3[%c0_59, %c0_60] : memref<1x256xf32, #tpu.memory_space<vmem>>, vector<1x256xf32>
    %54 = vector.broadcast %53 : vector<1x256xf32> to vector<24x256xf32>
    %55 = arith.addf %52, %54 : vector<24x256xf32>
    %c0_61 = arith.constant 0 : index
    %c0_62 = arith.constant 0 : index
    %56 = vector.load %arg6[%c0_61, %c0_62] : memref<24x1xf32, #tpu.memory_space<vmem>>, vector<24x1xf32>
    %57 = vector.broadcast %56 : vector<24x1xf32> to vector<24x256xf32>
    %58 = arith.mulf %55, %57 : vector<24x256xf32>
    %59 = vector.shape_cast %58 : vector<24x256xf32> to vector<1x24x256xf32>
    %cst_63 = arith.constant dense<0.000000e+00> : vector<1xf32>
    %60 = vector.multi_reduction <add>, %59, %cst_63 [1, 2] : vector<1x24x256xf32> to vector<1xf32>
    %61 = vector.shape_cast %60 : vector<1xf32> to vector<1x1x1xf32>
    %62 = vector.extract %61[0, 0, 0] : f32 from vector<1x1x1xf32>
    %cst_64 = arith.constant 2.44140625E-4 : f32
    %63 = arith.mulf %62, %cst_64 : f32
    %64 = vector.broadcast %63 : f32 to vector<24x256xf32>
    %65 = arith.subf %55, %64 : vector<24x256xf32>
    %66 = arith.mulf %65, %65 : vector<24x256xf32>
    %67 = vector.broadcast %56 : vector<24x1xf32> to vector<24x256xf32>
    %68 = arith.mulf %66, %67 : vector<24x256xf32>
    %69 = vector.shape_cast %68 : vector<24x256xf32> to vector<1x24x256xf32>
    %cst_65 = arith.constant dense<0.000000e+00> : vector<1xf32>
    %70 = vector.multi_reduction <add>, %69, %cst_65 [1, 2] : vector<1x24x256xf32> to vector<1xf32>
    %71 = vector.shape_cast %70 : vector<1xf32> to vector<1x1x1xf32>
    %72 = vector.extract %71[0, 0, 0] : f32 from vector<1x1x1xf32>
    %cst_66 = arith.constant 2.44140625E-4 : f32
    %73 = arith.mulf %72, %cst_66 : f32
    %cst_67 = arith.constant 9.99999974E-6 : f32
    %74 = arith.addf %73, %cst_67 : f32
    %75 = math.rsqrt %74 : f32
    %76 = vector.broadcast %75 : f32 to vector<24x256xf32>
    %77 = arith.mulf %65, %76 : vector<24x256xf32>
    %c0_68 = arith.constant 0 : index
    %c0_69 = arith.constant 0 : index
    %78 = vector.load %arg4[%c0_68, %c0_69] : memref<1x256xf32, #tpu.memory_space<vmem>>, vector<1x256xf32>
    %79 = vector.broadcast %78 : vector<1x256xf32> to vector<24x256xf32>
    %80 = arith.mulf %77, %79 : vector<24x256xf32>
    %c0_70 = arith.constant 0 : index
    %c0_71 = arith.constant 0 : index
    %81 = vector.load %arg5[%c0_70, %c0_71] : memref<1x256xf32, #tpu.memory_space<vmem>>, vector<1x256xf32>
    %82 = vector.broadcast %81 : vector<1x256xf32> to vector<24x256xf32>
    %83 = arith.addf %80, %82 : vector<24x256xf32>
    %cst_72 = arith.constant 0.000000e+00 : f32
    %84 = vector.broadcast %cst_72 : f32 to vector<24x256xf32>
    %85 = arith.cmpf ogt, %83, %84 : vector<24x256xf32>
    %cst_73 = arith.constant 2.000000e-01 : f32
    %86 = vector.broadcast %cst_73 : f32 to vector<24x256xf32>
    %87 = arith.mulf %86, %83 : vector<24x256xf32>
    %88 = arith.select %85, %83, %87 : vector<24x256xi1>, vector<24x256xf32>
    %89 = arith.truncf %88 : vector<24x256xf32> to vector<24x256xbf16>
    %c0_74 = arith.constant 0 : index
    %c0_75 = arith.constant 0 : index
    %c0_76 = arith.constant 0 : index
    %90 = vector.load %arg7[%c0_74, %c0_75, %c0_76] : memref<1x24x256xbf16, #tpu.memory_space<vmem>>, vector<1x24x256xbf16>
    %91 = vector.shape_cast %90 : vector<1x24x256xbf16> to vector<24x256xbf16>
    %92 = vector.shape_cast %89 : vector<24x256xbf16> to vector<1x24x256xbf16>
    tpu.vector_store %arg7[%c0_74, %c0_75, %c0_76], %92 {strides = array<i32>} : memref<1x24x256xbf16, #tpu.memory_space<vmem>>, vector<1x24x256xbf16>,
    return
  }
  func.func @transform_0(%arg0: i32) -> (i32, i32, i32, i32) {
    %c0_i32 = arith.constant 0 : i32
    %c0_i32_0 = arith.constant 0 : i32
    %c0_i32_1 = arith.constant 0 : i32
    %c0_i32_2 = arith.constant 0 : i32
    return %arg0, %c0_i32, %c0_i32_0, %c0_i32_1 : i32, i32, i32, i32
  }
  func.func @transform_1(%arg0: i32) -> (i32, i32, i32) {
    %c0_i32 = arith.constant 0 : i32
    %c0_i32_0 = arith.constant 0 : i32
    %c0_i32_1 = arith.constant 0 : i32
    %c0_i32_2 = arith.constant 0 : i32
    return %c0_i32, %c0_i32_0, %c0_i32_1 : i32, i32, i32
  }
  func.func @transform_2(%arg0: i32) -> (i32, i32) {
    %c0_i32 = arith.constant 0 : i32
    %c0_i32_0 = arith.constant 0 : i32
    %c0_i32_1 = arith.constant 0 : i32
    return %c0_i32, %c0_i32_0 : i32, i32
  }
  func.func @transform_3(%arg0: i32) -> (i32, i32) {
    %c0_i32 = arith.constant 0 : i32
    %c0_i32_0 = arith.constant 0 : i32
    %c0_i32_1 = arith.constant 0 : i32
    return %c0_i32, %c0_i32_0 : i32, i32
  }
  func.func @transform_4(%arg0: i32) -> (i32, i32) {
    %c0_i32 = arith.constant 0 : i32
    %c0_i32_0 = arith.constant 0 : i32
    %c0_i32_1 = arith.constant 0 : i32
    return %c0_i32, %c0_i32_0 : i32, i32
  }
  func.func @transform_5(%arg0: i32) -> (i32, i32) {
    %c0_i32 = arith.constant 0 : i32
    %c0_i32_0 = arith.constant 0 : i32
    %c0_i32_1 = arith.constant 0 : i32
    return %c0_i32, %c0_i32_0 : i32, i32
  }
  func.func @transform_6(%arg0: i32) -> (i32, i32, i32) {
    %c0_i32 = arith.constant 0 : i32
    %c0_i32_0 = arith.constant 0 : i32
    %c0_i32_1 = arith.constant 0 : i32
    return %arg0, %c0_i32, %c0_i32_0 : i32, i32, i32
  }
}

module attributes {stable_mosaic.version = 11 : i64} {
  func.func @_conv_layer_kernel(%arg0: i32, %arg1: memref<1x1x38x256xbf16, #tpu.memory_space<vmem>>, %arg2: memref<9x256x256xbf16, #tpu.memory_space<vmem>>, %arg3: memref<1x256xf32, #tpu.memory_space<vmem>>, %arg4: memref<1x256xf32, #tpu.memory_space<vmem>>, %arg5: memref<1x256xf32, #tpu.memory_space<vmem>>, %arg6: memref<24x1xf32, #tpu.memory_space<vmem>>, %arg7: memref<1x24x256xbf16, #tpu.memory_space<vmem>>) attributes {dimension_semantics = [#tpu.dimension_semantics<parallel>], iteration_bounds = array<i64: 2>, scalar_prefetch = 0 : i64, scratch_operands = 0 : i64, tpu.core_type = #tpu.core_type<tc>, window_params = [{transform_indices = @transform_0, window_bounds = array<i64: 1, 1, 38, 256>}, {pipeline_mode = #tpu.pipeline_mode<synchronous>, transform_indices = @transform_1, window_bounds = array<i64: 9, 256, 256>}, {pipeline_mode = #tpu.pipeline_mode<synchronous>, transform_indices = @transform_2, window_bounds = array<i64: 1, 256>}, {pipeline_mode = #tpu.pipeline_mode<synchronous>, transform_indices = @transform_3, window_bounds = array<i64: 1, 256>}, {pipeline_mode = #tpu.pipeline_mode<synchronous>, transform_indices = @transform_4, window_bounds = array<i64: 1, 256>}, {pipeline_mode = #tpu.pipeline_mode<synchronous>, transform_indices = @transform_5, window_bounds = array<i64: 24, 1>}, {transform_indices = @transform_6, window_bounds = array<i64: 1, 24, 256>}]} {
    %c0 = arith.constant 0 : index
    %c0_0 = arith.constant 0 : index
    %c0_1 = arith.constant 0 : index
    %c0_2 = arith.constant 0 : index
    %0 = vector.load %arg1[%c0, %c0_0, %c0_1, %c0_2] : memref<1x1x38x256xbf16, #tpu.memory_space<vmem>>, vector<1x1x24x256xbf16>
    %1 = vector.shape_cast %0 : vector<1x1x24x256xbf16> to vector<24x256xbf16>
    %c0_3 = arith.constant 0 : index
    %c0_4 = arith.constant 0 : index
    %c0_5 = arith.constant 0 : index
    %2 = vector.load %arg2[%c0_3, %c0_4, %c0_5] : memref<9x256x256xbf16, #tpu.memory_space<vmem>>, vector<1x256x256xbf16>
    %3 = vector.shape_cast %2 : vector<1x256x256xbf16> to vector<256x256xbf16>
    %cst = arith.constant dense<0.000000e+00> : vector<24x256xf32>
    %4 = tpu.matmul %1, %3, %cst {dimension_numbers = #tpu.dot_dimension_numbers<[1], [0], [0], [1], [0, 0, 1, 1], [], []>} : vector<24x256xbf16>, vector<256x256xbf16>, vector<24x256xf32> -> vector<24x256xf32>
    %c0_6 = arith.constant 0 : index
    %c0_7 = arith.constant 0 : index
    %c1 = arith.constant 1 : index
    %c0_8 = arith.constant 0 : index
    %5 = vector.load %arg1[%c0_6, %c0_7, %c1, %c0_8] : memref<1x1x38x256xbf16, #tpu.memory_space<vmem>>, vector<1x1x24x256xbf16>
    %6 = vector.shape_cast %5 : vector<1x1x24x256xbf16> to vector<24x256xbf16>
    %c1_9 = arith.constant 1 : index
    %c0_10 = arith.constant 0 : index
    %c0_11 = arith.constant 0 : index
    %7 = vector.load %arg2[%c1_9, %c0_10, %c0_11] : memref<9x256x256xbf16, #tpu.memory_space<vmem>>, vector<1x256x256xbf16>
    %8 = vector.shape_cast %7 : vector<1x256x256xbf16> to vector<256x256xbf16>
    %cst_12 = arith.constant dense<0.000000e+00> : vector<24x256xf32>
    %9 = tpu.matmul %6, %8, %cst_12 {dimension_numbers = #tpu.dot_dimension_numbers<[1], [0], [0], [1], [0, 0, 1, 1], [], []>} : vector<24x256xbf16>, vector<256x256xbf16>, vector<24x256xf32> -> vector<24x256xf32>
    %10 = arith.addf %4, %9 : vector<24x256xf32>
    %c0_13 = arith.constant 0 : index
    %c0_14 = arith.constant 0 : index
    %c2 = arith.constant 2 : index
    %c0_15 = arith.constant 0 : index
    %11 = vector.load %arg1[%c0_13, %c0_14, %c2, %c0_15] : memref<1x1x38x256xbf16, #tpu.memory_space<vmem>>, vector<1x1x24x256xbf16>
    %12 = vector.shape_cast %11 : vector<1x1x24x256xbf16> to vector<24x256xbf16>
    %c2_16 = arith.constant 2 : index
    %c0_17 = arith.constant 0 : index
    %c0_18 = arith.constant 0 : index
    %13 = vector.load %arg2[%c2_16, %c0_17, %c0_18] : memref<9x256x256xbf16, #tpu.memory_space<vmem>>, vector<1x256x256xbf16>
    %14 = vector.shape_cast %13 : vector<1x256x256xbf16> to vector<256x256xbf16>
    %cst_19 = arith.constant dense<0.000000e+00> : vector<24x256xf32>
    %15 = tpu.matmul %12, %14, %cst_19 {dimension_numbers = #tpu.dot_dimension_numbers<[1], [0], [0], [1], [0, 0, 1, 1], [], []>} : vector<24x256xbf16>, vector<256x256xbf16>, vector<24x256xf32> -> vector<24x256xf32>
    %16 = arith.addf %10, %15 : vector<24x256xf32>
    %c0_20 = arith.constant 0 : index
    %c0_21 = arith.constant 0 : index
    %c6 = arith.constant 6 : index
    %c0_22 = arith.constant 0 : index
    %17 = vector.load %arg1[%c0_20, %c0_21, %c6, %c0_22] : memref<1x1x38x256xbf16, #tpu.memory_space<vmem>>, vector<1x1x24x256xbf16>
    %18 = vector.shape_cast %17 : vector<1x1x24x256xbf16> to vector<24x256xbf16>
    %c3 = arith.constant 3 : index
    %c0_23 = arith.constant 0 : index
    %c0_24 = arith.constant 0 : index
    %19 = vector.load %arg2[%c3, %c0_23, %c0_24] : memref<9x256x256xbf16, #tpu.memory_space<vmem>>, vector<1x256x256xbf16>
    %20 = vector.shape_cast %19 : vector<1x256x256xbf16> to vector<256x256xbf16>
    %cst_25 = arith.constant dense<0.000000e+00> : vector<24x256xf32>
    %21 = tpu.matmul %18, %20, %cst_25 {dimension_numbers = #tpu.dot_dimension_numbers<[1], [0], [0], [1], [0, 0, 1, 1], [], []>} : vector<24x256xbf16>, vector<256x256xbf16>, vector<24x256xf32> -> vector<24x256xf32>
    %22 = arith.addf %16, %21 : vector<24x256xf32>
    %c0_26 = arith.constant 0 : index
    %c0_27 = arith.constant 0 : index
    %c7 = arith.constant 7 : index
    %c0_28 = arith.constant 0 : index
    %23 = vector.load %arg1[%c0_26, %c0_27, %c7, %c0_28] : memref<1x1x38x256xbf16, #tpu.memory_space<vmem>>, vector<1x1x24x256xbf16>
    %24 = vector.shape_cast %23 : vector<1x1x24x256xbf16> to vector<24x256xbf16>
    %c4 = arith.constant 4 : index
    %c0_29 = arith.constant 0 : index
    %c0_30 = arith.constant 0 : index
    %25 = vector.load %arg2[%c4, %c0_29, %c0_30] : memref<9x256x256xbf16, #tpu.memory_space<vmem>>, vector<1x256x256xbf16>
    %26 = vector.shape_cast %25 : vector<1x256x256xbf16> to vector<256x256xbf16>
    %cst_31 = arith.constant dense<0.000000e+00> : vector<24x256xf32>
    %27 = tpu.matmul %24, %26, %cst_31 {dimension_numbers = #tpu.dot_dimension_numbers<[1], [0], [0], [1], [0, 0, 1, 1], [], []>} : vector<24x256xbf16>, vector<256x256xbf16>, vector<24x256xf32> -> vector<24x256xf32>
    %28 = arith.addf %22, %27 : vector<24x256xf32>
    %c0_32 = arith.constant 0 : index
    %c0_33 = arith.constant 0 : index
    %c8 = arith.constant 8 : index
    %c0_34 = arith.constant 0 : index
    %29 = vector.load %arg1[%c0_32, %c0_33, %c8, %c0_34] : memref<1x1x38x256xbf16, #tpu.memory_space<vmem>>, vector<1x1x24x256xbf16>
    %30 = vector.shape_cast %29 : vector<1x1x24x256xbf16> to vector<24x256xbf16>
    %c5 = arith.constant 5 : index
    %c0_35 = arith.constant 0 : index
    %c0_36 = arith.constant 0 : index
    %31 = vector.load %arg2[%c5, %c0_35, %c0_36] : memref<9x256x256xbf16, #tpu.memory_space<vmem>>, vector<1x256x256xbf16>
    %32 = vector.shape_cast %31 : vector<1x256x256xbf16> to vector<256x256xbf16>
    %cst_37 = arith.constant dense<0.000000e+00> : vector<24x256xf32>
    %33 = tpu.matmul %30, %32, %cst_37 {dimension_numbers = #tpu.dot_dimension_numbers<[1], [0], [0], [1], [0, 0, 1, 1], [], []>} : vector<24x256xbf16>, vector<256x256xbf16>, vector<24x256xf32> -> vector<24x256xf32>
    %34 = arith.addf %28, %33 : vector<24x256xf32>
    %c0_38 = arith.constant 0 : index
    %c0_39 = arith.constant 0 : index
    %c12 = arith.constant 12 : index
    %c0_40 = arith.constant 0 : index
    %35 = vector.load %arg1[%c0_38, %c0_39, %c12, %c0_40] : memref<1x1x38x256xbf16, #tpu.memory_space<vmem>>, vector<1x1x24x256xbf16>
    %36 = vector.shape_cast %35 : vector<1x1x24x256xbf16> to vector<24x256xbf16>
    %c6_41 = arith.constant 6 : index
    %c0_42 = arith.constant 0 : index
    %c0_43 = arith.constant 0 : index
    %37 = vector.load %arg2[%c6_41, %c0_42, %c0_43] : memref<9x256x256xbf16, #tpu.memory_space<vmem>>, vector<1x256x256xbf16>
    %38 = vector.shape_cast %37 : vector<1x256x256xbf16> to vector<256x256xbf16>
    %cst_44 = arith.constant dense<0.000000e+00> : vector<24x256xf32>
    %39 = tpu.matmul %36, %38, %cst_44 {dimension_numbers = #tpu.dot_dimension_numbers<[1], [0], [0], [1], [0, 0, 1, 1], [], []>} : vector<24x256xbf16>, vector<256x256xbf16>, vector<24x256xf32> -> vector<24x256xf32>
    %40 = arith.addf %34, %39 : vector<24x256xf32>
    %c0_45 = arith.constant 0 : index
    %c0_46 = arith.constant 0 : index
    %c13 = arith.constant 13 : index
    %c0_47 = arith.constant 0 : index
    %41 = vector.load %arg1[%c0_45, %c0_46, %c13, %c0_47] : memref<1x1x38x256xbf16, #tpu.memory_space<vmem>>, vector<1x1x24x256xbf16>
    %42 = vector.shape_cast %41 : vector<1x1x24x256xbf16> to vector<24x256xbf16>
    %c7_48 = arith.constant 7 : index
    %c0_49 = arith.constant 0 : index
    %c0_50 = arith.constant 0 : index
    %43 = vector.load %arg2[%c7_48, %c0_49, %c0_50] : memref<9x256x256xbf16, #tpu.memory_space<vmem>>, vector<1x256x256xbf16>
    %44 = vector.shape_cast %43 : vector<1x256x256xbf16> to vector<256x256xbf16>
    %cst_51 = arith.constant dense<0.000000e+00> : vector<24x256xf32>
    %45 = tpu.matmul %42, %44, %cst_51 {dimension_numbers = #tpu.dot_dimension_numbers<[1], [0], [0], [1], [0, 0, 1, 1], [], []>} : vector<24x256xbf16>, vector<256x256xbf16>, vector<24x256xf32> -> vector<24x256xf32>
    %46 = arith.addf %40, %45 : vector<24x256xf32>
    %c0_52 = arith.constant 0 : index
    %c0_53 = arith.constant 0 : index
    %c14 = arith.constant 14 : index
    %c0_54 = arith.constant 0 : index
    %47 = vector.load %arg1[%c0_52, %c0_53, %c14, %c0_54] : memref<1x1x38x256xbf16, #tpu.memory_space<vmem>>, vector<1x1x24x256xbf16>
    %48 = vector.shape_cast %47 : vector<1x1x24x256xbf16> to vector<24x256xbf16>
    %c8_55 = arith.constant 8 : index
    %c0_56 = arith.constant 0 : index
    %c0_57 = arith.constant 0 : index
    %49 = vector.load %arg2[%c8_55, %c0_56, %c0_57] : memref<9x256x256xbf16, #tpu.memory_space<vmem>>, vector<1x256x256xbf16>
    %50 = vector.shape_cast %49 : vector<1x256x256xbf16> to vector<256x256xbf16>
    %cst_58 = arith.constant dense<0.000000e+00> : vector<24x256xf32>
    %51 = tpu.matmul %48, %50, %cst_58 {dimension_numbers = #tpu.dot_dimension_numbers<[1], [0], [0], [1], [0, 0, 1, 1], [], []>} : vector<24x256xbf16>, vector<256x256xbf16>, vector<24x256xf32> -> vector<24x256xf32>
    %52 = arith.addf %46, %51 : vector<24x256xf32>
    %c0_59 = arith.constant 0 : index
    %c0_60 = arith.constant 0 : index
    %53 = vector.load %arg3[%c0_59, %c0_60] : memref<1x256xf32, #tpu.memory_space<vmem>>, vector<1x256xf32>
    %54 = vector.broadcast %53 : vector<1x256xf32> to vector<24x256xf32>
    %55 = arith.addf %52, %54 : vector<24x256xf32>
    %c0_61 = arith.constant 0 : index
    %c0_62 = arith.constant 0 : index
    %56 = vector.load %arg6[%c0_61, %c0_62] : memref<24x1xf32, #tpu.memory_space<vmem>>, vector<24x1xf32>
    %57 = vector.broadcast %56 : vector<24x1xf32> to vector<24x256xf32>
    %58 = arith.mulf %55, %57 : vector<24x256xf32>
    %59 = vector.shape_cast %58 : vector<24x256xf32> to vector<1x24x256xf32>
    %cst_63 = arith.constant dense<0.000000e+00> : vector<1xf32>
    %60 = vector.multi_reduction <add>, %59, %cst_63 [1, 2] : vector<1x24x256xf32> to vector<1xf32>
    %61 = vector.shape_cast %60 : vector<1xf32> to vector<1x1x1xf32>
    %62 = vector.extract %61[0, 0, 0] : f32 from vector<1x1x1xf32>
    %cst_64 = arith.constant 2.44140625E-4 : f32
    %63 = arith.mulf %62, %cst_64 : f32
    %64 = vector.broadcast %63 : f32 to vector<24x256xf32>
    %65 = arith.subf %55, %64 : vector<24x256xf32>
    %66 = arith.mulf %65, %65 : vector<24x256xf32>
    %67 = vector.broadcast %56 : vector<24x1xf32> to vector<24x256xf32>
    %68 = arith.mulf %66, %67 : vector<24x256xf32>
    %69 = vector.shape_cast %68 : vector<24x256xf32> to vector<1x24x256xf32>
    %cst_65 = arith.constant dense<0.000000e+00> : vector<1xf32>
    %70 = vector.multi_reduction <add>, %69, %cst_65 [1, 2] : vector<1x24x256xf32> to vector<1xf32>
    %71 = vector.shape_cast %70 : vector<1xf32> to vector<1x1x1xf32>
    %72 = vector.extract %71[0, 0, 0] : f32 from vector<1x1x1xf32>
    %cst_66 = arith.constant 2.44140625E-4 : f32
    %73 = arith.mulf %72, %cst_66 : f32
    %cst_67 = arith.constant 9.99999974E-6 : f32
    %74 = arith.addf %73, %cst_67 : f32
    %75 = math.rsqrt %74 : f32
    %76 = vector.broadcast %75 : f32 to vector<24x256xf32>
    %77 = arith.mulf %65, %76 : vector<24x256xf32>
    %c0_68 = arith.constant 0 : index
    %c0_69 = arith.constant 0 : index
    %78 = vector.load %arg4[%c0_68, %c0_69] : memref<1x256xf32, #tpu.memory_space<vmem>>, vector<1x256xf32>
    %79 = vector.broadcast %78 : vector<1x256xf32> to vector<24x256xf32>
    %80 = arith.mulf %77, %79 : vector<24x256xf32>
    %c0_70 = arith.constant 0 : index
    %c0_71 = arith.constant 0 : index
    %81 = vector.load %arg5[%c0_70, %c0_71] : memref<1x256xf32, #tpu.memory_space<vmem>>, vector<1x256xf32>
    %82 = vector.broadcast %81 : vector<1x256xf32> to vector<24x256xf32>
    %83 = arith.addf %80, %82 : vector<24x256xf32>
    %cst_72 = arith.constant 0.000000e+00 : f32
    %84 = vector.broadcast %cst_72 : f32 to vector<24x256xf32>
    %85 = arith.cmpf ogt, %83, %84 : vector<24x256xf32>
    %cst_73 = arith.constant 2.000000e-01 : f32
    %86 = vector.broadcast %cst_73 : f32 to vector<24x256xf32>
    %87 = arith.mulf %86, %83 : vector<24x256xf32>
    %88 = arith.select %85, %83, %87 : vector<24x256xi1>, vector<24x256xf32>
    %89 = arith.truncf %88 : vector<24x256xf32> to vector<24x256xbf16>
    %c0_74 = arith.constant 0 : index
    %c0_75 = arith.constant 0 : index
    %c0_76 = arith.constant 0 : index
    %90 = vector.load %arg7[%c0_74, %c0_75, %c0_76] : memref<1x24x256xbf16, #tpu.memory_space<vmem>>, vector<1x24x256xbf16>
    %91 = vector.shape_cast %90 : vector<1x24x256xbf16> to vector<24x256xbf16>
    %92 = vector.shape_cast %89 : vector<24x256xbf16> to vector<1x24x256xbf16>
    tpu.vector_store %arg7[%c0_74, %c0_75, %c0_76], %92 {strides = array<i32>} : memref<1x24x256xbf16, #tpu.memory_space<vmem>>, vector<1x24x256xbf16>,
    return
  }
  func.func @transform_0(%arg0: i32) -> (i32, i32, i32, i32) {
    %c0_i32 = arith.constant 0 : i32
    %c0_i32_0 = arith.constant 0 : i32
    %c0_i32_1 = arith.constant 0 : i32
    %c0_i32_2 = arith.constant 0 : i32
    return %arg0, %c0_i32, %c0_i32_0, %c0_i32_1 : i32, i32, i32, i32
  }
  func.func @transform_1(%arg0: i32) -> (i32, i32, i32) {
    %c0_i32 = arith.constant 0 : i32
    %c0_i32_0 = arith.constant 0 : i32
    %c0_i32_1 = arith.constant 0 : i32
    %c0_i32_2 = arith.constant 0 : i32
    return %c0_i32, %c0_i32_0, %c0_i32_1 : i32, i32, i32
  }
  func.func @transform_2(%arg0: i32) -> (i32, i32) {
    %c0_i32 = arith.constant 0 : i32
    %c0_i32_0 = arith.constant 0 : i32
    %c0_i32_1 = arith.constant 0 : i32
    return %c0_i32, %c0_i32_0 : i32, i32
  }
  func.func @transform_3(%arg0: i32) -> (i32, i32) {
    %c0_i32 = arith.constant 0 : i32
    %c0_i32_0 = arith.constant 0 : i32
    %c0_i32_1 = arith.constant 0 : i32
    return %c0_i32, %c0_i32_0 : i32, i32
  }
  func.func @transform_4(%arg0: i32) -> (i32, i32) {
    %c0_i32 = arith.constant 0 : i32
    %c0_i32_0 = arith.constant 0 : i32
    %c0_i32_1 = arith.constant 0 : i32
    return %c0_i32, %c0_i32_0 : i32, i32
  }
  func.func @transform_5(%arg0: i32) -> (i32, i32) {
    %c0_i32 = arith.constant 0 : i32
    %c0_i32_0 = arith.constant 0 : i32
    %c0_i32_1 = arith.constant 0 : i32
    return %c0_i32, %c0_i32_0 : i32, i32
  }
  func.func @transform_6(%arg0: i32) -> (i32, i32, i32) {
    %c0_i32 = arith.constant 0 : i32
    %c0_i32_0 = arith.constant 0 : i32
    %c0_i32_1 = arith.constant 0 : i32
    return %arg0, %c0_i32, %c0_i32_0 : i32, i32, i32
  }
}

module attributes {stable_mosaic.version = 11 : i64} {
  func.func @_conv_layer_kernel(%arg0: i32, %arg1: memref<1x1x38x256xbf16, #tpu.memory_space<vmem>>, %arg2: memref<9x256x1xbf16, #tpu.memory_space<vmem>>, %arg3: memref<1x1xf32, #tpu.memory_space<vmem>>, %arg4: memref<1x1xf32, #tpu.memory_space<vmem>>, %arg5: memref<1x1xf32, #tpu.memory_space<vmem>>, %arg6: memref<24x1xf32, #tpu.memory_space<vmem>>, %arg7: memref<1x24x1xf32, #tpu.memory_space<vmem>>) attributes {dimension_semantics = [#tpu.dimension_semantics<parallel>], iteration_bounds = array<i64: 2>, scalar_prefetch = 0 : i64, scratch_operands = 0 : i64, tpu.core_type = #tpu.core_type<tc>, window_params = [{transform_indices = @transform_0, window_bounds = array<i64: 1, 1, 38, 256>}, {pipeline_mode = #tpu.pipeline_mode<synchronous>, transform_indices = @transform_1, window_bounds = array<i64: 9, 256, 1>}, {pipeline_mode = #tpu.pipeline_mode<synchronous>, transform_indices = @transform_2, window_bounds = array<i64: 1, 1>}, {pipeline_mode = #tpu.pipeline_mode<synchronous>, transform_indices = @transform_3, window_bounds = array<i64: 1, 1>}, {pipeline_mode = #tpu.pipeline_mode<synchronous>, transform_indices = @transform_4, window_bounds = array<i64: 1, 1>}, {pipeline_mode = #tpu.pipeline_mode<synchronous>, transform_indices = @transform_5, window_bounds = array<i64: 24, 1>}, {transform_indices = @transform_6, window_bounds = array<i64: 1, 24, 1>}]} {
    %c0 = arith.constant 0 : index
    %c0_0 = arith.constant 0 : index
    %c0_1 = arith.constant 0 : index
    %c0_2 = arith.constant 0 : index
    %0 = vector.load %arg1[%c0, %c0_0, %c0_1, %c0_2] : memref<1x1x38x256xbf16, #tpu.memory_space<vmem>>, vector<1x1x24x256xbf16>
    %1 = vector.shape_cast %0 : vector<1x1x24x256xbf16> to vector<24x256xbf16>
    %c0_3 = arith.constant 0 : index
    %c0_4 = arith.constant 0 : index
    %c0_5 = arith.constant 0 : index
    %2 = vector.load %arg2[%c0_3, %c0_4, %c0_5] : memref<9x256x1xbf16, #tpu.memory_space<vmem>>, vector<1x256x1xbf16>
    %3 = vector.shape_cast %2 : vector<1x256x1xbf16> to vector<256x1xbf16>
    %cst = arith.constant dense<0.000000e+00> : vector<24x1xf32>
    %4 = tpu.matmul %1, %3, %cst {dimension_numbers = #tpu.dot_dimension_numbers<[1], [0], [0], [1], [0, 0, 1, 1], [], []>} : vector<24x256xbf16>, vector<256x1xbf16>, vector<24x1xf32> -> vector<24x1xf32>
    %c0_6 = arith.constant 0 : index
    %c0_7 = arith.constant 0 : index
    %c1 = arith.constant 1 : index
    %c0_8 = arith.constant 0 : index
    %5 = vector.load %arg1[%c0_6, %c0_7, %c1, %c0_8] : memref<1x1x38x256xbf16, #tpu.memory_space<vmem>>, vector<1x1x24x256xbf16>
    %6 = vector.shape_cast %5 : vector<1x1x24x256xbf16> to vector<24x256xbf16>
    %c1_9 = arith.constant 1 : index
    %c0_10 = arith.constant 0 : index
    %c0_11 = arith.constant 0 : index
    %7 = vector.load %arg2[%c1_9, %c0_10, %c0_11] : memref<9x256x1xbf16, #tpu.memory_space<vmem>>, vector<1x256x1xbf16>
    %8 = vector.shape_cast %7 : vector<1x256x1xbf16> to vector<256x1xbf16>
    %cst_12 = arith.constant dense<0.000000e+00> : vector<24x1xf32>
    %9 = tpu.matmul %6, %8, %cst_12 {dimension_numbers = #tpu.dot_dimension_numbers<[1], [0], [0], [1], [0, 0, 1, 1], [], []>} : vector<24x256xbf16>, vector<256x1xbf16>, vector<24x1xf32> -> vector<24x1xf32>
    %10 = arith.addf %4, %9 : vector<24x1xf32>
    %c0_13 = arith.constant 0 : index
    %c0_14 = arith.constant 0 : index
    %c2 = arith.constant 2 : index
    %c0_15 = arith.constant 0 : index
    %11 = vector.load %arg1[%c0_13, %c0_14, %c2, %c0_15] : memref<1x1x38x256xbf16, #tpu.memory_space<vmem>>, vector<1x1x24x256xbf16>
    %12 = vector.shape_cast %11 : vector<1x1x24x256xbf16> to vector<24x256xbf16>
    %c2_16 = arith.constant 2 : index
    %c0_17 = arith.constant 0 : index
    %c0_18 = arith.constant 0 : index
    %13 = vector.load %arg2[%c2_16, %c0_17, %c0_18] : memref<9x256x1xbf16, #tpu.memory_space<vmem>>, vector<1x256x1xbf16>
    %14 = vector.shape_cast %13 : vector<1x256x1xbf16> to vector<256x1xbf16>
    %cst_19 = arith.constant dense<0.000000e+00> : vector<24x1xf32>
    %15 = tpu.matmul %12, %14, %cst_19 {dimension_numbers = #tpu.dot_dimension_numbers<[1], [0], [0], [1], [0, 0, 1, 1], [], []>} : vector<24x256xbf16>, vector<256x1xbf16>, vector<24x1xf32> -> vector<24x1xf32>
    %16 = arith.addf %10, %15 : vector<24x1xf32>
    %c0_20 = arith.constant 0 : index
    %c0_21 = arith.constant 0 : index
    %c6 = arith.constant 6 : index
    %c0_22 = arith.constant 0 : index
    %17 = vector.load %arg1[%c0_20, %c0_21, %c6, %c0_22] : memref<1x1x38x256xbf16, #tpu.memory_space<vmem>>, vector<1x1x24x256xbf16>
    %18 = vector.shape_cast %17 : vector<1x1x24x256xbf16> to vector<24x256xbf16>
    %c3 = arith.constant 3 : index
    %c0_23 = arith.constant 0 : index
    %c0_24 = arith.constant 0 : index
    %19 = vector.load %arg2[%c3, %c0_23, %c0_24] : memref<9x256x1xbf16, #tpu.memory_space<vmem>>, vector<1x256x1xbf16>
    %20 = vector.shape_cast %19 : vector<1x256x1xbf16> to vector<256x1xbf16>
    %cst_25 = arith.constant dense<0.000000e+00> : vector<24x1xf32>
    %21 = tpu.matmul %18, %20, %cst_25 {dimension_numbers = #tpu.dot_dimension_numbers<[1], [0], [0], [1], [0, 0, 1, 1], [], []>} : vector<24x256xbf16>, vector<256x1xbf16>, vector<24x1xf32> -> vector<24x1xf32>
    %22 = arith.addf %16, %21 : vector<24x1xf32>
    %c0_26 = arith.constant 0 : index
    %c0_27 = arith.constant 0 : index
    %c7 = arith.constant 7 : index
    %c0_28 = arith.constant 0 : index
    %23 = vector.load %arg1[%c0_26, %c0_27, %c7, %c0_28] : memref<1x1x38x256xbf16, #tpu.memory_space<vmem>>, vector<1x1x24x256xbf16>
    %24 = vector.shape_cast %23 : vector<1x1x24x256xbf16> to vector<24x256xbf16>
    %c4 = arith.constant 4 : index
    %c0_29 = arith.constant 0 : index
    %c0_30 = arith.constant 0 : index
    %25 = vector.load %arg2[%c4, %c0_29, %c0_30] : memref<9x256x1xbf16, #tpu.memory_space<vmem>>, vector<1x256x1xbf16>
    %26 = vector.shape_cast %25 : vector<1x256x1xbf16> to vector<256x1xbf16>
    %cst_31 = arith.constant dense<0.000000e+00> : vector<24x1xf32>
    %27 = tpu.matmul %24, %26, %cst_31 {dimension_numbers = #tpu.dot_dimension_numbers<[1], [0], [0], [1], [0, 0, 1, 1], [], []>} : vector<24x256xbf16>, vector<256x1xbf16>, vector<24x1xf32> -> vector<24x1xf32>
    %28 = arith.addf %22, %27 : vector<24x1xf32>
    %c0_32 = arith.constant 0 : index
    %c0_33 = arith.constant 0 : index
    %c8 = arith.constant 8 : index
    %c0_34 = arith.constant 0 : index
    %29 = vector.load %arg1[%c0_32, %c0_33, %c8, %c0_34] : memref<1x1x38x256xbf16, #tpu.memory_space<vmem>>, vector<1x1x24x256xbf16>
    %30 = vector.shape_cast %29 : vector<1x1x24x256xbf16> to vector<24x256xbf16>
    %c5 = arith.constant 5 : index
    %c0_35 = arith.constant 0 : index
    %c0_36 = arith.constant 0 : index
    %31 = vector.load %arg2[%c5, %c0_35, %c0_36] : memref<9x256x1xbf16, #tpu.memory_space<vmem>>, vector<1x256x1xbf16>
    %32 = vector.shape_cast %31 : vector<1x256x1xbf16> to vector<256x1xbf16>
    %cst_37 = arith.constant dense<0.000000e+00> : vector<24x1xf32>
    %33 = tpu.matmul %30, %32, %cst_37 {dimension_numbers = #tpu.dot_dimension_numbers<[1], [0], [0], [1], [0, 0, 1, 1], [], []>} : vector<24x256xbf16>, vector<256x1xbf16>, vector<24x1xf32> -> vector<24x1xf32>
    %34 = arith.addf %28, %33 : vector<24x1xf32>
    %c0_38 = arith.constant 0 : index
    %c0_39 = arith.constant 0 : index
    %c12 = arith.constant 12 : index
    %c0_40 = arith.constant 0 : index
    %35 = vector.load %arg1[%c0_38, %c0_39, %c12, %c0_40] : memref<1x1x38x256xbf16, #tpu.memory_space<vmem>>, vector<1x1x24x256xbf16>
    %36 = vector.shape_cast %35 : vector<1x1x24x256xbf16> to vector<24x256xbf16>
    %c6_41 = arith.constant 6 : index
    %c0_42 = arith.constant 0 : index
    %c0_43 = arith.constant 0 : index
    %37 = vector.load %arg2[%c6_41, %c0_42, %c0_43] : memref<9x256x1xbf16, #tpu.memory_space<vmem>>, vector<1x256x1xbf16>
    %38 = vector.shape_cast %37 : vector<1x256x1xbf16> to vector<256x1xbf16>
    %cst_44 = arith.constant dense<0.000000e+00> : vector<24x1xf32>
    %39 = tpu.matmul %36, %38, %cst_44 {dimension_numbers = #tpu.dot_dimension_numbers<[1], [0], [0], [1], [0, 0, 1, 1], [], []>} : vector<24x256xbf16>, vector<256x1xbf16>, vector<24x1xf32> -> vector<24x1xf32>
    %40 = arith.addf %34, %39 : vector<24x1xf32>
    %c0_45 = arith.constant 0 : index
    %c0_46 = arith.constant 0 : index
    %c13 = arith.constant 13 : index
    %c0_47 = arith.constant 0 : index
    %41 = vector.load %arg1[%c0_45, %c0_46, %c13, %c0_47] : memref<1x1x38x256xbf16, #tpu.memory_space<vmem>>, vector<1x1x24x256xbf16>
    %42 = vector.shape_cast %41 : vector<1x1x24x256xbf16> to vector<24x256xbf16>
    %c7_48 = arith.constant 7 : index
    %c0_49 = arith.constant 0 : index
    %c0_50 = arith.constant 0 : index
    %43 = vector.load %arg2[%c7_48, %c0_49, %c0_50] : memref<9x256x1xbf16, #tpu.memory_space<vmem>>, vector<1x256x1xbf16>
    %44 = vector.shape_cast %43 : vector<1x256x1xbf16> to vector<256x1xbf16>
    %cst_51 = arith.constant dense<0.000000e+00> : vector<24x1xf32>
    %45 = tpu.matmul %42, %44, %cst_51 {dimension_numbers = #tpu.dot_dimension_numbers<[1], [0], [0], [1], [0, 0, 1, 1], [], []>} : vector<24x256xbf16>, vector<256x1xbf16>, vector<24x1xf32> -> vector<24x1xf32>
    %46 = arith.addf %40, %45 : vector<24x1xf32>
    %c0_52 = arith.constant 0 : index
    %c0_53 = arith.constant 0 : index
    %c14 = arith.constant 14 : index
    %c0_54 = arith.constant 0 : index
    %47 = vector.load %arg1[%c0_52, %c0_53, %c14, %c0_54] : memref<1x1x38x256xbf16, #tpu.memory_space<vmem>>, vector<1x1x24x256xbf16>
    %48 = vector.shape_cast %47 : vector<1x1x24x256xbf16> to vector<24x256xbf16>
    %c8_55 = arith.constant 8 : index
    %c0_56 = arith.constant 0 : index
    %c0_57 = arith.constant 0 : index
    %49 = vector.load %arg2[%c8_55, %c0_56, %c0_57] : memref<9x256x1xbf16, #tpu.memory_space<vmem>>, vector<1x256x1xbf16>
    %50 = vector.shape_cast %49 : vector<1x256x1xbf16> to vector<256x1xbf16>
    %cst_58 = arith.constant dense<0.000000e+00> : vector<24x1xf32>
    %51 = tpu.matmul %48, %50, %cst_58 {dimension_numbers = #tpu.dot_dimension_numbers<[1], [0], [0], [1], [0, 0, 1, 1], [], []>} : vector<24x256xbf16>, vector<256x1xbf16>, vector<24x1xf32> -> vector<24x1xf32>
    %52 = arith.addf %46, %51 : vector<24x1xf32>
    %c0_59 = arith.constant 0 : index
    %c0_60 = arith.constant 0 : index
    %53 = vector.load %arg3[%c0_59, %c0_60] : memref<1x1xf32, #tpu.memory_space<vmem>>, vector<1x1xf32>
    %54 = vector.broadcast %53 : vector<1x1xf32> to vector<24x1xf32>
    %55 = arith.addf %52, %54 : vector<24x1xf32>
    %c0_61 = arith.constant 0 : index
    %c0_62 = arith.constant 0 : index
    %c0_63 = arith.constant 0 : index
    %56 = vector.load %arg7[%c0_61, %c0_62, %c0_63] : memref<1x24x1xf32, #tpu.memory_space<vmem>>, vector<1x24x1xf32>
    %57 = vector.shape_cast %56 : vector<1x24x1xf32> to vector<24x1xf32>
    %58 = vector.shape_cast %55 : vector<24x1xf32> to vector<1x24x1xf32>
    tpu.vector_store %arg7[%c0_61, %c0_62, %c0_63], %58 {strides = array<i32>} : memref<1x24x1xf32, #tpu.memory_space<vmem>>, vector<1x24x1xf32>,
    return
  }
  func.func @transform_0(%arg0: i32) -> (i32, i32, i32, i32) {
    %c0_i32 = arith.constant 0 : i32
    %c0_i32_0 = arith.constant 0 : i32
    %c0_i32_1 = arith.constant 0 : i32
    %c0_i32_2 = arith.constant 0 : i32
    return %arg0, %c0_i32, %c0_i32_0, %c0_i32_1 : i32, i32, i32, i32
  }
  func.func @transform_1(%arg0: i32) -> (i32, i32, i32) {
    %c0_i32 = arith.constant 0 : i32
    %c0_i32_0 = arith.constant 0 : i32
    %c0_i32_1 = arith.constant 0 : i32
    %c0_i32_2 = arith.constant 0 : i32
    return %c0_i32, %c0_i32_0, %c0_i32_1 : i32, i32, i32
  }
  func.func @transform_2(%arg0: i32) -> (i32, i32) {
    %c0_i32 = arith.constant 0 : i32
    %c0_i32_0 = arith.constant 0 : i32
    %c0_i32_1 = arith.constant 0 : i32
    return %c0_i32, %c0_i32_0 : i32, i32
  }
  func.func @transform_3(%arg0: i32) -> (i32, i32) {
    %c0_i32 = arith.constant 0 : i32
    %c0_i32_0 = arith.constant 0 : i32
    %c0_i32_1 = arith.constant 0 : i32
    return %c0_i32, %c0_i32_0 : i32, i32
  }
  func.func @transform_4(%arg0: i32) -> (i32, i32) {
    %c0_i32 = arith.constant 0 : i32
    %c0_i32_0 = arith.constant 0 : i32
    %c0_i32_1 = arith.constant 0 : i32
    return %c0_i32, %c0_i32_0 : i32, i32
  }
  func.func @transform_5(%arg0: i32) -> (i32, i32) {
    %c0_i32 = arith.constant 0 : i32
    %c0_i32_0 = arith.constant 0 : i32
    %c0_i32_1 = arith.constant 0 : i32
    return %c0_i32, %c0_i32_0 : i32, i32
  }
  func.func @transform_6(%arg0: i32) -> (i32, i32, i32) {
    %c0_i32 = arith.constant 0 : i32
    %c0_i32_0 = arith.constant 0 : i32
    %c0_i32_1 = arith.constant 0 : i32
    return %arg0, %c0_i32, %c0_i32_0 : i32, i32, i32
  }
}

</mosaic_0001>

<bundles_post_ra>
// kernel: discriminator_forward.7
= control target key start
LH: loop header
LB: loop body
LE: loop exit
PB: predicated region body
PF: predicated region fallthrough
CT: control target
= control target key end

     0   :  { %11 = vsyncpa [#allocation3], 0  ;;  %s6753_s0 = inlined_call_operand.vmem [shape: bf16[2,1,326,3], index: 0, kind: input, shape index: {}]   ;;  %s6754_s1 = inlined_call_operand.hbm [shape: bf16[9,3,32], index: 1, kind: input, shape index: {}]   ;;  %s6755_s2 = inlined_call_operand.hbm [shape: f32[1,32], index: 2, kind: input, shape index: {}]   ;;  %s6756_s3 = inlined_call_operand.hbm [shape: f32[1,32], index: 3, kind: input, shape index: {}]   ;;  %s6757_s4 = inlined_call_operand.hbm [shape: f32[1,32], index: 4, kind: input, shape index: {}]   ;;  %s6758_s5 = inlined_call_operand.hbm [shape: f32[288,1], index: 5, kind: input, shape index: {}]   ;;  %s6759_s6 = inlined_call_operand.vmem [shape: bf16[2,288,32], index: 6, kind: output, shape index: {}]  }
   0x1   :  { %12 = vsyncpa [#allocation5], 0 }
   0x2   :  { %13 = vsyncpa [#allocation8], 0  ;;  %s5670_s21 = smov 0  }
   0x3 LB: > { %s5625_s22 = smov [#allocation4]   ;;  %s5676_s24 = sadd.s32 4294967295, %s5623_s21   ;;  %s5623_s21 = sphi %s5670_s21, %s19_s21  }
   0x4   : > { %s207_s23 = sshll.u32 %s5625_s22, 4  ;;  %p4210_p0 = scmp.ge.s32.totalorder %s5623_s21, 1  ;;  %s5681_s23 = int_to_ptr.vmem [resolvable:$true] %s207_s23 }
   0x5   : > { %p181_p1 = scmp.lt.s32.totalorder %s5623_s21, 3  ;;  %p6760_p2 = scmp.eq.s32.totalorder %s5676_s24, 0 }
   0x6   : > { %s5626_s26 = smov [#allocation7]   ;;  %s5627_s28 = smov [#allocation2]  }
   0x7   : > { %p5683_p3 = pnand %p4210_p0, %p181_p1  ;;  %s229_s27 = sshll.u32 %s5626_s26, 4  ;;  %s5689_s27 = int_to_ptr.vmem [resolvable:$true] %s229_s27 }
   0x8   : > { %s193_s29 = sshll.u32 %s5627_s28, 4  ;;  %s5628_s7 = smov [#allocation6]   ;;  %s5697_s29 = int_to_ptr.vmem [resolvable:$true] %s193_s29 }
   0x9   : > { %s6762_s25 = scalar_select %p5683_p3, 1, 0 }
   0xa   : > { %p5349_p4 = pneg %p5683_p3  ;;  %s5699_s8 = sshll.u32 %s5628_s7, 4  ;;  %s219_s8 = int_to_ptr.vmem [resolvable:$true] %s5699_s8 }
   0xb   : > { %s5465_s11 = scalar_lea.hbm %s6755_s2, 16 }
   0xc   : > { %p5693_p5 = pnand %p6760_p2, %p5349_p4  ;;  %p5466_p6 = scmp.ne.s32.totalorder %s6755_s2, %s5465_s11 }
   0xd   : > { %p5472_p10 = scmp.lt.u32.totalorder %s5465_s11, %s6755_s2 }
   0xe   : > { %p5709_p7 = pneg %p5693_p5 }
  0x10   : > { %p5468_p8 = pnand %p5709_p7, %p5466_p6 }
  0x12   : > { %p5469_p9 = pneg %p5468_p8 }
  0x14   : > { %p5474_p11 = pnand %p5472_p10, %p5469_p9 }
  0x16   : > { %5477 = shalt.err (!%p5474_p11)
}
  0x17   : > { %s5478_s17 = scalar_lea.vmem %s5681_s23, 16  ;;  %s5485_s18 = scalar_lea.vmem %s5681_s23, 32 }
  0x18   : > { %p5479_p12 = scmp.ne.s32.totalorder %s5681_s23, %s5478_s17  ;;  %p5486_p1 = scmp.lt.s32.totalorder %s5681_s23, %s5681_s23 }
  0x19   : > { %p5487_p4 = scmp.lt.s32.totalorder %s5485_s18, %s5478_s17 }
  0x1a   : > { %p5481_p13 = pnand %p5479_p12, %p5709_p7 }
  0x1b   : > { %p5488_p6 = por %p5487_p4, %p5486_p1 }
  0x1c   : > { %p5482_p0 = pneg %p5481_p13 }
  0x1e   : > { %p5489_p8 = pnand %p5488_p6, %p5482_p0 }
  0x20   : > { %5492 = shalt.err (!%p5489_p8)
}
  0x21   : > { %5355 = dma.hbm_to_vmem [thread:$0]  (!%p5693_p5), %s6755_s2, 16, %s5681_s23, [#allocation5]  }
  0x22   : > { %s5493_s28 = scalar_lea.hbm %s6757_s4, 16 }
  0x23   : > { %p5494_p9 = scmp.ne.s32.totalorder %s6757_s4, %s5493_s28  ;;  %p5500_p12 = scmp.lt.u32.totalorder %s5493_s28, %s6757_s4 }
  0x25   : > { %p5496_p10 = pnand %p5494_p9, %p5709_p7 }
  0x27   : > { %p5497_p11 = pneg %p5496_p10 }
  0x29   : > { %p5502_p13 = pnand %p5500_p12, %p5497_p11 }
  0x2b   : > { %5505 = shalt.err (!%p5502_p13)
}
  0x2c   : > { %s5506_s23 = scalar_lea.vmem %s5689_s27, 16  ;;  %s5513_s12 = scalar_lea.vmem %s5689_s27, 32 }
  0x2d   : > { %p5507_p0 = scmp.ne.s32.totalorder %s5689_s27, %s5506_s23  ;;  %p5514_p6 = scmp.lt.s32.totalorder %s5689_s27, %s5689_s27 }
  0x2e   : > { %p5515_p8 = scmp.lt.s32.totalorder %s5513_s12, %s5506_s23 }
  0x2f   : > { %p5509_p1 = pnand %p5507_p0, %p5709_p7 }
  0x30   : > { %p5516_p9 = por %p5515_p8, %p5514_p6 }
  0x31   : > { %p5510_p4 = pneg %p5509_p1 }
  0x33   : > { %p5517_p10 = pnand %p5516_p9, %p5510_p4 }
  0x35   : > { %5520 = shalt.err (!%p5517_p10)
}
  0x36   : > { %5361 = dma.hbm_to_vmem [thread:$0]  (!%p5693_p5), %s6757_s4, 16, %s5689_s27, [#allocation8]  }
  0x37   : > { %s5521_s18 = scalar_lea.hbm %s6754_s1, 288 }
  0x38   : > { %p5522_p11 = scmp.ne.s32.totalorder %s6754_s1, %s5521_s18  ;;  %p5528_p0 = scmp.lt.u32.totalorder %s5521_s18, %s6754_s1 }
  0x3a   : > { %p5524_p12 = pnand %p5522_p11, %p5709_p7 }
  0x3c   : > { %p5525_p13 = pneg %p5524_p12 }
  0x3e   : > { %p5530_p1 = pnand %p5528_p0, %p5525_p13 }
  0x40   : > { %5533 = shalt.err (!%p5530_p1)
}
  0x41   : > { %s5534_s27 = scalar_lea.vmem %s5697_s29, 288  ;;  %p5542_p9 = scmp.lt.s32.totalorder %s5697_s29, %s5697_s29 }
  0x42   : > { %p5535_p4 = scmp.ne.s32.totalorder %s5697_s29, %s5534_s27  ;;  %p5543_p10 = scmp.lt.s32.totalorder %s5534_s27, %s5534_s27 }
  0x44   : > { %p5537_p6 = pnand %p5535_p4, %p5709_p7  ;;  %p5544_p11 = por %p5543_p10, %p5542_p9 }
  0x46   : > { %p5538_p8 = pneg %p5537_p6 }
  0x48   : > { %p5545_p12 = pnand %p5544_p11, %p5538_p8 }
  0x4a   : > { %5548 = shalt.err (!%p5545_p12)
}
  0x4b   : > { %s5629_s28 = smov 32   ;;  %s5630_s7 = smov 2  }
  0x4c   : > { %5352 = dma.hbm_to_vmem [thread:$0]  (!%p5693_p5), %s6754_s1, 288, %s5697_s29, [#allocation3], %s5629_s28, %s5629_s28, %s5630_s7  }
  0x4d   : > { %s5549_s12 = scalar_lea.hbm %s6756_s3, 16 }
  0x4e   : > { %p5550_p13 = scmp.ne.s32.totalorder %s6756_s3, %s5549_s12  ;;  %p5556_p4 = scmp.lt.u32.totalorder %s5549_s12, %s6756_s3 }
  0x50   : > { %p5552_p0 = pnand %p5550_p13, %p5709_p7 }
  0x52   : > { %p5553_p1 = pneg %p5552_p0 }
  0x54   : > { %p5558_p6 = pnand %p5556_p4, %p5553_p1 }
  0x56   : > { %5561 = shalt.err (!%p5558_p6)
}
  0x57   : > { %s5562_s18 = scalar_lea.vmem %s219_s8, 16  ;;  %s5569_s29 = scalar_lea.vmem %s219_s8, 32 }
  0x58   : > { %p5563_p8 = scmp.ne.s32.totalorder %s219_s8, %s5562_s18  ;;  %p5570_p11 = scmp.lt.s32.totalorder %s219_s8, %s219_s8 }
  0x59   : > { %p5571_p12 = scmp.lt.s32.totalorder %s5569_s29, %s5562_s18 }
  0x5a   : > { %p5565_p9 = pnand %p5563_p8, %p5709_p7 }
  0x5b   : > { %p5572_p2 = por %p5571_p12, %p5570_p11 }
  0x5c   : > { %p5566_p10 = pneg %p5565_p9 }
  0x5e   : > { %p5573_p3 = pnand %p5572_p2, %p5566_p10 }
  0x60   : > { %5576 = shalt.err (!%p5573_p3)
}
  0x61   : > { %5358 = dma.hbm_to_vmem [thread:$0]  (!%p5693_p5), %s6756_s3, 16, %s219_s8, [#allocation5]  }
  0x62   : > { %s5631_s22 = smov [#allocation9]   ;;  %s5577_s7 = scalar_lea.hbm %s6758_s5, 4608 }
  0x63   : > { %s239_s26 = sshll.u32 %s5631_s22, 4  ;;  %p5578_p13 = scmp.ne.s32.totalorder %s6758_s5, %s5577_s7  ;;  %s240_s26 = int_to_ptr.vmem [resolvable:$true] %s239_s26 }
  0x64   : > { %p5584_p0 = scmp.lt.u32.totalorder %s5577_s7, %s6758_s5 }
  0x65   : > { %p5580_p2 = pnand %p5578_p13, %p5709_p7 }
  0x67   : > { %p5581_p3 = pneg %p5580_p2 }
  0x69   : > { %p5586_p1 = pnand %p5584_p0, %p5581_p3 }
  0x6b   : > { %5589 = shalt.err (!%p5586_p1)
}
  0x6c   : > { %s5590_s8 = scalar_lea.vmem %s240_s26, 4608  ;;  %p5598_p9 = scmp.lt.s32.totalorder %s240_s26, %s240_s26 }
  0x6d   : > { %p5591_p4 = scmp.ne.s32.totalorder %s240_s26, %s5590_s8  ;;  %p5599_p10 = scmp.lt.s32.totalorder %s5590_s8, %s5590_s8 }
  0x6f   : > { %p5593_p6 = pnand %p5591_p4, %p5709_p7  ;;  %p5600_p11 = por %p5599_p10, %p5598_p9 }
  0x71   : > { %p5594_p8 = pneg %p5593_p6 }
  0x73   : > { %p5601_p12 = pnand %p5600_p11, %p5594_p8 }
  0x75   : > { %5604 = shalt.err (!%p5601_p12)
}
  0x76   : > { %s5632_s12 = smov 128   ;;  %s5633_s13 = smov 8  }
  0x77   : > { %5364 = dma.hbm_to_vmem [thread:$0]  (!%p5693_p5), %s6758_s5, 4608, %s240_s26, [#allocation8], %s5632_s12, %s5632_s12, %s5633_s13  }
  0x78   : > { %p6765_p13 = scmp.ne.s32.totalorder %s6762_s25, 0 }
  0x79   : > { %p6766_p2 = scmp.eq.s32.totalorder (!%p6765_p13), %s5676_s24, 0 }
  0x7a   : > { %263 = sbr.rel (%p6765_p13) target bundleno = 701 (0x2bd), region = 44 }
  0x81   : > { %5610 = dma.done.wait (%p6766_p2), [#allocation3], 288   ;;  %p6767_p7 = pmov %p6766_p2 }
  0x82   : > { %p6768_p3 = pmov %p6766_p2 }
  0x83   : > { %5612 = vsyncadd (%p6767_p7), [#allocation3], 4294967008 }
  0x84   : > { %5614 = dma.done.wait (%p6768_p3), [#allocation5], 32   ;;  %p6769_p0 = pmov %p6766_p2 }
  0x86   : > { %5616 = vsyncadd (%p6769_p0), [#allocation5], 4294967264  ;;  %p6770_p1 = pmov %p6769_p0 }
  0x87   : > { %p6771_p5 = pmov %p6769_p0 }
  0x88   : > { %5618 = dma.done.wait (%p6770_p1), [#allocation8], 4624  }
  0x89   : > { %5620 = vsyncadd (%p6771_p5), [#allocation8], 4294962672  ;;  %vm657_vm0 = vcmask 1040384   ;;  %p309_p4 = scmp.lt.s32.totalorder %s5676_s24, 1  ;;  %vm658_vm1 = vcmask 1041408   ;;  %v5634_v0 = vmov 65535  }
  0x8a   : > { %v659_v1 = vsel %vm657_vm0, 4294967295, %v5634_v0  ;;  %vm453_vm2 = vsmask.f32 7424  ;;  %v1812_v3 = vld [vmem:[#allocation2 + $0x8] sm:$0x3]  ;;  %vm602_vm4 = vcmask 23552  }
  0x8b   : > { %s6773_s24 = smov (!%p309_p4, %s5676_s24), 1  ;;  %v5834_v2 = vsel %vm658_vm1, %v659_v1, 0  ;;  %v359_v4 = vld [vmem:[#allocation2 + $0x2] sm:$0x3]  ;;  %vm1816_vm3 = vsmask.f32 6400 }
  0x8c   : > { %s5327_s25 = smul.u32 164, %s6773_s24  ;;  %v5843_v6 = vand.u32 %v1812_v3, %v5834_v2  ;;  %v662_v7 = vand.u32 %v5834_v2, %v359_v4  ;;  %v2259_v19 = vld [vmem:[#allocation2 + $0xa] sm:$0x3]  ;;  %v356_v46 = vld [vmem:[#allocation2] sm:$0x3]  ;;  %vm2263_vm5 = vcmask 1045504  }
  0x8d   : > { %v2356_v26 = vand.u32 %v2259_v19, %v5834_v2  ;;  %v878_v50 = vand.u32 %v5834_v2, %v356_v46  ;;  %vm1063_vm6 = vcmask 1046528   ;;  %vm3016_vm7 = vsmask.f32 5376  ;;  %s5328_s18 = smul.u32 144, %s6773_s24 }
  0x8e   : > { %s5839_s17 = scalar_lea.vmem %s6753_s0, %s5327_s25  ;;  %4847 = vmatprep.subr.bf16.mxu0 %v5843_v6  ;;  %4695 = vmatprep.subr.bf16.mxu1 %v662_v7  ;;  %vm3463_vm8 = vcmask 1044480   ;;  %vm4066_vm11 = vcmask 257024  }
  0x8f   : > { %v320_v5 = vld [vmem:[%s5839_s17] sm:$0xf]  ;;  %v5847_v8 = vld [vmem:[%s5839_s17 + $0x4] sm:$0xf]  ;;  %v5853_v10 = vld [vmem:[%s5839_s17 + $0x8] sm:$0xff]   ;;  %4848 = vmatpush3.bf16.msra.mxu0 %v5843_v6  ;;  %4696 = vmatpush3.bf16.msra.mxu1 %v662_v7  ;;  %s6632_s20 = scalar_lea.vmem %s6759_s6, %s5328_s18 }
  0x90   : > { %v5850_v9 = vcombine.low %v320_v5, %v5847_v8  ;;  %v1371_v11 = vld [vmem:[%s5839_s17 + $0x8] sm:$0xe]  ;;  %v5857_v12 = vld [vmem:[%s5839_s17 + $0xc] sm:$0xf]  ;;  %v5864_v14 = vld [vmem:[%s5839_s17 + $0x10] sm:$0xff]   ;;  %v462_v17 = vshll.u32 %v5853_v10, 16  ;;  %4885 = vmatprep.subr.bf16.mxu0 %v2356_v26  ;;  %4733 = vmatprep.subr.bf16.mxu1 %v878_v50 }
  0x91   : > { %v5861_v13 = vcombine.low %v1371_v11, %v5857_v12  ;;  %v466_v18 = vshrl.u32 %v5853_v10, 16  ;;  %v1826_v22 = vshrl.u32 %v5864_v14, 16  ;;  %v1829_v23 = vshll.u32 %v5864_v14, 16  ;;  %v5877_v27 = vld [vmem:[%s5839_s17 + $0x10] sm:$0xff]   ;;  %v5880_v28 = vld [vmem:[%s5839_s17 + $0x18] sm:$0xff]   ;;  %v5890_v42 = vld [vmem:[%s5839_s17 + $0x20] sm:$0xff]  }
  0x92   : > { %v455_v15 = vshrl.u32 %v5850_v9, 16  ;;  %v457_v16 = vshll.u32 %v5850_v9, 16  ;;  %v464_v25 = vrot.slane %v462_v17, 1  ;;  %v470_v35 = vshll.u32 %v5877_v27, 16  ;;  %v5886_v40 = vld [vmem:[%s5839_s17 + $0x18] sm:$0xff]   ;;  %v5902_v55 = vld [vmem:[%s5839_s17 + $0x20] sm:$0xff]  }
  0x93   : > { %v1818_v20 = vshrl.u32 %v5861_v13, 16  ;;  %v1821_v21 = vshll.u32 %v5861_v13, 16  ;;  %v1828_v31 = vrot.slane %v1826_v22, 1  ;;  %v1831_v32 = vrot.slane %v1829_v23, 2  ;;  %v5905_v56 = vld [vmem:[%s5839_s17 + $0x28] sm:$0xff]   ;;  %v5921_v17 = vld [vmem:[%s5839_s17 + $0x30] sm:$0xff]  }
  0x94   : > { %v459_v24 = vrot.slane %v457_v16, 1  ;;  %v468_v34 = vor.u32 %v466_v18, %v464_v25  ;;  %v1835_v36 = vshrl.u32 %v5880_v28, 16  ;;  %v1838_v39 = vshll.u32 %v5880_v28, 16  ;;  %v5915_v5 = vld [vmem:[%s5839_s17 + $0x28] sm:$0xff]  }
  0x95   : > { %v1820_v29 = vrot.slane %v1818_v20, 1  ;;  %v1823_v30 = vrot.slane %v1821_v21, 2  ;;  %v1832_v38 = vor.u32 %v1831_v32, %v1828_v31  ;;  %v474_v41 = vshrl.u32 %v5877_v27, 16  ;;  %v5934_v31 = vld [vmem:[%s5839_s17 + $0x38] sm:$0xff]  }
  0x96   : > { %v460_v33 = vor.u32 %v459_v24, %v455_v15  ;;  %v472_v44 = vrot.slane %v470_v35, 1  ;;  %v1837_v45 = vrot.slane %v1835_v36, 1  ;;  %v1840_v48 = vrot.slane %v1838_v39, 2  ;;  %v5928_v24 = vld [vmem:[%s5839_s17 + $0x30] sm:$0xff]  }
  0x97   : > { %v1824_v37 = vor.u32 %v1823_v30, %v1820_v29  ;;  %v478_v49 = vshll.u32 %v5886_v40, 16  ;;  %v1844_v53 = vshrl.u32 %v5890_v42, 16  ;;  %v1847_v54 = vshll.u32 %v5890_v42, 16 }
  0x98   : > { %v465_v43 = vsel %vm453_vm2, %v460_v33, %v464_v25  ;;  %v473_v51 = vsel %vm453_vm2, %v468_v34, %v472_v44  ;;  %v476_v52 = vor.u32 %v474_v41, %v472_v44  ;;  %v1841_v57 = vor.u32 %v1840_v48, %v1837_v45  ;;  %v5938_v34 = vld [vmem:[%s5839_s17 + $0x38] sm:$0xff]   ;;  %v5945_v41 = vld [vmem:[%s5839_s17 + $0x40] sm:$0xff]  }
  0x99   : > { %4697 = vmatprep.mubr.msk.bf16.mxu1 %vm602_vm4, %v465_v43  ;;  %v1833_v47 = vsel %vm1816_vm3, %v1824_v37, %v1832_v38  ;;  %v480_v58 = vrot.slane %v478_v49, 1  ;;  %v482_v59 = vshrl.u32 %v5886_v40, 16  ;;  %v1846_v60 = vrot.slane %v1844_v53, 1 }
  0x9a   : > { %4849 = vmatprep.mubr.msk.bf16.mxu0 %vm602_vm4, %v1833_v47  ;;  %4698 = vmatmul.mubr.msk.bf16.vlgmr.msra.gmra.mrb[0].mxu1 %vm602_vm4, %v473_v51  ;;  %v1849_v61 = vrot.slane %v1847_v54, 2  ;;  %v486_v62 = vshll.u32 %v5902_v55, 16  ;;  %v1853_v63 = vshrl.u32 %v5905_v56, 16  ;;  %v1842_v0 = vsel %vm1816_vm3, %v1832_v38, %v1841_v57 }
  0x9b   : > { %4734 = vmatpush3.bf16.msra.mxu1 %v878_v50  ;;  %v481_v1 = vsel %vm453_vm2, %v476_v52, %v480_v58  ;;  %v484_v3 = vor.u32 %v482_v59, %v480_v58  ;;  %v1856_v4 = vshll.u32 %v5905_v56, 16  ;;  %4850 = vmatmul.mubr.msk.bf16.vlgmr.msra.gmra.mrb[0].mxu0 %vm602_vm4, %v1842_v0  ;;  %v490_v16 = vshrl.u32 %v5902_v55, 16  ;;  %v5954_v50 = vld [vmem:[%s5839_s17 + $0x40] sm:$0xff]  }
  0x9c   : > { %4701 = vmatprep.mubr.msk.bf16.mxu1 %vm602_vm4, %v481_v1  ;;  %v1850_v7 = vor.u32 %v1849_v61, %v1846_v60  ;;  %v488_v11 = vrot.slane %v486_v62, 1  ;;  %v1855_v15 = vrot.slane %v1853_v63, 1  ;;  %4886 = vmatpush3.bf16.msra.mxu0 %v2356_v26  ;;  %v494_v19 = vshll.u32 %v5915_v5, 16  ;;  %v5959_v60 = vld [vmem:[%s5839_s17 + $0x48] sm:$0xff]  }
  0x9d   : > { %v1858_v18 = vrot.slane %v1856_v4, 2  ;;  %v1862_v23 = vshrl.u32 %v5921_v17, 16  ;;  %v1865_v26 = vshll.u32 %v5921_v17, 16  ;;  %v498_v30 = vshrl.u32 %v5915_v5, 16  ;;  %v5966_v1 = vld [vmem:[%s5839_s17 + $0x48] sm:$0xff]  }
  0x9e   : > { %v1851_v20 = vsel %vm1816_vm3, %v1841_v57, %v1850_v7  ;;  %v489_v21 = vsel %vm453_vm2, %v484_v3, %v488_v11  ;;  %v492_v22 = vor.u32 %v490_v16, %v488_v11  ;;  %v496_v29 = vrot.slane %v494_v19, 1  ;;  %v5969_v3 = vld [vmem:[%s5839_s17 + $0x50] sm:$0xff]  }
  0x9f   : > { %4853 = vmatprep.mubr.msk.bf16.mxu0 %vm602_vm4, %v1851_v20  ;;  %v1859_v25 = vor.u32 %v1858_v18, %v1855_v15  ;;  %v1864_v32 = vrot.slane %v1862_v23, 1  ;;  %v502_v33 = vshll.u32 %v5928_v24, 16  ;;  %v506_v35 = vshrl.u32 %v5928_v24, 16  ;;  %v5977_v20 = vld [vmem:[%s5839_s17 + $0x50] sm:$0xff]  }
  0xa0   : > { %v497_v37 = vsel %vm453_vm2, %v492_v22, %v496_v29  ;;  %v1867_v38 = vrot.slane %v1865_v26, 2  ;;  %v500_v39 = vor.u32 %v498_v30, %v496_v29  ;;  %v1871_v44 = vshrl.u32 %v5934_v31, 16  ;;  %v5984_v29 = vld [vmem:[%s5839_s17 + $0x58] sm:$0xff]  }
  0xa1   : > { %v1860_v36 = vsel %vm1816_vm3, %v1850_v7, %v1859_v25  ;;  %v504_v43 = vrot.slane %v502_v33, 1  ;;  %v1874_v45 = vshll.u32 %v5934_v31, 16  ;;  %v510_v46 = vshll.u32 %v5938_v34, 16 }
  0xa2   : > { %4702 = vmatmul.mubr.msk.bf16.gmra.mrb[4].mxu1 %vm602_vm4, %v489_v21  ;;  %v1868_v47 = vor.u32 %v1867_v38, %v1864_v32  ;;  %v1880_v48 = vshrl.u32 %v5945_v41, 16  ;;  %v1883_v49 = vshll.u32 %v5945_v41, 16  ;;  %v1873_v51 = vrot.slane %v1871_v44, 1  ;;  %v5989_v38 = vld [vmem:[%s5839_s17 + $0x58] sm:$0xff]  }
  0xa3   : > { %4705 = vmatprep.mubr.msk.bf16.mxu1 %vm602_vm4, %v497_v37  ;;  %4854 = vmatmul.mubr.msk.bf16.gmra.mrb[4].mxu0 %vm602_vm4, %v1860_v36  ;;  %v1876_v52 = vrot.slane %v1874_v45, 2  ;;  %v508_v53 = vor.u32 %v506_v35, %v504_v43  ;;  %v512_v57 = vrot.slane %v510_v46, 1  ;;  %v505_v61 = vsel %vm453_vm2, %v500_v39, %v504_v43  ;;  %v2609_v46 = vld [vmem:[#allocation2 + $0xc] sm:$0x3] }
  0xa4   : > { %v1869_v54 = vsel %vm1816_vm3, %v1859_v25, %v1868_v47  ;;  %v1882_v58 = vrot.slane %v1880_v48, 1  ;;  %v1885_v59 = vrot.slane %v1883_v49, 2  ;;  %v514_v63 = vshrl.u32 %v5938_v34, 16 }
  0xa5   : > { %4857 = vmatprep.mubr.msk.bf16.mxu0 %vm602_vm4, %v1869_v54  ;;  %v1877_v62 = vor.u32 %v1876_v52, %v1873_v51  ;;  %v518_v0 = vshll.u32 %v5954_v50, 16  ;;  %v513_v4 = vsel %vm453_vm2, %v508_v53, %v512_v57  ;;  %v1889_v11 = vshrl.u32 %v5959_v60, 16  ;;  %v2257_v51 = vld [vmem:[%s5839_s17 + $0x8] sm:$0xc] }
  0xa6   : > { %v1886_v7 = vor.u32 %v1885_v59, %v1882_v58  ;;  %v522_v15 = vshrl.u32 %v5954_v50, 16  ;;  %v1892_v18 = vshll.u32 %v5959_v60, 16  ;;  %v526_v19 = vshll.u32 %v5966_v1, 16 }
  0xa7   : > { %v520_v16 = vrot.slane %v518_v0, 1  ;;  %v1878_v21 = vsel %vm1816_vm3, %v1868_v47, %v1877_v62  ;;  %v1891_v22 = vrot.slane %v1889_v11, 1  ;;  %v1898_v23 = vshrl.u32 %v5969_v3, 16 }
  0xa8   : > { %v1901_v25 = vshll.u32 %v5969_v3, 16  ;;  %v1887_v26 = vsel %vm1816_vm3, %v1877_v62, %v1886_v7  ;;  %v516_v30 = vor.u32 %v514_v63, %v512_v57  ;;  %v1894_v32 = vrot.slane %v1892_v18, 2  ;;  %v6008_v63 = vld [vmem:[%s5839_s17 + $0x60] sm:$0xff]   ;;  %v6015_v18 = vld [vmem:[%s5839_s17 + $0x68] sm:$0xff]  }
  0xa9   : > { %v524_v33 = vor.u32 %v522_v15, %v520_v16  ;;  %v528_v35 = vrot.slane %v526_v19, 1  ;;  %v1900_v36 = vrot.slane %v1898_v23, 1  ;;  %v534_v39 = vshll.u32 %v5977_v20, 16 }
  0xaa   : > { %4706 = vmatmul.mubr.msk.bf16.gmra.mrb[8].mxu1 %vm602_vm4, %v505_v61  ;;  %v1903_v37 = vrot.slane %v1901_v25, 2  ;;  %v1895_v43 = vor.u32 %v1894_v32, %v1891_v22  ;;  %v1907_v44 = vshrl.u32 %v5984_v29, 16  ;;  %v1910_v45 = vshll.u32 %v5984_v29, 16 }
  0xab   : > { %4709 = vmatprep.mubr.msk.bf16.mxu1 %vm602_vm4, %v513_v4  ;;  %4858 = vmatmul.mubr.msk.bf16.gmra.mrb[8].mxu0 %vm602_vm4, %v1878_v21  ;;  %v521_v47 = vsel %vm453_vm2, %v516_v30, %v520_v16  ;;  %v530_v49 = vshrl.u32 %v5966_v1, 16  ;;  %v529_v52 = vsel %vm453_vm2, %v524_v33, %v528_v35  ;;  %v538_v53 = vshrl.u32 %v5977_v20, 16 }
  0xac   : > { %4861 = vmatprep.mubr.msk.bf16.mxu0 %vm602_vm4, %v1887_v26  ;;  %v1904_v48 = vor.u32 %v1903_v37, %v1900_v36  ;;  %v542_v54 = vshll.u32 %v5989_v38, 16  ;;  %v6003_v57 = vand.u32 %v2609_v46, %v5834_v2  ;;  %v1896_v58 = vsel %vm1816_vm3, %v1886_v7, %v1895_v43  ;;  %v6037_v37 = vld [vmem:[%s5839_s17 + $0x78] sm:$0xff]  }
  0xad   : > { %v536_v59 = vrot.slane %v534_v39, 1  ;;  %v1909_v61 = vrot.slane %v1907_v44, 1  ;;  %v1912_v62 = vrot.slane %v1910_v45, 2  ;;  %v532_v4 = vor.u32 %v530_v49, %v528_v35  ;;  %v6032_v35 = vld [vmem:[%s5839_s17 + $0x70] sm:$0xff]   ;;  %v1059_v44 = vld [vmem:[#allocation2 + $0x4] sm:$0x3] }
  0xae   : > { %v1905_v0 = vsel %vm1816_vm3, %v1895_v43, %v1904_v48  ;;  %v4355_v11 = vcombine.low %v2257_v51, %v5857_v12  ;;  %4923 = vmatprep.subr.bf16.mxu0 %v6003_v57  ;;  %v544_v16 = vrot.slane %v542_v54, 1  ;;  %v550_v19 = vshll.u32 %v6008_v63, 16 }
  0xaf   : > { %v540_v15 = vor.u32 %v538_v53, %v536_v59  ;;  %v6019_v7 = vor.u32 %v1912_v62, %v1909_v61  ;;  %v537_v21 = vsel %vm453_vm2, %v532_v4, %v536_v59  ;;  %v2265_v12 = vrot.slane %v5864_v14, 2 }
  0xb0   : > { %v2264_v22 = vrot.slane %v4355_v11, 2  ;;  %v546_v23 = vshrl.u32 %v5989_v38, 16  ;;  %v554_v26 = vshrl.u32 %v6008_v63, 16  ;;  %v558_v30 = vshll.u32 %v6015_v18, 16  ;;  %v3012_v11 = vld [vmem:[#allocation2 + $0xe] sm:$0x3] }
  0xb1   : > { %v545_v25 = vsel %vm453_vm2, %v540_v15, %v544_v16  ;;  %v1914_v32 = vsel %vm1816_vm3, %v1904_v48, %v6019_v7  ;;  %v552_v33 = vrot.slane %v550_v19, 1  ;;  %v2267_v45 = vrot.slane %v5880_v28, 2 }
  0xb2   : > { %4710 = vmatmul.mubr.msk.bf16.gmra.mrb[12].mxu1 %vm602_vm4, %v521_v47  ;;  %v2266_v14 = vsel %vm2263_vm5, %v2264_v22, %v2265_v12  ;;  %v548_v36 = vor.u32 %v546_v23, %v544_v16  ;;  %v560_v43 = vrot.slane %v558_v30, 1  ;;  %v2269_v46 = vrot.slane %v5890_v42, 2 }
  0xb3   : > { %4713 = vmatprep.mubr.msk.bf16.mxu1 %vm602_vm4, %v529_v52  ;;  %4862 = vmatmul.mubr.msk.bf16.gmra.mrb[12].mxu0 %vm602_vm4, %v1896_v58  ;;  %v556_v39 = vor.u32 %v554_v26, %v552_v33  ;;  %v566_v47 = vshll.u32 %v6032_v35, 16  ;;  %v562_v49 = vshrl.u32 %v6015_v18, 16  ;;  %v574_v51 = vshll.u32 %v6037_v37, 16  ;;  %v6056_v58 = vld [vmem:[%s5839_s17 + $0x80] sm:$0xff]  }
  0xb4   : > { %4865 = vmatprep.mubr.msk.bf16.mxu0 %vm602_vm4, %v1905_v0  ;;  %v553_v48 = vsel %vm453_vm2, %v548_v36, %v552_v33  ;;  %v6048_v52 = vand.u32 %v1059_v44, %v5834_v2  ;;  %v570_v54 = vshrl.u32 %v6032_v35, 16  ;;  %v2268_v28 = vsel %vm2263_vm5, %v2265_v12, %v2267_v45  ;;  %v6061_v0 = vld [vmem:[%s5839_s17 + $0x88] sm:$0xff]   ;;  %v6079_v26 = vld [vmem:[%s5839_s17 + $0x90] ss:$0 sps:$4 sm:$0x11]  }
  0xb5   : > { %v561_v53 = vsel %vm453_vm2, %v556_v39, %v560_v43  ;;  %v568_v42 = vrot.slane %v566_v47, 1  ;;  %v2270_v59 = vsel %vm2263_vm5, %v2267_v45, %v2269_v46  ;;  %v564_v61 = vor.u32 %v562_v49, %v560_v43 }
  0xb6   : > { %4771 = vmatprep.subr.bf16.mxu1 %v6048_v52  ;;  %v576_v62 = vrot.slane %v574_v51, 1  ;;  %v6065_v15 = vand.u32 %v3012_v11, %v5834_v2  ;;  %v2271_v16 = vrot.slane %v5905_v56, 2  ;;  %v582_v19 = vshll.u32 %v6056_v58, 16 }
  0xb7   : > { %v572_v4 = vor.u32 %v570_v54, %v568_v42  ;;  %v2273_v22 = vrot.slane %v5921_v17, 2  ;;  %v578_v12 = vshrl.u32 %v6037_v37, 16  ;;  %v2275_v36 = vrot.slane %v5934_v31, 2 }
  0xb8   : > { %v2272_v56 = vsel %vm2263_vm5, %v2269_v46, %v2271_v16  ;;  %v584_v30 = vrot.slane %v582_v19, 1  ;;  %v2277_v43 = vrot.slane %v5945_v41, 2  ;;  %v594_v44 = vshrl.u32 %v6061_v0, 16 }
  0xb9   : > { %v577_v23 = vsel %vm453_vm2, %v572_v4, %v576_v62  ;;  %v2274_v17 = vsel %vm2263_vm5, %v2271_v16, %v2273_v22  ;;  %v598_v45 = vshll.u32 %v6079_v26, 16  ;;  %v2276_v47 = vsel %vm2263_vm5, %v2273_v22, %v2275_v36  ;;  %v6145_v22 = vld [vmem:[%s5839_s17 + $0x80] sm:$0xff]  }
  0xba   : > { %4714 = vmatmul.mubr.msk.bf16.gmra.mrb[16].mxu1 %vm602_vm4, %v537_v21  ;;  %v569_v21 = vsel %vm453_vm2, %v564_v61, %v568_v42  ;;  %v2279_v41 = vrot.slane %v5959_v60, 2  ;;  %v6108_v42 = vld [vmem:[%s5839_s17 + $0x60] sm:$0xff]  }
  0xbb   : > { %4717 = vmatprep.mubr.msk.bf16.mxu1 %vm602_vm4, %v545_v25  ;;  %4866 = vmatmul.mubr.msk.bf16.gmra.mrb[16].mxu0 %vm602_vm4, %v1914_v32  ;;  %v586_v25 = vshrl.u32 %v6056_v58, 16  ;;  %v580_v32 = vor.u32 %v578_v12, %v576_v62  ;;  %v600_v49 = vrot.slane %v598_v45, 1  ;;  %v1409_v60 = vld [vmem:[#allocation2 + $0x6] sm:$0x3]  ;;  %v6121_v62 = vld [vmem:[%s5839_s17 + $0x68] sm:$0xff]   ;;  %v6184_v45 = vld [vmem:[%s5839_s17 + $0x18] sm:$0xff]  }
  0xbc   : > { %4887 = vmatprep.mubr.msk.bf16.mxu0 %vm602_vm4, %v2266_v14  ;;  %v2280_v54 = vsel %vm2263_vm5, %v2277_v43, %v2279_v41  ;;  %v6115_v61 = vand.u32 %v1409_v60, %v5834_v2  ;;  %v2287_v11 = vrot.slane %v6121_v62, 2 }
  0xbd   : > { %v588_v33 = vor.u32 %v586_v25, %v584_v30  ;;  %v585_v39 = vsel %vm453_vm2, %v580_v32, %v584_v30  ;;  %v6161_v30 = vld [vmem:[%s5839_s17 + $0x90] sm:$0xff]  }
  0xbe   : > { %v2297_v32 = vrot.slane %v6161_v30, 2 }
  0xc2   : > { %4718 = vmatmul.mubr.msk.bf16.gmra.mrb[20].mxu1 %vm602_vm4, %v553_v48  ;;  %v2278_v48 = vsel %vm2263_vm5, %v2275_v36, %v2277_v43 }
  0xc3   : > { %4721 = vmatprep.mubr.msk.bf16.mxu1 %vm602_vm4, %v561_v53  ;;  %4888 = vmatmul.mubr.msk.bf16.vlgmr.msra.gmra.mrb[0].mxu0 %vm602_vm4, %v2268_v28  ;;  %v2281_v53 = vrot.slane %v5969_v3, 2  ;;  %v2285_v3 = vrot.slane %v6108_v42, 2 }
  0xc4   : > { %4924 = vmatpush3.bf16.msra.mxu0 %v6003_v57  ;;  %4891 = vmatprep.mubr.msk.bf16.mxu0 %vm602_vm4, %v2270_v59  ;;  %v590_v57 = vshll.u32 %v6061_v0, 16  ;;  %v2283_v59 = vrot.slane %v5984_v29, 2  ;;  %v6128_v29 = vld [vmem:[%s5839_s17 + $0x70] sm:$0xff]  }
  0xc5   : > { %4961 = vmatprep.subr.bf16.mxu0 %v6065_v15  ;;  %v2282_v28 = vsel %vm2263_vm5, %v2279_v41, %v2281_v53  ;;  %v2289_v16 = vrot.slane %v6128_v29, 2  ;;  %v2288_v19 = vsel %vm2263_vm5, %v2285_v3, %v2287_v11 }
  0xc6   : > { %v592_v14 = vrot.slane %v590_v57, 1  ;;  %v2286_v4 = vsel %vm2263_vm5, %v2283_v59, %v2285_v3  ;;  %v6155_v57 = vld [vmem:[%s5839_s17 + $0x88] sm:$0xff]  }
  0xc8   : > { %v593_v46 = vsel %vm453_vm2, %v588_v33, %v592_v14  ;;  %v596_v31 = vor.u32 %v594_v44, %v592_v14  ;;  %v2571_v33 = vld [vmem:[%s5839_s17 + $0x10] sm:$0xc]  ;;  %v6169_v14 = vld [vmem:[%s5839_s17 + $0x14] sm:$0xf] }
  0xc9   : > { %v6181_v44 = vcombine.low %v2571_v33, %v6169_v14 }
  0xca   : > { %4722 = vmatmul.mubr.msk.bf16.gmra.mrb[24].mxu1 %vm602_vm4, %v569_v21  ;;  %v601_v51 = vsel %vm453_vm2, %v596_v31, %v600_v49  ;;  %v2290_v21 = vsel %vm2263_vm5, %v2287_v11, %v2289_v16  ;;  %v6195_v49 = vld [vmem:[%s5839_s17 + $0x20] sm:$0xff]  }
  0xcb   : > { %4725 = vmatprep.mubr.msk.bf16.mxu1 %vm602_vm4, %v577_v23  ;;  %4892 = vmatmul.mubr.msk.bf16.gmra.mrb[4].mxu0 %vm602_vm4, %v2272_v56  ;;  %v2293_v23 = vrot.slane %v6145_v22, 2 }
  0xcc   : > { %4895 = vmatprep.mubr.msk.bf16.mxu0 %vm602_vm4, %v2274_v17  ;;  %v2295_v17 = vrot.slane %v6155_v57, 2 }
  0xce   : > { %v2296_v36 = vsel %vm2263_vm5, %v2293_v23, %v2295_v17  ;;  %v2298_v43 = vsel %vm2263_vm5, %v2295_v17, %v2297_v32 }
  0xd2   : > { %4726 = vmatmul.mubr.msk.bf16.gmra.mrb[28].mxu1 %vm602_vm4, %v585_v39  ;;  %v6175_v39 = vld [vmem:[%s5839_s17 + $0x98] ss:$0 sps:$4 sm:$0x33]  }
  0xd3   : > { %4729 = vmatprep.mubr.msk.bf16.mxu1 %vm602_vm4, %v593_v46  ;;  %4896 = vmatmul.mubr.msk.bf16.gmra.mrb[8].mxu0 %vm602_vm4, %v2276_v47  ;;  %v2299_v46 = vrot.slane %v6175_v39, 2  ;;  %v2703_v47 = vrot.slane %v6181_v44, 2 }
  0xd4   : > { %4899 = vmatprep.mubr.msk.bf16.mxu0 %vm602_vm4, %v2278_v48  ;;  %v2704_v48 = vrot.slane %v6184_v45, 2 }
  0xd5   : > { %v2300_v31 = vsel %vm2263_vm5, %v2297_v32, %v2299_v46  ;;  %v6250_v32 = vld [vmem:[%s5839_s17 + $0x50] sm:$0xff]   ;;  %v1065_v46 = vrot.slane %v5853_v10, 1 }
  0xd6   : > { %v2705_v41 = vsel %vm2263_vm5, %v2703_v47, %v2704_v48 }
  0xda   : > { %4730 = vmatmul.mubr.msk.bf16.gmra.mrb[32].mxu1 %vm602_vm4, %v601_v51  ;;  %v6201_v51 = vld [vmem:[%s5839_s17 + $0x28] sm:$0xff]  }
  0xdb   : > { %4735 = vmatprep.mubr.msk.bf16.mxu1 %vm602_vm4, %v5850_v9  ;;  %4900 = vmatmul.mubr.msk.bf16.gmra.mrb[12].mxu0 %vm602_vm4, %v2280_v54  ;;  %v2284_v9 = vsel %vm2263_vm5, %v2281_v53, %v2283_v59  ;;  %v2706_v53 = vrot.slane %v6195_v49, 2  ;;  %v2708_v54 = vrot.slane %v6201_v51, 2  ;;  %v6211_v59 = vld [vmem:[%s5839_s17 + $0x30] sm:$0xff]  }
  0xdc   : > { %4903 = vmatprep.mubr.msk.bf16.mxu0 %vm602_vm4, %v2282_v28  ;;  %v3459_v28 = vld [vmem:[#allocation2 + $0x10] sm:$0x3]  ;;  %v2710_v11 = vrot.slane %v6211_v59, 2 }
  0xdd   : > { %v2707_v60 = vsel %vm2263_vm5, %v2704_v48, %v2706_v53  ;;  %v2709_v3 = vsel %vm2263_vm5, %v2706_v53, %v2708_v54  ;;  %v1067_v53 = vrot.slane %v5877_v27, 1 }
  0xe2   : > { %4736 = vmatmul.mubr.msk.bf16.vlgmr.msra.gmra.mrb[0].mxu1 %vm602_vm4, %v5853_v10 }
  0xe3   : > { %4739 = vmatprep.mubr.msk.bf16.mxu1 %vm602_vm4, %v5877_v27  ;;  %4772 = vmatpush3.bf16.msra.mxu1 %v6048_v52  ;;  %v6139_v52 = vld [vmem:[%s5839_s17 + $0x78] sm:$0xff]  }
  0xe4   : > { %4809 = vmatprep.subr.bf16.mxu1 %v6115_v61  ;;  %4904 = vmatmul.mubr.msk.bf16.gmra.mrb[16].mxu0 %vm602_vm4, %v2284_v9  ;;  %v2291_v12 = vrot.slane %v6139_v52, 2  ;;  %v6217_v9 = vld [vmem:[%s5839_s17 + $0x38] sm:$0xff]  }
  0xe5   : > { %4907 = vmatprep.mubr.msk.bf16.mxu0 %vm602_vm4, %v2286_v4  ;;  %v6220_v4 = vand.u32 %v3459_v28, %v5834_v2  ;;  %v6232_v2 = vld [vmem:[%s5839_s17 + $0x40] sm:$0xff]   ;;  %v1069_v28 = vrot.slane %v5886_v40, 1 }
  0xe6   : > { %v2292_v25 = vsel %vm2263_vm5, %v2289_v16, %v2291_v12  ;;  %v2294_v56 = vsel %vm2263_vm5, %v2291_v12, %v2293_v23  ;;  %v2712_v16 = vrot.slane %v6217_v9, 2  ;;  %v1057_v12 = vld [vmem:[%s5839_s17] sm:$0xe]  ;;  %v2714_v23 = vrot.slane %v6232_v2, 2 }
  0xe8   : > { %v2715_v17 = vsel %vm2263_vm5, %v2712_v16, %v2714_v23 }
  0xea   : > { %4740 = vmatmul.mubr.msk.bf16.gmra.mrb[4].mxu1 %vm602_vm4, %v5886_v40 }
  0xeb   : > { %4743 = vmatprep.mubr.msk.bf16.mxu1 %vm602_vm4, %v5902_v55 }
  0xec   : > { %4908 = vmatmul.mubr.msk.bf16.gmra.mrb[20].mxu0 %vm602_vm4, %v2288_v19  ;;  %v2711_v19 = vsel %vm2263_vm5, %v2708_v54, %v2710_v11  ;;  %v6274_v54 = vld [vmem:[%s5839_s17 + $0x68] sm:$0xff]  }
  0xed   : > { %4911 = vmatprep.mubr.msk.bf16.mxu0 %vm602_vm4, %v2290_v21  ;;  %v6238_v21 = vld [vmem:[%s5839_s17 + $0x48] sm:$0xff]  }
  0xf2   : > { %4744 = vmatmul.mubr.msk.bf16.gmra.mrb[8].mxu1 %vm602_vm4, %v5915_v5 }
  0xf3   : > { %4747 = vmatprep.mubr.msk.bf16.mxu1 %vm602_vm4, %v5928_v24 }
  0xf4   : > { %4912 = vmatmul.mubr.msk.bf16.gmra.mrb[24].mxu0 %vm602_vm4, %v2292_v25  ;;  %v2716_v25 = vrot.slane %v6238_v21, 2 }
  0xf5   : > { %4915 = vmatprep.mubr.msk.bf16.mxu0 %vm602_vm4, %v2294_v56  ;;  %v4280_v56 = vcombine.low %v1057_v12, %v5847_v8  ;;  %v2718_v8 = vrot.slane %v6250_v32, 2  ;;  %v6293_v12 = vld [vmem:[%s5839_s17 + $0x78] sm:$0xff]  }
  0xf6   : > { %v2717_v33 = vsel %vm2263_vm5, %v2714_v23, %v2716_v25  ;;  %v1073_v23 = vrot.slane %v5915_v5, 1  ;;  %v6306_v5 = vld [vmem:[%s5839_s17 + $0x80] sm:$0xff]  }
  0xfa   : > { %4748 = vmatmul.mubr.msk.bf16.gmra.mrb[12].mxu1 %vm602_vm4, %v5938_v34 }
  0xfb   : > { %4751 = vmatprep.mubr.msk.bf16.mxu1 %vm602_vm4, %v5954_v50 }
  0xfc   : > { %4916 = vmatmul.mubr.msk.bf16.gmra.mrb[28].mxu0 %vm602_vm4, %v2296_v36  ;;  %v6256_v36 = vld [vmem:[%s5839_s17 + $0x58] sm:$0xff]  }
  0xfd   : > { %4919 = vmatprep.mubr.msk.bf16.mxu0 %vm602_vm4, %v2298_v43  ;;  %v1064_v43 = vrot.slane %v4280_v56, 1  ;;  %v2720_v47 = vrot.slane %v6256_v36, 2 }
  0xff   : > { %v1066_v48 = vsel %vm1063_vm6, %v1064_v43, %v1065_v46  ;;  %v2721_v10 = vsel %vm2263_vm5, %v2718_v8, %v2720_v47  ;;  %v1075_v43 = vrot.slane %v5928_v24, 1 }
 0x102   : > { %4752 = vmatmul.mubr.msk.bf16.gmra.mrb[16].mxu1 %vm602_vm4, %v5966_v1 }
 0x103   : > { %4755 = vmatprep.mubr.msk.bf16.mxu1 %vm602_vm4, %v5977_v20 }
 0x104   : > { %4920 = vmatmul.mubr.msk.bf16.gmra.mrb[32].mxu0 %vm602_vm4, %v2300_v31  ;;  %v2719_v31 = vsel %vm2263_vm5, %v2716_v25, %v2718_v8  ;;  %v1077_v8 = vrot.slane %v5938_v34, 1  ;;  %v6328_v34 = vld [vmem:[%s5839_s17 + $0x98] sm:$0xff]  }
 0x105   : > { %4925 = vmatprep.mubr.msk.bf16.mxu0 %vm602_vm4, %v2705_v41  ;;  %v6268_v41 = vld [vmem:[%s5839_s17 + $0x60] sm:$0xff]  }
 0x10a   : > { %4756 = vmatmul.mubr.msk.bf16.gmra.mrb[20].mxu1 %vm602_vm4, %v5989_v38 }
 0x10b   : > { %4759 = vmatprep.mubr.msk.bf16.mxu1 %vm602_vm4, %v6008_v63 }
 0x10c   : > { %4926 = vmatmul.mubr.msk.bf16.vlgmr.msra.gmra.mrb[0].mxu0 %vm602_vm4, %v2707_v60  ;;  %v2722_v60 = vrot.slane %v6268_v41, 2 }
 0x10d   : > { %4962 = vmatpush3.bf16.msra.mxu0 %v6065_v15  ;;  %4929 = vmatprep.mubr.msk.bf16.mxu0 %vm602_vm4, %v2709_v3  ;;  %v2713_v15 = vsel %vm2263_vm5, %v2710_v11, %v2712_v16  ;;  %v1068_v3 = vsel %vm1063_vm6, %v1065_v46, %v1067_v53  ;;  %v2724_v11 = vrot.slane %v6274_v54, 2  ;;  %v1070_v16 = vsel %vm1063_vm6, %v1067_v53, %v1069_v28  ;;  %v6312_v46 = vld [vmem:[%s5839_s17 + $0x88] sm:$0xff]  }
 0x10e   : > { %4999 = vmatprep.subr.bf16.mxu0 %v6220_v4  ;;  %v2723_v27 = vsel %vm2263_vm5, %v2720_v47, %v2722_v60  ;;  %v2730_v47 = vrot.slane %v6306_v5, 2  ;;  %v1079_v53 = vrot.slane %v5954_v50, 1  ;;  %v2736_v50 = vrot.slane %v6328_v34, 2 }
 0x10f   : > { %v2725_v40 = vsel %vm2263_vm5, %v2722_v60, %v2724_v11 }
 0x112   : > { %4760 = vmatmul.mubr.msk.bf16.gmra.mrb[24].mxu1 %vm602_vm4, %v6015_v18 }
 0x113   : > { %4763 = vmatprep.mubr.msk.bf16.mxu1 %vm602_vm4, %v6032_v35 }
 0x114   : > { %4930 = vmatmul.mubr.msk.bf16.gmra.mrb[4].mxu0 %vm602_vm4, %v2711_v19  ;;  %v6286_v19 = vld [vmem:[%s5839_s17 + $0x70] sm:$0xff]  }
 0x115   : > { %4933 = vmatprep.mubr.msk.bf16.mxu0 %vm602_vm4, %v2713_v15  ;;  %v1071_v15 = vrot.slane %v5902_v55, 1  ;;  %v2726_v25 = vrot.slane %v6286_v19, 2 }
 0x117   : > { %v1072_v56 = vsel %vm1063_vm6, %v1069_v28, %v1071_v15  ;;  %v1074_v55 = vsel %vm1063_vm6, %v1071_v15, %v1073_v23  ;;  %v6325_v28 = vld [vmem:[%s5839_s17 + $0x90] sm:$0xff]   ;;  %v3026_v15 = vshrl.u32 %v6184_v45, 16 }
 0x11a   : > { %4764 = vmatmul.mubr.msk.bf16.gmra.mrb[28].mxu1 %vm602_vm4, %v6037_v37 }
 0x11b   : > { %4767 = vmatprep.mubr.msk.bf16.mxu1 %vm602_vm4, %v6056_v58 }
 0x11c   : > { %4934 = vmatmul.mubr.msk.bf16.gmra.mrb[8].mxu0 %vm602_vm4, %v2715_v17  ;;  %v2728_v17 = vrot.slane %v6293_v12, 2 }
 0x11d   : > { %4937 = vmatprep.mubr.msk.bf16.mxu0 %vm602_vm4, %v2717_v33 }
 0x11e   : > { %v2729_v33 = vsel %vm2263_vm5, %v2726_v25, %v2728_v17  ;;  %v2731_v24 = vsel %vm2263_vm5, %v2728_v17, %v2730_v47  ;;  %v1083_v17 = vrot.slane %v5977_v20, 1  ;;  %v3038_v20 = vshll.u32 %v6195_v49, 16 }
 0x122   : > { %4768 = vmatmul.mubr.msk.bf16.gmra.mrb[32].mxu1 %vm602_vm4, %v6061_v0 }
 0x123   : > { %4773 = vmatprep.mubr.msk.bf16.mxu1 %vm602_vm4, %v1066_v48  ;;  %v1076_v48 = vsel %vm1063_vm6, %v1073_v23, %v1075_v43  ;;  %v3029_v23 = vshll.u32 %v6184_v45, 16 }
 0x124   : > { %4938 = vmatmul.mubr.msk.bf16.gmra.mrb[12].mxu0 %vm602_vm4, %v2719_v31  ;;  %v2732_v31 = vrot.slane %v6312_v46, 2 }
 0x125   : > { %4941 = vmatprep.mubr.msk.bf16.mxu0 %vm602_vm4, %v2721_v10  ;;  %v1078_v10 = vsel %vm1063_vm6, %v1075_v43, %v1077_v8  ;;  %v3031_v43 = vrot.slane %v3029_v23, 3 }
 0x126   : > { %v2733_v60 = vsel %vm2263_vm5, %v2730_v47, %v2732_v31 }
 0x12a   : > { %4774 = vmatmul.mubr.msk.bf16.vlgmr.msra.gmra.mrb[0].mxu1 %vm602_vm4, %v1068_v3  ;;  %v1081_v3 = vrot.slane %v5966_v1, 1 }
 0x12b   : > { %4777 = vmatprep.mubr.msk.bf16.mxu1 %vm602_vm4, %v1070_v16  ;;  %4810 = vmatpush3.bf16.msra.mxu1 %v6115_v61  ;;  %v2727_v61 = vsel %vm2263_vm5, %v2724_v11, %v2726_v25  ;;  %v1080_v11 = vsel %vm1063_vm6, %v1077_v8, %v1079_v53  ;;  %v2734_v16 = vrot.slane %v6325_v28, 2  ;;  %v1085_v8 = vrot.slane %v5989_v38, 1 }
 0x12c   : > { %5037 = vmatprep.subr.bf16.mxu1 %v5843_v6  ;;  %4942 = vmatmul.mubr.msk.bf16.gmra.mrb[16].mxu0 %vm602_vm4, %v2723_v27  ;;  %v3018_v27 = vshrl.u32 %v6181_v44, 16  ;;  %v1082_v1 = vsel %vm1063_vm6, %v1079_v53, %v1081_v3  ;;  %v1084_v47 = vsel %vm1063_vm6, %v1081_v3, %v1083_v17  ;;  %v3044_v53 = vshrl.u32 %v6201_v51, 16 }
 0x12d   : > { %4945 = vmatprep.mubr.msk.bf16.mxu0 %vm602_vm4, %v2725_v40  ;;  %v3021_v40 = vshll.u32 %v6181_v44, 16  ;;  %v2735_v25 = vsel %vm2263_vm5, %v2732_v31, %v2734_v16  ;;  %v3028_v44 = vrot.slane %v3026_v15, 2  ;;  %v3035_v31 = vshrl.u32 %v6195_v49, 16 }
 0x12e   : > { %v3040_v3 = vrot.slane %v3038_v20, 3  ;;  %v3046_v15 = vrot.slane %v3044_v53, 2  ;;  %v1093_v20 = vrot.slane %v6037_v37, 1  ;;  %v3074_v53 = vshll.u32 %v6232_v2, 16 }
 0x132   : > { %4778 = vmatmul.mubr.msk.bf16.gmra.mrb[4].mxu1 %vm602_vm4, %v1072_v56  ;;  %v2737_v56 = vsel %vm2263_vm5, %v2734_v16, %v2736_v50  ;;  %v3037_v16 = vrot.slane %v3035_v31, 2 }
 0x133   : > { %4781 = vmatprep.mubr.msk.bf16.mxu1 %vm602_vm4, %v1074_v55  ;;  %v5451_v55 = vld [vmem:[%s5839_s17 + $0xa0] ss:$0 sps:$4 sm:$0x33]  }
 0x134   : > { %4946 = vmatmul.mubr.msk.bf16.gmra.mrb[20].mxu0 %vm602_vm4, %v2727_v61  ;;  %v3020_v61 = vrot.slane %v3018_v27, 2 }
 0x135   : > { %4949 = vmatprep.mubr.msk.bf16.mxu0 %vm602_vm4, %v2729_v33  ;;  %v3023_v33 = vrot.slane %v3021_v40, 3  ;;  %v1087_v40 = vrot.slane %v6008_v63, 1  ;;  %v3065_v63 = vshll.u32 %v6217_v9, 16 }
 0x137   : > { %v3067_v31 = vrot.slane %v3065_v63, 3 }
 0x13a   : > { %4782 = vmatmul.mubr.msk.bf16.gmra.mrb[8].mxu1 %vm602_vm4, %v1076_v48  ;;  %v2738_v48 = vrot.slane %v5451_v55, 2 }
 0x13b   : > { %4785 = vmatprep.mubr.msk.bf16.mxu1 %vm602_vm4, %v1078_v10  ;;  %v3024_v10 = vor.u32 %v3023_v33, %v3020_v61  ;;  %v3062_v61 = vshrl.u32 %v6217_v9, 16 }
 0x13c   : > { %4950 = vmatmul.mubr.msk.bf16.gmra.mrb[24].mxu0 %vm602_vm4, %v2731_v24  ;;  %v3032_v24 = vor.u32 %v3031_v43, %v3028_v44  ;;  %v2739_v38 = vsel %vm2263_vm5, %v2736_v50, %v2738_v48  ;;  %v3056_v50 = vshll.u32 %v6211_v59, 16  ;;  %v1091_v48 = vrot.slane %v6032_v35, 1 }
 0x13d   : > { %4953 = vmatprep.mubr.msk.bf16.mxu0 %vm602_vm4, %v2733_v60  ;;  %v3047_v60 = vshll.u32 %v6201_v51, 16  ;;  %v3080_v35 = vshrl.u32 %v6238_v21, 16 }
 0x13e   : > { %v3033_v27 = vsel %vm3016_vm7, %v3024_v10, %v3032_v24  ;;  %v3058_v43 = vrot.slane %v3056_v50, 3  ;;  %v1094_v37 = vsel %vm1063_vm6, %v1091_v48, %v1093_v20  ;;  %v3092_v50 = vshll.u32 %v6250_v32, 16 }
 0x13f   : > { %v3049_v23 = vrot.slane %v3047_v60, 3 }
 0x141   : > { %v3050_v55 = vor.u32 %v3049_v23, %v3046_v15  ;;  %v3082_v15 = vrot.slane %v3080_v35, 2 }
 0x142   : > { %4786 = vmatmul.mubr.msk.bf16.gmra.mrb[12].mxu1 %vm602_vm4, %v1080_v11  ;;  %v1086_v11 = vsel %vm1063_vm6, %v1083_v17, %v1085_v8  ;;  %v1088_v17 = vsel %vm1063_vm6, %v1085_v8, %v1087_v40  ;;  %v3064_v8 = vrot.slane %v3062_v61, 2  ;;  %v3098_v61 = vshrl.u32 %v6256_v36, 16 }
 0x143   : > { %4789 = vmatprep.mubr.msk.bf16.mxu1 %vm602_vm4, %v1082_v1  ;;  %v1089_v1 = vrot.slane %v6015_v18, 1 }
 0x144   : > { %4954 = vmatmul.mubr.msk.bf16.gmra.mrb[28].mxu0 %vm602_vm4, %v2735_v25  ;;  %v3041_v25 = vor.u32 %v3040_v3, %v3037_v16  ;;  %v3076_v3 = vrot.slane %v3074_v53, 3  ;;  %v3110_v53 = vshll.u32 %v6268_v41, 16 }
 0x145   : > { %4957 = vmatprep.mubr.msk.bf16.mxu0 %vm602_vm4, %v2737_v56  ;;  %v3053_v56 = vshrl.u32 %v6211_v59, 16  ;;  %v1090_v33 = vsel %vm1063_vm6, %v1087_v40, %v1089_v1  ;;  %v1092_v60 = vsel %vm1063_vm6, %v1089_v1, %v1091_v48  ;;  %v1095_v40 = vrot.slane %v6056_v58, 1 }
 0x146   : > { %v3042_v18 = vsel %vm3016_vm7, %v3032_v24, %v3041_v25  ;;  %v3071_v24 = vshrl.u32 %v6232_v2, 16  ;;  %v1097_v1 = vrot.slane %v6061_v0, 1  ;;  %v3101_v58 = vshll.u32 %v6256_v36, 16 }
 0x147   : > { %v3055_v44 = vrot.slane %v3053_v56, 2  ;;  %v3089_v56 = vshrl.u32 %v6250_v32, 16 }
 0x148   : > { %v3073_v16 = vrot.slane %v3071_v24, 2  ;;  %v1098_v63 = vsel %vm1063_vm6, %v1095_v40, %v1097_v1  ;;  %v3103_v48 = vrot.slane %v3101_v58, 3  ;;  %v3107_v24 = vshrl.u32 %v6268_v41, 16 }
 0x149   : > { %v3059_v10 = vor.u32 %v3058_v43, %v3055_v44  ;;  %v1099_v43 = vrot.slane %v6079_v26, 1  ;;  %v3137_v58 = vshll.u32 %v6293_v12, 16 }
 0x14a   : > { %4790 = vmatmul.mubr.msk.bf16.gmra.mrb[16].mxu1 %vm602_vm4, %v1084_v47  ;;  %v3051_v47 = vsel %vm3016_vm7, %v3041_v25, %v3050_v55  ;;  %v3077_v25 = vor.u32 %v3076_v3, %v3073_v16  ;;  %v5456_v3 = vld [vmem:[%s5839_s17 + $0x18] sm:$0xff]  }
 0x14b   : > { %4793 = vmatprep.mubr.msk.bf16.mxu1 %vm602_vm4, %v1086_v11  ;;  %v3068_v11 = vor.u32 %v3067_v31, %v3064_v8  ;;  %v1503_v8 = vrot.slane %v5861_v13, 1  ;;  %v5455_v31 = vld [vmem:[%s5839_s17 + $0x10] sm:$0xff]   ;;  %v3119_v13 = vshll.u32 %v6274_v54, 16 }
 0x14c   : > { %4958 = vmatmul.mubr.msk.bf16.gmra.mrb[32].mxu0 %vm602_vm4, %v2739_v38  ;;  %v3083_v38 = vshll.u32 %v6238_v21, 16 }
 0x14d   : > { %4963 = vmatprep.mubr.msk.bf16.mxu0 %vm602_vm4, %v3033_v27  ;;  %v3069_v27 = vsel %vm3016_vm7, %v3059_v10, %v3068_v11  ;;  %v3078_v0 = vsel %vm3016_vm7, %v3068_v11, %v3077_v25  ;;  %v3116_v11 = vshrl.u32 %v6274_v54, 16 }
 0x14e   : > { %v3085_v23 = vrot.slane %v3083_v38, 3 }
 0x152   : > { %4794 = vmatmul.mubr.msk.bf16.gmra.mrb[20].mxu1 %vm602_vm4, %v1088_v17  ;;  %v1096_v17 = vsel %vm1063_vm6, %v1093_v20, %v1095_v40  ;;  %v1504_v20 = vrot.slane %v5455_v31, 1  ;;  %v3118_v40 = vrot.slane %v3116_v11, 2  ;;  %v5459_v31 = vld [vmem:[%s5839_s17 + $0x30] sm:$0xff]   ;;  %v3155_v11 = vshll.u32 %v6312_v46, 16 }
 0x153   : > { %4797 = vmatprep.mubr.msk.bf16.mxu1 %vm602_vm4, %v1090_v33  ;;  %v3091_v33 = vrot.slane %v3089_v56, 2  ;;  %v3125_v56 = vshrl.u32 %v6286_v19, 16 }
 0x154   : > { %4964 = vmatmul.mubr.msk.bf16.vlgmr.msra.gmra.mrb[0].mxu0 %vm602_vm4, %v3042_v18  ;;  %v3094_v18 = vrot.slane %v3092_v50, 3  ;;  %v1505_v35 = vsel %vm1063_vm6, %v1503_v8, %v1504_v20  ;;  %v3128_v50 = vshll.u32 %v6286_v19, 16  ;;  %v3139_v8 = vrot.slane %v3137_v58, 3 }
 0x155   : > { %5000 = vmatpush3.bf16.msra.mxu0 %v6220_v4  ;;  %4967 = vmatprep.mubr.msk.bf16.mxu0 %vm602_vm4, %v3051_v47  ;;  %v3060_v4 = vsel %vm3016_vm7, %v3050_v55, %v3059_v10  ;;  %v3086_v55 = vor.u32 %v3085_v23, %v3082_v15  ;;  %v3100_v47 = vrot.slane %v3098_v61, 2  ;;  %v3121_v15 = vrot.slane %v3119_v13, 3  ;;  %v5457_v23 = vld [vmem:[%s5839_s17 + $0x20] sm:$0xff]  }
 0x156   : > { %v3095_v10 = vor.u32 %v3094_v18, %v3091_v33  ;;  %v3134_v61 = vshrl.u32 %v6293_v12, 16  ;;  %v3127_v33 = vrot.slane %v3125_v56, 2  ;;  %v3130_v18 = vrot.slane %v3128_v50, 3 }
 0x157   : > { %v3087_v44 = vsel %vm3016_vm7, %v3077_v25, %v3086_v55  ;;  %v3104_v26 = vor.u32 %v3103_v48, %v3100_v47  ;;  %v3164_v56 = vshll.u32 %v6325_v28, 16 }
 0x158   : > { %v3096_v38 = vsel %vm3016_vm7, %v3086_v55, %v3095_v10  ;;  %v3122_v55 = vor.u32 %v3121_v15, %v3118_v40  ;;  %v3136_v48 = vrot.slane %v3134_v61, 2  ;;  %v3157_v40 = vrot.slane %v3155_v11, 3  ;;  %v5461_v15 = vld [vmem:[%s5839_s17 + $0x40] sm:$0xff]   ;;  %v3457_v11 = vld [vmem:[%s5839_s17 + $0x10] sm:$0x8] }
 0x159   : > { %v3105_v16 = vsel %vm3016_vm7, %v3095_v10, %v3104_v26  ;;  %v3131_v10 = vor.u32 %v3130_v18, %v3127_v33  ;;  %v3173_v61 = vshll.u32 %v6328_v34, 16  ;;  %v3166_v33 = vrot.slane %v3164_v56, 3  ;;  %v6462_v18 = vld [vmem:[%s5839_s17 + $0xa0] ss:$0 sps:$4 sm:$0x77]  }
 0x15a   : > { %4798 = vmatmul.mubr.msk.bf16.gmra.mrb[24].mxu1 %vm602_vm4, %v1092_v60  ;;  %v1100_v60 = vsel %vm1063_vm6, %v1097_v1, %v1099_v43  ;;  %v1508_v1 = vrot.slane %v5457_v23, 1  ;;  %v5458_v43 = vld [vmem:[%s5839_s17 + $0x28] sm:$0xff]   ;;  %v1516_v23 = vrot.slane %v5461_v15, 1 }
 0x15b   : > { %4801 = vmatprep.mubr.msk.bf16.mxu1 %vm602_vm4, %v1094_v37  ;;  %v3109_v37 = vrot.slane %v3107_v24, 2  ;;  %v1510_v47 = vrot.slane %v5458_v43, 1  ;;  %v3143_v24 = vshrl.u32 %v6306_v5, 16  ;;  %v5462_v43 = vld [vmem:[%s5839_s17 + $0x48] sm:$0xff]  }
 0x15c   : > { %4968 = vmatmul.mubr.msk.bf16.gmra.mrb[4].mxu0 %vm602_vm4, %v3060_v4  ;;  %v3112_v4 = vrot.slane %v3110_v53, 3  ;;  %v3146_v53 = vshll.u32 %v6306_v5, 16 }
 0x15d   : > { %4971 = vmatprep.mubr.msk.bf16.mxu0 %vm602_vm4, %v3069_v27  ;;  %v1506_v27 = vrot.slane %v5456_v3, 1 }
 0x15e   : > { %v3113_v25 = vor.u32 %v3112_v4, %v3109_v37  ;;  %v3148_v37 = vrot.slane %v3146_v53, 3  ;;  %v3182_v53 = vshll.u32 %v6462_v18, 16 }
 0x162   : > { %4802 = vmatmul.mubr.msk.bf16.gmra.mrb[28].mxu1 %vm602_vm4, %v1096_v17  ;;  %v1507_v17 = vsel %vm1063_vm6, %v1504_v20, %v1506_v27  ;;  %v1512_v20 = vrot.slane %v5459_v31, 1  ;;  %v5463_v31 = vld [vmem:[%s5839_s17 + $0x50] sm:$0xff]  }
 0x163   : > { %4805 = vmatprep.mubr.msk.bf16.mxu1 %vm602_vm4, %v1098_v63  ;;  %v1509_v63 = vsel %vm1063_vm6, %v1506_v27, %v1508_v1 }
 0x164   : > { %4972 = vmatmul.mubr.msk.bf16.gmra.mrb[8].mxu0 %vm602_vm4, %v3078_v0  ;;  %v3114_v0 = vsel %vm3016_vm7, %v3104_v26, %v3113_v25  ;;  %v3140_v26 = vor.u32 %v3139_v8, %v3136_v48  ;;  %v1513_v13 = vsel %vm1063_vm6, %v1510_v47, %v1512_v20  ;;  %v3175_v8 = vrot.slane %v3173_v61, 3 }
 0x165   : > { %4975 = vmatprep.mubr.msk.bf16.mxu0 %vm602_vm4, %v3087_v44  ;;  %v3123_v44 = vsel %vm3016_vm7, %v3113_v25, %v3122_v55  ;;  %v3161_v25 = vshrl.u32 %v6325_v28, 16  ;;  %v3469_v61 = vrot.slane %v6201_v51, 3 }
 0x166   : > { %v3141_v4 = vsel %vm3016_vm7, %v3131_v10, %v3140_v26 }
 0x16a   : > { %4806 = vmatmul.mubr.msk.bf16.gmra.mrb[32].mxu1 %vm602_vm4, %v1100_v60  ;;  %v1511_v60 = vsel %vm1063_vm6, %v1508_v1, %v1510_v47  ;;  %v1518_v47 = vrot.slane %v5462_v43, 1  ;;  %v3473_v43 = vrot.slane %v6217_v9, 3  ;;  %v3475_v9 = vrot.slane %v6232_v2, 3 }
 0x16b   : > { %4811 = vmatprep.mubr.msk.bf16.mxu1 %vm602_vm4, %v1505_v35  ;;  %v3132_v35 = vsel %vm3016_vm7, %v3122_v55, %v3131_v10  ;;  %v3170_v55 = vshrl.u32 %v6328_v34, 16  ;;  %v1925_v2 = vshrl.u32 %v6121_v62, 16 }
 0x16c   : > { %4976 = vmatmul.mubr.msk.bf16.gmra.mrb[12].mxu0 %vm602_vm4, %v3096_v38  ;;  %v3145_v38 = vrot.slane %v3143_v24, 2  ;;  %v3179_v24 = vshrl.u32 %v6462_v18, 16 }
 0x16d   : > { %4979 = vmatprep.mubr.msk.bf16.mxu0 %vm602_vm4, %v3105_v16  ;;  %v5460_v16 = vld [vmem:[%s5839_s17 + $0x38] sm:$0xff]   ;;  %v3172_v48 = vrot.slane %v3170_v55, 2 }
 0x16e   : > { %v1514_v3 = vrot.slane %v5460_v16, 1  ;;  %v3149_v1 = vor.u32 %v3148_v37, %v3145_v38  ;;  %v3184_v38 = vrot.slane %v3182_v53, 3  ;;  %v3477_v53 = vrot.slane %v6238_v21, 3 }
 0x16f   : > { %v1934_v21 = vshrl.u32 %v6128_v29, 16 }
 0x170   : > { %v1515_v50 = vsel %vm1063_vm6, %v1512_v20, %v1514_v3  ;;  %v1517_v58 = vsel %vm1063_vm6, %v1514_v3, %v1516_v23  ;;  %v1520_v20 = vrot.slane %v5463_v31, 1  ;;  %v4430_v3 = vcombine.low %v3457_v11, %v6169_v14 }
 0x171   : > { %v1534_v31 = vrot.slane %v6155_v57, 1 }
 0x172   : > { %4812 = vmatmul.mubr.msk.bf16.vlgmr.msra.gmra.mrb[0].mxu1 %vm602_vm4, %v1507_v17 }
 0x173   : > { %4815 = vmatprep.mubr.msk.bf16.mxu1 %vm602_vm4, %v1509_v63  ;;  %5038 = vmatpush3.bf16.msra.mxu1 %v5843_v6  ;;  %v3152_v6 = vshrl.u32 %v6312_v46, 16  ;;  %v3150_v63 = vsel %vm3016_vm7, %v3140_v26, %v3149_v1  ;;  %v3176_v26 = vor.u32 %v3175_v8, %v3172_v48 }
 0x174   : > { %4980 = vmatmul.mubr.msk.bf16.gmra.mrb[16].mxu0 %vm602_vm4, %v3114_v0  ;;  %v3163_v0 = vrot.slane %v3161_v25, 2 }
 0x175   : > { %4983 = vmatprep.mubr.msk.bf16.mxu0 %vm602_vm4, %v3123_v44  ;;  %v3154_v27 = vrot.slane %v3152_v6, 2  ;;  %v1521_v6 = vsel %vm1063_vm6, %v1518_v47, %v1520_v20 }
 0x176   : > { %v3167_v10 = vor.u32 %v3166_v33, %v3163_v0  ;;  %v1530_v33 = vrot.slane %v6139_v52, 1 }
 0x177   : > { %v3158_v17 = vor.u32 %v3157_v40, %v3154_v27  ;;  %v1524_v27 = vrot.slane %v6108_v42, 1 }
 0x178   : > { %v3177_v37 = vsel %vm3016_vm7, %v3167_v10, %v3176_v26 }
 0x179   : > { %v3159_v44 = vsel %vm3016_vm7, %v3149_v1, %v3158_v17  ;;  %v3465_v1 = vrot.slane %v6184_v45, 3  ;;  %v3467_v45 = vrot.slane %v6195_v49, 3  ;;  %v3471_v49 = vrot.slane %v6211_v59, 3 }
 0x17a   : > { %4816 = vmatmul.mubr.msk.bf16.gmra.mrb[4].mxu1 %vm602_vm4, %v1511_v60  ;;  %v1519_v60 = vsel %vm1063_vm6, %v1516_v23, %v1518_v47  ;;  %v3464_v23 = vrot.slane %v4430_v3, 3  ;;  %v1916_v59 = vshrl.u32 %v6108_v42, 16 }
 0x17b   : > { %4819 = vmatprep.mubr.msk.bf16.mxu1 %vm602_vm4, %v1513_v13  ;;  %v3168_v13 = vsel %vm3016_vm7, %v3158_v17, %v3167_v10  ;;  %v1528_v17 = vrot.slane %v6128_v29, 1  ;;  %v3470_v0 = vsel %vm3463_vm8, %v3467_v45, %v3469_v61  ;;  %v3472_v48 = vsel %vm3463_vm8, %v3469_v61, %v3471_v49 }
 0x17c   : > { %4984 = vmatmul.mubr.msk.bf16.gmra.mrb[20].mxu0 %vm602_vm4, %v3132_v35  ;;  %v3181_v35 = vrot.slane %v3179_v24, 2  ;;  %v3466_v14 = vsel %vm3463_vm8, %v3464_v23, %v3465_v1  ;;  %v3474_v8 = vsel %vm3463_vm8, %v3471_v49, %v3473_v43  ;;  %v1919_v10 = vshll.u32 %v6108_v42, 16 }
 0x17d   : > { %4987 = vmatprep.mubr.msk.bf16.mxu0 %vm602_vm4, %v3141_v4  ;;  %v5464_v4 = vld [vmem:[%s5839_s17 + $0x58] sm:$0xff]   ;;  %v1531_v51 = vsel %vm1063_vm6, %v1528_v17, %v1530_v33  ;;  %v3478_v42 = vsel %vm3463_vm8, %v3475_v9, %v3477_v53  ;;  %v1936_v23 = vrot.slane %v1934_v21, 1  ;;  %v1964_v49 = vshll.u32 %v6155_v57, 16 }
 0x17e   : > { %v1522_v16 = vrot.slane %v5464_v4, 1  ;;  %v3185_v40 = vor.u32 %v3184_v38, %v3181_v35  ;;  %v1921_v11 = vrot.slane %v1919_v10, 2  ;;  %v1928_v38 = vshll.u32 %v6121_v62, 16 }
 0x17f   : > { %v1937_v4 = vshll.u32 %v6128_v29, 16 }
 0x180   : > { %v1523_v15 = vsel %vm1063_vm6, %v1520_v20, %v1522_v16  ;;  %v1525_v25 = vsel %vm1063_vm6, %v1522_v16, %v1524_v27  ;;  %v3186_v56 = vsel %vm3016_vm7, %v3176_v26, %v3185_v40  ;;  %v1536_v20 = vrot.slane %v6161_v30, 1 }
 0x181   : > { %v3479_v16 = vrot.slane %v6250_v32, 3  ;;  %v1927_v40 = vrot.slane %v1925_v2, 1 }
 0x182   : > { %4820 = vmatmul.mubr.msk.bf16.gmra.mrb[8].mxu1 %vm602_vm4, %v1515_v50  ;;  %v1526_v50 = vrot.slane %v6121_v62, 1  ;;  %v1537_v26 = vsel %vm1063_vm6, %v1534_v31, %v1536_v20 }
 0x183   : > { %4823 = vmatprep.mubr.msk.bf16.mxu1 %vm602_vm4, %v1517_v58  ;;  %v3480_v29 = vsel %vm3463_vm8, %v3477_v53, %v3479_v16  ;;  %v1982_v53 = vshll.u32 %v6175_v39, 16 }
 0x184   : > { %4988 = vmatmul.mubr.msk.bf16.gmra.mrb[24].mxu0 %vm602_vm4, %v3150_v63  ;;  %v1527_v55 = vsel %vm1063_vm6, %v1524_v27, %v1526_v50  ;;  %v1529_v58 = vsel %vm1063_vm6, %v1526_v50, %v1528_v17  ;;  %v3468_v63 = vsel %vm3463_vm8, %v3465_v1, %v3467_v45  ;;  %v3481_v27 = vrot.slane %v6256_v36, 3 }
 0x185   : > { %4991 = vmatprep.mubr.msk.bf16.mxu0 %vm602_vm4, %v3159_v44  ;;  %v1532_v44 = vrot.slane %v6145_v22, 1  ;;  %v1939_v1 = vrot.slane %v1937_v4, 2  ;;  %v1946_v36 = vshll.u32 %v6139_v52, 16  ;;  %v1952_v50 = vshrl.u32 %v6145_v22, 16 }
 0x186   : > { %v3483_v17 = vrot.slane %v6268_v41, 3  ;;  %v1961_v41 = vshrl.u32 %v6155_v57, 16  ;;  %v3499_v4 = vrot.slane %v6462_v18, 3 }
 0x187   : > { %v1533_v47 = vsel %vm1063_vm6, %v1530_v33, %v1532_v44  ;;  %v1535_v24 = vsel %vm1063_vm6, %v1532_v44, %v1534_v31 }
 0x188   : > { %v1963_v31 = vrot.slane %v1961_v41, 1 }
 0x18a   : > { %4824 = vmatmul.mubr.msk.bf16.gmra.mrb[12].mxu1 %vm602_vm4, %v1519_v60  ;;  %v5454_v60 = vld [vmem:[%s5839_s17 + $0x98] ss:$0 sps:$4 sm:$0x11]  }
 0x18b   : > { %4827 = vmatprep.mubr.msk.bf16.mxu1 %vm602_vm4, %v1521_v6  ;;  %v1918_v6 = vrot.slane %v1916_v59, 1  ;;  %v1538_v35 = vrot.slane %v5454_v60, 1  ;;  %v3491_v60 = vrot.slane %v6306_v5, 3  ;;  %v3495_v5 = vrot.slane %v6325_v28, 3 }
 0x18c   : > { %4992 = vmatmul.mubr.msk.bf16.gmra.mrb[28].mxu0 %vm602_vm4, %v3168_v13  ;;  %v3476_v13 = vsel %vm3463_vm8, %v3473_v43, %v3475_v9  ;;  %v1973_v43 = vshll.u32 %v6161_v30, 16 }
 0x18d   : > { %4995 = vmatprep.mubr.msk.bf16.mxu0 %vm602_vm4, %v3177_v37  ;;  %v1922_v37 = vor.u32 %v1921_v11, %v1918_v6  ;;  %v1539_v3 = vsel %vm1063_vm6, %v1536_v20, %v1538_v35  ;;  %v1966_v20 = vrot.slane %v1964_v49, 2  ;;  %v3493_v6 = vrot.slane %v6312_v46, 3 }
 0x18e   : > { %v1975_v10 = vrot.slane %v1973_v43, 2 }
 0x18f   : > { %v1923_v62 = vsel %vm1816_vm3, %v6019_v7, %v1922_v37  ;;  %v1955_v7 = vshll.u32 %v6145_v22, 16  ;;  %v3484_v22 = vsel %vm3463_vm8, %v3481_v27, %v3483_v17 }
 0x192   : > { %4828 = vmatmul.mubr.msk.bf16.gmra.mrb[16].mxu1 %vm602_vm4, %v1523_v15  ;;  %v1930_v15 = vrot.slane %v1928_v38, 2  ;;  %v3497_v38 = vrot.slane %v6328_v34, 3 }
 0x193   : > { %4831 = vmatprep.mubr.msk.bf16.mxu1 %vm602_vm4, %v1525_v25  ;;  %v3482_v25 = vsel %vm3463_vm8, %v3479_v16, %v3481_v27 }
 0x194   : > { %4996 = vmatmul.mubr.msk.bf16.gmra.mrb[32].mxu0 %vm602_vm4, %v3186_v56  ;;  %v1931_v32 = vor.u32 %v1930_v15, %v1927_v40  ;;  %v1943_v56 = vshrl.u32 %v6139_v52, 16  ;;  %v1954_v52 = vrot.slane %v1952_v50, 1  ;;  %v3498_v21 = vsel %vm3463_vm8, %v3495_v5, %v3497_v38 }
 0x195   : > { %5001 = vmatprep.mubr.msk.bf16.mxu0 %vm602_vm4, %v3466_v14  ;;  %v1940_v14 = vor.u32 %v1939_v1, %v1936_v23  ;;  %v3500_v16 = vsel %vm3463_vm8, %v3497_v38, %v3499_v4 }
 0x196   : > { %v1932_v45 = vsel %vm1816_vm3, %v1922_v37, %v1931_v32  ;;  %v1945_v61 = vrot.slane %v1943_v56, 1  ;;  %v3496_v37 = vsel %vm3463_vm8, %v3493_v6, %v3495_v5 }
 0x19a   : > { %4832 = vmatmul.mubr.msk.bf16.gmra.mrb[20].mxu1 %vm602_vm4, %v1527_v55  ;;  %v3485_v55 = vrot.slane %v6274_v54, 3 }
 0x19b   : > { %4835 = vmatprep.mubr.msk.bf16.mxu1 %vm602_vm4, %v1529_v58  ;;  %v1948_v58 = vrot.slane %v1946_v36, 2 }
 0x19c   : > { %5002 = vmatmul.mubr.msk.bf16.vlgmr.msra.gmra.mrb[0].mxu0 %vm602_vm4, %v3468_v63  ;;  %v1941_v63 = vsel %vm1816_vm3, %v1931_v32, %v1940_v14  ;;  %v3486_v33 = vsel %vm3463_vm8, %v3483_v17, %v3485_v55 }
 0x19d   : > { %5005 = vmatprep.mubr.msk.bf16.mxu0 %vm602_vm4, %v3470_v0  ;;  %v1957_v0 = vrot.slane %v1955_v7, 2  ;;  %v1949_v44 = vor.u32 %v1948_v58, %v1945_v61  ;;  %v6622_v61 = vld [vmem:[#allocation4] ss:$0 sm:$0xff] }
 0x19f   : > { %v1958_v54 = vor.u32 %v1957_v0, %v1954_v52 }
 0x1a1   : > { %v1959_v59 = vsel %vm1816_vm3, %v1949_v44, %v1958_v54 }
 0x1a2   : > { %4836 = vmatmul.mubr.msk.bf16.gmra.mrb[24].mxu1 %vm602_vm4, %v1531_v51  ;;  %v1970_v51 = vshrl.u32 %v6161_v30, 16 }
 0x1a3   : > { %4839 = vmatprep.mubr.msk.bf16.mxu1 %vm602_vm4, %v1533_v47  ;;  %v3487_v47 = vrot.slane %v6286_v19, 3  ;;  %v1979_v19 = vshrl.u32 %v6175_v39, 16  ;;  %v3494_v39 = vsel %vm3463_vm8, %v3491_v60, %v3493_v6 }
 0x1a4   : > { %5006 = vmatmul.mubr.msk.bf16.gmra.mrb[4].mxu0 %vm602_vm4, %v3472_v48  ;;  %v1950_v48 = vsel %vm1816_vm3, %v1940_v14, %v1949_v44  ;;  %v1972_v57 = vrot.slane %v1970_v51, 1 }
 0x1a5   : > { %5009 = vmatprep.mubr.msk.bf16.mxu0 %vm602_vm4, %v3474_v8  ;;  %v3489_v8 = vrot.slane %v6293_v12, 3  ;;  %v3488_v30 = vsel %vm3463_vm8, %v3485_v55, %v3487_v47  ;;  %v1981_v11 = vrot.slane %v1979_v19, 1 }
 0x1a6   : > { %v1976_v12 = vor.u32 %v1975_v10, %v1972_v57 }
 0x1a7   : > { %v3490_v9 = vsel %vm3463_vm8, %v3487_v47, %v3489_v8  ;;  %v3492_v35 = vsel %vm3463_vm8, %v3489_v8, %v3491_v60 }
 0x1aa   : > { %4840 = vmatmul.mubr.msk.bf16.gmra.mrb[28].mxu1 %vm602_vm4, %v1535_v24  ;;  %v1967_v24 = vor.u32 %v1966_v20, %v1963_v31 }
 0x1ab   : > { %4843 = vmatprep.mubr.msk.bf16.mxu1 %vm602_vm4, %v1537_v26 }
 0x1ac   : > { %5010 = vmatmul.mubr.msk.bf16.gmra.mrb[8].mxu0 %vm602_vm4, %v3476_v13  ;;  %v1968_v26 = vsel %vm1816_vm3, %v1958_v54, %v1967_v24  ;;  %v1984_v13 = vrot.slane %v1982_v53, 2 }
 0x1ad   : > { %5013 = vmatprep.mubr.msk.bf16.mxu0 %vm602_vm4, %v3478_v42  ;;  %v1977_v42 = vsel %vm1816_vm3, %v1967_v24, %v1976_v12 }
 0x1ae   : > { %v1985_v2 = vor.u32 %v1984_v13, %v1981_v11 }
 0x1b0   : > { %v1986_v46 = vsel %vm1816_vm3, %v1976_v12, %v1985_v2 }
 0x1b2   : > { %4844 = vmatmul.mubr.msk.bf16.gmra.mrb[32].mxu1 %vm602_vm4, %v1539_v3 }
 0x1b3   : > { %4869 = vmatprep.mubr.msk.bf16.mxu1 %vm602_vm4, %v1923_v62 }
 0x1b4   : > { %5014 = vmatmul.mubr.msk.bf16.gmra.mrb[12].mxu0 %vm602_vm4, %v3480_v29 }
 0x1b5   : > { %5017 = vmatprep.mubr.msk.bf16.mxu0 %vm602_vm4, %v3482_v25 }
 0x1ba   : > { %4870 = vmatmul.mubr.msk.bf16.vlgmr.msra.gmra.mrb[20].mxu1 %vm602_vm4, %v1932_v45 }
 0x1bb   : > { %4873 = vmatprep.mubr.msk.bf16.mxu1 %vm602_vm4, %v1941_v63 }
 0x1bc   : > { %5018 = vmatmul.mubr.msk.bf16.gmra.mrb[16].mxu0 %vm602_vm4, %v3484_v22 }
 0x1bd   : > { %5021 = vmatprep.mubr.msk.bf16.mxu0 %vm602_vm4, %v3486_v33 }
 0x1c2   : > { %4874 = vmatmul.mubr.msk.bf16.gmra.mrb[24].mxu1 %vm602_vm4, %v1950_v48 }
 0x1c3   : > { %4877 = vmatprep.mubr.msk.bf16.mxu1 %vm602_vm4, %v1959_v59 }
 0x1c4   : > { %5022 = vmatmul.mubr.msk.bf16.gmra.mrb[20].mxu0 %vm602_vm4, %v3488_v30 }
 0x1c5   : > { %5025 = vmatprep.mubr.msk.bf16.mxu0 %vm602_vm4, %v3490_v9 }
 0x1ca   : > { %4878 = vmatmul.mubr.msk.bf16.gmra.mrb[28].mxu1 %vm602_vm4, %v1968_v26 }
 0x1cb   : > { %4881 = vmatprep.mubr.msk.bf16.mxu1 %vm602_vm4, %v1977_v42 }
 0x1cc   : > { %5026 = vmatmul.mubr.msk.bf16.gmra.mrb[24].mxu0 %vm602_vm4, %v3492_v35 }
 0x1cd   : > { %5029 = vmatprep.mubr.msk.bf16.mxu0 %vm602_vm4, %v3494_v39 }
 0x1d2   : > { %4882 = vmatmul.mubr.msk.bf16.gmra.mrb[32].mxu1 %vm602_vm4, %v1986_v46 }
 0x1d4   : > { %5030 = vmatmul.mubr.msk.bf16.gmra.mrb[28].mxu0 %vm602_vm4, %v3496_v37 }
 0x1d5   : > { %5033 = vmatprep.mubr.msk.bf16.mxu0 %vm602_vm4, %v3498_v21 }
 0x1dc   : > { %5034 = vmatmul.mubr.msk.bf16.gmra.mrb[32].mxu0 %vm602_vm4, %v3500_v16 }
 0x245   : > { %v4813_v28 = vpop.f32.mrb[0].mxu1 }
 0x246   : > { %v1631_v3 = vpop.f32.mrb[1].mxu1 }
 0x247   : > { %v4814_v27 = vpop.f32.mrb[2].mxu1 }
 0x248   : > { %v1634_v34 = vpop.f32.mrb[3].mxu1 }
 0x24d   : > { %v4817_v40 = vpop.f32.mrb[4].mxu1 }
 0x24e   : > { %v1647_v15 = vpop.f32.mrb[5].mxu1 }
 0x24f   : > { %v4818_v62 = vpop.f32.mrb[6].mxu1 }
 0x250   : > { %v1650_v23 = vpop.f32.mrb[7].mxu1 }
 0x255   : > { %v6598_v1 = vpop.f32.mrb[8].mxu1 }
 0x256   : > { %v6600_v29 = vpop.f32.mrb[9].mxu1 }
 0x257   : > { %v6602_v25 = vpop.f32.mrb[10].mxu1 }
 0x258   : > { %v6604_v18 = vpop.f32.mrb[11].mxu1 }
 0x25d   : > { %v6606_v32 = vpop.f32.mrb[12].mxu1 }
 0x25e   : > { %v6608_v56 = vpop.f32.mrb[13].mxu1 }
 0x25f   : > { %v6610_v36 = vpop.f32.mrb[14].mxu1 }
 0x260   : > { %v6612_v14 = vpop.f32.mrb[15].mxu1 }
 0x265   : > { %v6614_v50 = vpop.f32.mrb[16].mxu1 }
 0x266   : > { %v6616_v7 = vpop.f32.mrb[17].mxu1 }
 0x267   : > { %v6618_v17 = vpop.f32.mrb[18].mxu1 }
 0x268   : > { %v6620_v45 = vpop.f32.mrb[19].mxu1 }
 0x26f   : > { %v5003_v55 = vpop.f32.mrb[0].mxu0 }
 0x270   : > { %v5039_v58 = vadd.f32 %v5003_v55, %v4813_v28  ;;  %v3592_v63 = vpop.f32.mrb[1].mxu0 }
 0x271   : > { %v5040_v52 = vadd.f32 %v3592_v63, %v1631_v3  ;;  %v5004_v0 = vpop.f32.mrb[2].mxu0 }
 0x272   : > { %v3780_v22 = vadd.f32 %v5039_v58, %v6622_v61  ;;  %v5041_v33 = vadd.f32 %v5004_v0, %v4814_v27  ;;  %v3595_v44 = vpop.f32.mrb[3].mxu0 }
 0x273   : > { %v3778_v41 = vadd.f32 %v5040_v52, %v6622_v61  ;;  %v5042_v49 = vadd.f32 %v3595_v44, %v1634_v34 }
 0x274   : > { %vm3816_vm9 = vcmp.gt.f32.partialorder %v3780_v22, 0.0  ;;  %v3852_v54 = vmul.f32 0.2, %v3780_v22  ;;  %v3781_v51 = vadd.f32 %v5041_v33, %v6622_v61 }
 0x275   : > { %vm3814_vm10 = vcmp.gt.f32.partialorder %v3778_v41, 0.0  ;;  %v3850_v43 = vmul.f32 0.2, %v3778_v41  ;;  %v3779_v47 = vadd.f32 %v5042_v49, %v6622_v61 }
 0x276   : > { %v3888_v48 = vsel %vm3816_vm9, %v3780_v22, %v3852_v54  ;;  %vm3817_vm12 = vcmp.gt.f32.partialorder %v3781_v51, 0.0  ;;  %v3853_v8 = vmul.f32 0.2, %v3781_v51 }
 0x277   : > { %v4490_v31 = vpack.c.bf16 %v3888_v48, %v3888_v48  ;;  %v3886_v20 = vsel %vm3814_vm10, %v3778_v41, %v3850_v43  ;;  %vm3815_vm13 = vcmp.gt.f32.partialorder %v3779_v47, 0.0  ;;  %v3851_v59 = vmul.f32 0.2, %v3779_v47  ;;  %v5007_v57 = vpop.f32.mrb[4].mxu0 }
 0x278   : > { %v4488_v10 = vpack.c.bf16 %v3886_v20, %v3886_v20  ;;  %v3889_v30 = vsel %vm3817_vm12, %v3781_v51, %v3853_v8  ;;  %v5043_v9 = vadd.f32 %v5007_v57, %v4817_v40  ;;  %v3608_v24 = vpop.f32.mrb[5].mxu0 }
 0x279   : > { %4069 = vst.msk [vmem:[%s6632_s20 + $0x8] sm:$0xf] %vm4066_vm11, %v4490_v31  ;;  %v4491_v19 = vpack.c.bf16 %v3889_v30, %v3889_v30  ;;  %v3887_v53 = vsel %vm3815_vm13, %v3779_v47, %v3851_v59  ;;  %v5044_v12 = vadd.f32 %v3608_v24, %v1647_v15  ;;  %v5008_v60 = vpop.f32.mrb[6].mxu0 }
 0x27a   : > { %4067 = vst.msk [vmem:[%s6632_s20] sm:$0xf] %vm4066_vm11, %v4488_v10  ;;  %v4489_v26 = vpack.c.bf16 %v3887_v53, %v3887_v53  ;;  %v3784_v6 = vadd.f32 %v5043_v9, %v6622_v61  ;;  %v5045_v11 = vadd.f32 %v5008_v60, %v4818_v62  ;;  %v3611_v13 = vpop.f32.mrb[7].mxu0 }
 0x27b   : > { %4070 = vst.msk [vmem:[%s6632_s20 + $0xc] sm:$0xf] %vm4066_vm11, %v4491_v19  ;;  %v3782_v42 = vadd.f32 %v5044_v12, %v6622_v61  ;;  %v5046_v35 = vadd.f32 %v3611_v13, %v1650_v23 }
 0x27c   : > { %4068 = vst.msk [vmem:[%s6632_s20 + $0x4] sm:$0xf] %vm4066_vm11, %v4489_v26  ;;  %vm3820_vm14 = vcmp.gt.f32.partialorder %v3784_v6, 0.0  ;;  %v3856_v39 = vmul.f32 0.2, %v3784_v6  ;;  %v3785_v2 = vadd.f32 %v5045_v11, %v6622_v61 }
 0x27d   : > { %vm3818_vm15 = vcmp.gt.f32.partialorder %v3782_v42, 0.0  ;;  %v3854_v5 = vmul.f32 0.2, %v3782_v42  ;;  %v3783_v46 = vadd.f32 %v5046_v35, %v6622_v61 }
 0x27e   : > { %v3892_v38 = vsel %vm3820_vm14, %v3784_v6, %v3856_v39  ;;  %vm3821_vm0 = vcmp.gt.f32.partialorder %v3785_v2, 0.0  ;;  %v3857_v37 = vmul.f32 0.2, %v3785_v2 }
 0x27f   : > { %v4494_v21 = vpack.c.bf16 %v3892_v38, %v3892_v38  ;;  %v3890_v4 = vsel %vm3818_vm15, %v3782_v42, %v3854_v5  ;;  %vm3819_vm1 = vcmp.gt.f32.partialorder %v3783_v46, 0.0  ;;  %v3855_v16 = vmul.f32 0.2, %v3783_v46  ;;  %v5011_v28 = vpop.f32.mrb[8].mxu0 }
 0x280   : > { %v4492_v3 = vpack.c.bf16 %v3890_v4, %v3890_v4  ;;  %v3893_v27 = vsel %vm3821_vm0, %v3785_v2, %v3857_v37  ;;  %v5047_v34 = vadd.f32 %v5011_v28, %v6598_v1  ;;  %v3624_v40 = vpop.f32.mrb[9].mxu0 }
 0x281   : > { %4073 = vst.msk [vmem:[%s6632_s20 + $0x18] sm:$0xf] %vm4066_vm11, %v4494_v21  ;;  %v4495_v15 = vpack.c.bf16 %v3893_v27, %v3893_v27  ;;  %v3891_v62 = vsel %vm3819_vm1, %v3783_v46, %v3855_v16  ;;  %v5048_v23 = vadd.f32 %v3624_v40, %v6600_v29  ;;  %v5012_v55 = vpop.f32.mrb[10].mxu0 }
 0x282   : > { %4071 = vst.msk [vmem:[%s6632_s20 + $0x10] sm:$0xf] %vm4066_vm11, %v4492_v3  ;;  %v4493_v58 = vpack.c.bf16 %v3891_v62, %v3891_v62  ;;  %v3788_v63 = vadd.f32 %v5047_v34, %v6622_v61  ;;  %v5049_v52 = vadd.f32 %v5012_v55, %v6602_v25  ;;  %v3627_v0 = vpop.f32.mrb[11].mxu0 }
 0x283   : > { %4074 = vst.msk [vmem:[%s6632_s20 + $0x1c] sm:$0xf] %vm4066_vm11, %v4495_v15  ;;  %v3786_v1 = vadd.f32 %v5048_v23, %v6622_v61  ;;  %v5050_v22 = vadd.f32 %v3627_v0, %v6604_v18 }
 0x284   : > { %4072 = vst.msk [vmem:[%s6632_s20 + $0x14] sm:$0xf] %vm4066_vm11, %v4493_v58  ;;  %vm3824_vm2 = vcmp.gt.f32.partialorder %v3788_v63, 0.0  ;;  %v3860_v33 = vmul.f32 0.2, %v3788_v63  ;;  %v3789_v29 = vadd.f32 %v5049_v52, %v6622_v61 }
 0x285   : > { %vm3822_vm3 = vcmp.gt.f32.partialorder %v3786_v1, 0.0  ;;  %v3858_v44 = vmul.f32 0.2, %v3786_v1  ;;  %v3787_v41 = vadd.f32 %v5050_v22, %v6622_v61 }
 0x286   : > { %v3896_v49 = vsel %vm3824_vm2, %v3788_v63, %v3860_v33  ;;  %vm3825_vm4 = vcmp.gt.f32.partialorder %v3789_v29, 0.0  ;;  %v3861_v25 = vmul.f32 0.2, %v3789_v29 }
 0x287   : > { %v4498_v54 = vpack.c.bf16 %v3896_v49, %v3896_v49  ;;  %v3894_v51 = vsel %vm3822_vm3, %v3786_v1, %v3858_v44  ;;  %vm3823_vm5 = vcmp.gt.f32.partialorder %v3787_v41, 0.0  ;;  %v3859_v43 = vmul.f32 0.2, %v3787_v41  ;;  %v5015_v18 = vpop.f32.mrb[12].mxu0 }
 0x288   : > { %v4496_v47 = vpack.c.bf16 %v3894_v51, %v3894_v51  ;;  %v3897_v48 = vsel %vm3825_vm4, %v3789_v29, %v3861_v25  ;;  %v5051_v8 = vadd.f32 %v5015_v18, %v6606_v32  ;;  %v3640_v31 = vpop.f32.mrb[13].mxu0 }
 0x289   : > { %4077 = vst.msk [vmem:[%s6632_s20 + $0x28] sm:$0xf] %vm4066_vm11, %v4498_v54  ;;  %v4499_v20 = vpack.c.bf16 %v3897_v48, %v3897_v48  ;;  %v3895_v59 = vsel %vm3823_vm5, %v3787_v41, %v3859_v43  ;;  %v5052_v57 = vadd.f32 %v3640_v31, %v6608_v56  ;;  %v5016_v10 = vpop.f32.mrb[14].mxu0 }
 0x28a   : > { %4075 = vst.msk [vmem:[%s6632_s20 + $0x20] sm:$0xf] %vm4066_vm11, %v4496_v47  ;;  %v4497_v30 = vpack.c.bf16 %v3895_v59, %v3895_v59  ;;  %v3792_v9 = vadd.f32 %v5051_v8, %v6622_v61  ;;  %v5053_v24 = vadd.f32 %v5016_v10, %v6610_v36  ;;  %v3643_v19 = vpop.f32.mrb[15].mxu0 }
 0x28b   : > { %4078 = vst.msk [vmem:[%s6632_s20 + $0x2c] sm:$0xf] %vm4066_vm11, %v4499_v20  ;;  %v3790_v32 = vadd.f32 %v5052_v57, %v6622_v61  ;;  %v5054_v53 = vadd.f32 %v3643_v19, %v6612_v14 }
 0x28c   : > { %4076 = vst.msk [vmem:[%s6632_s20 + $0x24] sm:$0xf] %vm4066_vm11, %v4497_v30  ;;  %vm3828_vm6 = vcmp.gt.f32.partialorder %v3792_v9, 0.0  ;;  %v3864_v12 = vmul.f32 0.2, %v3792_v9  ;;  %v3793_v56 = vadd.f32 %v5053_v24, %v6622_v61 }
 0x28d   : > { %v4871_v60 = vpop.f32.mrb[20].mxu1  ;;  %vm3826_vm7 = vcmp.gt.f32.partialorder %v3790_v32, 0.0  ;;  %v3862_v26 = vmul.f32 0.2, %v3790_v32  ;;  %v3791_v6 = vadd.f32 %v5054_v53, %v6622_v61 }
 0x28e   : > { %v2158_v36 = vpop.f32.mrb[21].mxu1  ;;  %v3900_v11 = vsel %vm3828_vm6, %v3792_v9, %v3864_v12  ;;  %vm3829_vm8 = vcmp.gt.f32.partialorder %v3793_v56, 0.0  ;;  %v3865_v13 = vmul.f32 0.2, %v3793_v56 }
 0x28f   : > { %v4872_v42 = vpop.f32.mrb[22].mxu1  ;;  %v4502_v35 = vpack.c.bf16 %v3900_v11, %v3900_v11  ;;  %v3898_v14 = vsel %vm3826_vm7, %v3790_v32, %v3862_v26  ;;  %vm3827_vm9 = vcmp.gt.f32.partialorder %v3791_v6, 0.0  ;;  %v3863_v39 = vmul.f32 0.2, %v3791_v6  ;;  %v5019_v2 = vpop.f32.mrb[16].mxu0 }
 0x290   : > { %v2161_v5 = vpop.f32.mrb[23].mxu1  ;;  %v4500_v46 = vpack.c.bf16 %v3898_v14, %v3898_v14  ;;  %v3901_v38 = vsel %vm3829_vm8, %v3793_v56, %v3865_v13  ;;  %v5055_v37 = vadd.f32 %v5019_v2, %v6614_v50  ;;  %v3656_v21 = vpop.f32.mrb[17].mxu0 }
 0x291   : > { %4081 = vst.msk [vmem:[%s6632_s20 + $0x38] sm:$0xf] %vm4066_vm11, %v4502_v35  ;;  %v4503_v4 = vpack.c.bf16 %v3901_v38, %v3901_v38  ;;  %v3899_v16 = vsel %vm3827_vm9, %v3791_v6, %v3863_v39  ;;  %v5056_v28 = vadd.f32 %v3656_v21, %v6616_v7  ;;  %v5020_v3 = vpop.f32.mrb[18].mxu0 }
 0x292   : > { %4079 = vst.msk [vmem:[%s6632_s20 + $0x30] sm:$0xf] %vm4066_vm11, %v4500_v46  ;;  %v4501_v27 = vpack.c.bf16 %v3899_v16, %v3899_v16  ;;  %v3796_v34 = vadd.f32 %v5055_v37, %v6622_v61  ;;  %v5057_v40 = vadd.f32 %v5020_v3, %v6618_v17  ;;  %v3659_v15 = vpop.f32.mrb[19].mxu0 }
 0x293   : > { %4082 = vst.msk [vmem:[%s6632_s20 + $0x3c] sm:$0xf] %vm4066_vm11, %v4503_v4  ;;  %v3794_v50 = vadd.f32 %v5056_v28, %v6622_v61  ;;  %v5058_v62 = vadd.f32 %v3659_v15, %v6620_v45 }
 0x294   : > { %4080 = vst.msk [vmem:[%s6632_s20 + $0x34] sm:$0xf] %vm4066_vm11, %v4501_v27  ;;  %vm3832_vm10 = vcmp.gt.f32.partialorder %v3796_v34, 0.0  ;;  %v3868_v23 = vmul.f32 0.2, %v3796_v34  ;;  %v3797_v7 = vadd.f32 %v5057_v40, %v6622_v61 }
 0x295   : > { %v4875_v55 = vpop.f32.mrb[24].mxu1  ;;  %vm3830_vm12 = vcmp.gt.f32.partialorder %v3794_v50, 0.0  ;;  %v3866_v58 = vmul.f32 0.2, %v3794_v50  ;;  %v3795_v63 = vadd.f32 %v5058_v62, %v6622_v61 }
 0x296   : > { %v2174_v17 = vpop.f32.mrb[25].mxu1  ;;  %v3904_v52 = vsel %vm3832_vm10, %v3796_v34, %v3868_v23  ;;  %vm3833_vm13 = vcmp.gt.f32.partialorder %v3797_v7, 0.0  ;;  %v3869_v0 = vmul.f32 0.2, %v3797_v7 }
 0x297   : > { %v4876_v1 = vpop.f32.mrb[26].mxu1  ;;  %v4506_v22 = vpack.c.bf16 %v3904_v52, %v3904_v52  ;;  %v3902_v45 = vsel %vm3830_vm12, %v3794_v50, %v3866_v58  ;;  %vm3831_vm14 = vcmp.gt.f32.partialorder %v3795_v63, 0.0  ;;  %v3867_v33 = vmul.f32 0.2, %v3795_v63  ;;  %v5023_v29 = vpop.f32.mrb[20].mxu0 }
 0x298   : > { %v2177_v44 = vpop.f32.mrb[27].mxu1  ;;  %v4504_v41 = vpack.c.bf16 %v3902_v45, %v3902_v45  ;;  %v3905_v49 = vsel %vm3833_vm13, %v3797_v7, %v3869_v0  ;;  %v5059_v25 = vadd.f32 %v5023_v29, %v4871_v60  ;;  %v3672_v54 = vpop.f32.mrb[21].mxu0 }
 0x299   : > { %4085 = vst.msk [vmem:[%s6632_s20 + $0x48] sm:$0xf] %vm4066_vm11, %v4506_v22  ;;  %v4507_v51 = vpack.c.bf16 %v3905_v49, %v3905_v49  ;;  %v3903_v43 = vsel %vm3831_vm14, %v3795_v63, %v3867_v33  ;;  %v5060_v18 = vadd.f32 %v3672_v54, %v2158_v36  ;;  %v5024_v47 = vpop.f32.mrb[22].mxu0 }
 0x29a   : > { %4083 = vst.msk [vmem:[%s6632_s20 + $0x40] sm:$0xf] %vm4066_vm11, %v4504_v41  ;;  %v4505_v48 = vpack.c.bf16 %v3903_v43, %v3903_v43  ;;  %v3800_v8 = vadd.f32 %v5059_v25, %v6622_v61  ;;  %v5061_v31 = vadd.f32 %v5024_v47, %v4872_v42  ;;  %v3675_v20 = vpop.f32.mrb[23].mxu0 }
 0x29b   : > { %4086 = vst.msk [vmem:[%s6632_s20 + $0x4c] sm:$0xf] %vm4066_vm11, %v4507_v51  ;;  %v3798_v59 = vadd.f32 %v5060_v18, %v6622_v61  ;;  %v5062_v57 = vadd.f32 %v3675_v20, %v2161_v5 }
 0x29c   : > { %4084 = vst.msk [vmem:[%s6632_s20 + $0x44] sm:$0xf] %vm4066_vm11, %v4505_v48  ;;  %vm3836_vm15 = vcmp.gt.f32.partialorder %v3800_v8, 0.0  ;;  %v3872_v10 = vmul.f32 0.2, %v3800_v8  ;;  %v3801_v30 = vadd.f32 %v5061_v31, %v6622_v61 }
 0x29d   : > { %v4879_v9 = vpop.f32.mrb[28].mxu1  ;;  %vm3834_vm0 = vcmp.gt.f32.partialorder %v3798_v59, 0.0  ;;  %v3870_v24 = vmul.f32 0.2, %v3798_v59  ;;  %v3799_v19 = vadd.f32 %v5062_v57, %v6622_v61 }
 0x29e   : > { %v2190_v32 = vpop.f32.mrb[29].mxu1  ;;  %v3908_v53 = vsel %vm3836_vm15, %v3800_v8, %v3872_v10  ;;  %vm3837_vm1 = vcmp.gt.f32.partialorder %v3801_v30, 0.0  ;;  %v3873_v12 = vmul.f32 0.2, %v3801_v30 }
 0x29f   : > { %v4880_v56 = vpop.f32.mrb[30].mxu1  ;;  %v4510_v60 = vpack.c.bf16 %v3908_v53, %v3908_v53  ;;  %v3906_v26 = vsel %vm3834_vm0, %v3798_v59, %v3870_v24  ;;  %vm3835_vm2 = vcmp.gt.f32.partialorder %v3799_v19, 0.0  ;;  %v3871_v6 = vmul.f32 0.2, %v3799_v19  ;;  %v5027_v36 = vpop.f32.mrb[24].mxu0 }
 0x2a0   : > { %v2193_v11 = vpop.f32.mrb[31].mxu1  ;;  %v4508_v13 = vpack.c.bf16 %v3906_v26, %v3906_v26  ;;  %v3909_v42 = vsel %vm3837_vm1, %v3801_v30, %v3873_v12  ;;  %v5063_v35 = vadd.f32 %v5027_v36, %v4875_v55  ;;  %v3688_v14 = vpop.f32.mrb[25].mxu0 }
 0x2a1   : > { %4089 = vst.msk [vmem:[%s6632_s20 + $0x58] sm:$0xf] %vm4066_vm11, %v4510_v60  ;;  %v4511_v39 = vpack.c.bf16 %v3909_v42, %v3909_v42  ;;  %v3907_v2 = vsel %vm3835_vm2, %v3799_v19, %v3871_v6  ;;  %v5064_v5 = vadd.f32 %v3688_v14, %v2174_v17  ;;  %v5028_v46 = vpop.f32.mrb[26].mxu0 }
 0x2a2   : > { %4087 = vst.msk [vmem:[%s6632_s20 + $0x50] sm:$0xf] %vm4066_vm11, %v4508_v13  ;;  %v4509_v38 = vpack.c.bf16 %v3907_v2, %v3907_v2  ;;  %v3804_v37 = vadd.f32 %v5063_v35, %v6622_v61  ;;  %v5065_v21 = vadd.f32 %v5028_v46, %v4876_v1  ;;  %v3691_v4 = vpop.f32.mrb[27].mxu0 }
 0x2a3   : > { %4090 = vst.msk [vmem:[%s6632_s20 + $0x5c] sm:$0xf] %vm4066_vm11, %v4511_v39  ;;  %v3802_v16 = vadd.f32 %v5064_v5, %v6622_v61  ;;  %v5066_v28 = vadd.f32 %v3691_v4, %v2177_v44 }
 0x2a4   : > { %4088 = vst.msk [vmem:[%s6632_s20 + $0x54] sm:$0xf] %vm4066_vm11, %v4509_v38  ;;  %vm3840_vm3 = vcmp.gt.f32.partialorder %v3804_v37, 0.0  ;;  %v3876_v3 = vmul.f32 0.2, %v3804_v37  ;;  %v3805_v27 = vadd.f32 %v5065_v21, %v6622_v61 }
 0x2a5   : > { %v4883_v34 = vpop.f32.mrb[32].mxu1  ;;  %vm3838_vm4 = vcmp.gt.f32.partialorder %v3802_v16, 0.0  ;;  %v3874_v40 = vmul.f32 0.2, %v3802_v16  ;;  %v3803_v15 = vadd.f32 %v5066_v28, %v6622_v61 }
 0x2a6   : > { %v2206_v50 = vpop.f32.mrb[33].mxu1  ;;  %v3912_v62 = vsel %vm3840_vm3, %v3804_v37, %v3876_v3  ;;  %vm3841_vm5 = vcmp.gt.f32.partialorder %v3805_v27, 0.0  ;;  %v3877_v23 = vmul.f32 0.2, %v3805_v27 }
 0x2a7   : > { %v4884_v7 = vpop.f32.mrb[34].mxu1  ;;  %v4514_v55 = vpack.c.bf16 %v3912_v62, %v3912_v62  ;;  %v3910_v58 = vsel %vm3838_vm4, %v3802_v16, %v3874_v40  ;;  %vm3839_vm6 = vcmp.gt.f32.partialorder %v3803_v15, 0.0  ;;  %v3875_v63 = vmul.f32 0.2, %v3803_v15  ;;  %v5031_v17 = vpop.f32.mrb[28].mxu0 }
 0x2a8   : > { %v2209_v52 = vpop.f32.mrb[35].mxu1  ;;  %v4512_v0 = vpack.c.bf16 %v3910_v58, %v3910_v58  ;;  %v3913_v1 = vsel %vm3841_vm5, %v3805_v27, %v3877_v23  ;;  %v5067_v22 = vadd.f32 %v5031_v17, %v4879_v9  ;;  %v3704_v45 = vpop.f32.mrb[29].mxu0 }
 0x2a9   : > { %4093 = vst.msk [vmem:[%s6632_s20 + $0x68] sm:$0xf] %vm4066_vm11, %v4514_v55  ;;  %v4515_v33 = vpack.c.bf16 %v3913_v1, %v3913_v1  ;;  %v3911_v29 = vsel %vm3839_vm6, %v3803_v15, %v3875_v63  ;;  %v5068_v44 = vadd.f32 %v3704_v45, %v2190_v32  ;;  %v5032_v41 = vpop.f32.mrb[30].mxu0 }
 0x2aa   : > { %4091 = vst.msk [vmem:[%s6632_s20 + $0x60] sm:$0xf] %vm4066_vm11, %v4512_v0  ;;  %v4513_v49 = vpack.c.bf16 %v3911_v29, %v3911_v29  ;;  %v3808_v25 = vadd.f32 %v5067_v22, %v6622_v61  ;;  %v5069_v54 = vadd.f32 %v5032_v41, %v4880_v56  ;;  %v3707_v51 = vpop.f32.mrb[31].mxu0 }
 0x2ab   : > { %4094 = vst.msk [vmem:[%s6632_s20 + $0x6c] sm:$0xf] %vm4066_vm11, %v4515_v33  ;;  %v3806_v43 = vadd.f32 %v5068_v44, %v6622_v61  ;;  %v5070_v18 = vadd.f32 %v3707_v51, %v2193_v11 }
 0x2ac   : > { %4092 = vst.msk [vmem:[%s6632_s20 + $0x64] sm:$0xf] %vm4066_vm11, %v4513_v49  ;;  %vm3844_vm7 = vcmp.gt.f32.partialorder %v3808_v25, 0.0  ;;  %v3880_v47 = vmul.f32 0.2, %v3808_v25  ;;  %v3809_v48 = vadd.f32 %v5069_v54, %v6622_v61 }
 0x2ad   : > { %vm3842_vm8 = vcmp.gt.f32.partialorder %v3806_v43, 0.0  ;;  %v3878_v8 = vmul.f32 0.2, %v3806_v43  ;;  %v3807_v31 = vadd.f32 %v5070_v18, %v6622_v61 }
 0x2ae   : > { %v3916_v20 = vsel %vm3844_vm7, %v3808_v25, %v3880_v47  ;;  %vm3845_vm9 = vcmp.gt.f32.partialorder %v3809_v48, 0.0  ;;  %v3881_v59 = vmul.f32 0.2, %v3809_v48 }
 0x2af   : > { %v4518_v57 = vpack.c.bf16 %v3916_v20, %v3916_v20  ;;  %v3914_v10 = vsel %vm3842_vm8, %v3806_v43, %v3878_v8  ;;  %vm3843_vm10 = vcmp.gt.f32.partialorder %v3807_v31, 0.0  ;;  %v3879_v30 = vmul.f32 0.2, %v3807_v31  ;;  %v5035_v9 = vpop.f32.mrb[32].mxu0 }
 0x2b0   : > { %v4516_v24 = vpack.c.bf16 %v3914_v10, %v3914_v10  ;;  %v3917_v19 = vsel %vm3845_vm9, %v3809_v48, %v3881_v59  ;;  %v5071_v32 = vadd.f32 %v5035_v9, %v4883_v34  ;;  %v3720_v53 = vpop.f32.mrb[33].mxu0 }
 0x2b1   : > { %4097 = vst.msk [vmem:[%s6632_s20 + $0x78] sm:$0xf] %vm4066_vm11, %v4518_v57  ;;  %v4519_v12 = vpack.c.bf16 %v3917_v19, %v3917_v19  ;;  %v3915_v56 = vsel %vm3843_vm10, %v3807_v31, %v3879_v30  ;;  %v5072_v60 = vadd.f32 %v3720_v53, %v2206_v50  ;;  %v5036_v26 = vpop.f32.mrb[34].mxu0 }
 0x2b2   : > { %4095 = vst.msk [vmem:[%s6632_s20 + $0x70] sm:$0xf] %vm4066_vm11, %v4516_v24  ;;  %v4517_v6 = vpack.c.bf16 %v3915_v56, %v3915_v56  ;;  %v3812_v36 = vadd.f32 %v5071_v32, %v6622_v61  ;;  %v5073_v11 = vadd.f32 %v5036_v26, %v4884_v7  ;;  %v3723_v13 = vpop.f32.mrb[35].mxu0 }
 0x2b3   : > { %4098 = vst.msk [vmem:[%s6632_s20 + $0x7c] sm:$0xf] %vm4066_vm11, %v4519_v12  ;;  %v3810_v42 = vadd.f32 %v5072_v60, %v6622_v61  ;;  %v5074_v35 = vadd.f32 %v3723_v13, %v2209_v52 }
 0x2b4   : > { %4096 = vst.msk [vmem:[%s6632_s20 + $0x74] sm:$0xf] %vm4066_vm11, %v4517_v6  ;;  %vm3848_vm12 = vcmp.gt.f32.partialorder %v3812_v36, 0.0  ;;  %v3884_v14 = vmul.f32 0.2, %v3812_v36  ;;  %v3813_v39 = vadd.f32 %v5073_v11, %v6622_v61 }
 0x2b5   : > { %vm3846_vm13 = vcmp.gt.f32.partialorder %v3810_v42, 0.0  ;;  %v3882_v2 = vmul.f32 0.2, %v3810_v42  ;;  %v3811_v5 = vadd.f32 %v5074_v35, %v6622_v61 }
 0x2b6   : > { %v3920_v46 = vsel %vm3848_vm12, %v3812_v36, %v3884_v14  ;;  %vm3849_vm14 = vcmp.gt.f32.partialorder %v3813_v39, 0.0  ;;  %v3885_v38 = vmul.f32 0.2, %v3813_v39 }
 0x2b7   : > { %v4522_v37 = vpack.c.bf16 %v3920_v46, %v3920_v46  ;;  %v3918_v21 = vsel %vm3846_vm13, %v3810_v42, %v3882_v2  ;;  %vm3847_vm15 = vcmp.gt.f32.partialorder %v3811_v5, 0.0  ;;  %v3883_v4 = vmul.f32 0.2, %v3811_v5 }
 0x2b8   : > { %v4520_v16 = vpack.c.bf16 %v3918_v21, %v3918_v21  ;;  %v3921_v28 = vsel %vm3849_vm14, %v3813_v39, %v3885_v38 }
 0x2b9   : > { %4101 = vst.msk [vmem:[%s6632_s20 + $0x88] sm:$0xf] %vm4066_vm11, %v4522_v37  ;;  %v4523_v3 = vpack.c.bf16 %v3921_v28, %v3921_v28  ;;  %v3919_v27 = vsel %vm3847_vm15, %v3811_v5, %v3883_v4 }
 0x2ba   : > { %4099 = vst.msk [vmem:[%s6632_s20 + $0x80] sm:$0xf] %vm4066_vm11, %v4520_v16  ;;  %v4521_v34 = vpack.c.bf16 %v3919_v27, %v3919_v27 }
 0x2bb   : > { %4102 = vst.msk [vmem:[%s6632_s20 + $0x8c] sm:$0xf] %vm4066_vm11, %v4523_v3 }
 0x2bc   : > { %4100 = vst.msk [vmem:[%s6632_s20 + $0x84] sm:$0xf] %vm4066_vm11, %v4521_v34 }
 0x2bd PF: > { %s19_s21 = sadd.s32 1, %s5623_s21  }
 0x2be   : > { %p16_p6 = scmp.ge.s32.totalorder %s19_s21, 4  }
 0x2c0   :  { %18 = sbr.rel (!%p16_p6) target bundleno = 3 (0x3), region = 103 }
 0x2c7   :  { %4124 = vsyncpa [#allocation3], 1 }
 0x2c8   :  { %4126 = vsyncpa [#allocation3 + $0x1], 1 }
 0x2c9   :  { %4127 = vsyncpa [#allocation5], 1 }
 0x2ca   :  { %4128 = vsyncpa [#allocation8], 1 }

// kernel: discriminator_forward.8
= control target key start
LH: loop header
LB: loop body
LE: loop exit
PB: predicated region body
PF: predicated region fallthrough
CT: control target
= control target key end

     0   :  { %s2449_s21 = smov 0   ;;  %s2880_s0 = inlined_call_operand.vmem [shape: bf16[2,4,82,32], index: 0, kind: input, shape index: {}]   ;;  %s2881_s1 = inlined_call_operand.vmem [shape: bf16[9,32,64], index: 1, kind: input, shape index: {}]   ;;  %s2882_s2 = inlined_call_operand.vmem [shape: f32[1,64], index: 2, kind: input, shape index: {}]   ;;  %s2883_s3 = inlined_call_operand.vmem [shape: f32[1,64], index: 3, kind: input, shape index: {}]   ;;  %s2884_s4 = inlined_call_operand.vmem [shape: f32[1,64], index: 4, kind: input, shape index: {}]   ;;  %s2885_s5 = inlined_call_operand.vmem [shape: f32[72,1], index: 5, kind: input, shape index: {}]   ;;  %s2886_s6 = inlined_call_operand.vmem [shape: bf16[2,72,64], index: 6, kind: output, shape index: {}]  }
   0x1 LB: > { %s1839_s3 = sadd.s32 4294967295, %s2410_s21   ;;  %p1843_p0 = scmp.ge.s32.totalorder %s2410_s21, 1  ;;  %s2410_s21 = sphi %s2449_s21, %s16_s21  }
   0x2   : > { %p212_p1 = scmp.lt.s32.totalorder %s2410_s21, 3 }
   0x4   : > { %p213_p2 = pnand %p1843_p0, %p212_p1 }
   0x5   : > { %v2345_v0 = vld [vmem:[%s2881_s1 + $0x10] sm:$0xff] (!%p213_p2)   ;;  %v2412_v1 = vmov (!%p213_p2), 0.0   ;;  %v2346_v2 = vld [vmem:[%s2881_s1 + $0x18] sm:$0xff] (!%p213_p2)   ;;  %p242_p3 = scmp.lt.s32.totalorder (!%p213_p2), %s1839_s3, 1  ;;  %vm2413_vm0 = vmmov (!%p213_p2), 0   ;;  %vm316_vm1 = vcmask (!%p213_p2), 261120  }
   0x6   : > { %216 = sbr.rel (%p213_p2) target bundleno = 416 (0x1a0), region = 44  ;;  %2113 = vmatprep.subr.bf16.mxu0 (!%p213_p2), %v2412_v1  ;;  %2329 = vmatprep.subr.bf16.mxu1 (!%p213_p2), %v2412_v1  ;;  %v2349_v3 = vld [vmem:[%s2881_s1 + $0x20] sm:$0xff] (!%p213_p2)   ;;  %v2354_v7 = vld [vmem:[%s2881_s1 + $0x28] sm:$0xff] (!%p213_p2)   ;;  %v2357_v19 = vld [vmem:[%s2881_s1 + $0x30] sm:$0xff] (!%p213_p2)   ;;  %vm566_vm2 = vsmask.f32 (!%p213_p2), 7424 }
   0x7   : > { %2114 = vmatpush3.bf16.msra.mxu0 (!%p213_p2), %v2345_v0  ;;  %2331 = vmatpush3.bf16.msra.mxu1 (!%p213_p2), %v2345_v0  ;;  %v2350_v4 = vld [vmem:[%s2881_s1] sm:$0xff] (!%p213_p2)   ;;  %v2353_v8 = vld [vmem:[%s2881_s1 + $0x8] sm:$0xff] (!%p213_p2)   ;;  %v2366_v23 = vld [vmem:[%s2881_s1 + $0x38] sm:$0xff] (!%p213_p2)   ;;  %vm1576_vm3 = vcmask (!%p213_p2), 1046528   ;;  %vm1774_vm5 = vcmask (!%p213_p2), 519168  }
   0x8   : > { %2115 = vmatprep.subr.bf16.mxu0 (!%p213_p2), %v2412_v1  ;;  %2330 = vmatprep.subr.bf16.mxu1 (!%p213_p2), %v2412_v1  ;;  %v2361_v24 = vld [vmem:[%s2881_s1 + $0x40] sm:$0xff] (!%p213_p2)   ;;  %v2367_v31 = vld [vmem:[%s2881_s1 + $0x48] sm:$0xff] (!%p213_p2)  }
   0x9   : > { %2117 = vmatprep.mubr.msk.bf16.mxu0 (!%p213_p2), %vm2413_vm0, %v2412_v1  ;;  %2129 = vmatprep.mubr.msk.bf16.mxu1 (!%p213_p2), %vm2413_vm0, %v2412_v1 }
   0xb   : > { %2116 = vmatpush3.bf16.msra.mxu0 (!%p213_p2), %v2346_v2  ;;  %2332 = vmatpush3.bf16.msra.mxu1 (!%p213_p2), %v2346_v2 }
   0xc   : > { %2161 = vmatprep.subr.bf16.mxu0 (!%p213_p2), %v2412_v1  ;;  %2137 = vmatprep.subr.bf16.mxu1 (!%p213_p2), %v2412_v1 }
   0xd   : > { %s2888_s3 = smov (!%p242_p3, %s1839_s3), 1 }
   0xe   : > { %s2333_s24 = smul.u32 176, %s2888_s3 }
   0xf   : > { %s2334_s13 = smul.u32 36, %s2888_s3 }
  0x10   : > { %s2482_s29 = scalar_lea.vmem %s2880_s0, %s2333_s24 }
  0x11   : > { %v2347_v5 = vld [vmem:[%s2482_s29 + $0x2c] sm:$0xff]   ;;  %v2348_v6 = vld [vmem:[%s2482_s29 + $0x44] sm:$0xff]   ;;  %v2351_v9 = vld [vmem:[%s2482_s29 + $0x34] sm:$0xff]   ;;  %s2845_s16 = scalar_lea.vmem %s2886_s6, %s2334_s13 }
  0x12   : > { %2118 = vmatmul.mubr.msk.bf16.vlgmr.msra.gmra.mrb[0].mxu0 %vm316_vm1, %v2347_v5  ;;  %2130 = vmatmul.mubr.msk.bf16.vlgmr.msra.gmra.mrb[0].mxu1 %vm316_vm1, %v2348_v6  ;;  %v2352_v10 = vld [vmem:[%s2482_s29 + $0x4c] ss:$0 sps:$4 sm:$0xff]   ;;  %v2359_v11 = vld [vmem:[%s2482_s29] sm:$0xff]   ;;  %v2363_v21 = vld [vmem:[%s2482_s29 + $0x10] sm:$0xff]  }
  0x13   : > { %2162 = vmatpush3.bf16.msra.mxu0 %v2349_v3  ;;  %2121 = vmatprep.mubr.msk.bf16.mxu0 %vm2413_vm0, %v2412_v1  ;;  %v2360_v12 = vld [vmem:[%s2482_s29 + $0x8] sm:$0xff]   ;;  %v570_v13 = vshll.u32 %v2359_v11, 16  ;;  %v2355_v14 = vld [vmem:[%s2482_s29 + $0x3c] sm:$0xff]   ;;  %v568_v17 = vshrl.u32 %v2359_v11, 16  ;;  %v583_v25 = vshll.u32 %v2363_v21, 16  ;;  %v2362_v35 = vld [vmem:[%s2482_s29 + $0x10] sm:$0xff]  }
  0x14   : > { %2133 = vmatprep.mubr.msk.bf16.mxu1 %vm2413_vm0, %v2412_v1  ;;  %2138 = vmatpush3.bf16.msra.mxu1 %v2350_v4  ;;  %v2356_v15 = vld [vmem:[%s2482_s29] sm:$0xff]   ;;  %v575_v16 = vshll.u32 %v2360_v12, 16  ;;  %v2358_v26 = vld [vmem:[%s2482_s29 + $0x8] sm:$0xff]   ;;  %v579_v28 = vshrl.u32 %v2360_v12, 16  ;;  %v2365_v29 = vld [vmem:[%s2482_s29 + $0x18] sm:$0xff]   ;;  %v587_v36 = vshrl.u32 %v2363_v21, 16 }
  0x15   : > { %2163 = vmatprep.subr.bf16.mxu0 %v2412_v1  ;;  %2139 = vmatprep.subr.bf16.mxu1 %v2412_v1  ;;  %v572_v18 = vrot.slane %v570_v13, 1  ;;  %v585_v30 = vrot.slane %v583_v25, 1  ;;  %v2544_v33 = vld [vmem:[%s2482_s29 + $0x20] sm:$0x1f]   ;;  %v591_v34 = vshll.u32 %v2365_v29, 16  ;;  %v2384_v39 = vld [vmem:[%s2482_s29 + $0x58] sm:$0xff]  }
  0x16   : > { %v577_v20 = vrot.slane %v575_v16, 1  ;;  %v599_v38 = vshll.u32 %v2544_v33, 16  ;;  %v2385_v40 = vld [vmem:[%s2482_s29 + $0x60] sm:$0xff]   ;;  %v595_v42 = vshrl.u32 %v2365_v29, 16  ;;  %v1047_v43 = vshrl.u32 %v2384_v39, 16  ;;  %v2387_v46 = vld [vmem:[%s2482_s29 + $0x68] sm:$0xff]  }
  0x17   : > { %2164 = vmatpush3.bf16.msra.mxu0 %v2354_v7  ;;  %v573_v22 = vor.u32 %v572_v18, %v568_v17  ;;  %v593_v41 = vrot.slane %v591_v34, 1  ;;  %v1049_v44 = vshll.u32 %v2384_v39, 16  ;;  %v1054_v45 = vshll.u32 %v2385_v40, 16  ;;  %v1193_v49 = vld [vmem:[%s2482_s29 + $0x4] sm:$0xf]  ;;  %v2561_v50 = vld [vmem:[%s2482_s29 + $0xc] sm:$0xff]  }
  0x18   : > { %2209 = vmatprep.subr.bf16.mxu0 %v2412_v1  ;;  %2140 = vmatpush3.bf16.msra.mxu1 %v2353_v8  ;;  %v581_v32 = vor.u32 %v579_v28, %v577_v20  ;;  %v589_v47 = vor.u32 %v587_v36, %v585_v30  ;;  %v1058_v48 = vshrl.u32 %v2385_v40, 16  ;;  %v2566_v51 = vrot.slane %v599_v38, 1  ;;  %v2569_v55 = vld [vmem:[%s2482_s29 + $0x8] sm:$0xf]  ;;  %v2391_v58 = vld [vmem:[%s2482_s29 + $0x70] sm:$0xff]   ;;  %v2364_v59 = vld [vmem:[%s2482_s29 + $0x18] sm:$0xff]  }
  0x19   : > { %2185 = vmatprep.subr.bf16.mxu1 %v2412_v1  ;;  %v578_v27 = vsel %vm566_vm2, %v573_v22, %v577_v20  ;;  %v1051_v52 = vrot.slane %v1049_v44, 1  ;;  %v1056_v53 = vrot.slane %v1054_v45, 1  ;;  %v1062_v54 = vshll.u32 %v2387_v46, 16  ;;  %v2585_v11 = vld [vmem:[%s2482_s29 + $0x14] sm:$0xff]   ;;  %v2592_v16 = vld [vmem:[%s2482_s29 + $0x1c] sm:$0xff]  }
  0x1a   : > { %2122 = vmatmul.mubr.msk.bf16.gmra.mrb[4].mxu0 %vm316_vm1, %v2351_v9  ;;  %2134 = vmatmul.mubr.msk.bf16.gmra.mrb[4].mxu1 %vm316_vm1, %v2352_v10  ;;  %v586_v37 = vsel %vm566_vm2, %v581_v32, %v585_v30  ;;  %v1979_v56 = vcombine.low %v1193_v49, %v2569_v55  ;;  %v1241_v57 = vshll.u32 %v2561_v50, 16  ;;  %v1066_v63 = vshrl.u32 %v2387_v46, 16  ;;  %v2617_v32 = vld [vmem:[%s2482_s29 + $0x24] sm:$0x1f]  }
  0x1b   : > { %2125 = vmatprep.mubr.msk.bf16.mxu0 %vm2413_vm0, %v2412_v1  ;;  %2141 = vmatprep.mubr.msk.bf16.mxu1 %vm2413_vm0, %v2412_v1  ;;  %v1052_v60 = vor.u32 %v1051_v52, %v1047_v43  ;;  %v1060_v61 = vor.u32 %v1058_v48, %v1056_v53  ;;  %v1064_v62 = vrot.slane %v1062_v54, 1  ;;  %v1070_v4 = vshll.u32 %v2391_v58, 16  ;;  %v2400_v43 = vld [vmem:[%s2482_s29 + $0x40] sm:$0xff]  }
  0x1c   : > { %v1234_v0 = vshrl.u32 %v1979_v56, 16  ;;  %v1236_v2 = vshll.u32 %v1979_v56, 16  ;;  %v1243_v3 = vrot.slane %v1241_v57, 1  ;;  %v594_v5 = vsel %vm566_vm2, %v589_v47, %v593_v41  ;;  %v2402_v56 = vld [vmem:[%s2482_s29 + $0x48] sm:$0xff]  }
  0x1d   : > { %v2579_v6 = vsel %vm566_vm2, %v1052_v60, %v1056_v53  ;;  %v2582_v7 = vsel %vm566_vm2, %v1060_v61, %v1064_v62  ;;  %v1068_v8 = vor.u32 %v1066_v63, %v1064_v62  ;;  %v1072_v10 = vrot.slane %v1070_v4, 1  ;;  %v2649_v62 = vld [vmem:[%s2482_s29 + $0x50] sm:$0x1f]  }
  0x1e   : > { %v1238_v9 = vrot.slane %v1236_v2, 1  ;;  %v1245_v12 = vshrl.u32 %v2561_v50, 16  ;;  %v597_v13 = vor.u32 %v595_v42, %v593_v41  ;;  %v1249_v20 = vshll.u32 %v2585_v11, 16  ;;  %v2399_v42 = vld [vmem:[%s2482_s29 + $0x38] sm:$0xff]   ;;  %v2371_v4 = vld [vmem:[%s2881_s1 + $0x50] sm:$0xff]  }
  0x1f   : > { %v2596_v18 = vsel %vm566_vm2, %v1068_v8, %v1072_v10  ;;  %v1261_v34 = vshrl.u32 %v2592_v16, 16  ;;  %v603_v38 = vshrl.u32 %v2544_v33, 16  ;;  %v1265_v41 = vshll.u32 %v2617_v32, 16 }
  0x20   : > { %v1239_v17 = vor.u32 %v1238_v9, %v1234_v0  ;;  %v602_v36 = vsel %vm566_vm2, %v597_v13, %v2566_v51  ;;  %v1428_v47 = vshll.u32 %v2399_v42, 16  ;;  %v1432_v48 = vshrl.u32 %v2399_v42, 16  ;;  %v2370_v0 = vld [vmem:[%s2482_s29 + $0x58] sm:$0xff]  }
  0x21   : > { %v2635_v46 = vrot.slane %v1265_v41, 1  ;;  %v1436_v49 = vshll.u32 %v2400_v43, 16  ;;  %v1444_v61 = vshll.u32 %v2402_v56, 16  ;;  %v1448_v63 = vshrl.u32 %v2402_v56, 16  ;;  %v2379_v13 = vld [vmem:[%s2881_s1 + $0x58] sm:$0xff]  }
  0x22   : > { %2126 = vmatmul.mubr.msk.bf16.gmra.mrb[8].mxu0 %vm316_vm1, %v2355_v14  ;;  %2142 = vmatmul.mubr.msk.bf16.vlgmr.msra.gmra.mrb[8].mxu1 %vm316_vm1, %v2356_v15  ;;  %v2589_v14 = vld [vmem:[%s2482_s29 + $0x78] sm:$0x1f]   ;;  %v1074_v15 = vshrl.u32 %v2391_v58, 16  ;;  %v2608_v25 = vsel %vm566_vm2, %v1239_v17, %v1243_v3  ;;  %v1430_v53 = vrot.slane %v1428_v47, 1  ;;  %v1440_v58 = vshrl.u32 %v2400_v43, 16  ;;  %v2373_v17 = vld [vmem:[%s2482_s29 + $0x84] sm:$0xff]  }
  0x23   : > { %2165 = vmatprep.mubr.msk.bf16.mxu0 %vm2413_vm0, %v2412_v1  ;;  %2145 = vmatprep.mubr.msk.bf16.mxu1 %vm2413_vm0, %v2412_v1  ;;  %v1078_v22 = vshll.u32 %v2589_v14, 16  ;;  %v1438_v54 = vrot.slane %v1436_v49, 1  ;;  %v1452_v8 = vshll.u32 %v2649_v62, 16  ;;  %v1456_v41 = vshrl.u32 %v2649_v62, 16 }
  0x24   : > { %2186 = vmatpush3.bf16.msra.mxu1 %v2357_v19  ;;  %v1247_v19 = vor.u32 %v1245_v12, %v1243_v3  ;;  %v1076_v21 = vor.u32 %v1074_v15, %v1072_v10  ;;  %v1434_v60 = vor.u32 %v1432_v48, %v1430_v53  ;;  %v1584_v42 = vrot.slane %v2617_v32, 1 }
  0x25   : > { %2187 = vmatprep.subr.bf16.mxu1 %v2412_v1  ;;  %v2611_v28 = vrot.slane %v1078_v22, 1  ;;  %v1442_v3 = vor.u32 %v1440_v58, %v1438_v54  ;;  %v2666_v12 = vrot.slane %v1452_v8, 1  ;;  %v2376_v22 = vld [vmem:[%s2482_s29 + $0x8c] sm:$0xff]  }
  0x28   : > { %2188 = vmatpush3.bf16.msra.mxu1 %v2366_v23  ;;  %v1253_v23 = vshrl.u32 %v2585_v11, 16 }
  0x29   : > { %2233 = vmatprep.subr.bf16.mxu1 %v2412_v1 }
  0x2a   : > { %2166 = vmatmul.mubr.msk.bf16.vlgmr.msra.gmra.mrb[12].mxu0 %vm316_vm1, %v578_v27  ;;  %2146 = vmatmul.mubr.msk.bf16.gmra.mrb[12].mxu1 %vm316_vm1, %v2358_v26  ;;  %v1251_v26 = vrot.slane %v1249_v20, 1  ;;  %v2368_v27 = vld [vmem:[%s2482_s29 + $0x20] ss:$0 sps:$4 sm:$0xff]  }
  0x2b   : > { %2210 = vmatpush3.bf16.msra.mxu0 %v2361_v24  ;;  %2149 = vmatprep.mubr.msk.bf16.mxu1 %vm2413_vm0, %v2412_v1  ;;  %v1257_v24 = vshll.u32 %v2592_v16, 16  ;;  %v2374_v20 = vld [vmem:[%s2881_s1 + $0x60] sm:$0xff]  }
  0x2c   : > { %2169 = vmatprep.mubr.msk.bf16.mxu0 %vm2413_vm0, %v2412_v1  ;;  %2211 = vmatprep.subr.bf16.mxu0 %v2412_v1  ;;  %v2614_v30 = vsel %vm566_vm2, %v1247_v19, %v1251_v26  ;;  %v2372_v19 = vld [vmem:[%s2482_s29 + $0x60] sm:$0xff]  }
  0x2d   : > { %v1259_v29 = vrot.slane %v1257_v24, 1  ;;  %v2378_v24 = vld [vmem:[%s2482_s29 + $0x94] sm:$0xff]  }
  0x2f   : > { %2212 = vmatpush3.bf16.msra.mxu0 %v2367_v31  ;;  %v1255_v31 = vor.u32 %v1253_v23, %v1251_v26  ;;  %v1263_v40 = vor.u32 %v1261_v34, %v1259_v29  ;;  %v2375_v23 = vld [vmem:[%s2482_s29 + $0x68] sm:$0xff]   ;;  %v2377_v26 = vld [vmem:[%s2482_s29 + $0x70] sm:$0xff]  }
  0x30   : > { %2257 = vmatprep.subr.bf16.mxu0 %v2412_v1  ;;  %v2386_v34 = vld [vmem:[%s2881_s1 + $0x70] sm:$0xff]  }
  0x31   : > { %v2629_v39 = vsel %vm566_vm2, %v1255_v31, %v1259_v29  ;;  %v2644_v52 = vsel %vm566_vm2, %v1263_v40, %v2635_v46  ;;  %v2381_v29 = vld [vmem:[%s2482_s29 + $0x78] ss:$0 sps:$4 sm:$0xff]   ;;  %v2383_v31 = vld [vmem:[%s2482_s29 + $0xa4] ss:$0 sps:$4 sm:$0xff]   ;;  %v1582_v40 = vrot.slane %v2592_v16, 1  ;;  %v1458_v16 = vor.u32 %v1456_v41, %v2666_v12 }
  0x32   : > { %2170 = vmatmul.mubr.msk.bf16.gmra.mrb[16].mxu0 %vm316_vm1, %v586_v37  ;;  %2150 = vmatmul.mubr.msk.bf16.gmra.mrb[16].mxu1 %vm316_vm1, %v2362_v35  ;;  %v2398_v35 = vld [vmem:[%s2482_s29 + $0x30] sm:$0xff]   ;;  %v2625_v37 = vsel %vm566_vm2, %v1076_v21, %v2611_v28  ;;  %v2380_v21 = vld [vmem:[%s2881_s1 + $0x68] sm:$0xff]  }
  0x33   : > { %2173 = vmatprep.mubr.msk.bf16.mxu0 %vm2413_vm0, %v2412_v1  ;;  %2153 = vmatprep.mubr.msk.bf16.mxu1 %vm2413_vm0, %v2412_v1  ;;  %v1421_v44 = vshrl.u32 %v2398_v35, 16  ;;  %v1423_v45 = vshll.u32 %v2398_v35, 16  ;;  %v2395_v35 = vld [vmem:[%s2881_s1 + $0x78] sm:$0xff]   ;;  %v1585_v43 = vsel %vm1576_vm3, %v1582_v40, %v1584_v42 }
  0x35   : > { %v1425_v33 = vrot.slane %v1423_v45, 1 }
  0x37   : > { %v1426_v57 = vor.u32 %v1425_v33, %v1421_v44 }
  0x39   : > { %v2653_v2 = vsel %vm566_vm2, %v1426_v57, %v1430_v53 }
  0x3a   : > { %2174 = vmatmul.mubr.msk.bf16.gmra.mrb[20].mxu0 %vm316_vm1, %v594_v5  ;;  %2154 = vmatmul.mubr.msk.bf16.gmra.mrb[20].mxu1 %vm316_vm1, %v2364_v59  ;;  %v605_v59 = vor.u32 %v603_v38, %v2566_v51  ;;  %v2659_v5 = vsel %vm566_vm2, %v1434_v60, %v1438_v54  ;;  %v1446_v51 = vrot.slane %v1444_v61, 1  ;;  %v1578_v38 = vrot.slane %v2561_v50, 1 }
  0x3b   : > { %2177 = vmatprep.mubr.msk.bf16.mxu0 %vm2413_vm0, %v2412_v1  ;;  %2157 = vmatprep.mubr.msk.bf16.mxu1 %vm2413_vm0, %v2412_v1 }
  0x3c   : > { %v2664_v9 = vsel %vm566_vm2, %v1442_v3, %v1446_v51  ;;  %v1450_v10 = vor.u32 %v1448_v63, %v1446_v51 }
  0x3e   : > { %v2678_v15 = vsel %vm566_vm2, %v1450_v10, %v2666_v12 }
  0x42   : > { %2178 = vmatmul.mubr.msk.bf16.gmra.mrb[24].mxu0 %vm316_vm1, %v602_v36  ;;  %2158 = vmatmul.mubr.msk.bf16.gmra.mrb[24].mxu1 %vm316_vm1, %v2368_v27  ;;  %v2382_v27 = vld [vmem:[%s2482_s29 + $0x9c] sm:$0xff]  }
  0x43   : > { %2181 = vmatprep.mubr.msk.bf16.mxu0 %vm2413_vm0, %v2412_v1  ;;  %2189 = vmatprep.mubr.msk.bf16.mxu1 %vm2413_vm0, %v2412_v1  ;;  %v2390_v36 = vld [vmem:[%s2881_s1 + $0x80] sm:$0xff]  }
  0x4a   : > { %2182 = vmatmul.mubr.msk.bf16.gmra.mrb[28].mxu0 %vm316_vm1, %v605_v59  ;;  %2190 = vmatmul.mubr.msk.bf16.vlgmr.msra.gmra.mrb[28].mxu1 %vm316_vm1, %v2370_v0 }
  0x4b   : > { %2213 = vmatprep.mubr.msk.bf16.mxu0 %vm2413_vm0, %v2412_v1  ;;  %2193 = vmatprep.mubr.msk.bf16.mxu1 %vm2413_vm0, %v2412_v1 }
  0x4c   : > { %2234 = vmatpush3.bf16.msra.mxu1 %v2371_v4 }
  0x4d   : > { %2235 = vmatprep.subr.bf16.mxu1 %v2412_v1 }
  0x50   : > { %2236 = vmatpush3.bf16.msra.mxu1 %v2379_v13 }
  0x51   : > { %2281 = vmatprep.subr.bf16.mxu1 %v2412_v1 }
  0x52   : > { %2214 = vmatmul.mubr.msk.bf16.vlgmr.msra.gmra.mrb[32].mxu0 %vm316_vm1, %v2373_v17  ;;  %2194 = vmatmul.mubr.msk.bf16.gmra.mrb[32].mxu1 %vm316_vm1, %v2372_v19 }
  0x53   : > { %2258 = vmatpush3.bf16.msra.mxu0 %v2374_v20  ;;  %2197 = vmatprep.mubr.msk.bf16.mxu1 %vm2413_vm0, %v2412_v1 }
  0x54   : > { %2217 = vmatprep.mubr.msk.bf16.mxu0 %vm2413_vm0, %v2412_v1  ;;  %2259 = vmatprep.subr.bf16.mxu0 %v2412_v1 }
  0x57   : > { %2260 = vmatpush3.bf16.msra.mxu0 %v2380_v21 }
  0x58   : > { %2305 = vmatprep.subr.bf16.mxu0 %v2412_v1 }
  0x5a   : > { %2218 = vmatmul.mubr.msk.bf16.gmra.mrb[36].mxu0 %vm316_vm1, %v2376_v22  ;;  %2198 = vmatmul.mubr.msk.bf16.gmra.mrb[36].mxu1 %vm316_vm1, %v2375_v23 }
  0x5b   : > { %2221 = vmatprep.mubr.msk.bf16.mxu0 %vm2413_vm0, %v2412_v1  ;;  %2201 = vmatprep.mubr.msk.bf16.mxu1 %vm2413_vm0, %v2412_v1 }
  0x62   : > { %2222 = vmatmul.mubr.msk.bf16.gmra.mrb[40].mxu0 %vm316_vm1, %v2378_v24  ;;  %2202 = vmatmul.mubr.msk.bf16.gmra.mrb[40].mxu1 %vm316_vm1, %v2377_v26 }
  0x63   : > { %2225 = vmatprep.mubr.msk.bf16.mxu0 %vm2413_vm0, %v2412_v1  ;;  %2205 = vmatprep.mubr.msk.bf16.mxu1 %vm2413_vm0, %v2412_v1 }
  0x6a   : > { %2226 = vmatmul.mubr.msk.bf16.gmra.mrb[44].mxu0 %vm316_vm1, %v2382_v27  ;;  %2206 = vmatmul.mubr.msk.bf16.gmra.mrb[44].mxu1 %vm316_vm1, %v2381_v29 }
  0x6b   : > { %2229 = vmatprep.mubr.msk.bf16.mxu0 %vm2413_vm0, %v2412_v1  ;;  %2237 = vmatprep.mubr.msk.bf16.mxu1 %vm2413_vm0, %v2412_v1 }
  0x72   : > { %2230 = vmatmul.mubr.msk.bf16.gmra.mrb[48].mxu0 %vm316_vm1, %v2383_v31  ;;  %2238 = vmatmul.mubr.msk.bf16.vlgmr.msra.gmra.mrb[48].mxu1 %vm316_vm1, %v2579_v6  ;;  %v2396_v6 = vld [vmem:[%s2881_s1 + $0x88] sm:$0xff]  }
  0x73   : > { %2261 = vmatprep.mubr.msk.bf16.mxu0 %vm2413_vm0, %v2412_v1  ;;  %2241 = vmatprep.mubr.msk.bf16.mxu1 %vm2413_vm0, %v2412_v1 }
  0x74   : > { %2282 = vmatpush3.bf16.msra.mxu1 %v2386_v34 }
  0x75   : > { %2283 = vmatprep.subr.bf16.mxu1 %v2412_v1 }
  0x78   : > { %2284 = vmatpush3.bf16.msra.mxu1 %v2395_v35 }
  0x7a   : > { %2262 = vmatmul.mubr.msk.bf16.vlgmr.msra.gmra.mrb[52].mxu0 %vm316_vm1, %v2608_v25  ;;  %2242 = vmatmul.mubr.msk.bf16.gmra.mrb[52].mxu1 %vm316_vm1, %v2582_v7  ;;  %v1082_v7 = vshrl.u32 %v2589_v14, 16  ;;  %v1269_v25 = vshrl.u32 %v2617_v32, 16 }
  0x7b   : > { %2306 = vmatpush3.bf16.msra.mxu0 %v2390_v36  ;;  %2245 = vmatprep.mubr.msk.bf16.mxu1 %vm2413_vm0, %v2412_v1 }
  0x7c   : > { %2265 = vmatprep.mubr.msk.bf16.mxu0 %vm2413_vm0, %v2412_v1  ;;  %2307 = vmatprep.subr.bf16.mxu0 %v2412_v1  ;;  %v1271_v14 = vor.u32 %v1269_v25, %v2635_v46 }
  0x7f   : > { %2308 = vmatpush3.bf16.msra.mxu0 %v2396_v6 }
  0x82   : > { %2266 = vmatmul.mubr.msk.bf16.gmra.mrb[56].mxu0 %vm316_vm1, %v2614_v30  ;;  %2246 = vmatmul.mubr.msk.bf16.gmra.mrb[56].mxu1 %vm316_vm1, %v2596_v18  ;;  %v1084_v18 = vor.u32 %v1082_v7, %v2611_v28  ;;  %v1567_v30 = vld [vmem:[%s2482_s29 + $0x4] sm:$0xe] }
  0x83   : > { %2269 = vmatprep.mubr.msk.bf16.mxu0 %vm2413_vm0, %v2412_v1  ;;  %2249 = vmatprep.mubr.msk.bf16.mxu1 %vm2413_vm0, %v2412_v1 }
  0x8a   : > { %2270 = vmatmul.mubr.msk.bf16.gmra.mrb[60].mxu0 %vm316_vm1, %v2629_v39  ;;  %2250 = vmatmul.mubr.msk.bf16.gmra.mrb[60].mxu1 %vm316_vm1, %v2625_v37  ;;  %v2021_v37 = vcombine.low %v1567_v30, %v2569_v55  ;;  %v1580_v55 = vrot.slane %v2585_v11, 1 }
  0x8b   : > { %2273 = vmatprep.mubr.msk.bf16.mxu0 %vm2413_vm0, %v2412_v1  ;;  %2253 = vmatprep.mubr.msk.bf16.mxu1 %vm2413_vm0, %v2412_v1 }
  0x8c   : > { %v1577_v28 = vrot.slane %v2021_v37, 1  ;;  %v1581_v50 = vsel %vm1576_vm3, %v1578_v38, %v1580_v55  ;;  %v1583_v11 = vsel %vm1576_vm3, %v1580_v55, %v1582_v40 }
  0x8e   : > { %v1579_v39 = vsel %vm1576_vm3, %v1577_v28, %v1578_v38 }
  0x92   : > { %2274 = vmatmul.mubr.msk.bf16.gmra.mrb[64].mxu0 %vm316_vm1, %v2644_v52  ;;  %2254 = vmatmul.mubr.msk.bf16.gmra.mrb[64].mxu1 %vm316_vm1, %v1084_v18 }
  0x93   : > { %2277 = vmatprep.mubr.msk.bf16.mxu0 %vm2413_vm0, %v2412_v1  ;;  %2285 = vmatprep.mubr.msk.bf16.mxu1 %vm2413_vm0, %v2412_v1 }
  0x9a   : > { %2278 = vmatmul.mubr.msk.bf16.gmra.mrb[68].mxu0 %vm316_vm1, %v1271_v14  ;;  %2286 = vmatmul.mubr.msk.bf16.vlgmr.msra.gmra.mrb[68].mxu1 %vm316_vm1, %v2653_v2 }
  0x9b   : > { %2309 = vmatprep.mubr.msk.bf16.mxu0 %vm2413_vm0, %v2412_v1  ;;  %2289 = vmatprep.mubr.msk.bf16.mxu1 %vm2413_vm0, %v2412_v1 }
  0xa2   : > { %2310 = vmatmul.mubr.msk.bf16.vlgmr.msra.gmra.mrb[72].mxu0 %vm316_vm1, %v1579_v39  ;;  %2290 = vmatmul.mubr.msk.bf16.gmra.mrb[72].mxu1 %vm316_vm1, %v2659_v5 }
  0xa3   : > { %2313 = vmatprep.mubr.msk.bf16.mxu0 %vm2413_vm0, %v2412_v1  ;;  %2293 = vmatprep.mubr.msk.bf16.mxu1 %vm2413_vm0, %v2412_v1 }
  0xaa   : > { %2314 = vmatmul.mubr.msk.bf16.gmra.mrb[76].mxu0 %vm316_vm1, %v1581_v50  ;;  %2294 = vmatmul.mubr.msk.bf16.gmra.mrb[76].mxu1 %vm316_vm1, %v2664_v9 }
  0xab   : > { %2317 = vmatprep.mubr.msk.bf16.mxu0 %vm2413_vm0, %v2412_v1  ;;  %2297 = vmatprep.mubr.msk.bf16.mxu1 %vm2413_vm0, %v2412_v1 }
  0xb2   : > { %2318 = vmatmul.mubr.msk.bf16.gmra.mrb[80].mxu0 %vm316_vm1, %v1583_v11  ;;  %2298 = vmatmul.mubr.msk.bf16.gmra.mrb[80].mxu1 %vm316_vm1, %v2678_v15 }
  0xb3   : > { %2321 = vmatprep.mubr.msk.bf16.mxu0 %vm2413_vm0, %v2412_v1  ;;  %2301 = vmatprep.mubr.msk.bf16.mxu1 %vm2413_vm0, %v2412_v1 }
  0xba   : > { %2322 = vmatmul.mubr.msk.bf16.gmra.mrb[84].mxu0 %vm316_vm1, %v1585_v43  ;;  %2302 = vmatmul.mubr.msk.bf16.gmra.mrb[84].mxu1 %vm316_vm1, %v1458_v16 }
  0xbb   : > { %2325 = vmatprep.mubr.msk.bf16.mxu0 %vm2413_vm0, %v2412_v1 }
  0xc2   : > { %2326 = vmatmul.mubr.msk.bf16.gmra.mrb[88].mxu0 %vm316_vm1, %v1584_v42 }
  0xe5   : > { %v366_v44 = vpop.f32.mrb[0].mxu0  ;;  %v390_v46 = vpop.f32.mrb[0].mxu1 }
  0xe6   : > { %v2119_v45 = vpop.f32.mrb[1].mxu0  ;;  %v2131_v47 = vpop.f32.mrb[1].mxu1 }
  0xe7   : > { %v369_v32 = vpop.f32.mrb[2].mxu0  ;;  %v393_v49 = vpop.f32.mrb[2].mxu1 }
  0xe8   : > { %v2120_v48 = vpop.f32.mrb[3].mxu0  ;;  %v2132_v33 = vpop.f32.mrb[3].mxu1 }
  0xed   : > { %v374_v52 = vpop.f32.mrb[4].mxu0  ;;  %v398_v54 = vpop.f32.mrb[4].mxu1 }
  0xee   : > { %v2123_v53 = vpop.f32.mrb[5].mxu0  ;;  %v2135_v57 = vpop.f32.mrb[5].mxu1 }
  0xef   : > { %v377_v56 = vpop.f32.mrb[6].mxu0  ;;  %v401_v59 = vpop.f32.mrb[6].mxu1 }
  0xf0   : > { %v2124_v58 = vpop.f32.mrb[7].mxu0  ;;  %v2136_v60 = vpop.f32.mrb[7].mxu1 }
  0xf5   : > { %v382_v61 = vpop.f32.mrb[8].mxu0  ;;  %v488_v1 = vpop.f32.mrb[8].mxu1 }
  0xf6   : > { %v2127_v62 = vpop.f32.mrb[9].mxu0  ;;  %v489_v63 = vadd.f32 %v488_v1, %v366_v44  ;;  %v2143_v0 = vpop.f32.mrb[9].mxu1 }
  0xf7   : > { %v385_v2 = vpop.f32.mrb[10].mxu0  ;;  %v491_v3 = vpop.f32.mrb[10].mxu1 }
  0xf8   : > { %v2128_v4 = vpop.f32.mrb[11].mxu0  ;;  %v492_v5 = vadd.f32 %v491_v3, %v369_v32  ;;  %v2144_v51 = vpop.f32.mrb[11].mxu1 }
  0xfd   : > { %v667_v8 = vpop.f32.mrb[12].mxu0  ;;  %v496_v9 = vpop.f32.mrb[12].mxu1 }
  0xfe   : > { %v705_v10 = vadd.f32 %v667_v8, %v489_v63  ;;  %v2167_v12 = vpop.f32.mrb[13].mxu0  ;;  %v497_v13 = vadd.f32 %v496_v9, %v374_v52  ;;  %v2147_v15 = vpop.f32.mrb[13].mxu1 }
  0xff   : > { %v670_v17 = vpop.f32.mrb[14].mxu0  ;;  %v499_v19 = vpop.f32.mrb[14].mxu1 }
 0x100   : > { %v706_v20 = vadd.f32 %v670_v17, %v492_v5  ;;  %v2168_v21 = vpop.f32.mrb[15].mxu0  ;;  %v500_v22 = vadd.f32 %v499_v19, %v377_v56  ;;  %v2148_v23 = vpop.f32.mrb[15].mxu1 }
 0x105   : > { %v675_v24 = vpop.f32.mrb[16].mxu0  ;;  %v504_v26 = vpop.f32.mrb[16].mxu1 }
 0x106   : > { %v707_v27 = vadd.f32 %v675_v24, %v497_v13  ;;  %v2171_v29 = vpop.f32.mrb[17].mxu0  ;;  %v505_v31 = vadd.f32 %v504_v26, %v382_v61  ;;  %v2151_v34 = vpop.f32.mrb[17].mxu1 }
 0x107   : > { %v678_v35 = vpop.f32.mrb[18].mxu0  ;;  %v507_v36 = vpop.f32.mrb[18].mxu1 }
 0x108   : > { %v708_v6 = vadd.f32 %v678_v35, %v500_v22  ;;  %v2172_v7 = vpop.f32.mrb[19].mxu0  ;;  %v508_v18 = vadd.f32 %v507_v36, %v385_v2  ;;  %v2152_v25 = vpop.f32.mrb[19].mxu1 }
 0x10d   : > { %v683_v30 = vpop.f32.mrb[20].mxu0  ;;  %v512_v14 = vpop.f32.mrb[20].mxu1 }
 0x10e   : > { %v709_v37 = vadd.f32 %v683_v30, %v505_v31  ;;  %v2175_v28 = vpop.f32.mrb[21].mxu0  ;;  %v513_v38 = vadd.f32 %v512_v14, %v390_v46  ;;  %v2155_v39 = vpop.f32.mrb[21].mxu1 }
 0x10f   : > { %v686_v55 = vpop.f32.mrb[22].mxu0  ;;  %v515_v50 = vpop.f32.mrb[22].mxu1 }
 0x110   : > { %v710_v40 = vadd.f32 %v686_v55, %v508_v18  ;;  %v2176_v11 = vpop.f32.mrb[23].mxu0  ;;  %v516_v41 = vadd.f32 %v515_v50, %v393_v49  ;;  %v2156_v42 = vpop.f32.mrb[23].mxu1 }
 0x115   : > { %v691_v16 = vpop.f32.mrb[24].mxu0  ;;  %v520_v43 = vpop.f32.mrb[24].mxu1 }
 0x116   : > { %v711_v44 = vadd.f32 %v691_v16, %v513_v38  ;;  %v2179_v45 = vpop.f32.mrb[25].mxu0  ;;  %v521_v32 = vadd.f32 %v520_v43, %v398_v54  ;;  %v2159_v48 = vpop.f32.mrb[25].mxu1 }
 0x117   : > { %v694_v47 = vpop.f32.mrb[26].mxu0  ;;  %v523_v53 = vpop.f32.mrb[26].mxu1 }
 0x118   : > { %v712_v33 = vadd.f32 %v694_v47, %v516_v41  ;;  %v2180_v52 = vpop.f32.mrb[27].mxu0  ;;  %v2160_v56 = vpop.f32.mrb[27].mxu1 }
 0x11d   : > { %v699_v57 = vpop.f32.mrb[28].mxu0  ;;  %v813_v58 = vpop.f32.mrb[28].mxu1 }
 0x11e   : > { %v713_v46 = vadd.f32 %v699_v57, %v521_v32  ;;  %v2183_v59 = vpop.f32.mrb[29].mxu0  ;;  %v851_v60 = vadd.f32 %v813_v58, %v705_v10  ;;  %v2191_v61 = vpop.f32.mrb[29].mxu1 }
 0x11f   : > { %v702_v1 = vpop.f32.mrb[30].mxu0  ;;  %v816_v49 = vpop.f32.mrb[30].mxu1 }
 0x120   : > { %v2184_v62 = vpop.f32.mrb[31].mxu0  ;;  %v852_v63 = vadd.f32 %v816_v49, %v706_v20  ;;  %v2192_v0 = vpop.f32.mrb[31].mxu1 }
 0x125   : > { %v959_v2 = vpop.f32.mrb[32].mxu0  ;;  %v821_v3 = vpop.f32.mrb[32].mxu1 }
 0x126   : > { %v997_v54 = vadd.f32 %v959_v2, %v851_v60  ;;  %v2215_v4 = vpop.f32.mrb[33].mxu0  ;;  %v853_v5 = vadd.f32 %v821_v3, %v707_v27  ;;  %v2195_v51 = vpop.f32.mrb[33].mxu1 }
 0x127   : > { %v962_v8 = vpop.f32.mrb[34].mxu0  ;;  %v824_v9 = vpop.f32.mrb[34].mxu1 }
 0x128   : > { %v998_v12 = vadd.f32 %v962_v8, %v852_v63  ;;  %v2216_v13 = vpop.f32.mrb[35].mxu0  ;;  %v854_v15 = vadd.f32 %v824_v9, %v708_v6  ;;  %v2196_v17 = vpop.f32.mrb[35].mxu1 }
 0x12d   : > { %v967_v19 = vpop.f32.mrb[36].mxu0  ;;  %v829_v10 = vpop.f32.mrb[36].mxu1 }
 0x12e   : > { %v999_v21 = vadd.f32 %v967_v19, %v853_v5  ;;  %v2219_v22 = vpop.f32.mrb[37].mxu0  ;;  %v855_v23 = vadd.f32 %v829_v10, %v709_v37  ;;  %v2199_v24 = vpop.f32.mrb[37].mxu1 }
 0x12f   : > { %v970_v20 = vpop.f32.mrb[38].mxu0  ;;  %v832_v26 = vpop.f32.mrb[38].mxu1 }
 0x130   : > { %v1000_v29 = vadd.f32 %v970_v20, %v854_v15  ;;  %v2220_v31 = vpop.f32.mrb[39].mxu0  ;;  %v856_v34 = vadd.f32 %v832_v26, %v710_v40  ;;  %v2200_v35 = vpop.f32.mrb[39].mxu1 }
 0x135   : > { %v975_v27 = vpop.f32.mrb[40].mxu0  ;;  %v837_v36 = vpop.f32.mrb[40].mxu1 }
 0x136   : > { %v1001_v7 = vadd.f32 %v975_v27, %v855_v23  ;;  %v2223_v18 = vpop.f32.mrb[41].mxu0  ;;  %v857_v25 = vadd.f32 %v837_v36, %v711_v44  ;;  %v2203_v30 = vpop.f32.mrb[41].mxu1 }
 0x137   : > { %v978_v6 = vpop.f32.mrb[42].mxu0  ;;  %v840_v14 = vpop.f32.mrb[42].mxu1 }
 0x138   : > { %v1002_v28 = vadd.f32 %v978_v6, %v856_v34  ;;  %v2224_v38 = vpop.f32.mrb[43].mxu0  ;;  %v858_v39 = vadd.f32 %v840_v14, %v712_v33  ;;  %v2204_v55 = vpop.f32.mrb[43].mxu1 }
 0x13d   : > { %v983_v37 = vpop.f32.mrb[44].mxu0  ;;  %v845_v50 = vpop.f32.mrb[44].mxu1 }
 0x13e   : > { %v1003_v11 = vadd.f32 %v983_v37, %v857_v25  ;;  %v2227_v41 = vpop.f32.mrb[45].mxu0  ;;  %v859_v42 = vadd.f32 %v845_v50, %v713_v46  ;;  %v2207_v40 = vpop.f32.mrb[45].mxu1 }
 0x13f   : > { %v986_v16 = vpop.f32.mrb[46].mxu0  ;;  %v848_v32 = vpop.f32.mrb[46].mxu1 }
 0x140   : > { %v1004_v43 = vadd.f32 %v986_v16, %v858_v39  ;;  %v2228_v45 = vpop.f32.mrb[47].mxu0  ;;  %v2208_v47 = vpop.f32.mrb[47].mxu1 }
 0x145   : > { %v991_v48 = vpop.f32.mrb[48].mxu0  ;;  %v1146_v52 = vpop.f32.mrb[48].mxu1 }
 0x146   : > { %v1005_v44 = vadd.f32 %v991_v48, %v859_v42  ;;  %v2231_v53 = vpop.f32.mrb[49].mxu0  ;;  %v1184_v56 = vadd.f32 %v1146_v52, %v997_v54  ;;  %v2239_v57 = vpop.f32.mrb[49].mxu1 }
 0x147   : > { %v994_v58 = vpop.f32.mrb[50].mxu0  ;;  %v1149_v33 = vpop.f32.mrb[50].mxu1 }
 0x148   : > { %v2232_v59 = vpop.f32.mrb[51].mxu0  ;;  %v1185_v60 = vadd.f32 %v1149_v33, %v998_v12  ;;  %v2240_v61 = vpop.f32.mrb[51].mxu1  ;;  %v2837_v58 = vld [vmem:[%s2882_s2] ss:$0 sm:$0xff] }
 0x14d   : > { %v1333_v1 = vpop.f32.mrb[52].mxu0  ;;  %v1154_v49 = vpop.f32.mrb[52].mxu1 }
 0x14e   : > { %v1371_v46 = vadd.f32 %v1333_v1, %v1184_v56  ;;  %v2263_v62 = vpop.f32.mrb[53].mxu0  ;;  %v1186_v63 = vadd.f32 %v1154_v49, %v999_v21  ;;  %v2243_v0 = vpop.f32.mrb[53].mxu1 }
 0x14f   : > { %v1336_v2 = vpop.f32.mrb[54].mxu0  ;;  %v1157_v3 = vpop.f32.mrb[54].mxu1 }
 0x150   : > { %v1372_v4 = vadd.f32 %v1336_v2, %v1185_v60  ;;  %v2264_v5 = vpop.f32.mrb[55].mxu0  ;;  %v1187_v51 = vadd.f32 %v1157_v3, %v1000_v29  ;;  %v2244_v8 = vpop.f32.mrb[55].mxu1 }
 0x155   : > { %v1341_v9 = vpop.f32.mrb[56].mxu0  ;;  %v1162_v54 = vpop.f32.mrb[56].mxu1 }
 0x156   : > { %v1373_v13 = vadd.f32 %v1341_v9, %v1186_v63  ;;  %v2267_v15 = vpop.f32.mrb[57].mxu0  ;;  %v1188_v17 = vadd.f32 %v1162_v54, %v1001_v7  ;;  %v2247_v19 = vpop.f32.mrb[57].mxu1 }
 0x157   : > { %v1344_v12 = vpop.f32.mrb[58].mxu0  ;;  %v1165_v10 = vpop.f32.mrb[58].mxu1 }
 0x158   : > { %v1374_v22 = vadd.f32 %v1344_v12, %v1187_v51  ;;  %v2268_v23 = vpop.f32.mrb[59].mxu0  ;;  %v1189_v24 = vadd.f32 %v1165_v10, %v1002_v28  ;;  %v2248_v20 = vpop.f32.mrb[59].mxu1 }
 0x15d   : > { %v1349_v21 = vpop.f32.mrb[60].mxu0  ;;  %v1170_v26 = vpop.f32.mrb[60].mxu1 }
 0x15e   : > { %v2824_v31 = vadd.f32 %v1349_v21, %v1188_v17  ;;  %v2271_v34 = vpop.f32.mrb[61].mxu0  ;;  %v1190_v35 = vadd.f32 %v1170_v26, %v1003_v11  ;;  %v2251_v29 = vpop.f32.mrb[61].mxu1 }
 0x15f   : > { %v1352_v27 = vpop.f32.mrb[62].mxu0  ;;  %v1173_v36 = vpop.f32.mrb[62].mxu1 }
 0x160   : > { %v2826_v18 = vadd.f32 %v1352_v27, %v1189_v24  ;;  %v2272_v25 = vpop.f32.mrb[63].mxu0  ;;  %v1191_v7 = vadd.f32 %v1173_v36, %v1004_v43  ;;  %v2252_v30 = vpop.f32.mrb[63].mxu1 }
 0x165   : > { %v1357_v6 = vpop.f32.mrb[64].mxu0  ;;  %v1178_v14 = vpop.f32.mrb[64].mxu1 }
 0x166   : > { %v2828_v38 = vadd.f32 %v1357_v6, %v1190_v35  ;;  %v2275_v28 = vpop.f32.mrb[65].mxu0  ;;  %v1192_v39 = vadd.f32 %v1178_v14, %v1005_v44  ;;  %v2255_v37 = vpop.f32.mrb[65].mxu1 }
 0x167   : > { %v1360_v55 = vpop.f32.mrb[66].mxu0  ;;  %v1181_v11 = vpop.f32.mrb[66].mxu1 }
 0x168   : > { %v2830_v50 = vadd.f32 %v1360_v55, %v1191_v7  ;;  %v2276_v41 = vpop.f32.mrb[67].mxu0  ;;  %v2256_v42 = vpop.f32.mrb[67].mxu1 }
 0x16d   : > { %v1365_v16 = vpop.f32.mrb[68].mxu0  ;;  %v1520_v45 = vpop.f32.mrb[68].mxu1 }
 0x16e   : > { %v2832_v40 = vadd.f32 %v1365_v16, %v1192_v39  ;;  %v2279_v32 = vpop.f32.mrb[69].mxu0  ;;  %v1558_v43 = vadd.f32 %v1520_v45, %v1371_v46  ;;  %v2287_v47 = vpop.f32.mrb[69].mxu1 }
 0x16f   : > { %v1368_v48 = vpop.f32.mrb[70].mxu0  ;;  %v1523_v52 = vpop.f32.mrb[70].mxu1 }
 0x170   : > { %v2280_v53 = vpop.f32.mrb[71].mxu0  ;;  %v1559_v56 = vadd.f32 %v1523_v52, %v1372_v4  ;;  %v2288_v44 = vpop.f32.mrb[71].mxu1 }
 0x175   : > { %v1647_v57 = vpop.f32.mrb[72].mxu0  ;;  %v1528_v33 = vpop.f32.mrb[72].mxu1 }
 0x176   : > { %v1685_v59 = vadd.f32 %v1647_v57, %v1558_v43  ;;  %v2311_v60 = vpop.f32.mrb[73].mxu0  ;;  %v1560_v61 = vadd.f32 %v1528_v33, %v1373_v13  ;;  %v2291_v1 = vpop.f32.mrb[73].mxu1 }
 0x177   : > { %v1650_v49 = vpop.f32.mrb[74].mxu0  ;;  %v1531_v62 = vpop.f32.mrb[74].mxu1 }
 0x178   : > { %v1701_v46 = vadd.f32 %v2837_v58, %v1685_v59  ;;  %v1686_v63 = vadd.f32 %v1650_v49, %v1559_v56  ;;  %v2312_v0 = vpop.f32.mrb[75].mxu0  ;;  %v1561_v2 = vadd.f32 %v1531_v62, %v1374_v22  ;;  %v2292_v3 = vpop.f32.mrb[75].mxu1 }
 0x17a   : > { %vm1710_vm4 = vcmp.gt.f32.partialorder %v1701_v46, 0.0  ;;  %v1719_v4 = vmul.f32 0.2, %v1701_v46  ;;  %v1702_v5 = vadd.f32 %v2837_v58, %v1686_v63 }
 0x17c   : > { %v1728_v51 = vsel %vm1710_vm4, %v1701_v46, %v1719_v4  ;;  %vm1711_vm6 = vcmp.gt.f32.partialorder %v1702_v5, 0.0  ;;  %v1720_v8 = vmul.f32 0.2, %v1702_v5 }
 0x17d   : > { %v2041_v9 = vpack.c.bf16 %v1728_v51, %v1728_v51  ;;  %v1655_v54 = vpop.f32.mrb[76].mxu0  ;;  %v1536_v15 = vpop.f32.mrb[76].mxu1 }
 0x17e   : > { %v1729_v13 = vsel %vm1711_vm6, %v1702_v5, %v1720_v8  ;;  %v1687_v17 = vadd.f32 %v1655_v54, %v1560_v61  ;;  %v2315_v19 = vpop.f32.mrb[77].mxu0  ;;  %v1562_v10 = vadd.f32 %v1536_v15, %v2824_v31  ;;  %v2295_v22 = vpop.f32.mrb[77].mxu1 }
 0x17f   : > { %1775 = vst.msk [vmem:[%s2845_s16] sm:$0xf] %vm1774_vm5, %v2041_v9  ;;  %v2042_v12 = vpack.c.bf16 %v1729_v13, %v1729_v13  ;;  %v1658_v23 = vpop.f32.mrb[78].mxu0  ;;  %v1539_v20 = vpop.f32.mrb[78].mxu1 }
 0x180   : > { %v1703_v24 = vadd.f32 %v2837_v58, %v1687_v17  ;;  %v1688_v21 = vadd.f32 %v1658_v23, %v1561_v2  ;;  %v2316_v26 = vpop.f32.mrb[79].mxu0  ;;  %v1563_v34 = vadd.f32 %v1539_v20, %v2826_v18  ;;  %v2296_v35 = vpop.f32.mrb[79].mxu1 }
 0x181   : > { %1776 = vst.msk [vmem:[%s2845_s16 + $0x4] sm:$0xf] %vm1774_vm5, %v2042_v12 }
 0x182   : > { %vm1712_vm7 = vcmp.gt.f32.partialorder %v1703_v24, 0.0  ;;  %v1721_v29 = vmul.f32 0.2, %v1703_v24  ;;  %v1704_v27 = vadd.f32 %v2837_v58, %v1688_v21 }
 0x184   : > { %v1730_v36 = vsel %vm1712_vm7, %v1703_v24, %v1721_v29  ;;  %vm1713_vm8 = vcmp.gt.f32.partialorder %v1704_v27, 0.0  ;;  %v1722_v31 = vmul.f32 0.2, %v1704_v27 }
 0x185   : > { %v2043_v25 = vpack.c.bf16 %v1730_v36, %v1730_v36  ;;  %v1663_v7 = vpop.f32.mrb[80].mxu0  ;;  %v1544_v6 = vpop.f32.mrb[80].mxu1 }
 0x186   : > { %v1731_v30 = vsel %vm1713_vm8, %v1704_v27, %v1722_v31  ;;  %v1689_v14 = vadd.f32 %v1663_v7, %v1562_v10  ;;  %v2319_v28 = vpop.f32.mrb[81].mxu0  ;;  %v1564_v18 = vadd.f32 %v1544_v6, %v2828_v38  ;;  %v2299_v55 = vpop.f32.mrb[81].mxu1 }
 0x187   : > { %1777 = vst.msk [vmem:[%s2845_s16 + $0x8] sm:$0xf] %vm1774_vm5, %v2043_v25  ;;  %v2044_v39 = vpack.c.bf16 %v1731_v30, %v1731_v30  ;;  %v1666_v37 = vpop.f32.mrb[82].mxu0  ;;  %v1547_v11 = vpop.f32.mrb[82].mxu1 }
 0x188   : > { %v1705_v41 = vadd.f32 %v2837_v58, %v1689_v14  ;;  %v1690_v42 = vadd.f32 %v1666_v37, %v1563_v34  ;;  %v2320_v16 = vpop.f32.mrb[83].mxu0  ;;  %v1565_v45 = vadd.f32 %v1547_v11, %v2830_v50  ;;  %v2300_v32 = vpop.f32.mrb[83].mxu1 }
 0x189   : > { %1778 = vst.msk [vmem:[%s2845_s16 + $0xc] sm:$0xf] %vm1774_vm5, %v2044_v39 }
 0x18a   : > { %vm1714_vm9 = vcmp.gt.f32.partialorder %v1705_v41, 0.0  ;;  %v1723_v43 = vmul.f32 0.2, %v1705_v41  ;;  %v1706_v47 = vadd.f32 %v2837_v58, %v1690_v42 }
 0x18c   : > { %v1732_v48 = vsel %vm1714_vm9, %v1705_v41, %v1723_v43  ;;  %vm1715_vm10 = vcmp.gt.f32.partialorder %v1706_v47, 0.0  ;;  %v1724_v38 = vmul.f32 0.2, %v1706_v47 }
 0x18d   : > { %v2045_v52 = vpack.c.bf16 %v1732_v48, %v1732_v48  ;;  %v1671_v53 = vpop.f32.mrb[84].mxu0  ;;  %v1552_v44 = vpop.f32.mrb[84].mxu1 }
 0x18e   : > { %v1733_v56 = vsel %vm1715_vm10, %v1706_v47, %v1724_v38  ;;  %v1691_v57 = vadd.f32 %v1671_v53, %v1564_v18  ;;  %v2323_v33 = vpop.f32.mrb[85].mxu0  ;;  %v1566_v50 = vadd.f32 %v1552_v44, %v2832_v40  ;;  %v2303_v61 = vpop.f32.mrb[85].mxu1 }
 0x18f   : > { %1779 = vst.msk [vmem:[%s2845_s16 + $0x10] sm:$0xf] %vm1774_vm5, %v2045_v52  ;;  %v2046_v59 = vpack.c.bf16 %v1733_v56, %v1733_v56  ;;  %v1674_v60 = vpop.f32.mrb[86].mxu0  ;;  %v1555_v62 = vpop.f32.mrb[86].mxu1 }
 0x190   : > { %v1707_v1 = vadd.f32 %v2837_v58, %v1691_v57  ;;  %v1692_v49 = vadd.f32 %v1674_v60, %v1565_v45  ;;  %v2324_v46 = vpop.f32.mrb[87].mxu0  ;;  %v2304_v63 = vpop.f32.mrb[87].mxu1 }
 0x191   : > { %1780 = vst.msk [vmem:[%s2845_s16 + $0x14] sm:$0xf] %vm1774_vm5, %v2046_v59 }
 0x192   : > { %vm1716_vm11 = vcmp.gt.f32.partialorder %v1707_v1, 0.0  ;;  %v1725_v0 = vmul.f32 0.2, %v1707_v1  ;;  %v1708_v2 = vadd.f32 %v2837_v58, %v1692_v49 }
 0x194   : > { %v1734_v3 = vsel %vm1716_vm11, %v1707_v1, %v1725_v0  ;;  %vm1717_vm12 = vcmp.gt.f32.partialorder %v1708_v2, 0.0  ;;  %v1726_v4 = vmul.f32 0.2, %v1708_v2 }
 0x195   : > { %v2047_v40 = vpack.c.bf16 %v1734_v3, %v1734_v3  ;;  %v1679_v5 = vpop.f32.mrb[88].mxu0 }
 0x196   : > { %v1735_v51 = vsel %vm1717_vm12, %v1708_v2, %v1726_v4  ;;  %v1693_v8 = vadd.f32 %v1679_v5, %v1566_v50  ;;  %v2327_v9 = vpop.f32.mrb[89].mxu0 }
 0x197   : > { %1781 = vst.msk [vmem:[%s2845_s16 + $0x18] sm:$0xf] %vm1774_vm5, %v2047_v40  ;;  %v2048_v54 = vpack.c.bf16 %v1735_v51, %v1735_v51  ;;  %v1682_v13 = vpop.f32.mrb[90].mxu0 }
 0x198   : > { %v1709_v15 = vadd.f32 %v2837_v58, %v1693_v8  ;;  %v2328_v17 = vpop.f32.mrb[91].mxu0 }
 0x199   : > { %1782 = vst.msk [vmem:[%s2845_s16 + $0x1c] sm:$0xf] %vm1774_vm5, %v2048_v54 }
 0x19a   : > { %vm1718_vm13 = vcmp.gt.f32.partialorder %v1709_v15, 0.0  ;;  %v1727_v19 = vmul.f32 0.2, %v1709_v15 }
 0x19c   : > { %v1736_v12 = vsel %vm1718_vm13, %v1709_v15, %v1727_v19 }
 0x19d   : > { %v2049_v10 = vpack.c.bf16 %v1736_v12, %v1736_v12 }
 0x19f   : > { %1783 = vst.msk [vmem:[%s2845_s16 + $0x20] sm:$0xf] %vm1774_vm5, %v2049_v10 }
 0x1a0 PF: > { %s16_s21 = sadd.s32 1, %s2410_s21  }
 0x1a1   : > { %p13_p4 = scmp.ge.s32.totalorder %s16_s21, 4  }
 0x1a3   :  { %15 = sbr.rel (!%p13_p4) target bundleno = 1 (0x1), region = 85 }

// kernel: discriminator_forward.9
= control target key start
LH: loop header
LB: loop body
LE: loop exit
PB: predicated region body
PF: predicated region fallthrough
CT: control target
= control target key end

     0   :  { %s2793_s21 = smov 0   ;;  %s3405_s0 = inlined_call_operand.vmem [shape: bf16[2,1,102,64], index: 0, kind: input, shape index: {}]   ;;  %s3406_s1 = inlined_call_operand.vmem [shape: bf16[9,64,128], index: 1, kind: input, shape index: {}]   ;;  %s3407_s2 = inlined_call_operand.vmem [shape: f32[1,128], index: 2, kind: input, shape index: {}]   ;;  %s3408_s3 = inlined_call_operand.vmem [shape: f32[1,128], index: 3, kind: input, shape index: {}]   ;;  %s3409_s4 = inlined_call_operand.vmem [shape: f32[1,128], index: 4, kind: input, shape index: {}]   ;;  %s3410_s5 = inlined_call_operand.vmem [shape: f32[80,1], index: 5, kind: input, shape index: {}]   ;;  %s3411_s6 = inlined_call_operand.vmem [shape: bf16[2,80,128], index: 6, kind: output, shape index: {}]  }
   0x1 LB: > { %s2095_s22 = sadd.s32 4294967295, %s2753_s21   ;;  %p2099_p0 = scmp.ge.s32.totalorder %s2753_s21, 1  ;;  %s2753_s21 = sphi %s2793_s21, %s16_s21  }
   0x2   : > { %p212_p1 = scmp.lt.s32.totalorder %s2753_s21, 3 }
   0x4   : > { %p213_p2 = pnand %p2099_p0, %p212_p1 }
   0x5   : > { %v2686_v0 = vld [vmem:[%s3406_s1 + $0x20] sm:$0xff] (!%p213_p2)   ;;  %v2755_v1 = vmov (!%p213_p2), 0.0   ;;  %v2687_v2 = vld [vmem:[%s3406_s1 + $0x28] sm:$0xff] (!%p213_p2)   ;;  %p242_p3 = scmp.lt.s32.totalorder (!%p213_p2), %s2095_s22, 1  ;;  %vm2756_vm0 = vmmov (!%p213_p2), 0   ;;  %v2688_v3 = vld [vmem:[%s3406_s1 + $0x30] sm:$0xff] (!%p213_p2)  }
   0x6   : > { %216 = sbr.rel (%p213_p2) target bundleno = 947 (0x3b3), region = 44  ;;  %2657 = vmatprep.subr.bf16.mxu1 (!%p213_p2), %v2755_v1  ;;  %2405 = vmatprep.subr.bf16.mxu0 (!%p213_p2), %v2755_v1  ;;  %v2689_v4 = vld [vmem:[%s3406_s1 + $0x38] sm:$0xff] (!%p213_p2)   ;;  %vm309_vm1 = vsmask.f32 (!%p213_p2), 7424  ;;  %vm378_vm2 = vcmask (!%p213_p2), 523264   ;;  %v2692_v21 = vld [vmem:[%s3406_s1] sm:$0xff] (!%p213_p2)  }
   0x7   : > { %2661 = vmatpush3.bf16.msra.mxu1 (!%p213_p2), %v2686_v0  ;;  %2406 = vmatpush3.bf16.msra.mxu0 (!%p213_p2), %v2686_v0  ;;  %v2697_v28 = vld [vmem:[%s3406_s1 + $0x40] sm:$0xff] (!%p213_p2)   ;;  %v2693_v31 = vld [vmem:[%s3406_s1 + $0x8] sm:$0xff] (!%p213_p2)   ;;  %v2698_v35 = vld [vmem:[%s3406_s1 + $0x10] sm:$0xff] (!%p213_p2)   ;;  %vm587_vm3 = vcmask (!%p213_p2), 1046528   ;;  %vm915_vm4 = vsmask.f32 (!%p213_p2), 6400 }
   0x8   : > { %2658 = vmatprep.subr.bf16.mxu1 (!%p213_p2), %v2755_v1  ;;  %2407 = vmatprep.subr.bf16.mxu0 (!%p213_p2), %v2755_v1  ;;  %v2699_v36 = vld [vmem:[%s3406_s1 + $0x48] sm:$0xff] (!%p213_p2)   ;;  %v2701_v43 = vld [vmem:[%s3406_s1 + $0x50] sm:$0xff] (!%p213_p2)   ;;  %v2702_v47 = vld [vmem:[%s3406_s1 + $0x18] sm:$0xff] (!%p213_p2)   ;;  %vm1104_vm5 = vcmask (!%p213_p2), 1045504   ;;  %vm1621_vm6 = vcmask (!%p213_p2), 1044480  }
   0x9   : > { %2421 = vmatprep.mubr.msk.bf16.mxu1 (!%p213_p2), %vm2756_vm0, %v2755_v1  ;;  %2413 = vmatprep.mubr.msk.bf16.mxu0 (!%p213_p2), %vm2756_vm0, %v2755_v1  ;;  %v2703_v48 = vld [vmem:[%s3406_s1 + $0x58] sm:$0xff] (!%p213_p2)   ;;  %v2706_v53 = vld [vmem:[%s3406_s1 + $0x80] sm:$0xff] (!%p213_p2)   ;;  %v2708_v55 = vld [vmem:[%s3406_s1 + $0x88] sm:$0xff] (!%p213_p2)   ;;  %vm1432_vm7 = vsmask.f32 (!%p213_p2), 5376 }
   0xa   : > { %v2705_v56 = vld [vmem:[%s3406_s1 + $0x60] sm:$0xff] (!%p213_p2)   ;;  %v2710_v60 = vld [vmem:[%s3406_s1 + $0x90] sm:$0xff] (!%p213_p2)   ;;  %v2707_v0 = vld [vmem:[%s3406_s1 + $0x68] sm:$0xff] (!%p213_p2)  }
   0xb   : > { %2662 = vmatpush3.bf16.msra.mxu1 (!%p213_p2), %v2687_v2  ;;  %2408 = vmatpush3.bf16.msra.mxu0 (!%p213_p2), %v2687_v2 }
   0xc   : > { %2659 = vmatprep.subr.bf16.mxu1 (!%p213_p2), %v2755_v1  ;;  %2409 = vmatprep.subr.bf16.mxu0 (!%p213_p2), %v2755_v1 }
   0xd   : > { %s3413_s22 = smov (!%p242_p3, %s2095_s22), 1 }
   0xe   : > { %s2665_s29 = smul.u32 52, %s3413_s22 }
   0xf   : > { %2663 = vmatpush3.bf16.msra.mxu1 %v2688_v3  ;;  %2410 = vmatpush3.bf16.msra.mxu0 %v2688_v3  ;;  %s2666_s24 = smul.u32 40, %s3413_s22 }
  0x10   : > { %s2829_s10 = scalar_lea.vmem %s3405_s0, %s2665_s29  ;;  %2660 = vmatprep.subr.bf16.mxu1 %v2755_v1  ;;  %2411 = vmatprep.subr.bf16.mxu0 %v2755_v1 }
  0x11   : > { %v2832_v5 = vld [vmem:[%s2829_s10 + $0x10] sm:$0xff]   ;;  %v2835_v6 = vld [vmem:[%s2829_s10 + $0x18] sm:$0xff]   ;;  %v253_v7 = vld [vmem:[%s2829_s10] sm:$0xf]  ;;  %s251_s26 = scalar_lea.vmem %s3411_s6, %s2666_s24 }
  0x12   : > { %v2841_v8 = vld [vmem:[%s2829_s10 + $0x4] sm:$0xf]  ;;  %v326_v9 = vshll.u32 %v2832_v5, 16  ;;  %v330_v10 = vshrl.u32 %v2832_v5, 16  ;;  %v334_v11 = vshll.u32 %v2835_v6, 16  ;;  %v2850_v13 = vld [vmem:[%s2829_s10 + $0x8] sm:$0xff]  }
  0x13   : > { %v2847_v12 = vcombine.low %v253_v7, %v2841_v8  ;;  %v2853_v14 = vld [vmem:[%s2829_s10 + $0x20] sm:$0xff]   ;;  %2664 = vmatpush3.bf16.msra.mxu1 %v2689_v4  ;;  %2412 = vmatpush3.bf16.msra.mxu0 %v2689_v4  ;;  %v318_v19 = vshll.u32 %v2850_v13, 16  ;;  %v338_v23 = vshrl.u32 %v2835_v6, 16  ;;  %v322_v29 = vshrl.u32 %v2850_v13, 16  ;;  %v2712_v7 = vld [vmem:[%s3406_s1 + $0x98] sm:$0xff]  }
  0x14   : > { %v328_v15 = vrot.slane %v326_v9, 1  ;;  %v336_v16 = vrot.slane %v334_v11, 1  ;;  %2433 = vmatprep.subr.bf16.mxu1 %v2755_v1  ;;  %2461 = vmatprep.subr.bf16.mxu0 %v2755_v1  ;;  %v342_v24 = vshll.u32 %v2853_v14, 16  ;;  %v2872_v30 = vld [vmem:[%s2829_s10 + $0x28] ss:$0 sps:$4 sm:$0x11]  }
  0x15   : > { %v311_v17 = vshrl.u32 %v2847_v12, 16  ;;  %v313_v18 = vshll.u32 %v2847_v12, 16  ;;  %v320_v25 = vrot.slane %v318_v19, 1  ;;  %v574_v38 = vld [vmem:[%s2829_s10] sm:$0xe]  ;;  %v346_v40 = vshrl.u32 %v2853_v14, 16 }
  0x16   : > { %v332_v20 = vor.u32 %v330_v10, %v328_v15  ;;  %v340_v33 = vor.u32 %v338_v23, %v336_v16  ;;  %v344_v34 = vrot.slane %v342_v24, 1  ;;  %v350_v41 = vshll.u32 %v2872_v30, 16  ;;  %v2939_v57 = vld [vmem:[%s2829_s10 + $0x1c] sm:$0xff]   ;;  %v2942_v58 = vld [vmem:[%s2829_s10 + $0x24] sm:$0xff]   ;;  %v2709_v9 = vld [vmem:[%s3406_s1 + $0x70] sm:$0xff]  }
  0x17   : > { %v315_v22 = vrot.slane %v313_v18, 1  ;;  %v324_v37 = vor.u32 %v322_v29, %v320_v25  ;;  %v2142_v44 = vcombine.low %v574_v38, %v2841_v8  ;;  %v589_v50 = vrot.slane %v2850_v13, 1  ;;  %v2725_v63 = vld [vmem:[%s2829_s10 + $0x2c] ss:$0 sps:$4 sm:$0x11]  }
  0x18   : > { %v337_v26 = vsel %vm309_vm1, %v332_v20, %v336_v16  ;;  %v345_v39 = vsel %vm309_vm1, %v340_v33, %v344_v34  ;;  %v348_v45 = vor.u32 %v346_v40, %v344_v34  ;;  %v352_v46 = vrot.slane %v350_v41, 1  ;;  %v3002_v18 = vld [vmem:[%s2829_s10 + $0xc] sm:$0xff]  }
  0x19   : > { %v316_v27 = vor.u32 %v315_v22, %v311_v17  ;;  %2422 = vmatmul.mubr.msk.bf16.vlgmr.msra.gmra.mrb[0].mxu1 %vm378_vm2, %v337_v26  ;;  %v329_v42 = vsel %vm309_vm1, %v324_v37, %v328_v15  ;;  %v588_v49 = vrot.slane %v2142_v44, 1  ;;  %v591_v54 = vrot.slane %v2832_v5, 1  ;;  %v2996_v15 = vld [vmem:[%s2829_s10 + $0x8] sm:$0xf] }
  0x1a   : > { %2434 = vmatpush3.bf16.msra.mxu1 %v2692_v21  ;;  %2425 = vmatprep.mubr.msk.bf16.mxu1 %vm2756_vm0, %v2755_v1  ;;  %v353_v51 = vsel %vm309_vm1, %v348_v45, %v352_v46  ;;  %v774_v61 = vrot.slane %v2939_v57, 1  ;;  %v776_v62 = vrot.slane %v2942_v58, 1  ;;  %v778_v3 = vrot.slane %v2725_v63, 1  ;;  %v2722_v46 = vld [vmem:[%s3406_s1 + $0xd0] sm:$0xff]  }
  0x1b   : > { %v321_v32 = vsel %vm309_vm1, %v316_v27, %v320_v25  ;;  %2435 = vmatprep.subr.bf16.mxu1 %v2755_v1  ;;  %v590_v52 = vsel %vm587_vm3, %v588_v49, %v589_v50  ;;  %v592_v59 = vsel %vm587_vm3, %v589_v50, %v591_v54  ;;  %v593_v4 = vrot.slane %v2835_v6, 1 }
  0x1c   : > { %2414 = vmatmul.mubr.msk.bf16.vlgmr.msra.gmra.mrb[0].mxu0 %vm378_vm2, %v321_v32  ;;  %v2962_v2 = vsel %vm587_vm3, %v774_v61, %v776_v62  ;;  %v2974_v8 = vsel %vm587_vm3, %v776_v62, %v778_v3  ;;  %v595_v11 = vrot.slane %v2853_v14, 1  ;;  %v597_v19 = vrot.slane %v2872_v30, 1  ;;  %v2724_v62 = vld [vmem:[%s3406_s1 + $0xb8] sm:$0xff]  }
  0x1d   : > { %2462 = vmatpush3.bf16.msra.mxu0 %v2697_v28  ;;  %2417 = vmatprep.mubr.msk.bf16.mxu0 %vm2756_vm0, %v2755_v1  ;;  %v594_v10 = vsel %vm587_vm3, %v591_v54, %v593_v4  ;;  %v925_v22 = vshrl.u32 %v3002_v18, 16  ;;  %v928_v23 = vshll.u32 %v3002_v18, 16  ;;  %v3016_v28 = vld [vmem:[%s2829_s10 + $0x14] sm:$0xff]   ;;  %v770_v37 = vrot.slane %v3002_v18, 1 }
  0x1e   : > { %2463 = vmatprep.subr.bf16.mxu0 %v2755_v1  ;;  %2436 = vmatpush3.bf16.msra.mxu1 %v2693_v31  ;;  %v596_v16 = vsel %vm587_vm3, %v593_v4, %v595_v11  ;;  %v598_v24 = vsel %vm587_vm3, %v595_v11, %v597_v19  ;;  %v934_v31 = vshrl.u32 %v3016_v28, 16  ;;  %v937_v32 = vshll.u32 %v3016_v28, 16  ;;  %v2721_v54 = vld [vmem:[%s3406_s1 + $0xb0] sm:$0xff]   ;;  %v1091_v19 = vld [vmem:[%s2829_s10 + $0x4] sm:$0xc] }
  0x1f   : > { %2437 = vmatprep.subr.bf16.mxu1 %v2755_v1  ;;  %v927_v26 = vrot.slane %v925_v22, 1  ;;  %v930_v27 = vrot.slane %v928_v23, 2  ;;  %v943_v40 = vshrl.u32 %v2939_v57, 16  ;;  %v952_v50 = vshrl.u32 %v2942_v58, 16 }
  0x20   : > { %v936_v34 = vrot.slane %v934_v31, 1  ;;  %v2201_v22 = vcombine.low %v1091_v19, %v2996_v15  ;;  %v2757_v31 = vmov 0  }
  0x21   : > { %2464 = vmatpush3.bf16.msra.mxu0 %v2699_v36  ;;  %2426 = vmatmul.mubr.msk.bf16.gmra.mrb[4].mxu1 %vm378_vm2, %v345_v39  ;;  %v931_v30 = vor.u32 %v930_v27, %v927_v26  ;;  %v2719_v39 = vld [vmem:[%s3406_s1 + $0xc8] sm:$0xff]   ;;  %v945_v44 = vrot.slane %v943_v40, 1 }
  0x22   : > { %2465 = vmatprep.subr.bf16.mxu0 %v2755_v1  ;;  %2438 = vmatpush3.bf16.msra.mxu1 %v2698_v35  ;;  %v939_v35 = vrot.slane %v937_v32, 2  ;;  %v2735_v26 = vld [vmem:[%s3406_s1 + $0x108] sm:$0xff]   ;;  %v1108_v32 = vrot.slane %v3016_v28, 2 }
  0x23   : > { %2429 = vmatprep.mubr.msk.bf16.mxu1 %vm2756_vm0, %v2755_v1  ;;  %2439 = vmatprep.subr.bf16.mxu1 %v2755_v1  ;;  %v3190_v40 = vld [vmem:[%s2829_s10 + $0x28] sm:$0xff]  }
  0x24   : > { %2418 = vmatmul.mubr.msk.bf16.gmra.mrb[4].mxu0 %vm378_vm2, %v329_v42  ;;  %v940_v38 = vor.u32 %v939_v35, %v936_v34  ;;  %v2715_v42 = vld [vmem:[%s3406_s1 + $0xa0] sm:$0xff]   ;;  %2684 = vset.pattern.permute.xlu0 %v2757_v31  ;;  %v1774_v35 = vld [vmem:[%s3410_s5 + $0x10] sm:$0xff] }
  0x25   : > { %2466 = vmatpush3.bf16.msra.mxu0 %v2701_v43  ;;  %2469 = vmatprep.mubr.msk.bf16.mxu0 %vm2756_vm0, %v2755_v1 }
  0x26   : > { %2467 = vmatprep.subr.bf16.mxu0 %v2755_v1  ;;  %2440 = vmatpush3.bf16.msra.mxu1 %v2702_v47  ;;  %v941_v43 = vsel %vm915_vm4, %v931_v30, %v940_v38  ;;  %v772_v47 = vrot.slane %v3016_v28, 1  ;;  %v2742_v28 = vld [vmem:[%s3406_s1 + $0x118] sm:$0xff]  }
  0x27   : > { %2489 = vmatprep.subr.bf16.mxu1 %v2755_v1  ;;  %2685 = vset.pattern.permute.xlu1 %v2757_v31  ;;  %v1469_v31 = vshrl.u32 %v3190_v40, 16 }
  0x28   : > { %v775_v4 = vsel %vm587_vm3, %v772_v47, %v774_v61  ;;  %v1238_v61 = vld [vmem:[%s2829_s10 + $0x8] sm:$0xc]  ;;  %1794 = vperm.xlu1 %2685, %v1774_v35  }
  0x29   : > { %2468 = vmatpush3.bf16.msra.mxu0 %v2703_v48  ;;  %2430 = vmatmul.mubr.msk.bf16.gmra.mrb[8].mxu1 %vm378_vm2, %v353_v51  ;;  %v2718_v48 = vld [vmem:[%s3406_s1 + $0xa8] sm:$0xff]   ;;  %v955_v51 = vshll.u32 %v2942_v58, 16 }
  0x2a   : > { %2517 = vmatprep.subr.bf16.mxu0 %v2755_v1  ;;  %2441 = vmatprep.mubr.msk.bf16.mxu1 %vm2756_vm0, %v2755_v1 }
  0x2c   : > { %2470 = vmatmul.mubr.msk.bf16.vlgmr.msra.gmra.mrb[8].mxu0 %vm378_vm2, %v590_v52  ;;  %v2727_v52 = vld [vmem:[%s3406_s1 + $0xd8] sm:$0xff]  }
  0x2d   : > { %2518 = vmatpush3.bf16.msra.mxu0 %v2706_v53  ;;  %2473 = vmatprep.mubr.msk.bf16.mxu0 %vm2756_vm0, %v2755_v1  ;;  %v773_v53 = vsel %vm587_vm3, %v770_v37, %v772_v47 }
  0x2e   : > { %2519 = vmatprep.subr.bf16.mxu0 %v2755_v1 }
  0x31   : > { %2520 = vmatpush3.bf16.msra.mxu0 %v2708_v55  ;;  %2442 = vmatmul.mubr.msk.bf16.vlgmr.msra.gmra.mrb[12].mxu1 %vm378_vm2, %v2847_v12  ;;  %v2711_v12 = vld [vmem:[%s3406_s1 + $0x78] sm:$0xff]  }
  0x32   : > { %2521 = vmatprep.subr.bf16.mxu0 %v2755_v1  ;;  %2490 = vmatpush3.bf16.msra.mxu1 %v2705_v56  ;;  %v954_v56 = vrot.slane %v952_v50, 1  ;;  %v1112_v50 = vrot.slane %v2942_v58, 2 }
  0x33   : > { %2445 = vmatprep.mubr.msk.bf16.mxu1 %vm2756_vm0, %v2755_v1  ;;  %2491 = vmatprep.subr.bf16.mxu1 %v2755_v1 }
  0x34   : > { %2474 = vmatmul.mubr.msk.bf16.gmra.mrb[12].mxu0 %vm378_vm2, %v592_v59  ;;  %v957_v59 = vrot.slane %v955_v51, 2  ;;  %v1780_v51 = vld [vmem:[%s3410_s5 + $0x40] sm:$0xff] }
  0x35   : > { %2477 = vmatprep.mubr.msk.bf16.mxu0 %vm2756_vm0, %v2755_v1  ;;  %2522 = vmatpush3.bf16.msra.mxu0 %v2710_v60  ;;  %v3078_v60 = vld [vmem:[%s2829_s10 + $0x2c] ss:$0 sps:$4 sm:$0x33]  }
  0x36   : > { %2523 = vmatprep.subr.bf16.mxu0 %v2755_v1  ;;  %2492 = vmatpush3.bf16.msra.mxu1 %v2707_v0  ;;  %v958_v63 = vor.u32 %v957_v59, %v954_v56  ;;  %v961_v0 = vshrl.u32 %v3078_v60, 16  ;;  %v964_v3 = vshll.u32 %v3078_v60, 16  ;;  %v1114_v59 = vrot.slane %v3078_v60, 2 }
  0x37   : > { %2493 = vmatprep.subr.bf16.mxu1 %v2755_v1 }
  0x38   : > { %v1115_v60 = vsel %vm1104_vm5, %v1112_v50, %v1114_v59 }
  0x39   : > { %2524 = vmatpush3.bf16.msra.mxu0 %v2712_v7  ;;  %2446 = vmatmul.mubr.msk.bf16.gmra.mrb[16].mxu1 %vm378_vm2, %v2850_v13  ;;  %v721_v13 = vld [vmem:[%s2829_s10 + $0x4] sm:$0xe] }
  0x3a   : > { %2573 = vmatprep.subr.bf16.mxu0 %v2755_v1  ;;  %2449 = vmatprep.mubr.msk.bf16.mxu1 %vm2756_vm0, %v2755_v1  ;;  %v2160_v17 = vcombine.low %v721_v13, %v2996_v15 }
  0x3b   : > { %2494 = vmatpush3.bf16.msra.mxu1 %v2709_v9  ;;  %v963_v9 = vrot.slane %v961_v0, 1 }
  0x3c   : > { %2478 = vmatmul.mubr.msk.bf16.gmra.mrb[16].mxu0 %vm378_vm2, %v594_v10  ;;  %2495 = vmatprep.subr.bf16.mxu1 %v2755_v1  ;;  %v917_v20 = vshrl.u32 %v2160_v17, 16  ;;  %v920_v21 = vshll.u32 %v2160_v17, 16  ;;  %v769_v36 = vrot.slane %v2160_v17, 1  ;;  %v966_v10 = vrot.slane %v964_v3, 2  ;;  %v3113_v17 = vld [vmem:[%s2829_s10 + $0x10] sm:$0xff]  }
  0x3d   : > { %2481 = vmatprep.mubr.msk.bf16.mxu0 %vm2756_vm0, %v2755_v1  ;;  %v1442_v0 = vshrl.u32 %v3113_v17, 16  ;;  %v1445_v3 = vshll.u32 %v3113_v17, 16 }
  0x3e   : > { %v919_v25 = vrot.slane %v917_v20, 1  ;;  %v771_v41 = vsel %vm587_vm3, %v769_v36, %v770_v37  ;;  %v967_v11 = vor.u32 %v966_v10, %v963_v9  ;;  %v2737_v37 = vld [vmem:[%s3406_s1 + $0xf0] sm:$0xff]  }
  0x3f   : > { %2496 = vmatpush3.bf16.msra.mxu1 %v2711_v12  ;;  %v3106_v12 = vld [vmem:[%s2829_s10 + $0xc] sm:$0xf] }
  0x40   : > { %2545 = vmatprep.subr.bf16.mxu1 %v2755_v1  ;;  %v968_v13 = vsel %vm915_vm4, %v958_v63, %v967_v11  ;;  %v1444_v11 = vrot.slane %v1442_v0, 2 }
  0x41   : > { %2450 = vmatmul.mubr.msk.bf16.gmra.mrb[20].mxu1 %vm378_vm2, %v2832_v5  ;;  %v922_v5 = vrot.slane %v920_v21, 2  ;;  %v1287_v21 = vrot.slane %v3113_v17, 2 }
  0x42   : > { %2453 = vmatprep.mubr.msk.bf16.mxu1 %vm2756_vm0, %v2755_v1 }
  0x43   : > { %v923_v29 = vor.u32 %v922_v5, %v919_v25  ;;  %v1105_v25 = vrot.slane %v2201_v22, 2  ;;  %v1106_v5 = vrot.slane %v3002_v18, 2  ;;  %v2731_v18 = vld [vmem:[%s3406_s1 + $0xe0] sm:$0xff]  }
  0x44   : > { %2482 = vmatmul.mubr.msk.bf16.gmra.mrb[20].mxu0 %vm378_vm2, %v596_v16  ;;  %v3110_v16 = vcombine.low %v1238_v61, %v3106_v12  ;;  %v1447_v61 = vrot.slane %v1445_v3, 3 }
  0x45   : > { %2485 = vmatprep.mubr.msk.bf16.mxu0 %vm2756_vm0, %v2755_v1  ;;  %v932_v33 = vsel %vm915_vm4, %v923_v29, %v931_v30  ;;  %v3152_v29 = vld [vmem:[%s2829_s10 + $0x20] sm:$0xff]   ;;  %v2738_v30 = vld [vmem:[%s3406_s1 + $0x110] sm:$0xff]   ;;  %v1109_v36 = vsel %vm1104_vm5, %v1106_v5, %v1108_v32 }
  0x46   : > { %v1286_v20 = vrot.slane %v3110_v16, 2  ;;  %v1291_v34 = vrot.slane %v3152_v29, 2 }
  0x48   : > { %v1288_v23 = vsel %vm1104_vm5, %v1286_v20, %v1287_v21 }
  0x49   : > { %2454 = vmatmul.mubr.msk.bf16.gmra.mrb[24].mxu1 %vm378_vm2, %v2835_v6  ;;  %v2716_v6 = vld [vmem:[%s3406_s1 + $0xc0] sm:$0xff]  }
  0x4a   : > { %2457 = vmatprep.mubr.msk.bf16.mxu1 %vm2756_vm0, %v2755_v1 }
  0x4c   : > { %2486 = vmatmul.mubr.msk.bf16.gmra.mrb[24].mxu0 %vm378_vm2, %v598_v24  ;;  %v3131_v24 = vld [vmem:[%s2829_s10 + $0x18] sm:$0xff]  }
  0x4d   : > { %2525 = vmatprep.mubr.msk.bf16.mxu0 %vm2756_vm0, %v2755_v1  ;;  %v1289_v15 = vrot.slane %v3131_v24, 2  ;;  %v1451_v19 = vshrl.u32 %v3131_v24, 16  ;;  %v1625_v20 = vrot.slane %v3131_v24, 3 }
  0x4f   : > { %v1290_v27 = vsel %vm1104_vm5, %v1287_v21, %v1289_v15  ;;  %v1453_v22 = vrot.slane %v1451_v19, 2 }
  0x51   : > { %2458 = vmatmul.mubr.msk.bf16.gmra.mrb[28].mxu1 %vm378_vm2, %v2853_v14  ;;  %v946_v14 = vshll.u32 %v2939_v57, 16 }
  0x52   : > { %2497 = vmatprep.mubr.msk.bf16.mxu1 %vm2756_vm0, %v2755_v1 }
  0x53   : > { %v948_v45 = vrot.slane %v946_v14, 2  ;;  %v1775_v14 = vld [vmem:[%s3410_s5 + $0x18] sm:$0xff] }
  0x54   : > { %2526 = vmatmul.mubr.msk.bf16.vlgmr.msra.gmra.mrb[28].mxu0 %vm378_vm2, %v932_v33  ;;  %v2734_v33 = vld [vmem:[%s3406_s1 + $0xe8] sm:$0xff]   ;;  %1799 = vperm.xlu1 %2685, %v1775_v14  }
  0x55   : > { %2574 = vmatpush3.bf16.msra.mxu0 %v2716_v6  ;;  %2529 = vmatprep.mubr.msk.bf16.mxu0 %vm2756_vm0, %v2755_v1  ;;  %v949_v49 = vor.u32 %v948_v45, %v945_v44  ;;  %v1772_v6 = vld [vmem:[%s3410_s5] sm:$0xff]  ;;  %v1293_v44 = vrot.slane %v3190_v40, 2 }
  0x56   : > { %2575 = vmatprep.subr.bf16.mxu0 %v2755_v1  ;;  %1784 = vperm.xlu0 %2684, %v1772_v6   ;;  %v1471_v6 = vrot.slane %v1469_v31, 2 }
  0x57   : > { %v950_v55 = vsel %vm915_vm4, %v940_v38, %v949_v49  ;;  %v959_v7 = vsel %vm915_vm4, %v949_v49, %v958_v63  ;;  %v1773_v38 = vld [vmem:[%s3410_s5 + $0x8] sm:$0xff]  ;;  %v1294_v47 = vsel %vm1104_vm5, %v1291_v34, %v1293_v44  ;;  %v1779_v49 = vld [vmem:[%s3410_s5 + $0x38] sm:$0xff]  ;;  %v1437_v63 = vshll.u32 %v3110_v16, 16 }
  0x59   : > { %2576 = vmatpush3.bf16.msra.mxu0 %v2719_v39  ;;  %2498 = vmatmul.mubr.msk.bf16.vlgmr.msra.gmra.mrb[32].mxu1 %vm378_vm2, %v771_v41  ;;  %v1292_v39 = vsel %vm1104_vm5, %v1289_v15, %v1291_v34  ;;  %v1110_v41 = vrot.slane %v2939_v57, 2  ;;  %v1777_v57 = vld [vmem:[%s3410_s5 + $0x28] sm:$0xff]  ;;  %v1439_v10 = vrot.slane %v1437_v63, 3  ;;  %v1463_v15 = vshll.u32 %v3152_v29, 16 }
  0x5a   : > { %2577 = vmatprep.subr.bf16.mxu0 %v2755_v1  ;;  %2546 = vmatpush3.bf16.msra.mxu1 %v2715_v42  ;;  %v2740_v42 = vld [vmem:[%s3406_s1 + $0xf8] sm:$0xff]  }
  0x5b   : > { %2501 = vmatprep.mubr.msk.bf16.mxu1 %vm2756_vm0, %v2755_v1  ;;  %2547 = vmatprep.subr.bf16.mxu1 %v2755_v1  ;;  %v1111_v45 = vsel %vm1104_vm5, %v1108_v32, %v1110_v41  ;;  %v1472_v32 = vshll.u32 %v3190_v40, 16 }
  0x5c   : > { %2530 = vmatmul.mubr.msk.bf16.gmra.mrb[32].mxu0 %vm378_vm2, %v941_v43  ;;  %1789 = vperm.xlu0 %2684, %v1773_v38   ;;  %v1776_v43 = vld [vmem:[%s3410_s5 + $0x20] sm:$0xff] }
  0x5d   : > { %2533 = vmatprep.mubr.msk.bf16.mxu0 %vm2756_vm0, %v2755_v1  ;;  %2578 = vmatpush3.bf16.msra.mxu0 %v2722_v46  ;;  %v1778_v46 = vld [vmem:[%s3410_s5 + $0x30] sm:$0xff]  ;;  %v1474_v34 = vrot.slane %v1472_v32, 3 }
  0x5e   : > { %2579 = vmatprep.subr.bf16.mxu0 %v2755_v1  ;;  %2548 = vmatpush3.bf16.msra.mxu1 %v2718_v48  ;;  %v2741_v48 = vld [vmem:[%s2829_s10 + $0x30] ss:$0 sps:$4 sm:$0x33]  }
  0x5f   : > { %2549 = vmatprep.subr.bf16.mxu1 %v2755_v1  ;;  %1809 = vperm.xlu1 %2685, %v1777_v57  }
  0x60   : > { %1804 = vperm.xlu0 %2684, %v1776_v43  }
  0x61   : > { %2580 = vmatpush3.bf16.msra.mxu0 %v2727_v52  ;;  %2502 = vmatmul.mubr.msk.bf16.gmra.mrb[36].mxu1 %vm378_vm2, %v773_v53  ;;  %v1295_v52 = vrot.slane %v2741_v48, 2  ;;  %v1608_v53 = vld [vmem:[%s2829_s10 + $0x8] sm:$0x8] }
  0x62   : > { %2629 = vmatprep.subr.bf16.mxu0 %v2755_v1  ;;  %2505 = vmatprep.mubr.msk.bf16.mxu1 %vm2756_vm0, %v2755_v1  ;;  %v2260_v56 = vcombine.low %v1608_v53, %v3106_v12 }
  0x63   : > { %2550 = vmatpush3.bf16.msra.mxu1 %v2721_v54  ;;  %1819 = vperm.xlu1 %2685, %v1779_v49   ;;  %v1781_v54 = vld [vmem:[%s3410_s5 + $0x48] sm:$0xff]  ;;  %v1296_v58 = vsel %vm1104_vm5, %v1293_v44, %v1295_v52 }
  0x64   : > { %2534 = vmatmul.mubr.msk.bf16.gmra.mrb[36].mxu0 %vm378_vm2, %v950_v55  ;;  %2551 = vmatprep.subr.bf16.mxu1 %v2755_v1  ;;  %v1113_v55 = vsel %vm1104_vm5, %v1110_v41, %v1112_v50 }
  0x65   : > { %2537 = vmatprep.mubr.msk.bf16.mxu0 %vm2756_vm0, %v2755_v1  ;;  %1814 = vperm.xlu0 %2684, %v1778_v46  }
  0x67   : > { %2552 = vmatpush3.bf16.msra.mxu1 %v2724_v62  ;;  %1829 = vperm.xlu1 %2685, %v1781_v54   ;;  %v1434_v62 = vshrl.u32 %v3110_v16, 16  ;;  %v1448_v16 = vor.u32 %v1447_v61, %v1444_v11 }
  0x68   : > { %2601 = vmatprep.subr.bf16.mxu1 %v2755_v1 }
  0x69   : > { %2506 = vmatmul.mubr.msk.bf16.gmra.mrb[40].mxu1 %vm378_vm2, %v775_v4  ;;  %1824 = vperm.xlu0 %2684, %v1780_v51   ;;  %v1622_v4 = vrot.slane %v2260_v56, 3  ;;  %v1436_v9 = vrot.slane %v1434_v62, 2 }
  0x6a   : > { %2509 = vmatprep.mubr.msk.bf16.mxu1 %vm2756_vm0, %v2755_v1 }
  0x6c   : > { %2538 = vmatmul.mubr.msk.bf16.gmra.mrb[40].mxu0 %vm378_vm2, %v959_v7  ;;  %v1623_v7 = vrot.slane %v3113_v17, 3  ;;  %v1454_v17 = vshll.u32 %v3131_v24, 16  ;;  %v1627_v24 = vrot.slane %v3152_v29, 3 }
  0x6d   : > { %2541 = vmatprep.mubr.msk.bf16.mxu0 %vm2756_vm0, %v2755_v1 }
  0x6e   : > { %v1624_v12 = vsel %vm1621_vm6, %v1622_v4, %v1623_v7 }
  0x71   : > { %2510 = vmatmul.mubr.msk.bf16.gmra.mrb[44].mxu1 %vm378_vm2, %v2962_v2  ;;  %v2732_v2 = vld [vmem:[%s3406_s1 + $0x100] sm:$0xff]  }
  0x72   : > { %2513 = vmatprep.mubr.msk.bf16.mxu1 %vm2756_vm0, %v2755_v1 }
  0x74   : > { %2542 = vmatmul.mubr.msk.bf16.gmra.mrb[44].mxu0 %vm378_vm2, %v968_v13  ;;  %v1440_v13 = vor.u32 %v1439_v10, %v1436_v9 }
  0x75   : > { %2581 = vmatprep.mubr.msk.bf16.mxu0 %vm2756_vm0, %v2755_v1 }
  0x76   : > { %v1449_v21 = vsel %vm1432_vm7, %v1440_v13, %v1448_v16 }
  0x79   : > { %2514 = vmatmul.mubr.msk.bf16.gmra.mrb[48].mxu1 %vm378_vm2, %v2974_v8  ;;  %v1107_v8 = vsel %vm1104_vm5, %v1105_v25, %v1106_v5  ;;  %v1460_v5 = vshrl.u32 %v3152_v29, 16  ;;  %v1629_v29 = vrot.slane %v3190_v40, 3 }
  0x7a   : > { %2553 = vmatprep.mubr.msk.bf16.mxu1 %vm2756_vm0, %v2755_v1 }
  0x7b   : > { %v1630_v35 = vsel %vm1621_vm6, %v1627_v24, %v1629_v29 }
  0x7c   : > { %2582 = vmatmul.mubr.msk.bf16.vlgmr.msra.gmra.mrb[48].mxu0 %vm378_vm2, %v1288_v23  ;;  %v1456_v23 = vrot.slane %v1454_v17, 3 }
  0x7d   : > { %2630 = vmatpush3.bf16.msra.mxu0 %v2732_v2  ;;  %2585 = vmatprep.mubr.msk.bf16.mxu0 %vm2756_vm0, %v2755_v1  ;;  %v1626_v2 = vsel %vm1621_vm6, %v1623_v7, %v1625_v20 }
  0x7e   : > { %2631 = vmatprep.subr.bf16.mxu0 %v2755_v1  ;;  %v1457_v25 = vor.u32 %v1456_v23, %v1453_v22 }
  0x81   : > { %2632 = vmatpush3.bf16.msra.mxu0 %v2735_v26  ;;  %2554 = vmatmul.mubr.msk.bf16.vlgmr.msra.gmra.mrb[52].mxu1 %vm378_vm2, %v1107_v8  ;;  %v1458_v26 = vsel %vm1432_vm7, %v1448_v16, %v1457_v25  ;;  %v1462_v8 = vrot.slane %v1460_v5, 2 }
  0x82   : > { %2633 = vmatprep.subr.bf16.mxu0 %v2755_v1  ;;  %2602 = vmatpush3.bf16.msra.mxu1 %v2731_v18  ;;  %v1465_v18 = vrot.slane %v1463_v15, 3 }
  0x83   : > { %2557 = vmatprep.mubr.msk.bf16.mxu1 %vm2756_vm0, %v2755_v1  ;;  %2603 = vmatprep.subr.bf16.mxu1 %v2755_v1 }
  0x84   : > { %2586 = vmatmul.mubr.msk.bf16.gmra.mrb[52].mxu0 %vm378_vm2, %v1290_v27  ;;  %v1628_v27 = vsel %vm1621_vm6, %v1625_v20, %v1627_v24 }
  0x85   : > { %2589 = vmatprep.mubr.msk.bf16.mxu0 %vm2756_vm0, %v2755_v1  ;;  %2634 = vmatpush3.bf16.msra.mxu0 %v2738_v30  ;;  %v1466_v30 = vor.u32 %v1465_v18, %v1462_v8 }
  0x86   : > { %2635 = vmatprep.subr.bf16.mxu0 %v2755_v1  ;;  %2604 = vmatpush3.bf16.msra.mxu1 %v2734_v33 }
  0x87   : > { %2605 = vmatprep.subr.bf16.mxu1 %v2755_v1  ;;  %v1467_v33 = vsel %vm1432_vm7, %v1457_v25, %v1466_v30 }
  0x89   : > { %2636 = vmatpush3.bf16.msra.mxu0 %v2742_v28  ;;  %2558 = vmatmul.mubr.msk.bf16.gmra.mrb[56].mxu1 %vm378_vm2, %v1109_v36  ;;  %v2744_v28 = vld [vmem:[%s2829_s10 + $0x30] ss:$0 sps:$4 sm:$0x77]   ;;  %v1475_v36 = vor.u32 %v1474_v34, %v1471_v6 }
  0x8a   : > { %2561 = vmatprep.mubr.msk.bf16.mxu1 %vm2756_vm0, %v2755_v1  ;;  %2606 = vmatpush3.bf16.msra.mxu1 %v2737_v37  ;;  %v1478_v37 = vshrl.u32 %v2744_v28, 16  ;;  %v1481_v38 = vshll.u32 %v2744_v28, 16 }
  0x8b   : > { %2607 = vmatprep.subr.bf16.mxu1 %v2755_v1  ;;  %v1476_v40 = vsel %vm1432_vm7, %v1466_v30, %v1475_v36 }
  0x8c   : > { %2590 = vmatmul.mubr.msk.bf16.gmra.mrb[56].mxu0 %vm378_vm2, %v1292_v39  ;;  %v1631_v39 = vrot.slane %v2744_v28, 3  ;;  %v1480_v14 = vrot.slane %v1478_v37, 2  ;;  %v1483_v41 = vrot.slane %v1481_v38, 3 }
  0x8d   : > { %2593 = vmatprep.mubr.msk.bf16.mxu0 %vm2756_vm0, %v2755_v1 }
  0x8e   : > { %2608 = vmatpush3.bf16.msra.mxu1 %v2740_v42  ;;  %v1632_v42 = vsel %vm1621_vm6, %v1629_v29, %v1631_v39  ;;  %v1484_v43 = vor.u32 %v1483_v41, %v1480_v14 }
  0x90   : > { %v1485_v44 = vsel %vm1432_vm7, %v1475_v36, %v1484_v43 }
  0x91   : > { %2562 = vmatmul.mubr.msk.bf16.gmra.mrb[60].mxu1 %vm378_vm2, %v1111_v45 }
  0x92   : > { %2565 = vmatprep.mubr.msk.bf16.mxu1 %vm2756_vm0, %v2755_v1 }
  0x94   : > { %2594 = vmatmul.mubr.msk.bf16.gmra.mrb[60].mxu0 %vm378_vm2, %v1294_v47 }
  0x95   : > { %2597 = vmatprep.mubr.msk.bf16.mxu0 %vm2756_vm0, %v2755_v1 }
  0x99   : > { %2566 = vmatmul.mubr.msk.bf16.gmra.mrb[64].mxu1 %vm378_vm2, %v1113_v55 }
  0x9a   : > { %2569 = vmatprep.mubr.msk.bf16.mxu1 %vm2756_vm0, %v2755_v1 }
  0x9c   : > { %2598 = vmatmul.mubr.msk.bf16.gmra.mrb[64].mxu0 %vm378_vm2, %v1296_v58 }
  0x9d   : > { %2637 = vmatprep.mubr.msk.bf16.mxu0 %vm2756_vm0, %v2755_v1 }
  0xa1   : > { %2570 = vmatmul.mubr.msk.bf16.gmra.mrb[68].mxu1 %vm378_vm2, %v1115_v60 }
  0xa2   : > { %2609 = vmatprep.mubr.msk.bf16.mxu1 %vm2756_vm0, %v2755_v1 }
  0xa4   : > { %2638 = vmatmul.mubr.msk.bf16.vlgmr.msra.gmra.mrb[68].mxu0 %vm378_vm2, %v1624_v12 }
  0xa5   : > { %2641 = vmatprep.mubr.msk.bf16.mxu0 %vm2756_vm0, %v2755_v1 }
  0xa9   : > { %2610 = vmatmul.mubr.msk.bf16.vlgmr.msra.gmra.mrb[72].mxu1 %vm378_vm2, %v1449_v21 }
  0xaa   : > { %2613 = vmatprep.mubr.msk.bf16.mxu1 %vm2756_vm0, %v2755_v1 }
  0xac   : > { %2642 = vmatmul.mubr.msk.bf16.gmra.mrb[72].mxu0 %vm378_vm2, %v1626_v2 }
  0xad   : > { %2645 = vmatprep.mubr.msk.bf16.mxu0 %vm2756_vm0, %v2755_v1 }
  0xb1   : > { %2614 = vmatmul.mubr.msk.bf16.gmra.mrb[76].mxu1 %vm378_vm2, %v1458_v26 }
  0xb2   : > { %2617 = vmatprep.mubr.msk.bf16.mxu1 %vm2756_vm0, %v2755_v1 }
  0xb4   : > { %2646 = vmatmul.mubr.msk.bf16.gmra.mrb[76].mxu0 %vm378_vm2, %v1628_v27 }
  0xb5   : > { %2649 = vmatprep.mubr.msk.bf16.mxu0 %vm2756_vm0, %v2755_v1 }
  0xb9   : > { %2618 = vmatmul.mubr.msk.bf16.gmra.mrb[80].mxu1 %vm378_vm2, %v1467_v33 }
  0xba   : > { %2621 = vmatprep.mubr.msk.bf16.mxu1 %vm2756_vm0, %v2755_v1 }
  0xbc   : > { %2650 = vmatmul.mubr.msk.bf16.gmra.mrb[80].mxu0 %vm378_vm2, %v1630_v35 }
  0xbd   : > { %2653 = vmatprep.mubr.msk.bf16.mxu0 %vm2756_vm0, %v2755_v1 }
  0xc1   : > { %2622 = vmatmul.mubr.msk.bf16.gmra.mrb[84].mxu1 %vm378_vm2, %v1476_v40 }
  0xc2   : > { %2625 = vmatprep.mubr.msk.bf16.mxu1 %vm2756_vm0, %v2755_v1 }
  0xc4   : > { %2654 = vmatmul.mubr.msk.bf16.gmra.mrb[84].mxu0 %vm378_vm2, %v1632_v42 }
  0xc9   : > { %2626 = vmatmul.mubr.msk.bf16.gmra.mrb[88].mxu1 %vm378_vm2, %v1485_v44 }
  0xec   : > { %v444_v57 = vpop.f32.mrb[0].mxu1 }
  0xed   : > { %v2423_v45 = vpop.f32.mrb[1].mxu1 }
  0xee   : > { %v447_v46 = vpop.f32.mrb[2].mxu1 }
  0xef   : > { %v428_v47 = vpop.f32.mrb[0].mxu0  ;;  %v2424_v48 = vpop.f32.mrb[3].mxu1 }
  0xf0   : > { %v2415_v49 = vpop.f32.mrb[1].mxu0 }
  0xf1   : > { %v431_v50 = vpop.f32.mrb[2].mxu0 }
  0xf2   : > { %v2416_v51 = vpop.f32.mrb[3].mxu0 }
  0xf4   : > { %v452_v52 = vpop.f32.mrb[4].mxu1 }
  0xf5   : > { %v2427_v53 = vpop.f32.mrb[5].mxu1 }
  0xf6   : > { %v455_v54 = vpop.f32.mrb[6].mxu1 }
  0xf7   : > { %v436_v55 = vpop.f32.mrb[4].mxu0  ;;  %v2428_v1 = vpop.f32.mrb[7].mxu1 }
  0xf8   : > { %v2419_v58 = vpop.f32.mrb[5].mxu0 }
  0xf9   : > { %v439_v56 = vpop.f32.mrb[6].mxu0 }
  0xfa   : > { %v2420_v59 = vpop.f32.mrb[7].mxu0 }
  0xfc   : > { %v460_v62 = vpop.f32.mrb[8].mxu1 }
  0xfd   : > { %v2431_v63 = vpop.f32.mrb[9].mxu1 }
  0xfe   : > { %v463_v0 = vpop.f32.mrb[10].mxu1 }
  0xff   : > { %v672_v3 = vpop.f32.mrb[8].mxu0  ;;  %v2432_v4 = vpop.f32.mrb[11].mxu1 }
 0x100   : > { %v2471_v7 = vpop.f32.mrb[9].mxu0 }
 0x101   : > { %v675_v60 = vpop.f32.mrb[10].mxu0 }
 0x102   : > { %v2472_v9 = vpop.f32.mrb[11].mxu0 }
 0x104   : > { %v535_v10 = vpop.f32.mrb[12].mxu1 }
 0x105   : > { %v536_v11 = vadd.f32 %v535_v10, %v428_v47  ;;  %v2443_v61 = vpop.f32.mrb[13].mxu1 }
 0x106   : > { %v538_v12 = vpop.f32.mrb[14].mxu1 }
 0x107   : > { %v680_v13 = vpop.f32.mrb[12].mxu0  ;;  %v711_v16 = vadd.f32 %v672_v3, %v536_v11  ;;  %v539_v19 = vadd.f32 %v538_v12, %v431_v50  ;;  %v2444_v17 = vpop.f32.mrb[15].mxu1 }
 0x108   : > { %v2475_v20 = vpop.f32.mrb[13].mxu0 }
 0x109   : > { %v683_v21 = vpop.f32.mrb[14].mxu0  ;;  %v712_v22 = vadd.f32 %v675_v60, %v539_v19 }
 0x10a   : > { %v2476_v23 = vpop.f32.mrb[15].mxu0 }
 0x10c   : > { %v543_v2 = vpop.f32.mrb[16].mxu1 }
 0x10d   : > { %v544_v25 = vadd.f32 %v543_v2, %v436_v55  ;;  %v2447_v5 = vpop.f32.mrb[17].mxu1 }
 0x10e   : > { %v546_v15 = vpop.f32.mrb[18].mxu1 }
 0x10f   : > { %v688_v24 = vpop.f32.mrb[16].mxu0  ;;  %v713_v26 = vadd.f32 %v680_v13, %v544_v25  ;;  %v547_v8 = vadd.f32 %v546_v15, %v439_v56  ;;  %v2448_v18 = vpop.f32.mrb[19].mxu1 }
 0x110   : > { %v2479_v27 = vpop.f32.mrb[17].mxu0 }
 0x111   : > { %v691_v30 = vpop.f32.mrb[18].mxu0  ;;  %v714_v31 = vadd.f32 %v683_v21, %v547_v8 }
 0x112   : > { %v2480_v32 = vpop.f32.mrb[19].mxu0 }
 0x114   : > { %v551_v29 = vpop.f32.mrb[20].mxu1 }
 0x115   : > { %v552_v33 = vadd.f32 %v551_v29, %v444_v57  ;;  %v2451_v6 = vpop.f32.mrb[21].mxu1 }
 0x116   : > { %v554_v34 = vpop.f32.mrb[22].mxu1 }
 0x117   : > { %v696_v28 = vpop.f32.mrb[20].mxu0  ;;  %v715_v35 = vadd.f32 %v688_v24, %v552_v33  ;;  %v555_v36 = vadd.f32 %v554_v34, %v447_v46  ;;  %v2452_v37 = vpop.f32.mrb[23].mxu1 }
 0x118   : > { %v2483_v38 = vpop.f32.mrb[21].mxu0 }
 0x119   : > { %v699_v39 = vpop.f32.mrb[22].mxu0  ;;  %v716_v40 = vadd.f32 %v691_v30, %v555_v36 }
 0x11a   : > { %v2484_v14 = vpop.f32.mrb[23].mxu0 }
 0x11c   : > { %v559_v41 = vpop.f32.mrb[24].mxu1 }
 0x11d   : > { %v560_v42 = vadd.f32 %v559_v41, %v452_v52  ;;  %v2455_v43 = vpop.f32.mrb[25].mxu1 }
 0x11e   : > { %v562_v44 = vpop.f32.mrb[26].mxu1 }
 0x11f   : > { %v704_v45 = vpop.f32.mrb[24].mxu0  ;;  %v717_v47 = vadd.f32 %v696_v28, %v560_v42  ;;  %v563_v48 = vadd.f32 %v562_v44, %v455_v54  ;;  %v2456_v49 = vpop.f32.mrb[27].mxu1 }
 0x120   : > { %v2487_v50 = vpop.f32.mrb[25].mxu0 }
 0x121   : > { %v707_v57 = vpop.f32.mrb[26].mxu0  ;;  %v718_v51 = vadd.f32 %v699_v39, %v563_v48 }
 0x122   : > { %v2488_v53 = vpop.f32.mrb[27].mxu0 }
 0x124   : > { %v567_v55 = vpop.f32.mrb[28].mxu1 }
 0x125   : > { %v568_v1 = vadd.f32 %v567_v55, %v460_v62  ;;  %v2459_v46 = vpop.f32.mrb[29].mxu1 }
 0x126   : > { %v570_v58 = vpop.f32.mrb[30].mxu1 }
 0x127   : > { %v1042_v56 = vpop.f32.mrb[28].mxu0  ;;  %v719_v59 = vadd.f32 %v704_v45, %v568_v1  ;;  %v571_v63 = vadd.f32 %v570_v58, %v463_v0  ;;  %v2460_v3 = vpop.f32.mrb[31].mxu1 }
 0x128   : > { %v2527_v4 = vpop.f32.mrb[29].mxu0 }
 0x129   : > { %v1045_v52 = vpop.f32.mrb[30].mxu0  ;;  %v720_v7 = vadd.f32 %v707_v57, %v571_v63 }
 0x12a   : > { %v2528_v60 = vpop.f32.mrb[31].mxu0 }
 0x12c   : > { %v853_v9 = vpop.f32.mrb[32].mxu1 }
 0x12d   : > { %v892_v10 = vadd.f32 %v853_v9, %v711_v16  ;;  %v2499_v54 = vpop.f32.mrb[33].mxu1 }
 0x12e   : > { %v856_v11 = vpop.f32.mrb[34].mxu1 }
 0x12f   : > { %v1050_v61 = vpop.f32.mrb[32].mxu0  ;;  %v1081_v12 = vadd.f32 %v1042_v56, %v892_v10  ;;  %v893_v13 = vadd.f32 %v856_v11, %v712_v22  ;;  %v2500_v19 = vpop.f32.mrb[35].mxu1 }
 0x130   : > { %v2531_v17 = vpop.f32.mrb[33].mxu0 }
 0x131   : > { %v1053_v62 = vpop.f32.mrb[34].mxu0  ;;  %v1082_v20 = vadd.f32 %v1045_v52, %v893_v13 }
 0x132   : > { %v2532_v21 = vpop.f32.mrb[35].mxu0 }
 0x134   : > { %v861_v23 = vpop.f32.mrb[36].mxu1 }
 0x135   : > { %v894_v2 = vadd.f32 %v861_v23, %v713_v26  ;;  %v2503_v0 = vpop.f32.mrb[37].mxu1 }
 0x136   : > { %v864_v25 = vpop.f32.mrb[38].mxu1 }
 0x137   : > { %v1058_v5 = vpop.f32.mrb[36].mxu0  ;;  %v1083_v15 = vadd.f32 %v1050_v61, %v894_v2  ;;  %v895_v24 = vadd.f32 %v864_v25, %v714_v31  ;;  %v2504_v8 = vpop.f32.mrb[39].mxu1 }
 0x138   : > { %v2535_v18 = vpop.f32.mrb[37].mxu0 }
 0x139   : > { %v1061_v16 = vpop.f32.mrb[38].mxu0  ;;  %v1084_v27 = vadd.f32 %v1053_v62, %v895_v24 }
 0x13a   : > { %v2536_v30 = vpop.f32.mrb[39].mxu0 }
 0x13c   : > { %v869_v32 = vpop.f32.mrb[40].mxu1 }
 0x13d   : > { %v896_v29 = vadd.f32 %v869_v32, %v715_v35  ;;  %v2507_v22 = vpop.f32.mrb[41].mxu1 }
 0x13e   : > { %v872_v33 = vpop.f32.mrb[42].mxu1 }
 0x13f   : > { %v1066_v6 = vpop.f32.mrb[40].mxu0  ;;  %v1085_v34 = vadd.f32 %v1058_v5, %v896_v29  ;;  %v897_v28 = vadd.f32 %v872_v33, %v716_v40  ;;  %v2508_v36 = vpop.f32.mrb[43].mxu1 }
 0x140   : > { %v2539_v37 = vpop.f32.mrb[41].mxu0 }
 0x141   : > { %v1069_v26 = vpop.f32.mrb[42].mxu0  ;;  %v1086_v38 = vadd.f32 %v1061_v16, %v897_v28 }
 0x142   : > { %v2540_v39 = vpop.f32.mrb[43].mxu0 }
 0x144   : > { %v877_v14 = vpop.f32.mrb[44].mxu1 }
 0x145   : > { %v898_v41 = vadd.f32 %v877_v14, %v717_v47  ;;  %v2511_v31 = vpop.f32.mrb[45].mxu1 }
 0x146   : > { %v880_v42 = vpop.f32.mrb[46].mxu1 }
 0x147   : > { %v1074_v43 = vpop.f32.mrb[44].mxu0  ;;  %v1087_v44 = vadd.f32 %v1066_v6, %v898_v41  ;;  %v899_v45 = vadd.f32 %v880_v42, %v718_v51  ;;  %v2512_v48 = vpop.f32.mrb[47].mxu1 }
 0x148   : > { %v2543_v49 = vpop.f32.mrb[45].mxu0 }
 0x149   : > { %v1077_v35 = vpop.f32.mrb[46].mxu0  ;;  %v1088_v50 = vadd.f32 %v1069_v26, %v899_v45 }
 0x14a   : > { %v2544_v57 = vpop.f32.mrb[47].mxu0 }
 0x14c   : > { %v885_v53 = vpop.f32.mrb[48].mxu1 }
 0x14d   : > { %v900_v55 = vadd.f32 %v885_v53, %v719_v59  ;;  %v2515_v40 = vpop.f32.mrb[49].mxu1 }
 0x14e   : > { %v888_v1 = vpop.f32.mrb[50].mxu1 }
 0x14f   : > { %v1370_v46 = vpop.f32.mrb[48].mxu0  ;;  %v1089_v58 = vadd.f32 %v1074_v43, %v900_v55  ;;  %v901_v56 = vadd.f32 %v888_v1, %v720_v7  ;;  %v2516_v63 = vpop.f32.mrb[51].mxu1 }
 0x150   : > { %v2583_v3 = vpop.f32.mrb[49].mxu0 }
 0x151   : > { %v1373_v47 = vpop.f32.mrb[50].mxu0  ;;  %v1090_v4 = vadd.f32 %v1077_v35, %v901_v56 }
 0x152   : > { %v2584_v52 = vpop.f32.mrb[51].mxu0 }
 0x154   : > { %v1189_v60 = vpop.f32.mrb[52].mxu1 }
 0x155   : > { %v1228_v9 = vadd.f32 %v1189_v60, %v1081_v12  ;;  %v2555_v51 = vpop.f32.mrb[53].mxu1 }
 0x156   : > { %v1192_v10 = vpop.f32.mrb[54].mxu1 }
 0x157   : > { %v1378_v54 = vpop.f32.mrb[52].mxu0  ;;  %v1409_v11 = vadd.f32 %v1370_v46, %v1228_v9  ;;  %v1229_v61 = vadd.f32 %v1192_v10, %v1082_v20  ;;  %v2556_v13 = vpop.f32.mrb[55].mxu1 }
 0x158   : > { %v2587_v19 = vpop.f32.mrb[53].mxu0 }
 0x159   : > { %v1381_v59 = vpop.f32.mrb[54].mxu0  ;;  %v1410_v17 = vadd.f32 %v1373_v47, %v1229_v61 }
 0x15a   : > { %v2588_v62 = vpop.f32.mrb[55].mxu0 }
 0x15b   : > { %v3313_v62 = vpop.permute.xlu0 %1784 }
 0x15c   : > { %v1197_v21 = vpop.f32.mrb[56].mxu1 }
 0x15d   : > { %v1230_v23 = vadd.f32 %v1197_v21, %v1083_v15  ;;  %v2559_v7 = vpop.f32.mrb[57].mxu1 }
 0x15e   : > { %v1200_v2 = vpop.f32.mrb[58].mxu1 }
 0x15f   : > { %v1386_v0 = vpop.f32.mrb[56].mxu0  ;;  %v1411_v25 = vadd.f32 %v1378_v54, %v1230_v23  ;;  %v1231_v5 = vadd.f32 %v1200_v2, %v1084_v27  ;;  %v2560_v24 = vpop.f32.mrb[59].mxu1 }
 0x160   : > { %v2591_v8 = vpop.f32.mrb[57].mxu0 }
 0x161   : > { %v1389_v12 = vpop.f32.mrb[58].mxu0  ;;  %v1412_v18 = vadd.f32 %v1381_v59, %v1231_v5 }
 0x162   : > { %v2592_v16 = vpop.f32.mrb[59].mxu0 }
 0x164   : > { %v1205_v30 = vpop.f32.mrb[60].mxu1 }
 0x165   : > { %v1232_v32 = vadd.f32 %v1205_v30, %v1085_v34  ;;  %v2563_v20 = vpop.f32.mrb[61].mxu1 }
 0x166   : > { %v1208_v29 = vpop.f32.mrb[62].mxu1 }
 0x167   : > { %v1394_v22 = vpop.f32.mrb[60].mxu0  ;;  %v3301_v33 = vadd.f32 %v1386_v0, %v1232_v32  ;;  %v1233_v6 = vadd.f32 %v1208_v29, %v1086_v38  ;;  %v2564_v28 = vpop.f32.mrb[63].mxu1 }
 0x168   : > { %v2595_v15 = vpop.f32.mrb[61].mxu0  ;;  %v3326_v32 = vpop.permute.xlu0 %1789 }
 0x169   : > { %v1397_v36 = vpop.f32.mrb[62].mxu0  ;;  %v3303_v37 = vadd.f32 %v1389_v12, %v1233_v6  ;;  %v3331_v29 = vpop.permute.xlu1 %1794 }
 0x16a   : > { %v2596_v26 = vpop.f32.mrb[63].mxu0 }
 0x16c   : > { %v1213_v27 = vpop.f32.mrb[64].mxu1 }
 0x16d   : > { %v1234_v39 = vadd.f32 %v1213_v27, %v1087_v44  ;;  %v2567_v14 = vpop.f32.mrb[65].mxu1 }
 0x16e   : > { %v1216_v41 = vpop.f32.mrb[66].mxu1 }
 0x16f   : > { %v1402_v31 = vpop.f32.mrb[64].mxu0  ;;  %v3305_v42 = vadd.f32 %v1394_v22, %v1234_v39  ;;  %v1235_v34 = vadd.f32 %v1216_v41, %v1088_v50  ;;  %v2568_v43 = vpop.f32.mrb[67].mxu1 }
 0x170   : > { %v2599_v45 = vpop.f32.mrb[65].mxu0 }
 0x171   : > { %v1405_v48 = vpop.f32.mrb[66].mxu0  ;;  %v3307_v49 = vadd.f32 %v1397_v36, %v1235_v34 }
 0x172   : > { %v2600_v38 = vpop.f32.mrb[67].mxu0 }
 0x174   : > { %v1221_v35 = vpop.f32.mrb[68].mxu1 }
 0x175   : > { %v1236_v57 = vadd.f32 %v1221_v35, %v1089_v58  ;;  %v2571_v53 = vpop.f32.mrb[69].mxu1  ;;  %v3347_v35 = vpop.permute.xlu1 %1799 }
 0x176   : > { %v1224_v55 = vpop.f32.mrb[70].mxu1 }
 0x177   : > { %v1706_v40 = vpop.f32.mrb[68].mxu0  ;;  %v3309_v1 = vadd.f32 %v1402_v31, %v1236_v57  ;;  %v1237_v44 = vadd.f32 %v1224_v55, %v1090_v4  ;;  %v2572_v46 = vpop.f32.mrb[71].mxu1 }
 0x178   : > { %v2639_v56 = vpop.f32.mrb[69].mxu0  ;;  %v3351_v55 = vpop.permute.xlu0 %1804 }
 0x179   : > { %v1709_v63 = vpop.f32.mrb[70].mxu0  ;;  %v3311_v3 = vadd.f32 %v1405_v48, %v1237_v44 }
 0x17a   : > { %v2640_v50 = vpop.f32.mrb[71].mxu0 }
 0x17c   : > { %v1559_v47 = vpop.f32.mrb[72].mxu1 }
 0x17d   : > { %v1598_v52 = vadd.f32 %v1559_v47, %v1409_v11  ;;  %v2611_v60 = vpop.f32.mrb[73].mxu1  ;;  %v3318_v11 = vld [vmem:[%s3407_s2] ss:$0 sm:$0xff] }
 0x17e   : > { %v1562_v9 = vpop.f32.mrb[74].mxu1 }
 0x17f   : > { %v1714_v51 = vpop.f32.mrb[72].mxu0  ;;  %v1745_v10 = vadd.f32 %v1706_v40, %v1598_v52  ;;  %v1599_v54 = vadd.f32 %v1562_v9, %v1410_v17  ;;  %v2612_v58 = vpop.f32.mrb[75].mxu1 }
 0x180   : > { %v2643_v61 = vpop.f32.mrb[73].mxu0 }
 0x181   : > { %v1717_v13 = vpop.f32.mrb[74].mxu0  ;;  %v1746_v19 = vadd.f32 %v1709_v63, %v1599_v54 }
 0x182   : > { %v2644_v59 = vpop.f32.mrb[75].mxu0 }
 0x183   : > { %v3321_v12 = vadd.f32 %v3318_v11, %v1746_v19 }
 0x184   : > { %v1567_v4 = vpop.f32.mrb[76].mxu1 }
 0x185   : > { %v1600_v21 = vadd.f32 %v1567_v4, %v1411_v25  ;;  %v2615_v23 = vpop.f32.mrb[77].mxu1  ;;  %v3324_v25 = vadd.f32 %v3318_v11, %v1745_v10  ;;  %v3358_v10 = vpop.permute.xlu1 %1809 }
 0x186   : > { %v1570_v7 = vpop.f32.mrb[78].mxu1 }
 0x187   : > { %v1722_v2 = vpop.f32.mrb[76].mxu0  ;;  %v1747_v0 = vadd.f32 %v1714_v51, %v1600_v21  ;;  %v1601_v5 = vadd.f32 %v1570_v7, %v1412_v18  ;;  %v2616_v17 = vpop.f32.mrb[79].mxu1  ;;  %v1833_v18 = vmul.f32 %v3326_v32, %v3321_v12  ;;  %v1832_v15 = vmul.f32 %v3313_v62, %v3324_v25 }
 0x188   : > { %v2647_v24 = vpop.f32.mrb[77].mxu0 }
 0x189   : > { %v1725_v8 = vpop.f32.mrb[78].mxu0  ;;  %v1748_v16 = vadd.f32 %v1717_v13, %v1601_v5  ;;  %v3329_v20 = vadd.f32 %v3318_v11, %v1747_v0  ;;  %v1842_v45 = vadd.f32 %v1833_v18, %v1832_v15  ;;  %v1820_v0 = vpop.permute.xlu1 %1819 }
 0x18a   : > { %v2648_v30 = vpop.f32.mrb[79].mxu0 }
 0x18b   : > { %v1834_v27 = vmul.f32 %v3331_v29, %v3329_v20  ;;  %v3341_v39 = vadd.f32 %v3318_v11, %v1748_v16 }
 0x18c   : > { %v1575_v22 = vpop.f32.mrb[80].mxu1 }
 0x18d   : > { %v1602_v6 = vadd.f32 %v1575_v22, %v3301_v33  ;;  %v2619_v28 = vpop.f32.mrb[81].mxu1  ;;  %v1843_v57 = vadd.f32 %v1842_v45, %v1834_v27  ;;  %v1835_v53 = vmul.f32 %v3347_v35, %v3341_v39 }
 0x18e   : > { %v1578_v36 = vpop.f32.mrb[82].mxu1 }
 0x18f   : > { %v1730_v26 = vpop.f32.mrb[80].mxu0  ;;  %v1749_v14 = vadd.f32 %v1722_v2, %v1602_v6  ;;  %v1603_v41 = vadd.f32 %v1578_v36, %v3303_v37  ;;  %v2620_v31 = vpop.f32.mrb[83].mxu1  ;;  %v1844_v47 = vadd.f32 %v1843_v57, %v1835_v53 }
 0x190   : > { %v2651_v34 = vpop.f32.mrb[81].mxu0 }
 0x191   : > { %v1733_v43 = vpop.f32.mrb[82].mxu0  ;;  %v3345_v33 = vadd.f32 %v3318_v11, %v1749_v14  ;;  %v1750_v48 = vadd.f32 %v1725_v8, %v1603_v41 }
 0x192   : > { %v2652_v38 = vpop.f32.mrb[83].mxu0 }
 0x193   : > { %v1836_v37 = vmul.f32 %v3351_v55, %v3345_v33  ;;  %v1767_v44 = vadd.f32 %v3318_v11, %v1750_v48 }
 0x194   : > { %v1583_v40 = vpop.f32.mrb[84].mxu1 }
 0x195   : > { %v1604_v46 = vadd.f32 %v1583_v40, %v3305_v42  ;;  %v2623_v56 = vpop.f32.mrb[85].mxu1  ;;  %v1845_v58 = vadd.f32 %v1844_v47, %v1836_v37  ;;  %v1837_v61 = vmul.f32 %v3358_v10, %v1767_v44  ;;  %v3362_v42 = vpop.permute.xlu0 %1814 }
 0x196   : > { %v1586_v63 = vpop.f32.mrb[86].mxu1 }
 0x197   : > { %v1738_v50 = vpop.f32.mrb[84].mxu0  ;;  %v1751_v52 = vadd.f32 %v1730_v26, %v1604_v46  ;;  %v1605_v60 = vadd.f32 %v1586_v63, %v3307_v49  ;;  %v2624_v9 = vpop.f32.mrb[87].mxu1  ;;  %v1846_v49 = vadd.f32 %v1845_v58, %v1837_v61 }
 0x198   : > { %v2655_v51 = vpop.f32.mrb[85].mxu0  ;;  %v1830_v26 = vpop.permute.xlu1 %1829 }
 0x199   : > { %v1741_v54 = vpop.f32.mrb[86].mxu0  ;;  %v1768_v13 = vadd.f32 %v3318_v11, %v1751_v52  ;;  %v1752_v19 = vadd.f32 %v1733_v43, %v1605_v60  ;;  %v1825_v6 = vpop.permute.xlu0 %1824 }
 0x19a   : > { %v2656_v59 = vpop.f32.mrb[87].mxu0 }
 0x19b   : > { %v1838_v4 = vmul.f32 %v3362_v42, %v1768_v13  ;;  %v1769_v21 = vadd.f32 %v3318_v11, %v1752_v19 }
 0x19c   : > { %v1591_v23 = vpop.f32.mrb[88].mxu1 }
 0x19d   : > { %v1606_v7 = vadd.f32 %v1591_v23, %v3309_v1  ;;  %v2627_v2 = vpop.f32.mrb[89].mxu1  ;;  %v1847_v17 = vadd.f32 %v1846_v49, %v1838_v4  ;;  %v1839_v24 = vmul.f32 %v1820_v0, %v1769_v21 }
 0x19e   : > { %v1594_v5 = vpop.f32.mrb[90].mxu1 }
 0x19f   : > { %v1753_v8 = vadd.f32 %v1738_v50, %v1606_v7  ;;  %v1607_v16 = vadd.f32 %v1594_v5, %v3311_v3  ;;  %v2628_v30 = vpop.f32.mrb[91].mxu1  ;;  %v1848_v36 = vadd.f32 %v1847_v17, %v1839_v24 }
 0x1a1   : > { %v1770_v22 = vadd.f32 %v3318_v11, %v1753_v8  ;;  %v1754_v18 = vadd.f32 %v1741_v54, %v1607_v16 }
 0x1a3   : > { %v1840_v28 = vmul.f32 %v1825_v6, %v1770_v22  ;;  %v1771_v15 = vadd.f32 %v3318_v11, %v1754_v18 }
 0x1a5   : > { %v1841_v27 = vmul.f32 %v1830_v26, %v1771_v15  ;;  %v1849_v1 = vadd.f32 %v1848_v36, %v1840_v28  ;;  %v2271_v28 = vld [vmem:[%s3408_s3] ss:$0 sm:$0xff] }
 0x1a7   : > { %v1850_v14 = vadd.f32 %v1849_v1, %v1841_v27 }
 0x1a9   : > { %1851 = vadd.xlane.f32.xlu0 %v1850_v14 }
 0x236   : > { %v1852_v41 = vpop.xlane.xlu0 %1851 }
 0x237   : > { %v1853_v31 = vrot.slane %v1852_v41, 4 }
 0x239   : > { %v1854_v34 = vadd.f32 %v1853_v31, %v1852_v41 }
 0x23b   : > { %v1855_v43 = vrot.slane %v1854_v34, 2 }
 0x23d   : > { %v1856_v45 = vadd.f32 %v1855_v43, %v1854_v34 }
 0x23f   : > { %v1857_v3 = vrot.slane %v1856_v45, 1 }
 0x241   : > { %v1858_v48 = vadd.f32 %v1857_v3, %v1856_v45 }
 0x243   : > { %2667 = vpush %v1858_v48  ;;  %v2272_v48 = vld [vmem:[%s3409_s4] ss:$0 sm:$0xff] }
 0x274   : > { %s2668_s12 = spop %2667 }
 0x275   : > { %s1860_s13 = smul.f32 0.00012207031, %s2668_s12 }
 0x277   : > { %v1861_v38 = vstv %s1860_s13 }
 0x278   : > { %v1862_v57 = vsub.f32 %v3324_v25, %v1861_v38  ;;  %v1863_v11 = vsub.f32 %v3321_v12, %v1861_v38  ;;  %v1864_v53 = vsub.f32 %v3329_v20, %v1861_v38  ;;  %v1865_v40 = vsub.f32 %v3341_v39, %v1861_v38 }
 0x279   : > { %v1866_v56 = vsub.f32 %v3345_v33, %v1861_v38  ;;  %v1867_v50 = vsub.f32 %v1767_v44, %v1861_v38  ;;  %v1868_v9 = vsub.f32 %v1768_v13, %v1861_v38  ;;  %v1869_v54 = vsub.f32 %v1769_v21, %v1861_v38 }
 0x27a   : > { %v1872_v37 = vmul.f32 %v1862_v57, %v1862_v57  ;;  %v1873_v46 = vmul.f32 %v1863_v11, %v1863_v11  ;;  %v1874_v63 = vmul.f32 %v1864_v53, %v1864_v53  ;;  %v1875_v47 = vmul.f32 %v1865_v40, %v1865_v40 }
 0x27b   : > { %v1876_v51 = vmul.f32 %v1866_v56, %v1866_v56  ;;  %v1877_v20 = vmul.f32 %v1867_v50, %v1867_v50  ;;  %v1870_v61 = vsub.f32 %v1770_v22, %v1861_v38  ;;  %v1878_v19 = vmul.f32 %v1868_v9, %v1868_v9 }
 0x27c   : > { %v1882_v52 = vmul.f32 %v1872_v37, %v3313_v62  ;;  %v1883_v60 = vmul.f32 %v1873_v46, %v3326_v32  ;;  %v1884_v25 = vmul.f32 %v1874_v63, %v3331_v29  ;;  %v1885_v39 = vmul.f32 %v1875_v47, %v3347_v35 }
 0x27d   : > { %v1886_v33 = vmul.f32 %v1876_v51, %v3351_v55  ;;  %v1871_v59 = vsub.f32 %v1771_v15, %v1861_v38  ;;  %v1879_v4 = vmul.f32 %v1869_v54, %v1869_v54  ;;  %v1887_v62 = vmul.f32 %v1877_v20, %v3358_v10 }
 0x27e   : > { %v1892_v12 = vadd.f32 %v1883_v60, %v1882_v52  ;;  %v1880_v13 = vmul.f32 %v1870_v61, %v1870_v61  ;;  %v1888_v23 = vmul.f32 %v1878_v19, %v3362_v42 }
 0x27f   : > { %v1881_v49 = vmul.f32 %v1871_v59, %v1871_v59  ;;  %v1889_v21 = vmul.f32 %v1879_v4, %v1820_v0 }
 0x280   : > { %v1893_v58 = vadd.f32 %v1892_v12, %v1884_v25  ;;  %v1890_v2 = vmul.f32 %v1880_v13, %v1825_v6 }
 0x281   : > { %v1891_v5 = vmul.f32 %v1881_v49, %v1830_v26 }
 0x282   : > { %v1894_v44 = vadd.f32 %v1893_v58, %v1885_v39 }
 0x284   : > { %v1895_v32 = vadd.f32 %v1894_v44, %v1886_v33 }
 0x286   : > { %v1896_v29 = vadd.f32 %v1895_v32, %v1887_v62 }
 0x288   : > { %v1897_v7 = vadd.f32 %v1896_v29, %v1888_v23 }
 0x28a   : > { %v1898_v35 = vadd.f32 %v1897_v7, %v1889_v21 }
 0x28c   : > { %v1899_v17 = vadd.f32 %v1898_v35, %v1890_v2 }
 0x28e   : > { %v1900_v24 = vadd.f32 %v1899_v17, %v1891_v5 }
 0x290   : > { %1901 = vadd.xlane.f32.xlu1 %v1900_v24 }
 0x31d   : > { %v1902_v55 = vpop.xlane.xlu1 %1901 }
 0x31e   : > { %v1903_v8 = vrot.slane %v1902_v55, 4 }
 0x320   : > { %v1904_v16 = vadd.f32 %v1903_v8, %v1902_v55 }
 0x322   : > { %v1905_v30 = vrot.slane %v1904_v16, 2 }
 0x324   : > { %v1906_v22 = vadd.f32 %v1905_v30, %v1904_v16 }
 0x326   : > { %v1907_v10 = vrot.slane %v1906_v22, 1 }
 0x328   : > { %v1908_v18 = vadd.f32 %v1907_v10, %v1906_v22 }
 0x32a   : > { %2669 = vpush %v1908_v18 }
 0x35b   : > { %s2670_s14 = spop %2669 }
 0x35c   : > { %s1910_s15 = smul.f32 0.00012207031, %s2670_s14 }
 0x35e   : > { %s1911_s16 = sadd.f32 1e-05, %s1910_s15 }
 0x360   : > { %v1912_v42 = vstv %s1911_s16 }
 0x361   : > { %2745 = vrsqrt.f32 %v1912_v42 }
 0x36b   : > { %v2746_v0 = vpop.eup %2745 }
 0x36c   : > { %2671 = vpush %v2746_v0 }
 0x39d   : > { %s2672_s17 = spop %2671 }
 0x39e   : > { %v1915_v6 = vstv %s2672_s17 }
 0x39f   : > { %v1916_v15 = vmul.f32 %v1915_v6, %v1862_v57  ;;  %v1917_v36 = vmul.f32 %v1915_v6, %v1863_v11  ;;  %v1918_v26 = vmul.f32 %v1915_v6, %v1864_v53  ;;  %v1919_v27 = vmul.f32 %v1915_v6, %v1865_v40 }
 0x3a0   : > { %v1920_v1 = vmul.f32 %v1915_v6, %v1866_v56  ;;  %v1921_v14 = vmul.f32 %v1915_v6, %v1867_v50  ;;  %v1922_v41 = vmul.f32 %v1915_v6, %v1868_v9  ;;  %v1923_v31 = vmul.f32 %v1915_v6, %v1869_v54 }
 0x3a1   : > { %v1924_v34 = vmul.f32 %v1915_v6, %v1870_v61  ;;  %v1925_v43 = vmul.f32 %v1915_v6, %v1871_v59  ;;  %v1933_v45 = vmul.f32 %v2271_v28, %v1916_v15  ;;  %v1934_v3 = vmul.f32 %v2271_v28, %v1917_v36 }
 0x3a2   : > { %v1935_v38 = vmul.f32 %v2271_v28, %v1918_v26  ;;  %v1936_v37 = vmul.f32 %v2271_v28, %v1919_v27  ;;  %v1937_v46 = vmul.f32 %v2271_v28, %v1920_v1  ;;  %v1938_v63 = vmul.f32 %v2271_v28, %v1921_v14 }
 0x3a3   : > { %v1939_v57 = vmul.f32 %v2271_v28, %v1922_v41  ;;  %v1940_v11 = vmul.f32 %v2271_v28, %v1923_v31  ;;  %v1941_v53 = vmul.f32 %v2271_v28, %v1924_v34  ;;  %v1942_v40 = vmul.f32 %v2271_v28, %v1925_v43 }
 0x3a4   : > { %v1950_v56 = vadd.f32 %v2272_v48, %v1933_v45  ;;  %v1951_v50 = vadd.f32 %v2272_v48, %v1934_v3  ;;  %v1952_v47 = vadd.f32 %v2272_v48, %v1935_v38  ;;  %v1953_v52 = vadd.f32 %v2272_v48, %v1936_v37 }
 0x3a5   : > { %v1954_v60 = vadd.f32 %v2272_v48, %v1937_v46  ;;  %v1955_v9 = vadd.f32 %v2272_v48, %v1938_v63  ;;  %v1956_v51 = vadd.f32 %v2272_v48, %v1939_v57  ;;  %v1957_v25 = vadd.f32 %v2272_v48, %v1940_v11 }
 0x3a6   : > { %v1958_v12 = vadd.f32 %v2272_v48, %v1941_v53  ;;  %v1959_v54 = vadd.f32 %v2272_v48, %v1942_v40  ;;  %vm1960_vm8 = vcmp.gt.f32.partialorder %v1950_v56, 0.0  ;;  %vm1961_vm9 = vcmp.gt.f32.partialorder %v1951_v50, 0.0 }
 0x3a7   : > { %vm1962_vm10 = vcmp.gt.f32.partialorder %v1952_v47, 0.0  ;;  %vm1963_vm11 = vcmp.gt.f32.partialorder %v1953_v52, 0.0  ;;  %vm1964_vm12 = vcmp.gt.f32.partialorder %v1954_v60, 0.0  ;;  %vm1965_vm13 = vcmp.gt.f32.partialorder %v1955_v9, 0.0 }
 0x3a8   : > { %vm1966_vm14 = vcmp.gt.f32.partialorder %v1956_v51, 0.0  ;;  %vm1967_vm15 = vcmp.gt.f32.partialorder %v1957_v25, 0.0  ;;  %vm1968_vm0 = vcmp.gt.f32.partialorder %v1958_v12, 0.0  ;;  %vm1969_vm1 = vcmp.gt.f32.partialorder %v1959_v54, 0.0 }
 0x3a9   : > { %v1970_v20 = vmul.f32 0.2, %v1950_v56  ;;  %v1971_v39 = vmul.f32 0.2, %v1951_v50  ;;  %v1972_v58 = vmul.f32 0.2, %v1952_v47 }
 0x3aa   : > { %v1973_v61 = vmul.f32 0.2, %v1953_v52  ;;  %v1974_v19 = vmul.f32 0.2, %v1954_v60  ;;  %v1975_v33 = vmul.f32 0.2, %v1955_v9 }
 0x3ab   : > { %v1976_v44 = vmul.f32 0.2, %v1956_v51  ;;  %v1977_v59 = vmul.f32 0.2, %v1957_v25  ;;  %v1978_v4 = vmul.f32 0.2, %v1958_v12  ;;  %v1980_v62 = vsel %vm1960_vm8, %v1950_v56, %v1970_v20 }
 0x3ac   : > { %v1979_v32 = vmul.f32 0.2, %v1959_v54  ;;  %v1981_v13 = vsel %vm1961_vm9, %v1951_v50, %v1971_v39  ;;  %v1982_v23 = vsel %vm1962_vm10, %v1952_v47, %v1972_v58  ;;  %v1983_v29 = vsel %vm1963_vm11, %v1953_v52, %v1973_v61 }
 0x3ad   : > { %v1984_v49 = vsel %vm1964_vm12, %v1954_v60, %v1974_v19  ;;  %v1985_v21 = vsel %vm1965_vm13, %v1955_v9, %v1975_v33  ;;  %v1986_v7 = vsel %vm1966_vm14, %v1956_v51, %v1976_v44  ;;  %v1987_v2 = vsel %vm1967_vm15, %v1957_v25, %v1977_v59 }
 0x3ae   : > { %v1988_v35 = vsel %vm1968_vm0, %v1958_v12, %v1978_v4  ;;  %v1989_v5 = vsel %vm1969_vm1, %v1959_v54, %v1979_v32  ;;  %v2298_v17 = vpack.c.bf16 %v1981_v13, %v1980_v62  ;;  %v2303_v24 = vpack.c.bf16 %v1983_v29, %v1982_v23 }
 0x3af   : > { %v2308_v55 = vpack.c.bf16 %v1985_v21, %v1984_v49  ;;  %v2313_v8 = vpack.c.bf16 %v1987_v2, %v1986_v7  ;;  %v2318_v16 = vpack.c.bf16 %v1989_v5, %v1988_v35 }
 0x3b0   : > { %2299 = vst [vmem:[%s251_s26] sm:$0xff] %v2298_v17   ;;  %2320 = vst [vmem:[%s251_s26 + $0x8] sm:$0xff] %v2303_v24  }
 0x3b1   : > { %2321 = vst [vmem:[%s251_s26 + $0x10] sm:$0xff] %v2308_v55   ;;  %2322 = vst [vmem:[%s251_s26 + $0x18] sm:$0xff] %v2313_v8  }
 0x3b2   : > { %2323 = vst [vmem:[%s251_s26 + $0x20] sm:$0xff] %v2318_v16  }
 0x3b3 PF: > { %s16_s21 = sadd.s32 1, %s2753_s21  }
 0x3b4   : > { %p13_p4 = scmp.ge.s32.totalorder %s16_s21, 4  }
 0x3b6   :  { %15 = sbr.rel (!%p13_p4) target bundleno = 1 (0x1), region = 82 }

// kernel: discriminator_forward.10
= control target key start
LH: loop header
LB: loop body
LE: loop exit
PB: predicated region body
PF: predicated region fallthrough
CT: control target
= control target key end

     0   :  { %s2216_s21 = smov 0   ;;  %s2501_s0 = inlined_call_operand.vmem [shape: bf16[2,4,26,128], index: 0, kind: input, shape index: {}]   ;;  %s2502_s1 = inlined_call_operand.vmem [shape: bf16[9,128,128], index: 1, kind: input, shape index: {}]   ;;  %s2503_s2 = inlined_call_operand.vmem [shape: f32[1,128], index: 2, kind: input, shape index: {}]   ;;  %s2504_s3 = inlined_call_operand.vmem [shape: f32[1,128], index: 3, kind: input, shape index: {}]   ;;  %s2505_s4 = inlined_call_operand.vmem [shape: f32[1,128], index: 4, kind: input, shape index: {}]   ;;  %s2506_s5 = inlined_call_operand.vmem [shape: f32[20,1], index: 5, kind: input, shape index: {}]   ;;  %s2507_s6 = inlined_call_operand.vmem [shape: bf16[2,20,128], index: 6, kind: output, shape index: {}]  }
   0x1 LB: > { %s1555_s3 = sadd.s32 4294967295, %s2179_s21   ;;  %p1559_p0 = scmp.ge.s32.totalorder %s2179_s21, 1  ;;  %s2179_s21 = sphi %s2216_s21, %s16_s21  }
   0x2   : > { %p212_p1 = scmp.lt.s32.totalorder %s2179_s21, 3 }
   0x4   : > { %p213_p2 = pnand %p1559_p0, %p212_p1 }
   0x5   : > { %v2086_v0 = vld [vmem:[%s2502_s1 + $0x40] sm:$0xff] (!%p213_p2)   ;;  %v2088_v2 = vld [vmem:[%s2502_s1 + $0x48] sm:$0xff] (!%p213_p2)   ;;  %p242_p3 = scmp.lt.s32.totalorder (!%p213_p2), %s1555_s3, 1  ;;  %v2090_v4 = vld [vmem:[%s2502_s1 + $0x50] sm:$0xff] (!%p213_p2)   ;;  %vm526_vm0 = vsmask.f32 (!%p213_p2), 7424 }
   0x6   : > { %216 = sbr.rel (%p213_p2) target bundleno = 391 (0x187), region = 44  ;;  %v2087_v1 = vld [vmem:[%s2502_s1] sm:$0xff] (!%p213_p2)   ;;  %1897 = vmatprep.subr.bf16.mxu0 (!%p213_p2), %v2086_v0  ;;  %v2089_v3 = vld [vmem:[%s2502_s1 + $0x8] sm:$0xff] (!%p213_p2)   ;;  %v2091_v5 = vld [vmem:[%s2502_s1 + $0x10] sm:$0xff] (!%p213_p2)   ;;  %vm1071_vm1 = vsmask.f32 (!%p213_p2), 5376 }
   0x7   : > { %1917 = vmatprep.subr.bf16.mxu1 (!%p213_p2), %v2087_v1  ;;  %1898 = vmatpush3.bf16.msra.mxu0 (!%p213_p2), %v2086_v0  ;;  %v2092_v6 = vld [vmem:[%s2502_s1 + $0x58] sm:$0xff] (!%p213_p2)   ;;  %v2094_v8 = vld [vmem:[%s2502_s1 + $0x60] sm:$0xff] (!%p213_p2)   ;;  %v2096_v10 = vld [vmem:[%s2502_s1 + $0x68] sm:$0xff] (!%p213_p2)   ;;  %vm1360_vm2 = vcmask (!%p213_p2), 1044480  }
   0x8   : > { %1918 = vmatpush3.bf16.msra.mxu1 (!%p213_p2), %v2087_v1  ;;  %1899 = vmatprep.subr.bf16.mxu0 (!%p213_p2), %v2088_v2  ;;  %v2093_v7 = vld [vmem:[%s2502_s1 + $0x18] sm:$0xff] (!%p213_p2)   ;;  %v2095_v9 = vld [vmem:[%s2502_s1 + $0x20] sm:$0xff] (!%p213_p2)   ;;  %v2097_v11 = vld [vmem:[%s2502_s1 + $0x28] sm:$0xff] (!%p213_p2)  }
   0x9   : > { %1919 = vmatprep.subr.bf16.mxu1 (!%p213_p2), %v2089_v3  ;;  %v2098_v14 = vld [vmem:[%s2502_s1 + $0x70] sm:$0xff] (!%p213_p2)   ;;  %v2100_v16 = vld [vmem:[%s2502_s1 + $0x78] sm:$0xff] (!%p213_p2)   ;;  %v2106_v19 = vld [vmem:[%s2502_s1 + $0x80] sm:$0xff] (!%p213_p2)  }
   0xa   : > { %v2099_v15 = vld [vmem:[%s2502_s1 + $0x30] sm:$0xff] (!%p213_p2)   ;;  %v2101_v17 = vld [vmem:[%s2502_s1 + $0x38] sm:$0xff] (!%p213_p2)   ;;  %v2107_v21 = vld [vmem:[%s2502_s1 + $0xc0] sm:$0xff] (!%p213_p2)  }
   0xb   : > { %1900 = vmatpush3.bf16.msra.mxu0 (!%p213_p2), %v2088_v2  ;;  %v2108_v23 = vld [vmem:[%s2502_s1 + $0x88] sm:$0xff] (!%p213_p2)   ;;  %v2110_v27 = vld [vmem:[%s2502_s1 + $0x90] sm:$0xff] (!%p213_p2)   ;;  %v2112_v33 = vld [vmem:[%s2502_s1 + $0x98] sm:$0xff] (!%p213_p2)  }
   0xc   : > { %1920 = vmatpush3.bf16.msra.mxu1 (!%p213_p2), %v2089_v3  ;;  %1901 = vmatprep.subr.bf16.mxu0 (!%p213_p2), %v2090_v4  ;;  %v2109_v24 = vld [vmem:[%s2502_s1 + $0xc8] sm:$0xff] (!%p213_p2)   ;;  %v2111_v28 = vld [vmem:[%s2502_s1 + $0xd0] sm:$0xff] (!%p213_p2)   ;;  %v2113_v34 = vld [vmem:[%s2502_s1 + $0xd8] sm:$0xff] (!%p213_p2)  }
   0xd   : > { %s2509_s3 = smov (!%p242_p3, %s1555_s3), 1  ;;  %1921 = vmatprep.subr.bf16.mxu1 %v2091_v5  ;;  %v2114_v37 = vld [vmem:[%s2502_s1 + $0xa0] sm:$0xff]   ;;  %v2116_v39 = vld [vmem:[%s2502_s1 + $0xa8] sm:$0xff]   ;;  %v2118_v41 = vld [vmem:[%s2502_s1 + $0xb0] sm:$0xff]  }
   0xe   : > { %s1798_s12 = sshll.u32 %s2509_s3, 6  ;;  %v2115_v38 = vld [vmem:[%s2502_s1 + $0xe0] sm:$0xff]   ;;  %v2117_v40 = vld [vmem:[%s2502_s1 + $0xe8] sm:$0xff]   ;;  %v2119_v42 = vld [vmem:[%s2502_s1 + $0xf0] sm:$0xff]   ;;  %s2077_s24 = smul.u32 12, %s2509_s3 }
   0xf   : > { %1902 = vmatpush3.bf16.msra.mxu0 %v2090_v4  ;;  %s2260_s19 = scalar_lea.vmem %s2501_s0, %s1798_s12  ;;  %v2120_v44 = vld [vmem:[%s2502_s1 + $0xb8] sm:$0xff]   ;;  %v2123_v50 = vld [vmem:[%s2502_s1 + $0x100] sm:$0xff]   ;;  %v2127_v55 = vld [vmem:[%s2502_s1 + $0x108] sm:$0xff]  }
  0x10   : > { %1922 = vmatpush3.bf16.msra.mxu1 %v2091_v5  ;;  %1903 = vmatprep.subr.bf16.mxu0 %v2092_v6  ;;  %v2102_v12 = vld [vmem:[%s2260_s19 + $0x10] sm:$0xff]   ;;  %v2103_v13 = vld [vmem:[%s2260_s19] sm:$0xff]   ;;  %v2104_v18 = vld [vmem:[%s2260_s19 + $0x18] ss:$0 sps:$4 sm:$0x33]   ;;  %s251_s27 = scalar_lea.vmem %s2507_s6, %s2077_s24 }
  0x11   : > { %1923 = vmatprep.subr.bf16.mxu1 %v2093_v7  ;;  %1913 = vmatprep.mubr.bf16.mxu0 %v2102_v12  ;;  %v2105_v20 = vld [vmem:[%s2260_s19 + $0x8] ss:$0 sps:$4 sm:$0x33]   ;;  %v530_v22 = vshll.u32 %v2103_v13, 16  ;;  %v528_v25 = vshrl.u32 %v2103_v13, 16  ;;  %v2124_v32 = vld [vmem:[%s2260_s19 + $0x20] sm:$0xff]  }
  0x12   : > { %1933 = vmatprep.mubr.bf16.mxu1 %v2103_v13  ;;  %v2122_v29 = vld [vmem:[%s2260_s19 + $0x8] ss:$0 sps:$4 sm:$0x77]   ;;  %v927_v43 = vshll.u32 %v2124_v32, 16  ;;  %v2121_v45 = vld [vmem:[%s2502_s1 + $0xf8] sm:$0xff]   ;;  %v925_v48 = vshrl.u32 %v2124_v32, 16 }
  0x13   : > { %1904 = vmatpush3.bf16.msra.mxu0 %v2092_v6  ;;  %v532_v26 = vrot.slane %v530_v22, 1  ;;  %v535_v31 = vshll.u32 %v2122_v29, 16  ;;  %v539_v46 = vshrl.u32 %v2122_v29, 16  ;;  %v2336_v47 = vld [vmem:[%s2260_s19 + $0x28] ss:$0 sps:$4 sm:$0x77]  }
  0x14   : > { %1924 = vmatpush3.bf16.msra.mxu1 %v2093_v7  ;;  %1905 = vmatprep.subr.bf16.mxu0 %v2094_v8  ;;  %v929_v49 = vrot.slane %v927_v43, 1  ;;  %v932_v51 = vshll.u32 %v2336_v47, 16  ;;  %v2125_v52 = vld [vmem:[%s2260_s19 + $0x28] ss:$0 sps:$4 sm:$0x33]   ;;  %v2126_v53 = vld [vmem:[%s2502_s1 + $0x140] sm:$0xff]  }
  0x15   : > { %1925 = vmatprep.subr.bf16.mxu1 %v2095_v9  ;;  %v533_v30 = vor.u32 %v532_v26, %v528_v25  ;;  %v537_v35 = vrot.slane %v535_v31, 1  ;;  %v2128_v58 = vld [vmem:[%s2502_s1 + $0x148] sm:$0xff]   ;;  %v2141_v59 = vld [vmem:[%s2260_s19 + $0x30] sm:$0xff]   ;;  %v2131_v63 = vld [vmem:[%s2502_s1 + $0x118] sm:$0xff]  }
  0x16   : > { %v930_v56 = vor.u32 %v929_v49, %v925_v48  ;;  %v2349_v57 = vrot.slane %v932_v51, 1  ;;  %v2129_v61 = vld [vmem:[%s2502_s1 + $0x110] sm:$0xff]   ;;  %v2132_v0 = vld [vmem:[%s2502_s1 + $0x158] sm:$0xff]   ;;  %v2133_v1 = vld [vmem:[%s2502_s1 + $0x120] sm:$0xff]  }
  0x17   : > { %1906 = vmatpush3.bf16.msra.mxu0 %v2094_v8  ;;  %v538_v36 = vsel %vm526_vm0, %v533_v30, %v537_v35  ;;  %v541_v54 = vor.u32 %v539_v46, %v537_v35  ;;  %v2130_v62 = vld [vmem:[%s2502_s1 + $0x150] sm:$0xff]   ;;  %v2134_v2 = vld [vmem:[%s2502_s1 + $0x160] sm:$0xff]   ;;  %v2135_v5 = vld [vmem:[%s2502_s1 + $0x128] sm:$0xff]  }
  0x18   : > { %1926 = vmatpush3.bf16.msra.mxu1 %v2095_v9  ;;  %1907 = vmatprep.subr.bf16.mxu0 %v2096_v10  ;;  %v935_v60 = vsel %vm526_vm0, %v930_v56, %v2349_v57  ;;  %v1040_v3 = vld [vmem:[%s2260_s19] sm:$0xc]  ;;  %v2377_v4 = vld [vmem:[%s2260_s19 + $0x4] sm:$0xf]  ;;  %v2136_v6 = vld [vmem:[%s2502_s1 + $0x168] sm:$0xff]  }
  0x19   : > { %1927 = vmatprep.subr.bf16.mxu1 %v2097_v11  ;;  %v1727_v7 = vcombine.low %v1040_v3, %v2377_v4  ;;  %v2387_v8 = vld [vmem:[%s2260_s19 + $0x8] sm:$0x1f]   ;;  %v2137_v9 = vld [vmem:[%s2502_s1 + $0x130] sm:$0xff]   ;;  %v2140_v22 = vld [vmem:[%s2502_s1 + $0x178] sm:$0xff]  }
  0x1a   : > { %v2138_v12 = vld [vmem:[%s2502_s1 + $0x170] sm:$0xff]   ;;  %v2150_v46 = vld [vmem:[%s2502_s1 + $0x198] sm:$0xff]   ;;  %v2152_v48 = vld [vmem:[%s2502_s1 + $0x1a0] sm:$0xff]  }
  0x1b   : > { %1908 = vmatpush3.bf16.msra.mxu0 %v2096_v10  ;;  %v2163_v10 = vld [vmem:[%s2260_s19 + $0x10] sm:$0xfc]   ;;  %v1073_v13 = vshrl.u32 %v1727_v7, 16  ;;  %v2153_v49 = vld [vmem:[%s2502_s1 + $0x1e0] sm:$0xff]   ;;  %v2155_v51 = vld [vmem:[%s2502_s1 + $0x1e8] sm:$0xff]  }
  0x1c   : > { %1928 = vmatpush3.bf16.msra.mxu1 %v2097_v11  ;;  %1909 = vmatprep.subr.bf16.mxu0 %v2098_v14  ;;  %v2164_v11 = vld [vmem:[%s2260_s19 + $0x18] sm:$0x1f]   ;;  %v2170_v3 = vld [vmem:[%s2502_s1 + $0x230] sm:$0xff]  }
  0x1d   : > { %1929 = vmatprep.subr.bf16.mxu1 %v2099_v15  ;;  %v2159_v56 = vld [vmem:[%s2502_s1 + $0x1f8] sm:$0xff]  }
  0x1f   : > { %1910 = vmatpush3.bf16.msra.mxu0 %v2098_v14  ;;  %v1076_v14 = vshll.u32 %v1727_v7, 16 }
  0x20   : > { %1930 = vmatpush3.bf16.msra.mxu1 %v2099_v15  ;;  %1911 = vmatprep.subr.bf16.mxu0 %v2100_v16  ;;  %v1081_v15 = vshrl.u32 %v2387_v8, 16 }
  0x21   : > { %1931 = vmatprep.subr.bf16.mxu1 %v2101_v17  ;;  %v1078_v25 = vrot.slane %v1076_v14, 3 }
  0x22   : > { %v1083_v26 = vrot.slane %v1081_v15, 2 }
  0x23   : > { %1912 = vmatpush3.bf16.msra.mxu0 %v2100_v16  ;;  %v1084_v16 = vshll.u32 %v2387_v8, 16 }
  0x24   : > { %1932 = vmatpush3.bf16.msra.mxu1 %v2101_v17  ;;  %1937 = vmatprep.subr.bf16.mxu0 %v2106_v19  ;;  %v1222_v17 = vshrl.u32 %v2163_v10, 16 }
  0x25   : > { %1957 = vmatprep.subr.bf16.mxu1 %v2107_v21 }
  0x26   : > { %1914 = vmatmul.mubr.bf16.vlgmr.msra.gmra.mrb[0].mxu0 %v2104_v18  ;;  %v1225_v18 = vshll.u32 %v2163_v10, 16 }
  0x27   : > { %1934 = vmatmul.mubr.bf16.vlgmr.msra.gmra.mrb[0].mxu1 %v2105_v20  ;;  %1938 = vmatpush3.bf16.msra.mxu0 %v2106_v19  ;;  %v1230_v19 = vshrl.u32 %v2164_v11, 16  ;;  %v1233_v20 = vshll.u32 %v2164_v11, 16 }
  0x28   : > { %1958 = vmatpush3.bf16.msra.mxu1 %v2107_v21  ;;  %1939 = vmatprep.subr.bf16.mxu0 %v2108_v23  ;;  %v2139_v21 = vld [vmem:[%s2502_s1 + $0x138] sm:$0xff]   ;;  %v1227_v29 = vrot.slane %v1225_v18, 3 }
  0x29   : > { %1959 = vmatprep.subr.bf16.mxu1 %v2109_v24  ;;  %1973 = vmatprep.mubr.bf16.mxu1 %v2124_v32  ;;  %v1232_v30 = vrot.slane %v1230_v19, 2  ;;  %v1235_v31 = vrot.slane %v1233_v20, 3  ;;  %v2143_v32 = vld [vmem:[%s2502_s1 + $0x180] sm:$0xff]  }
  0x2a   : > { %1953 = vmatprep.mubr.bf16.mxu0 %v538_v36 }
  0x2b   : > { %1940 = vmatpush3.bf16.msra.mxu0 %v2108_v23  ;;  %v936_v23 = vshrl.u32 %v2336_v47, 16  ;;  %v2151_v47 = vld [vmem:[%s2502_s1 + $0x1d8] sm:$0xff]  }
  0x2c   : > { %1960 = vmatpush3.bf16.msra.mxu1 %v2109_v24  ;;  %1941 = vmatprep.subr.bf16.mxu0 %v2110_v27  ;;  %v1075_v24 = vrot.slane %v1073_v13, 2 }
  0x2d   : > { %1961 = vmatprep.subr.bf16.mxu1 %v2111_v28 }
  0x2e   : > { %v1079_v35 = vor.u32 %v1078_v25, %v1075_v24 }
  0x2f   : > { %1942 = vmatpush3.bf16.msra.mxu0 %v2110_v27  ;;  %v1086_v27 = vrot.slane %v1084_v16, 3 }
  0x30   : > { %1962 = vmatpush3.bf16.msra.mxu1 %v2111_v28  ;;  %1943 = vmatprep.subr.bf16.mxu0 %v2112_v33  ;;  %v1224_v28 = vrot.slane %v1222_v17, 2 }
  0x31   : > { %1963 = vmatprep.subr.bf16.mxu1 %v2113_v34  ;;  %v2413_v36 = vor.u32 %v1086_v27, %v1083_v26 }
  0x33   : > { %1944 = vmatpush3.bf16.msra.mxu0 %v2112_v33  ;;  %v2145_v33 = vld [vmem:[%s2502_s1 + $0x1c0] sm:$0xff]  }
  0x34   : > { %1964 = vmatpush3.bf16.msra.mxu1 %v2113_v34  ;;  %1945 = vmatprep.subr.bf16.mxu0 %v2114_v37  ;;  %v2142_v34 = vld [vmem:[%s2260_s19 + $0x38] ss:$0 sps:$4 sm:$0x33]  }
  0x35   : > { %1965 = vmatprep.subr.bf16.mxu1 %v2115_v38 }
  0x37   : > { %1946 = vmatpush3.bf16.msra.mxu0 %v2114_v37  ;;  %v938_v37 = vor.u32 %v936_v23, %v2349_v57 }
  0x38   : > { %1966 = vmatpush3.bf16.msra.mxu1 %v2115_v38  ;;  %1947 = vmatprep.subr.bf16.mxu0 %v2116_v39  ;;  %v1228_v38 = vor.u32 %v1227_v29, %v1224_v28 }
  0x39   : > { %1967 = vmatprep.subr.bf16.mxu1 %v2117_v40 }
  0x3b   : > { %1948 = vmatpush3.bf16.msra.mxu0 %v2116_v39  ;;  %v2416_v39 = vor.u32 %v1235_v31, %v1232_v30 }
  0x3c   : > { %1968 = vmatpush3.bf16.msra.mxu1 %v2117_v40  ;;  %1949 = vmatprep.subr.bf16.mxu0 %v2118_v41  ;;  %v2146_v40 = vld [vmem:[%s2502_s1 + $0x188] sm:$0xff]  }
  0x3d   : > { %1969 = vmatprep.subr.bf16.mxu1 %v2119_v42  ;;  %v1237_v43 = vsel %vm1071_vm1, %v1228_v38, %v2416_v39 }
  0x3f   : > { %1950 = vmatpush3.bf16.msra.mxu0 %v2118_v41  ;;  %v2147_v41 = vld [vmem:[%s2502_s1 + $0x1c8] sm:$0xff]  }
  0x40   : > { %1970 = vmatpush3.bf16.msra.mxu1 %v2119_v42  ;;  %1951 = vmatprep.subr.bf16.mxu0 %v2120_v44  ;;  %v1088_v42 = vsel %vm1071_vm1, %v1079_v35, %v2413_v36 }
  0x41   : > { %1971 = vmatprep.subr.bf16.mxu1 %v2121_v45 }
  0x43   : > { %1952 = vmatpush3.bf16.msra.mxu0 %v2120_v44  ;;  %v2148_v44 = vld [vmem:[%s2502_s1 + $0x190] sm:$0xff]  }
  0x44   : > { %1972 = vmatpush3.bf16.msra.mxu1 %v2121_v45  ;;  %1977 = vmatprep.subr.bf16.mxu0 %v2123_v50  ;;  %v2149_v45 = vld [vmem:[%s2502_s1 + $0x1d0] sm:$0xff]  }
  0x45   : > { %1997 = vmatprep.subr.bf16.mxu1 %v2126_v53 }
  0x46   : > { %1954 = vmatmul.mubr.bf16.vlgmr.msra.gmra.mrb[4].mxu0 %v541_v54  ;;  %v1339_v54 = vld [vmem:[%s2260_s19] sm:$0x8] }
  0x47   : > { %1978 = vmatpush3.bf16.msra.mxu0 %v2123_v50  ;;  %1974 = vmatmul.mubr.bf16.vlgmr.msra.gmra.mrb[4].mxu1 %v2125_v52  ;;  %v2154_v50 = vld [vmem:[%s2502_s1 + $0x1a8] sm:$0xff]   ;;  %v2156_v52 = vld [vmem:[%s2502_s1 + $0x1b0] sm:$0xff]   ;;  %v1783_v57 = vcombine.low %v1339_v54, %v2377_v4  ;;  %v2171_v4 = vld [vmem:[%s2502_s1 + $0x238] sm:$0xff]  }
  0x48   : > { %1998 = vmatpush3.bf16.msra.mxu1 %v2126_v53  ;;  %1979 = vmatprep.subr.bf16.mxu0 %v2127_v55  ;;  %v2157_v53 = vld [vmem:[%s2502_s1 + $0x1f0] sm:$0xff]  }
  0x49   : > { %1999 = vmatprep.subr.bf16.mxu1 %v2128_v58  ;;  %1993 = vmatprep.mubr.bf16.mxu0 %v2141_v59  ;;  %v1361_v59 = vrot.slane %v1783_v57, 3 }
  0x4a   : > { %2013 = vmatprep.mubr.bf16.mxu1 %v935_v60  ;;  %v1362_v60 = vrot.slane %v2387_v8, 3 }
  0x4b   : > { %1980 = vmatpush3.bf16.msra.mxu0 %v2127_v55  ;;  %v2158_v55 = vld [vmem:[%s2502_s1 + $0x1b8] sm:$0xff]  }
  0x4c   : > { %2000 = vmatpush3.bf16.msra.mxu1 %v2128_v58  ;;  %1981 = vmatprep.subr.bf16.mxu0 %v2129_v61  ;;  %v2162_v58 = vld [vmem:[%s2502_s1 + $0x200] sm:$0xff]  }
  0x4d   : > { %2001 = vmatprep.subr.bf16.mxu1 %v2130_v62 }
  0x4f   : > { %1982 = vmatpush3.bf16.msra.mxu0 %v2129_v61  ;;  %v2165_v61 = vld [vmem:[%s2502_s1 + $0x208] sm:$0xff]  }
  0x50   : > { %2002 = vmatpush3.bf16.msra.mxu1 %v2130_v62  ;;  %1983 = vmatprep.subr.bf16.mxu0 %v2131_v63  ;;  %v1363_v62 = vsel %vm1360_vm2, %v1361_v59, %v1362_v60  ;;  %v1792_v59 = vld [vmem:[%s2503_s2] ss:$0 sm:$0xff] }
  0x51   : > { %2003 = vmatprep.subr.bf16.mxu1 %v2132_v0 }
  0x53   : > { %1984 = vmatpush3.bf16.msra.mxu0 %v2131_v63  ;;  %v2166_v63 = vld [vmem:[%s2502_s1 + $0x210] sm:$0xff]  }
  0x54   : > { %2004 = vmatpush3.bf16.msra.mxu1 %v2132_v0  ;;  %1985 = vmatprep.subr.bf16.mxu0 %v2133_v1  ;;  %v2167_v0 = vld [vmem:[%s2502_s1 + $0x218] sm:$0xff]  }
  0x55   : > { %2005 = vmatprep.subr.bf16.mxu1 %v2134_v2 }
  0x57   : > { %1986 = vmatpush3.bf16.msra.mxu0 %v2133_v1  ;;  %v2168_v1 = vld [vmem:[%s2502_s1 + $0x220] sm:$0xff]  }
  0x58   : > { %2006 = vmatpush3.bf16.msra.mxu1 %v2134_v2  ;;  %1987 = vmatprep.subr.bf16.mxu0 %v2135_v5  ;;  %v2169_v2 = vld [vmem:[%s2502_s1 + $0x228] sm:$0xff]  }
  0x59   : > { %2007 = vmatprep.subr.bf16.mxu1 %v2136_v6 }
  0x5b   : > { %1988 = vmatpush3.bf16.msra.mxu0 %v2135_v5 }
  0x5c   : > { %2008 = vmatpush3.bf16.msra.mxu1 %v2136_v6  ;;  %1989 = vmatprep.subr.bf16.mxu0 %v2137_v9 }
  0x5d   : > { %2009 = vmatprep.subr.bf16.mxu1 %v2138_v12 }
  0x5f   : > { %1990 = vmatpush3.bf16.msra.mxu0 %v2137_v9 }
  0x60   : > { %2010 = vmatpush3.bf16.msra.mxu1 %v2138_v12  ;;  %1991 = vmatprep.subr.bf16.mxu0 %v2139_v21 }
  0x61   : > { %2011 = vmatprep.subr.bf16.mxu1 %v2140_v22 }
  0x63   : > { %1992 = vmatpush3.bf16.msra.mxu0 %v2139_v21 }
  0x64   : > { %2012 = vmatpush3.bf16.msra.mxu1 %v2140_v22  ;;  %2017 = vmatprep.subr.bf16.mxu0 %v2143_v32 }
  0x65   : > { %2037 = vmatprep.subr.bf16.mxu1 %v2145_v33 }
  0x66   : > { %1994 = vmatmul.mubr.bf16.vlgmr.msra.gmra.mrb[8].mxu0 %v2142_v34 }
  0x67   : > { %2018 = vmatpush3.bf16.msra.mxu0 %v2143_v32  ;;  %2014 = vmatmul.mubr.bf16.vlgmr.msra.gmra.mrb[8].mxu1 %v938_v37 }
  0x68   : > { %2038 = vmatpush3.bf16.msra.mxu1 %v2145_v33  ;;  %2019 = vmatprep.subr.bf16.mxu0 %v2146_v40 }
  0x69   : > { %2039 = vmatprep.subr.bf16.mxu1 %v2147_v41  ;;  %2033 = vmatprep.mubr.bf16.mxu0 %v1088_v42 }
  0x6a   : > { %2053 = vmatprep.mubr.bf16.mxu1 %v1237_v43 }
  0x6b   : > { %2020 = vmatpush3.bf16.msra.mxu0 %v2146_v40 }
  0x6c   : > { %2040 = vmatpush3.bf16.msra.mxu1 %v2147_v41  ;;  %2021 = vmatprep.subr.bf16.mxu0 %v2148_v44 }
  0x6d   : > { %2041 = vmatprep.subr.bf16.mxu1 %v2149_v45 }
  0x6f   : > { %2022 = vmatpush3.bf16.msra.mxu0 %v2148_v44 }
  0x70   : > { %2042 = vmatpush3.bf16.msra.mxu1 %v2149_v45  ;;  %2023 = vmatprep.subr.bf16.mxu0 %v2150_v46 }
  0x71   : > { %2043 = vmatprep.subr.bf16.mxu1 %v2151_v47 }
  0x73   : > { %2024 = vmatpush3.bf16.msra.mxu0 %v2150_v46 }
  0x74   : > { %2044 = vmatpush3.bf16.msra.mxu1 %v2151_v47  ;;  %2025 = vmatprep.subr.bf16.mxu0 %v2152_v48 }
  0x75   : > { %2045 = vmatprep.subr.bf16.mxu1 %v2153_v49 }
  0x77   : > { %2026 = vmatpush3.bf16.msra.mxu0 %v2152_v48 }
  0x78   : > { %2046 = vmatpush3.bf16.msra.mxu1 %v2153_v49  ;;  %2027 = vmatprep.subr.bf16.mxu0 %v2154_v50 }
  0x79   : > { %2047 = vmatprep.subr.bf16.mxu1 %v2155_v51 }
  0x7b   : > { %2028 = vmatpush3.bf16.msra.mxu0 %v2154_v50 }
  0x7c   : > { %2048 = vmatpush3.bf16.msra.mxu1 %v2155_v51  ;;  %2029 = vmatprep.subr.bf16.mxu0 %v2156_v52 }
  0x7d   : > { %2049 = vmatprep.subr.bf16.mxu1 %v2157_v53 }
  0x7f   : > { %2030 = vmatpush3.bf16.msra.mxu0 %v2156_v52 }
  0x80   : > { %2050 = vmatpush3.bf16.msra.mxu1 %v2157_v53  ;;  %2031 = vmatprep.subr.bf16.mxu0 %v2158_v55 }
  0x81   : > { %2051 = vmatprep.subr.bf16.mxu1 %v2159_v56 }
  0x83   : > { %2032 = vmatpush3.bf16.msra.mxu0 %v2158_v55 }
  0x84   : > { %2052 = vmatpush3.bf16.msra.mxu1 %v2159_v56  ;;  %2057 = vmatprep.subr.bf16.mxu0 %v2162_v58 }
  0x86   : > { %2034 = vmatmul.mubr.bf16.vlgmr.msra.gmra.mrb[12].mxu0 %v2413_v36 }
  0x87   : > { %2058 = vmatpush3.bf16.msra.mxu0 %v2162_v58  ;;  %2054 = vmatmul.mubr.bf16.vlgmr.msra.gmra.mrb[12].mxu1 %v2416_v39 }
  0x88   : > { %2059 = vmatprep.subr.bf16.mxu0 %v2165_v61  ;;  %2073 = vmatprep.mubr.bf16.mxu0 %v1363_v62 }
  0x8b   : > { %2060 = vmatpush3.bf16.msra.mxu0 %v2165_v61 }
  0x8c   : > { %2061 = vmatprep.subr.bf16.mxu0 %v2166_v63 }
  0x8f   : > { %2062 = vmatpush3.bf16.msra.mxu0 %v2166_v63 }
  0x90   : > { %2063 = vmatprep.subr.bf16.mxu0 %v2167_v0 }
  0x93   : > { %2064 = vmatpush3.bf16.msra.mxu0 %v2167_v0 }
  0x94   : > { %2065 = vmatprep.subr.bf16.mxu0 %v2168_v1 }
  0x97   : > { %2066 = vmatpush3.bf16.msra.mxu0 %v2168_v1 }
  0x98   : > { %2067 = vmatprep.subr.bf16.mxu0 %v2169_v2 }
  0x9b   : > { %2068 = vmatpush3.bf16.msra.mxu0 %v2169_v2 }
  0x9c   : > { %2069 = vmatprep.subr.bf16.mxu0 %v2170_v3 }
  0x9f   : > { %2070 = vmatpush3.bf16.msra.mxu0 %v2170_v3 }
  0xa0   : > { %2071 = vmatprep.subr.bf16.mxu0 %v2171_v4 }
  0xa3   : > { %2072 = vmatpush3.bf16.msra.mxu0 %v2171_v4 }
  0xa6   : > { %2074 = vmatmul.mubr.bf16.vlgmr.msra.gmra.mrb[16].mxu0 %v1362_v60 }
  0xf9   : > { %v1915_v5 = vpop.f32.mrb[0].mxu0 }
  0xfa   : > { %v1935_v6 = vpop.f32.mrb[0].mxu1  ;;  %v385_v7 = vpop.f32.mrb[1].mxu0 }
  0xfb   : > { %v500_v8 = vadd.f32 %v1935_v6, %v1915_v5  ;;  %v491_v9 = vpop.f32.mrb[1].mxu1  ;;  %v1916_v10 = vpop.f32.mrb[2].mxu0 }
  0xfc   : > { %v492_v11 = vadd.f32 %v491_v9, %v385_v7  ;;  %v1936_v12 = vpop.f32.mrb[2].mxu1  ;;  %v388_v13 = vpop.f32.mrb[3].mxu0 }
  0xfd   : > { %v494_v14 = vpop.f32.mrb[3].mxu1 }
  0xfe   : > { %v495_v15 = vadd.f32 %v494_v14, %v388_v13 }
 0x119   : > { %v1955_v16 = vpop.f32.mrb[4].mxu0 }
 0x11a   : > { %v642_v17 = vadd.f32 %v1955_v16, %v500_v8  ;;  %v626_v18 = vpop.f32.mrb[5].mxu0  ;;  %v1975_v19 = vpop.f32.mrb[4].mxu1 }
 0x11b   : > { %v640_v20 = vadd.f32 %v626_v18, %v492_v11  ;;  %v1956_v21 = vpop.f32.mrb[6].mxu0  ;;  %v756_v22 = vpop.f32.mrb[5].mxu1 }
 0x11c   : > { %v772_v23 = vadd.f32 %v1975_v19, %v642_v17  ;;  %v629_v24 = vpop.f32.mrb[7].mxu0  ;;  %v1976_v25 = vpop.f32.mrb[6].mxu1 }
 0x11d   : > { %v641_v26 = vadd.f32 %v629_v24, %v495_v15  ;;  %v770_v27 = vadd.f32 %v756_v22, %v640_v20  ;;  %v759_v28 = vpop.f32.mrb[7].mxu1 }
 0x11f   : > { %v771_v29 = vadd.f32 %v759_v28, %v641_v26 }
 0x139   : > { %v1995_v30 = vpop.f32.mrb[8].mxu0 }
 0x13a   : > { %v902_v31 = vadd.f32 %v1995_v30, %v772_v23  ;;  %v886_v32 = vpop.f32.mrb[9].mxu0  ;;  %v2015_v33 = vpop.f32.mrb[8].mxu1 }
 0x13b   : > { %v900_v34 = vadd.f32 %v886_v32, %v770_v27  ;;  %v1996_v35 = vpop.f32.mrb[10].mxu0  ;;  %v1023_v36 = vpop.f32.mrb[9].mxu1 }
 0x13c   : > { %v1039_v37 = vadd.f32 %v2015_v33, %v902_v31  ;;  %v889_v38 = vpop.f32.mrb[11].mxu0  ;;  %v2016_v39 = vpop.f32.mrb[10].mxu1 }
 0x13d   : > { %v901_v40 = vadd.f32 %v889_v38, %v771_v29  ;;  %v1037_v41 = vadd.f32 %v1023_v36, %v900_v34  ;;  %v1026_v42 = vpop.f32.mrb[11].mxu1 }
 0x13f   : > { %v1038_v43 = vadd.f32 %v1026_v42, %v901_v40 }
 0x159   : > { %v2035_v44 = vpop.f32.mrb[12].mxu0 }
 0x15a   : > { %v1189_v45 = vadd.f32 %v2035_v44, %v1039_v37  ;;  %v1173_v46 = vpop.f32.mrb[13].mxu0  ;;  %v2055_v47 = vpop.f32.mrb[12].mxu1 }
 0x15b   : > { %v1187_v48 = vadd.f32 %v1173_v46, %v1037_v41  ;;  %v2036_v49 = vpop.f32.mrb[14].mxu0  ;;  %v1322_v50 = vpop.f32.mrb[13].mxu1 }
 0x15c   : > { %v1338_v51 = vadd.f32 %v2055_v47, %v1189_v45  ;;  %v1176_v52 = vpop.f32.mrb[15].mxu0  ;;  %v2056_v53 = vpop.f32.mrb[14].mxu1 }
 0x15d   : > { %v1188_v54 = vadd.f32 %v1176_v52, %v1038_v43  ;;  %v1336_v55 = vadd.f32 %v1322_v50, %v1187_v48  ;;  %v1325_v56 = vpop.f32.mrb[15].mxu1 }
 0x15f   : > { %v1337_v57 = vadd.f32 %v1325_v56, %v1188_v54 }
 0x179   : > { %v2075_v58 = vpop.f32.mrb[16].mxu0 }
 0x17a   : > { %v1464_v60 = vadd.f32 %v2075_v58, %v1338_v51  ;;  %v1448_v61 = vpop.f32.mrb[17].mxu0 }
 0x17b   : > { %v1462_v62 = vadd.f32 %v1448_v61, %v1336_v55  ;;  %v2076_v63 = vpop.f32.mrb[18].mxu0 }
 0x17c   : > { %v1474_v0 = vadd.f32 %v1792_v59, %v1464_v60  ;;  %v1451_v1 = vpop.f32.mrb[19].mxu0 }
 0x17d   : > { %v1472_v2 = vadd.f32 %v1792_v59, %v1462_v62  ;;  %v1463_v3 = vadd.f32 %v1451_v1, %v1337_v57 }
 0x17e   : > { %vm1477_vm3 = vcmp.gt.f32.partialorder %v1474_v0, 0.0  ;;  %v1480_v4 = vmul.f32 0.2, %v1474_v0 }
 0x17f   : > { %v1478_v5 = vmul.f32 0.2, %v1472_v2  ;;  %v1473_v6 = vadd.f32 %v1792_v59, %v1463_v3  ;;  %vm1475_vm4 = vcmp.gt.f32.partialorder %v1472_v2, 0.0 }
 0x180   : > { %v1483_v7 = vsel %vm1477_vm3, %v1474_v0, %v1480_v4 }
 0x181   : > { %v1801_v8 = vpack.c.bf16 %v1483_v7, %v1483_v7  ;;  %vm1476_vm5 = vcmp.gt.f32.partialorder %v1473_v6, 0.0  ;;  %v1479_v9 = vmul.f32 0.2, %v1473_v6  ;;  %v1481_v10 = vsel %vm1475_vm4, %v1472_v2, %v1478_v5 }
 0x183   : > { %1499 = vst [vmem:[%s251_s27 + $0x8] sm:$0x3] %v1801_v8  ;;  %v1482_v11 = vsel %vm1476_vm5, %v1473_v6, %v1479_v9 }
 0x184   : > { %v1805_v12 = vpack.c.bf16 %v1482_v11, %v1481_v10 }
 0x186   : > { %1806 = vst [vmem:[%s251_s27] sm:$0xff] %v1805_v12  }
 0x187 PF: > { %s16_s21 = sadd.s32 1, %s2179_s21  }
 0x188   : > { %p13_p4 = scmp.ge.s32.totalorder %s16_s21, 4  }
 0x18a   :  { %15 = sbr.rel (!%p13_p4) target bundleno = 1 (0x1), region = 85 }

// kernel: discriminator_forward.11
= control target key start
LH: loop header
LB: loop body
LE: loop exit
PB: predicated region body
PF: predicated region fallthrough
CT: control target
= control target key end

     0   :  { %s2642_s21 = smov 0   ;;  %s3225_s0 = inlined_call_operand.vmem [shape: bf16[2,1,38,128], index: 0, kind: input, shape index: {}]   ;;  %s3226_s1 = inlined_call_operand.vmem [shape: bf16[9,128,256], index: 1, kind: input, shape index: {}]   ;;  %s3227_s2 = inlined_call_operand.vmem [shape: f32[1,256], index: 2, kind: input, shape index: {}]   ;;  %s3228_s3 = inlined_call_operand.vmem [shape: f32[1,256], index: 3, kind: input, shape index: {}]   ;;  %s3229_s4 = inlined_call_operand.vmem [shape: f32[1,256], index: 4, kind: input, shape index: {}]   ;;  %s3230_s5 = inlined_call_operand.vmem [shape: f32[24,1], index: 5, kind: input, shape index: {}]   ;;  %s3231_s6 = inlined_call_operand.vmem [shape: bf16[2,24,256], index: 6, kind: output, shape index: {}]  }
   0x1 LB: > { %s2000_s22 = sadd.s32 4294967295, %s2604_s21   ;;  %p2004_p0 = scmp.ge.s32.totalorder %s2604_s21, 1  ;;  %s2604_s21 = sphi %s2642_s21, %s16_s21  }
   0x2   : > { %p212_p1 = scmp.lt.s32.totalorder %s2604_s21, 3 }
   0x4   : > { %p213_p2 = pnand %p2004_p0, %p212_p1 }
   0x5   : > { %v2367_v0 = vld [vmem:[%s3226_s1 + $0x84] ss:$8 sps:$4 sm:$0xff] (!%p213_p2)   ;;  %v2606_v2 = vmov (!%p213_p2), 0   ;;  %v2371_v3 = vld [vmem:[%s3226_s1 + $0x80] ss:$8 sps:$4 sm:$0xff] (!%p213_p2)   ;;  %p242_p3 = scmp.lt.s32.totalorder (!%p213_p2), %s2000_s22, 1 }
   0x6   : > { %216 = sbr.rel (%p213_p2) target bundleno = 906 (0x38a), region = 44  ;;  %v2369_v1 = vld [vmem:[%s3226_s1 + $0x204] ss:$8 sps:$4 sm:$0xff] (!%p213_p2)   ;;  %430 = vmatprep.mubr.bf16.mxu1 (!%p213_p2), %v2606_v2  ;;  %1068 = vmatprep.mubr.bf16.mxu0 (!%p213_p2), %v2606_v2  ;;  %v2372_v4 = vld [vmem:[%s3226_s1 + $0x200] ss:$8 sps:$4 sm:$0xff] (!%p213_p2)   ;;  %vm604_vm2 = vcmask (!%p213_p2), 1046528  }
   0x7   : > { %398 = vmatprep.subr.bf16.mxu1 (!%p213_p2), %v2367_v0  ;;  %2365 = vset.pattern.permute.xlu0 (!%p213_p2), %v2606_v2  ;;  %v2373_v5 = vld [vmem:[%s3226_s1 + $0x94] ss:$8 sps:$4 sm:$0xff] (!%p213_p2)   ;;  %v2377_v7 = vld [vmem:[%s3226_s1 + $0x90] ss:$8 sps:$4 sm:$0xff] (!%p213_p2)   ;;  %v2379_v9 = vld [vmem:[%s3226_s1 + $0xa4] ss:$8 sps:$4 sm:$0xff] (!%p213_p2)  }
   0x8   : > { %1036 = vmatprep.subr.bf16.mxu0 (!%p213_p2), %v2369_v1  ;;  %2366 = vset.pattern.permute.xlu1 (!%p213_p2), %v2606_v2  ;;  %v2375_v6 = vld [vmem:[%s3226_s1 + $0x214] ss:$8 sps:$4 sm:$0xff] (!%p213_p2)   ;;  %v2378_v8 = vld [vmem:[%s3226_s1 + $0x210] ss:$8 sps:$4 sm:$0xff] (!%p213_p2)   ;;  %v2381_v10 = vld [vmem:[%s3226_s1 + $0x224] ss:$8 sps:$4 sm:$0xff] (!%p213_p2)  }
   0x9   : > { %399 = vmatpush1.bf16.msra.mxu1 (!%p213_p2), %v2371_v3  ;;  %1037 = vmatpush1.bf16.msra.mxu0 (!%p213_p2), %v2372_v4  ;;  %v2383_v11 = vld [vmem:[%s3226_s1 + $0xa0] ss:$8 sps:$4 sm:$0xff] (!%p213_p2)   ;;  %v2385_v13 = vld [vmem:[%s3226_s1 + $0xb4] ss:$8 sps:$4 sm:$0xff] (!%p213_p2)   ;;  %v2389_v15 = vld [vmem:[%s3226_s1 + $0xb0] ss:$8 sps:$4 sm:$0xff] (!%p213_p2)  }
   0xa   : > { %400 = vmatprep.subr.bf16.mxu1 (!%p213_p2), %v2373_v5  ;;  %1038 = vmatprep.subr.bf16.mxu0 (!%p213_p2), %v2375_v6  ;;  %v2384_v12 = vld [vmem:[%s3226_s1 + $0x220] ss:$8 sps:$4 sm:$0xff] (!%p213_p2)   ;;  %v2387_v14 = vld [vmem:[%s3226_s1 + $0x234] ss:$8 sps:$4 sm:$0xff] (!%p213_p2)   ;;  %v2390_v16 = vld [vmem:[%s3226_s1 + $0x230] ss:$8 sps:$4 sm:$0xff] (!%p213_p2)  }
   0xb   : > { %v2391_v17 = vld [vmem:[%s3226_s1 + $0xc4] ss:$8 sps:$4 sm:$0xff] (!%p213_p2)   ;;  %v2395_v19 = vld [vmem:[%s3226_s1 + $0xc0] ss:$8 sps:$4 sm:$0xff] (!%p213_p2)   ;;  %v2397_v21 = vld [vmem:[%s3226_s1 + $0xd4] ss:$8 sps:$4 sm:$0xff] (!%p213_p2)  }
   0xc   : > { %v2393_v18 = vld [vmem:[%s3226_s1 + $0x244] ss:$8 sps:$4 sm:$0xff] (!%p213_p2)   ;;  %v2396_v20 = vld [vmem:[%s3226_s1 + $0x240] ss:$8 sps:$4 sm:$0xff] (!%p213_p2)   ;;  %v2399_v22 = vld [vmem:[%s3226_s1 + $0x254] ss:$8 sps:$4 sm:$0xff] (!%p213_p2)  }
   0xd   : > { %401 = vmatpush1.bf16.msra.mxu1 %v2377_v7  ;;  %1039 = vmatpush1.bf16.msra.mxu0 %v2378_v8  ;;  %s3233_s22 = smov (!%p242_p3, %s2000_s22), 1  ;;  %v2401_v23 = vld [vmem:[%s3226_s1 + $0xd0] ss:$8 sps:$4 sm:$0xff]   ;;  %v2403_v25 = vld [vmem:[%s3226_s1 + $0xe4] ss:$8 sps:$4 sm:$0xff]   ;;  %vm1282_vm3 = vcmask 1045504  }
   0xe   : > { %402 = vmatprep.subr.bf16.mxu1 %v2379_v9  ;;  %1040 = vmatprep.subr.bf16.mxu0 %v2381_v10  ;;  %s2348_s23 = smul.u32 20, %s3233_s22  ;;  %v2402_v24 = vld [vmem:[%s3226_s1 + $0x250] ss:$8 sps:$4 sm:$0xff]   ;;  %v2405_v26 = vld [vmem:[%s3226_s1 + $0x264] ss:$8 sps:$4 sm:$0xff]   ;;  %vm772_vm4 = vcmask 1044480  }
   0xf   : > { %v2407_v27 = vld [vmem:[%s3226_s1 + $0xe0] ss:$8 sps:$4 sm:$0xff]   ;;  %v2409_v29 = vld [vmem:[%s3226_s1 + $0xf4] ss:$8 sps:$4 sm:$0xff]   ;;  %v2413_v38 = vld [vmem:[%s3226_s1 + $0xf0] ss:$8 sps:$4 sm:$0xff]  }
  0x10   : > { %s2742_s10 = scalar_lea.vmem %s3225_s0, %s2348_s23  ;;  %v2408_v28 = vld [vmem:[%s3226_s1 + $0x260] ss:$8 sps:$4 sm:$0xff]   ;;  %v2411_v30 = vld [vmem:[%s3226_s1 + $0x274] ss:$8 sps:$4 sm:$0xff]   ;;  %vm300_vm0 = vsmask.f32 7424 }
  0x11   : > { %403 = vmatpush1.bf16.msra.mxu1 %v2383_v11  ;;  %1041 = vmatpush1.bf16.msra.mxu0 %v2384_v12  ;;  %v253_v31 = vld [vmem:[%s2742_s10] sm:$0xf]  ;;  %v2758_v32 = vld [vmem:[%s2742_s10 + $0x4] sm:$0xf]  ;;  %v2761_v33 = vld [vmem:[%s2742_s10 + $0x8] sm:$0xf] }
  0x12   : > { %404 = vmatprep.subr.bf16.mxu1 %v2385_v13  ;;  %1042 = vmatprep.subr.bf16.mxu0 %v2387_v14  ;;  %v272_v34 = vld [vmem:[%s2742_s10 + $0xc] sm:$0x1]  ;;  %v2765_v35 = vcombine.low %v253_v31, %v2758_v32  ;;  %v747_v36 = vld [vmem:[%s2742_s10] sm:$0x8]  ;;  %v2414_v42 = vld [vmem:[%s3226_s1 + $0x270] ss:$8 sps:$4 sm:$0xff]  }
  0x13   : > { %v2769_v37 = vld [vmem:[%s2742_s10 + $0xc] sm:$0xf]  ;;  %v2775_v39 = vcombine.low %v2761_v33, %v272_v34  ;;  %v2778_v40 = vcombine.low %v747_v36, %v2758_v32  ;;  %v2415_v59 = vld [vmem:[%s3226_s1] ss:$8 sps:$4 sm:$0xff]   ;;  %vm936_vm1 = vsmask.f32 4352 }
  0x14   : > { %v2141_v41 = vcombine.low %v2761_v33, %v2769_v37  ;;  %v302_v43 = vshrl.u32 %v2765_v35, 16  ;;  %v304_v44 = vshll.u32 %v2765_v35, 16  ;;  %v2417_v45 = vld [vmem:[%s3226_s1 + $0x4] ss:$8 sps:$4 sm:$0xff]   ;;  %v2418_v61 = vld [vmem:[%s3226_s1 + $0x280] ss:$8 sps:$4 sm:$0xff]  }
  0x15   : > { %405 = vmatpush1.bf16.msra.mxu1 %v2389_v15  ;;  %1043 = vmatpush1.bf16.msra.mxu0 %v2390_v16  ;;  %v309_v46 = vshll.u32 %v2775_v39, 16  ;;  %v938_v47 = vshrl.u32 %v2778_v40, 16  ;;  %v941_v48 = vshll.u32 %v2778_v40, 16  ;;  %v2420_v50 = vld [vmem:[%s3226_s1 + $0x284] ss:$8 sps:$4 sm:$0xff]   ;;  %v313_v4 = vshrl.u32 %v2775_v39, 16 }
  0x16   : > { %406 = vmatprep.subr.bf16.mxu1 %v2391_v17  ;;  %1044 = vmatprep.subr.bf16.mxu0 %v2393_v18  ;;  %v946_v49 = vshrl.u32 %v2141_v41, 16  ;;  %v306_v51 = vrot.slane %v304_v44, 1  ;;  %v949_v52 = vshll.u32 %v2141_v41, 16  ;;  %v2427_v0 = vld [vmem:[%s3226_s1 + $0x14] ss:$8 sps:$4 sm:$0xff]   ;;  %v2174_v41 = vcombine.low %v2758_v32, %v2761_v33  ;;  %s2349_s12 = smul.u32 24, %s3233_s22 }
  0x17   : > { %v311_v53 = vrot.slane %v309_v46, 1  ;;  %v940_v54 = vrot.slane %v938_v47, 3  ;;  %v943_v55 = vrot.slane %v941_v48, 4  ;;  %v2430_v1 = vld [vmem:[%s3226_s1 + $0x294] ss:$8 sps:$4 sm:$0xff]  }
  0x18   : > { %v948_v56 = vrot.slane %v946_v49, 3  ;;  %v307_v57 = vor.u32 %v306_v51, %v302_v43  ;;  %v951_v58 = vrot.slane %v949_v52, 4  ;;  %v2425_v5 = vld [vmem:[%s3226_s1 + $0x10] ss:$8 sps:$4 sm:$0xff]   ;;  %v2433_v7 = vld [vmem:[%s3226_s1 + $0x24] ss:$8 sps:$4 sm:$0xff]   ;;  %s251_s15 = scalar_lea.vmem %s3231_s6, %s2349_s12 }
  0x19   : > { %407 = vmatpush1.bf16.msra.mxu1 %v2395_v19  ;;  %1045 = vmatpush1.bf16.msra.mxu0 %v2396_v20  ;;  %v944_v60 = vor.u32 %v943_v55, %v940_v54  ;;  %v2428_v6 = vld [vmem:[%s3226_s1 + $0x290] ss:$8 sps:$4 sm:$0xff]   ;;  %v2436_v8 = vld [vmem:[%s3226_s1 + $0x2a4] ss:$8 sps:$4 sm:$0xff]   ;;  %v315_v9 = vor.u32 %v313_v4, %v311_v53  ;;  %v2431_v10 = vld [vmem:[%s3226_s1 + $0x20] ss:$8 sps:$4 sm:$0xff]   ;;  %v2175_v54 = vcombine.low %v2769_v37, %v2769_v37 }
  0x1a   : > { %408 = vmatprep.subr.bf16.mxu1 %v2397_v21  ;;  %1046 = vmatprep.subr.bf16.mxu0 %v2399_v22  ;;  %v312_v62 = vsel %vm300_vm0, %v307_v57, %v311_v53  ;;  %v952_v63 = vor.u32 %v951_v58, %v948_v56  ;;  %v2434_v11 = vld [vmem:[%s3226_s1 + $0x2a0] ss:$8 sps:$4 sm:$0xff]   ;;  %v2439_v12 = vld [vmem:[%s3226_s1 + $0x34] ss:$8 sps:$4 sm:$0xff]   ;;  %v2437_v14 = vld [vmem:[%s3226_s1 + $0x30] ss:$8 sps:$4 sm:$0xff]  }
  0x1b   : > { %v2442_v13 = vld [vmem:[%s3226_s1 + $0x2b4] ss:$8 sps:$4 sm:$0xff]   ;;  %v2440_v15 = vld [vmem:[%s3226_s1 + $0x2b0] ss:$8 sps:$4 sm:$0xff]   ;;  %v2445_v16 = vld [vmem:[%s3226_s1 + $0x44] ss:$8 sps:$4 sm:$0xff]  }
  0x1c   : > { %v953_v3 = vsel %vm936_vm1, %v944_v60, %v952_v63  ;;  %v2448_v17 = vld [vmem:[%s3226_s1 + $0x2c4] ss:$8 sps:$4 sm:$0xff]   ;;  %v2443_v18 = vld [vmem:[%s3226_s1 + $0x40] ss:$8 sps:$4 sm:$0xff]   ;;  %v2451_v20 = vld [vmem:[%s3226_s1 + $0x54] ss:$8 sps:$4 sm:$0xff]  }
  0x1d   : > { %409 = vmatpush1.bf16.msra.mxu1 %v2401_v23  ;;  %1047 = vmatpush1.bf16.msra.mxu0 %v2402_v24  ;;  %v2446_v19 = vld [vmem:[%s3226_s1 + $0x2c0] ss:$8 sps:$4 sm:$0xff]   ;;  %v2454_v21 = vld [vmem:[%s3226_s1 + $0x2d4] ss:$8 sps:$4 sm:$0xff]   ;;  %v2449_v22 = vld [vmem:[%s3226_s1 + $0x50] ss:$8 sps:$4 sm:$0xff]  }
  0x1e   : > { %410 = vmatprep.subr.bf16.mxu1 %v2403_v25  ;;  %1048 = vmatprep.subr.bf16.mxu0 %v2405_v26  ;;  %v2452_v23 = vld [vmem:[%s3226_s1 + $0x2d0] ss:$8 sps:$4 sm:$0xff]   ;;  %v2457_v24 = vld [vmem:[%s3226_s1 + $0x64] ss:$8 sps:$4 sm:$0xff]   ;;  %v2455_v26 = vld [vmem:[%s3226_s1 + $0x60] ss:$8 sps:$4 sm:$0xff]  }
  0x1f   : > { %v2460_v25 = vld [vmem:[%s3226_s1 + $0x2e4] ss:$8 sps:$4 sm:$0xff]   ;;  %v2464_v31 = vld [vmem:[%s3226_s1 + $0x2f0] ss:$8 sps:$4 sm:$0xff]   ;;  %v2476_v43 = vld [vmem:[%s3226_s1 + $0x114] ss:$8 sps:$4 sm:$0xff]  }
  0x20   : > { %v2469_v34 = vld [vmem:[%s3226_s1 + $0x104] ss:$8 sps:$4 sm:$0xff]   ;;  %v2479_v44 = vld [vmem:[%s3226_s1 + $0x314] ss:$8 sps:$4 sm:$0xff]   ;;  %v2474_v46 = vld [vmem:[%s3226_s1 + $0x110] ss:$8 sps:$4 sm:$0xff]  }
  0x21   : > { %411 = vmatpush1.bf16.msra.mxu1 %v2407_v27  ;;  %1049 = vmatpush1.bf16.msra.mxu0 %v2408_v28  ;;  %v2458_v27 = vld [vmem:[%s3226_s1 + $0x2e0] ss:$8 sps:$4 sm:$0xff]   ;;  %v2463_v28 = vld [vmem:[%s3226_s1 + $0x74] ss:$8 sps:$4 sm:$0xff]   ;;  %v2472_v36 = vld [vmem:[%s3226_s1 + $0x304] ss:$8 sps:$4 sm:$0xff]  }
  0x22   : > { %412 = vmatprep.subr.bf16.mxu1 %v2409_v29  ;;  %1050 = vmatprep.subr.bf16.mxu0 %v2411_v30  ;;  %v2466_v29 = vld [vmem:[%s3226_s1 + $0x2f4] ss:$8 sps:$4 sm:$0xff]   ;;  %v2461_v30 = vld [vmem:[%s3226_s1 + $0x70] ss:$8 sps:$4 sm:$0xff]   ;;  %v606_v49 = vrot.slane %v2775_v39, 1 }
  0x23   : > { %v2477_v47 = vld [vmem:[%s3226_s1 + $0x310] ss:$8 sps:$4 sm:$0xff]   ;;  %v2481_v52 = vld [vmem:[%s3226_s1 + $0x120] ss:$8 sps:$4 sm:$0xff]   ;;  %v2489_v56 = vld [vmem:[%s3226_s1 + $0x134] ss:$8 sps:$4 sm:$0xff]  }
  0x24   : > { %v2484_v53 = vld [vmem:[%s3226_s1 + $0x320] ss:$8 sps:$4 sm:$0xff]   ;;  %v2492_v57 = vld [vmem:[%s3226_s1 + $0x334] ss:$8 sps:$4 sm:$0xff]   ;;  %v2487_v37 = vld [vmem:[%s3226_s1 + $0x130] ss:$8 sps:$4 sm:$0xff]  }
  0x25   : > { %413 = vmatpush1.bf16.msra.mxu1 %v2413_v38  ;;  %1051 = vmatpush1.bf16.msra.mxu0 %v2414_v42  ;;  %v2467_v38 = vld [vmem:[%s3226_s1 + $0x100] ss:$8 sps:$4 sm:$0xff]   ;;  %v2490_v58 = vld [vmem:[%s3226_s1 + $0x330] ss:$8 sps:$4 sm:$0xff]   ;;  %v2498_v60 = vld [vmem:[%s3226_s1 + $0x344] ss:$8 sps:$4 sm:$0xff]  }
  0x26   : > { %532 = vmatprep.subr.bf16.mxu1 %v2417_v45  ;;  %1194 = vmatprep.subr.bf16.mxu0 %v2420_v50  ;;  %v2470_v42 = vld [vmem:[%s3226_s1 + $0x300] ss:$8 sps:$4 sm:$0xff]   ;;  %v2486_v50 = vld [vmem:[%s3226_s1 + $0x324] ss:$8 sps:$4 sm:$0xff]   ;;  %vm1446_vm5 = vsmask.f32 5376 }
  0x27   : > { %v583_v45 = vld [vmem:[%s2742_s10] sm:$0xe]  ;;  %v2508_v4 = vld [vmem:[%s3226_s1 + $0x164] ss:$8 sps:$4 sm:$0xff]  }
  0x28   : > { %431 = vmatmul.mubr.bf16.vlgmr.msra.gmra.mrb[0].mxu1 %v312_v62  ;;  %1069 = vmatmul.mubr.bf16.vlgmr.msra.gmra.mrb[0].mxu0 %v953_v3  ;;  %v2074_v48 = vcombine.low %v583_v45, %v2758_v32  ;;  %v2041_v32 = vcombine.low %v2761_v33, %v2761_v33  ;;  %v2496_v62 = vld [vmem:[%s3226_s1 + $0x340] ss:$8 sps:$4 sm:$0xff]   ;;  %v2502_v3 = vld [vmem:[%s3226_s1 + $0x350] ss:$8 sps:$4 sm:$0xff]   ;;  %v2551_v39 = vld [vmem:[%s3226_s1 + $0x3c4] ss:$8 sps:$4 sm:$0xff]  }
  0x29   : > { %533 = vmatpush1.bf16.msra.mxu1 %v2415_v59  ;;  %1195 = vmatpush1.bf16.msra.mxu0 %v2418_v61  ;;  %v2495_v59 = vld [vmem:[%s3226_s1 + $0x144] ss:$8 sps:$4 sm:$0xff]   ;;  %v2493_v61 = vld [vmem:[%s3226_s1 + $0x140] ss:$8 sps:$4 sm:$0xff]   ;;  %v1425_v45 = vld [vmem:[%s2742_s10 + $0x10] sm:$0x7] }
  0x2a   : > { %534 = vmatprep.subr.bf16.mxu1 %v2427_v0  ;;  %1196 = vmatprep.subr.bf16.mxu0 %v2430_v1  ;;  %v605_v51 = vrot.slane %v2074_v48, 1  ;;  %v2499_v0 = vld [vmem:[%s3226_s1 + $0x150] ss:$8 sps:$4 sm:$0xff]   ;;  %v2504_v1 = vld [vmem:[%s3226_s1 + $0x354] ss:$8 sps:$4 sm:$0xff]  }
  0x2b   : > { %1078 = vmatprep.mubr.bf16.mxu0 %v2606_v2  ;;  %440 = vmatprep.mubr.bf16.mxu1 %v2606_v2 }
  0x2c   : > { %v2942_v55 = vsel %vm604_vm2, %v605_v51, %v606_v49  ;;  %v2557_v51 = vld [vmem:[%s3226_s1 + $0x3d4] ss:$8 sps:$4 sm:$0xff]  }
  0x2d   : > { %535 = vmatpush1.bf16.msra.mxu1 %v2425_v5  ;;  %1197 = vmatpush1.bf16.msra.mxu0 %v2428_v6  ;;  %v2511_v5 = vld [vmem:[%s3226_s1 + $0x364] ss:$8 sps:$4 sm:$0xff]  }
  0x2e   : > { %536 = vmatprep.subr.bf16.mxu1 %v2433_v7  ;;  %1198 = vmatprep.subr.bf16.mxu0 %v2436_v8  ;;  %v1251_v6 = vld [vmem:[%s2742_s10 + $0x4] sm:$0xc]  ;;  %v2990_v7 = vld [vmem:[%s2742_s10 + $0x8] sm:$0xf]  ;;  %v2993_v8 = vld [vmem:[%s2742_s10 + $0xc] sm:$0xf] }
  0x2f   : > { %v3091_v48 = vcombine.low %v2993_v8, %v1425_v45 }
  0x30   : > { %441 = vmatmul.mubr.bf16.gmra.mrb[4].mxu1 %v315_v9  ;;  %1079 = vmatmul.mubr.bf16.gmra.mrb[4].mxu0 %v952_v63  ;;  %v2501_v63 = vld [vmem:[%s3226_s1 + $0x154] ss:$8 sps:$4 sm:$0xff]   ;;  %v1254_v9 = vld [vmem:[%s2742_s10 + $0x10] sm:$0x3] }
  0x31   : > { %537 = vmatpush1.bf16.msra.mxu1 %v2431_v10  ;;  %1199 = vmatpush1.bf16.msra.mxu0 %v2434_v11  ;;  %v2506_v10 = vld [vmem:[%s3226_s1 + $0x160] ss:$8 sps:$4 sm:$0xff]  }
  0x32   : > { %538 = vmatprep.subr.bf16.mxu1 %v2439_v12  ;;  %1200 = vmatprep.subr.bf16.mxu0 %v2442_v13  ;;  %v2509_v11 = vld [vmem:[%s3226_s1 + $0x360] ss:$8 sps:$4 sm:$0xff]   ;;  %v2514_v12 = vld [vmem:[%s3226_s1 + $0x174] ss:$8 sps:$4 sm:$0xff]   ;;  %v3006_v13 = vcombine.low %v1251_v6, %v2990_v7 }
  0x33   : > { %564 = vmatprep.mubr.bf16.mxu1 %v2606_v2  ;;  %1226 = vmatprep.mubr.bf16.mxu0 %v2606_v2 }
  0x35   : > { %539 = vmatpush1.bf16.msra.mxu1 %v2437_v14  ;;  %1201 = vmatpush1.bf16.msra.mxu0 %v2440_v15  ;;  %v2209_v14 = vcombine.low %v2993_v8, %v1254_v9  ;;  %v2517_v15 = vld [vmem:[%s3226_s1 + $0x374] ss:$8 sps:$4 sm:$0xff]   ;;  %v2567_v8 = vld [vmem:[%s3226_s1 + $0x3f0] ss:$8 sps:$4 sm:$0xff]   ;;  %v2573_v9 = vld [vmem:[%s3226_s1 + $0x404] ss:$8 sps:$4 sm:$0xff]  }
  0x36   : > { %540 = vmatprep.subr.bf16.mxu1 %v2445_v16  ;;  %1202 = vmatprep.subr.bf16.mxu0 %v2448_v17  ;;  %v2512_v16 = vld [vmem:[%s3226_s1 + $0x170] ss:$8 sps:$4 sm:$0xff]  }
  0x37   : > { %v2515_v17 = vld [vmem:[%s3226_s1 + $0x370] ss:$8 sps:$4 sm:$0xff]  }
  0x39   : > { %541 = vmatpush1.bf16.msra.mxu1 %v2443_v18  ;;  %1203 = vmatpush1.bf16.msra.mxu0 %v2446_v19  ;;  %v2521_v18 = vld [vmem:[%s3226_s1 + $0x184] ss:$8 sps:$4 sm:$0xff]   ;;  %v1283_v19 = vrot.slane %v3006_v13, 2 }
  0x3a   : > { %542 = vmatprep.subr.bf16.mxu1 %v2451_v20  ;;  %1204 = vmatprep.subr.bf16.mxu0 %v2454_v21  ;;  %v1284_v20 = vrot.slane %v2209_v14, 2  ;;  %v2524_v21 = vld [vmem:[%s3226_s1 + $0x384] ss:$8 sps:$4 sm:$0xff]   ;;  %v2576_v14 = vld [vmem:[%s3226_s1 + $0x414] ss:$8 sps:$4 sm:$0xff]  }
  0x3d   : > { %543 = vmatpush1.bf16.msra.mxu1 %v2449_v22  ;;  %1205 = vmatpush1.bf16.msra.mxu0 %v2452_v23  ;;  %v2519_v22 = vld [vmem:[%s3226_s1 + $0x180] ss:$8 sps:$4 sm:$0xff]  }
  0x3e   : > { %544 = vmatprep.subr.bf16.mxu1 %v2457_v24  ;;  %1206 = vmatprep.subr.bf16.mxu0 %v2460_v25  ;;  %v2522_v23 = vld [vmem:[%s3226_s1 + $0x380] ss:$8 sps:$4 sm:$0xff]   ;;  %v1285_v24 = vsel %vm1282_vm3, %v1283_v19, %v1284_v20  ;;  %v2530_v25 = vld [vmem:[%s3226_s1 + $0x194] ss:$8 sps:$4 sm:$0xff]   ;;  %v2580_v19 = vld [vmem:[%s3226_s1 + $0x430] ss:$8 sps:$4 sm:$0xff]  }
  0x41   : > { %545 = vmatpush1.bf16.msra.mxu1 %v2455_v26  ;;  %1207 = vmatpush1.bf16.msra.mxu0 %v2458_v27  ;;  %v2533_v26 = vld [vmem:[%s3226_s1 + $0x394] ss:$8 sps:$4 sm:$0xff]   ;;  %v2528_v27 = vld [vmem:[%s3226_s1 + $0x190] ss:$8 sps:$4 sm:$0xff]  }
  0x42   : > { %546 = vmatprep.subr.bf16.mxu1 %v2463_v28  ;;  %1208 = vmatprep.subr.bf16.mxu0 %v2466_v29  ;;  %v2531_v28 = vld [vmem:[%s3226_s1 + $0x390] ss:$8 sps:$4 sm:$0xff]   ;;  %v2536_v29 = vld [vmem:[%s3226_s1 + $0x1a4] ss:$8 sps:$4 sm:$0xff]  }
  0x45   : > { %547 = vmatpush1.bf16.msra.mxu1 %v2461_v30  ;;  %1209 = vmatpush1.bf16.msra.mxu0 %v2464_v31  ;;  %v2539_v30 = vld [vmem:[%s3226_s1 + $0x3a4] ss:$8 sps:$4 sm:$0xff]  }
  0x46   : > { %690 = vmatprep.subr.bf16.mxu1 %v2469_v34  ;;  %1368 = vmatprep.subr.bf16.mxu0 %v2472_v36  ;;  %v1784_v31 = vld [vmem:[%s3230_s5] sm:$0xff]  ;;  %v1786_v34 = vld [vmem:[%s3230_s5 + $0x10] sm:$0xff] }
  0x47   : > { %1789 = vperm.xlu0 %2365, %v1784_v31   ;;  %v2534_v36 = vld [vmem:[%s3226_s1 + $0x1a0] ss:$8 sps:$4 sm:$0xff]   ;;  %1799 = vperm.xlu1 %2366, %v1786_v34  }
  0x48   : > { %565 = vmatmul.mubr.bf16.vlgmr.msra.gmra.mrb[0].mxu1 %v2765_v35  ;;  %1227 = vmatmul.mubr.bf16.vlgmr.msra.gmra.mrb[0].mxu0 %v2174_v41  ;;  %v2483_v35 = vld [vmem:[%s3226_s1 + $0x124] ss:$8 sps:$4 sm:$0xff]   ;;  %v2537_v41 = vld [vmem:[%s3226_s1 + $0x3a0] ss:$8 sps:$4 sm:$0xff]  }
  0x49   : > { %691 = vmatpush1.bf16.msra.mxu1 %v2467_v38  ;;  %1369 = vmatpush1.bf16.msra.mxu0 %v2470_v42  ;;  %v1785_v38 = vld [vmem:[%s3230_s5 + $0x8] sm:$0xff]  ;;  %v2542_v42 = vld [vmem:[%s3226_s1 + $0x1b4] ss:$8 sps:$4 sm:$0xff]  }
  0x4a   : > { %692 = vmatprep.subr.bf16.mxu1 %v2476_v43  ;;  %1370 = vmatprep.subr.bf16.mxu0 %v2479_v44  ;;  %v2545_v43 = vld [vmem:[%s3226_s1 + $0x3b4] ss:$8 sps:$4 sm:$0xff]   ;;  %v2540_v44 = vld [vmem:[%s3226_s1 + $0x1b0] ss:$8 sps:$4 sm:$0xff]  }
  0x4b   : > { %574 = vmatprep.mubr.bf16.mxu1 %v2606_v2  ;;  %1236 = vmatprep.mubr.bf16.mxu0 %v2606_v2 }
  0x4c   : > { %1794 = vperm.xlu0 %2365, %v1785_v38  }
  0x4d   : > { %693 = vmatpush1.bf16.msra.mxu1 %v2474_v46  ;;  %1371 = vmatpush1.bf16.msra.mxu0 %v2477_v47  ;;  %v2543_v46 = vld [vmem:[%s3226_s1 + $0x3b0] ss:$8 sps:$4 sm:$0xff]   ;;  %v2548_v47 = vld [vmem:[%s3226_s1 + $0x1c4] ss:$8 sps:$4 sm:$0xff]  }
  0x4e   : > { %694 = vmatprep.subr.bf16.mxu1 %v2483_v35  ;;  %1372 = vmatprep.subr.bf16.mxu0 %v2486_v50  ;;  %v2549_v35 = vld [vmem:[%s3226_s1 + $0x3c0] ss:$8 sps:$4 sm:$0xff]   ;;  %v2554_v50 = vld [vmem:[%s3226_s1 + $0x1d4] ss:$8 sps:$4 sm:$0xff]  }
  0x50   : > { %575 = vmatmul.mubr.bf16.gmra.mrb[8].mxu1 %v2041_v32  ;;  %1237 = vmatmul.mubr.bf16.gmra.mrb[8].mxu0 %v2175_v54  ;;  %v2552_v32 = vld [vmem:[%s3226_s1 + $0x1d0] ss:$8 sps:$4 sm:$0xff]   ;;  %v1456_v54 = vshrl.u32 %v3091_v48, 16 }
  0x51   : > { %695 = vmatpush1.bf16.msra.mxu1 %v2481_v52  ;;  %1373 = vmatpush1.bf16.msra.mxu0 %v2484_v53  ;;  %v1448_v52 = vshrl.u32 %v3006_v13, 16  ;;  %v1451_v53 = vshll.u32 %v3006_v13, 16 }
  0x52   : > { %696 = vmatprep.subr.bf16.mxu1 %v2489_v56  ;;  %1374 = vmatprep.subr.bf16.mxu0 %v2492_v57  ;;  %v2555_v56 = vld [vmem:[%s3226_s1 + $0x3d0] ss:$8 sps:$4 sm:$0xff]   ;;  %v2560_v57 = vld [vmem:[%s3226_s1 + $0x1e4] ss:$8 sps:$4 sm:$0xff]  }
  0x53   : > { %722 = vmatprep.mubr.bf16.mxu1 %v2606_v2  ;;  %1400 = vmatprep.mubr.bf16.mxu0 %v2606_v2 }
  0x55   : > { %697 = vmatpush1.bf16.msra.mxu1 %v2487_v37  ;;  %1375 = vmatpush1.bf16.msra.mxu0 %v2490_v58  ;;  %v748_v37 = vld [vmem:[%s2742_s10 + $0xc] sm:$0x7] }
  0x56   : > { %698 = vmatprep.subr.bf16.mxu1 %v2495_v59  ;;  %1376 = vmatprep.subr.bf16.mxu0 %v2498_v60  ;;  %v2563_v58 = vld [vmem:[%s3226_s1 + $0x3e4] ss:$8 sps:$4 sm:$0xff]   ;;  %v2558_v59 = vld [vmem:[%s3226_s1 + $0x1e0] ss:$8 sps:$4 sm:$0xff]   ;;  %v2108_v60 = vcombine.low %v2761_v33, %v748_v37  ;;  %v2564_v33 = vld [vmem:[%s3226_s1 + $0x1f0] ss:$8 sps:$4 sm:$0xff]  }
  0x58   : > { %v774_v6 = vrot.slane %v2108_v60, 3 }
  0x59   : > { %699 = vmatpush1.bf16.msra.mxu1 %v2493_v61  ;;  %1377 = vmatpush1.bf16.msra.mxu0 %v2496_v62  ;;  %v1450_v61 = vrot.slane %v1448_v52, 2  ;;  %v1453_v62 = vrot.slane %v1451_v53, 3 }
  0x5a   : > { %700 = vmatprep.subr.bf16.mxu1 %v2501_v63  ;;  %1378 = vmatprep.subr.bf16.mxu0 %v2504_v1  ;;  %v2561_v63 = vld [vmem:[%s3226_s1 + $0x3e0] ss:$8 sps:$4 sm:$0xff]   ;;  %v1458_v1 = vrot.slane %v1456_v54, 2 }
  0x5d   : > { %701 = vmatpush1.bf16.msra.mxu1 %v2499_v0  ;;  %1379 = vmatpush1.bf16.msra.mxu0 %v2502_v3  ;;  %v2566_v0 = vld [vmem:[%s3226_s1 + $0x1f4] ss:$8 sps:$4 sm:$0xff]  }
  0x5e   : > { %702 = vmatprep.subr.bf16.mxu1 %v2508_v4  ;;  %1380 = vmatprep.subr.bf16.mxu0 %v2511_v5  ;;  %v2569_v4 = vld [vmem:[%s3226_s1 + $0x3f4] ss:$8 sps:$4 sm:$0xff]   ;;  %v773_v5 = vrot.slane %v2778_v40, 3  ;;  %v2571_v40 = vld [vmem:[%s3226_s1 + $0x400] ss:$8 sps:$4 sm:$0xff]  }
  0x61   : > { %703 = vmatpush1.bf16.msra.mxu1 %v2506_v10  ;;  %1381 = vmatpush1.bf16.msra.mxu0 %v2509_v11  ;;  %v1454_v10 = vor.u32 %v1453_v62, %v1450_v61 }
  0x62   : > { %704 = vmatprep.subr.bf16.mxu1 %v2514_v12  ;;  %1382 = vmatprep.subr.bf16.mxu0 %v2517_v15  ;;  %v775_v12 = vsel %vm772_vm4, %v773_v5, %v774_v6  ;;  %v2574_v15 = vld [vmem:[%s3226_s1 + $0x410] ss:$8 sps:$4 sm:$0xff]  }
  0x65   : > { %705 = vmatpush1.bf16.msra.mxu1 %v2512_v16  ;;  %1383 = vmatpush1.bf16.msra.mxu0 %v2515_v17  ;;  %v2579_v16 = vld [vmem:[%s3226_s1 + $0x424] ss:$8 sps:$4 sm:$0xff]   ;;  %v2577_v17 = vld [vmem:[%s3226_s1 + $0x420] ss:$8 sps:$4 sm:$0xff]  }
  0x66   : > { %858 = vmatprep.subr.bf16.mxu1 %v2521_v18  ;;  %1546 = vmatprep.subr.bf16.mxu0 %v2524_v21  ;;  %v2582_v18 = vld [vmem:[%s3226_s1 + $0x434] ss:$8 sps:$4 sm:$0xff]   ;;  %v2583_v21 = vld [vmem:[%s3226_s1 + $0x440] ss:$8 sps:$4 sm:$0xff]  }
  0x68   : > { %723 = vmatmul.mubr.bf16.vlgmr.msra.gmra.mrb[0].mxu1 %v2942_v55  ;;  %1401 = vmatmul.mubr.bf16.vlgmr.msra.gmra.mrb[0].mxu0 %v1285_v24  ;;  %v1459_v55 = vshll.u32 %v3091_v48, 16  ;;  %v1603_v24 = vld [vmem:[%s2742_s10 + $0x4] sm:$0x8] }
  0x69   : > { %859 = vmatpush1.bf16.msra.mxu1 %v2519_v22  ;;  %1547 = vmatpush1.bf16.msra.mxu0 %v2522_v23  ;;  %v2588_v22 = vld [vmem:[%s3226_s1 + $0x454] ss:$8 sps:$4 sm:$0xff]   ;;  %v2586_v23 = vld [vmem:[%s3226_s1 + $0x450] ss:$8 sps:$4 sm:$0xff]  }
  0x6a   : > { %860 = vmatprep.subr.bf16.mxu1 %v2530_v25  ;;  %1548 = vmatprep.subr.bf16.mxu0 %v2533_v26  ;;  %v1461_v3 = vrot.slane %v1459_v55, 3  ;;  %v2589_v25 = vld [vmem:[%s3226_s1 + $0x460] ss:$8 sps:$4 sm:$0xff]   ;;  %v2594_v26 = vld [vmem:[%s3226_s1 + $0x474] ss:$8 sps:$4 sm:$0xff]  }
  0x6b   : > { %732 = vmatprep.mubr.bf16.mxu1 %v2606_v2  ;;  %1410 = vmatprep.mubr.bf16.mxu0 %v2606_v2 }
  0x6c   : > { %v1462_v11 = vor.u32 %v1461_v3, %v1458_v1 }
  0x6d   : > { %861 = vmatpush1.bf16.msra.mxu1 %v2528_v27  ;;  %1549 = vmatpush1.bf16.msra.mxu0 %v2531_v28  ;;  %v2275_v27 = vcombine.low %v1603_v24, %v2990_v7  ;;  %v2592_v28 = vld [vmem:[%s3226_s1 + $0x470] ss:$8 sps:$4 sm:$0xff]  }
  0x6e   : > { %862 = vmatprep.subr.bf16.mxu1 %v2536_v29  ;;  %1550 = vmatprep.subr.bf16.mxu0 %v2539_v30  ;;  %v1463_v13 = vsel %vm1446_vm5, %v1454_v10, %v1462_v11  ;;  %v1625_v30 = vrot.slane %v3091_v48, 3 }
  0x6f   : > { %v1624_v29 = vrot.slane %v2275_v27, 3 }
  0x70   : > { %733 = vmatmul.mubr.bf16.gmra.mrb[12].mxu1 %v606_v49  ;;  %1411 = vmatmul.mubr.bf16.gmra.mrb[12].mxu0 %v1284_v20  ;;  %v2546_v49 = vld [vmem:[%s3226_s1 + $0x1c0] ss:$8 sps:$4 sm:$0xff]   ;;  %v2585_v20 = vld [vmem:[%s3226_s1 + $0x444] ss:$8 sps:$4 sm:$0xff]  }
  0x71   : > { %863 = vmatpush1.bf16.msra.mxu1 %v2534_v36  ;;  %1551 = vmatpush1.bf16.msra.mxu0 %v2537_v41  ;;  %v1626_v31 = vsel %vm772_vm4, %v1624_v29, %v1625_v30 }
  0x72   : > { %864 = vmatprep.subr.bf16.mxu1 %v2542_v42  ;;  %1552 = vmatprep.subr.bf16.mxu0 %v2545_v43 }
  0x73   : > { %890 = vmatprep.mubr.bf16.mxu1 %v2606_v2  ;;  %1578 = vmatprep.mubr.bf16.mxu0 %v2606_v2 }
  0x75   : > { %865 = vmatpush1.bf16.msra.mxu1 %v2540_v44  ;;  %1553 = vmatpush1.bf16.msra.mxu0 %v2543_v46 }
  0x76   : > { %866 = vmatprep.subr.bf16.mxu1 %v2548_v47  ;;  %1554 = vmatprep.subr.bf16.mxu0 %v2551_v39 }
  0x79   : > { %867 = vmatpush1.bf16.msra.mxu1 %v2546_v49  ;;  %1555 = vmatpush1.bf16.msra.mxu0 %v2549_v35 }
  0x7a   : > { %868 = vmatprep.subr.bf16.mxu1 %v2554_v50  ;;  %1556 = vmatprep.subr.bf16.mxu0 %v2557_v51 }
  0x7d   : > { %869 = vmatpush1.bf16.msra.mxu1 %v2552_v32  ;;  %1557 = vmatpush1.bf16.msra.mxu0 %v2555_v56 }
  0x7e   : > { %870 = vmatprep.subr.bf16.mxu1 %v2560_v57  ;;  %1558 = vmatprep.subr.bf16.mxu0 %v2563_v58 }
  0x81   : > { %871 = vmatpush1.bf16.msra.mxu1 %v2558_v59  ;;  %1559 = vmatpush1.bf16.msra.mxu0 %v2561_v63 }
  0x82   : > { %872 = vmatprep.subr.bf16.mxu1 %v2566_v0  ;;  %1560 = vmatprep.subr.bf16.mxu0 %v2569_v4 }
  0x85   : > { %873 = vmatpush1.bf16.msra.mxu1 %v2564_v33  ;;  %1561 = vmatpush1.bf16.msra.mxu0 %v2567_v8 }
  0x86   : > { %2300 = vmatprep.subr.bf16.mxu1 %v2573_v9  ;;  %1709 = vmatprep.subr.bf16.mxu0 %v2573_v9 }
  0x88   : > { %891 = vmatmul.mubr.bf16.vlgmr.msra.gmra.mrb[0].mxu1 %v775_v12  ;;  %1579 = vmatmul.mubr.bf16.vlgmr.msra.gmra.mrb[0].mxu0 %v1463_v13 }
  0x89   : > { %2308 = vmatpush1.bf16.msra.mxu1 %v2571_v40  ;;  %1710 = vmatpush1.bf16.msra.mxu0 %v2571_v40 }
  0x8a   : > { %2301 = vmatprep.subr.bf16.mxu1 %v2576_v14  ;;  %1711 = vmatprep.subr.bf16.mxu0 %v2576_v14 }
  0x8b   : > { %900 = vmatprep.mubr.bf16.mxu1 %v2606_v2  ;;  %1588 = vmatprep.mubr.bf16.mxu0 %v2606_v2 }
  0x8d   : > { %2309 = vmatpush1.bf16.msra.mxu1 %v2574_v15  ;;  %1712 = vmatpush1.bf16.msra.mxu0 %v2574_v15 }
  0x8e   : > { %2302 = vmatprep.subr.bf16.mxu1 %v2579_v16  ;;  %1713 = vmatprep.subr.bf16.mxu0 %v2579_v16 }
  0x90   : > { %901 = vmatmul.mubr.bf16.gmra.mrb[16].mxu1 %v774_v6  ;;  %1589 = vmatmul.mubr.bf16.gmra.mrb[16].mxu0 %v1462_v11 }
  0x91   : > { %2310 = vmatpush1.bf16.msra.mxu1 %v2577_v17  ;;  %1714 = vmatpush1.bf16.msra.mxu0 %v2577_v17 }
  0x92   : > { %2303 = vmatprep.subr.bf16.mxu1 %v2582_v18  ;;  %1715 = vmatprep.subr.bf16.mxu0 %v2582_v18 }
  0x93   : > { %1741 = vmatprep.mubr.bf16.mxu0 %v2606_v2  ;;  %1751 = vmatprep.mubr.bf16.mxu1 %v2606_v2  ;;  %v2591_v2 = vld [vmem:[%s3226_s1 + $0x464] ss:$8 sps:$4 sm:$0xff]  }
  0x95   : > { %2311 = vmatpush1.bf16.msra.mxu1 %v2580_v19  ;;  %1716 = vmatpush1.bf16.msra.mxu0 %v2580_v19  ;;  %v1768_v19 = vlaneseq }
  0x96   : > { %2304 = vmatprep.subr.bf16.mxu1 %v2585_v20  ;;  %1717 = vmatprep.subr.bf16.mxu0 %v2585_v20 }
  0x97   : > { %v1769_v20 = vshrl.u32 %v1768_v19, 7 }
  0x99   : > { %2312 = vmatpush1.bf16.msra.mxu1 %v2583_v21  ;;  %1718 = vmatpush1.bf16.msra.mxu0 %v2583_v21  ;;  %v3199_v21 = vsub.s32 0, %v1769_v20 }
  0x9a   : > { %2305 = vmatprep.subr.bf16.mxu1 %v2588_v22  ;;  %1719 = vmatprep.subr.bf16.mxu0 %v2588_v22  ;;  %v1766_v22 = vld [vmem:[%s3227_s2] sm:$0x3] }
  0x9b   : > { %v1771_v24 = vrot.slane %v1766_v22, %v3199_v21 }
  0x9d   : > { %2313 = vmatpush1.bf16.msra.mxu1 %v2586_v23  ;;  %1720 = vmatpush1.bf16.msra.mxu0 %v2586_v23  ;;  %v3204_v23 = vsub.s32 1, %v1769_v20 }
  0x9e   : > { %2306 = vmatprep.subr.bf16.mxu1 %v2591_v2  ;;  %1721 = vmatprep.subr.bf16.mxu0 %v2591_v2 }
  0xa1   : > { %2314 = vmatpush1.bf16.msra.mxu1 %v2589_v25  ;;  %1722 = vmatpush1.bf16.msra.mxu0 %v2589_v25 }
  0xa2   : > { %2307 = vmatprep.subr.bf16.mxu1 %v2594_v26  ;;  %1723 = vmatprep.subr.bf16.mxu0 %v2594_v26 }
  0xa5   : > { %2315 = vmatpush1.bf16.msra.mxu1 %v2592_v28  ;;  %1724 = vmatpush1.bf16.msra.mxu0 %v2592_v28  ;;  %v1775_v28 = vrot.slane %v1766_v22, %v3204_v23 }
  0xa8   : > { %1752 = vmatmul.mubr.bf16.vlgmr.msra.gmra.mrb[20].mxu1 %v1625_v30  ;;  %1742 = vmatmul.mubr.bf16.vlgmr.msra.gmra.mrb[0].mxu0 %v1626_v31 }
  0xc6   : > { %v1790_v2 = vpop.permute.xlu0 %1789 }
 0x103   : > { %v442_v34 = vpop.f32.mrb[4].mxu1  ;;  %v1080_v7 = vpop.f32.mrb[4].mxu0 }
 0x104   : > { %v444_v36 = vpop.f32.mrb[5].mxu1  ;;  %v1082_v38 = vpop.f32.mrb[5].mxu0 }
 0x105   : > { %v446_v41 = vpop.f32.mrb[6].mxu1  ;;  %v1084_v42 = vpop.f32.mrb[6].mxu0 }
 0x106   : > { %v447_v43 = vpop.f32.mrb[7].mxu1  ;;  %v1085_v44 = vpop.f32.mrb[7].mxu0 }
 0x123   : > { %v576_v45 = vpop.f32.mrb[8].mxu1  ;;  %v1238_v39 = vpop.f32.mrb[8].mxu0 }
 0x124   : > { %v577_v46 = vadd.f32 %v576_v45, %v442_v34  ;;  %v578_v47 = vpop.f32.mrb[9].mxu1  ;;  %v1240_v49 = vpop.f32.mrb[9].mxu0 }
 0x125   : > { %v579_v48 = vadd.f32 %v578_v47, %v444_v36  ;;  %v580_v35 = vpop.f32.mrb[10].mxu1  ;;  %v1242_v50 = vpop.f32.mrb[10].mxu0 }
 0x126   : > { %v581_v51 = vpop.f32.mrb[11].mxu1  ;;  %v1243_v32 = vpop.f32.mrb[11].mxu0 }
 0x143   : > { %v734_v52 = vpop.f32.mrb[12].mxu1  ;;  %v1412_v55 = vpop.f32.mrb[12].mxu0 }
 0x144   : > { %v745_v53 = vadd.f32 %v734_v52, %v577_v46  ;;  %v736_v54 = vpop.f32.mrb[13].mxu1  ;;  %v1414_v57 = vpop.f32.mrb[13].mxu0 }
 0x145   : > { %v746_v56 = vadd.f32 %v736_v54, %v579_v48  ;;  %v738_v37 = vpop.f32.mrb[14].mxu1  ;;  %v1416_v58 = vpop.f32.mrb[14].mxu0 }
 0x146   : > { %v739_v59 = vpop.f32.mrb[15].mxu1  ;;  %v1417_v60 = vpop.f32.mrb[15].mxu0 }
 0x147   : > { %v1800_v52 = vpop.permute.xlu1 %1799 }
 0x15b   : > { %v892_v61 = vpop.f32.mrb[0].mxu1 }
 0x15c   : > { %v894_v62 = vpop.f32.mrb[1].mxu1 }
 0x15d   : > { %v896_v63 = vpop.f32.mrb[2].mxu1 }
 0x15e   : > { %v898_v0 = vpop.f32.mrb[3].mxu1 }
 0x163   : > { %v902_v1 = vpop.f32.mrb[16].mxu1  ;;  %v1590_v33 = vpop.f32.mrb[16].mxu0 }
 0x164   : > { %v913_v3 = vadd.f32 %v902_v1, %v745_v53  ;;  %v904_v4 = vpop.f32.mrb[17].mxu1  ;;  %v1592_v6 = vpop.f32.mrb[17].mxu0 }
 0x165   : > { %v914_v5 = vadd.f32 %v904_v4, %v746_v56  ;;  %v906_v8 = vpop.f32.mrb[18].mxu1  ;;  %v1594_v10 = vpop.f32.mrb[18].mxu0 }
 0x166   : > { %v1091_v9 = vadd.f32 %v1080_v7, %v913_v3  ;;  %v907_v11 = vpop.f32.mrb[19].mxu1  ;;  %v1595_v40 = vpop.f32.mrb[19].mxu0 }
 0x167   : > { %v1092_v12 = vadd.f32 %v1082_v38, %v914_v5 }
 0x168   : > { %v1249_v13 = vadd.f32 %v1238_v39, %v1091_v9 }
 0x169   : > { %v1250_v14 = vadd.f32 %v1240_v49, %v1092_v12  ;;  %v1795_v49 = vpop.permute.xlu0 %1794 }
 0x16a   : > { %v1423_v15 = vadd.f32 %v1412_v55, %v1249_v13 }
 0x16b   : > { %v1424_v16 = vadd.f32 %v1414_v57, %v1250_v14 }
 0x16c   : > { %v1601_v17 = vadd.f32 %v1590_v33, %v1423_v15 }
 0x16d   : > { %v1602_v18 = vadd.f32 %v1592_v6, %v1424_v16 }
 0x17b   : > { %v1753_v25 = vpop.f32.mrb[20].mxu1  ;;  %v1743_v26 = vpop.f32.mrb[0].mxu0 }
 0x17c   : > { %v1764_v27 = vadd.f32 %v1753_v25, %v1601_v17  ;;  %v1755_v29 = vpop.f32.mrb[21].mxu1  ;;  %v2316_v30 = vadd.f32 %v1743_v26, %v892_v61  ;;  %v1745_v31 = vpop.f32.mrb[1].mxu0 }
 0x17d   : > { %v1765_v34 = vadd.f32 %v1755_v29, %v1602_v18  ;;  %v1757_v7 = vpop.f32.mrb[22].mxu1  ;;  %v2317_v36 = vadd.f32 %v1745_v31, %v894_v62  ;;  %v1747_v38 = vpop.f32.mrb[2].mxu0 }
 0x17e   : > { %v1758_v41 = vpop.f32.mrb[23].mxu1  ;;  %v1778_v42 = vadd.f32 %v2316_v30, %v1771_v24  ;;  %v2318_v43 = vadd.f32 %v1747_v38, %v896_v63  ;;  %v1749_v44 = vpop.f32.mrb[3].mxu0  ;;  %v1782_v51 = vadd.f32 %v1771_v24, %v1764_v27 }
 0x17f   : > { %v1779_v45 = vadd.f32 %v2317_v36, %v1775_v28  ;;  %v2319_v46 = vadd.f32 %v1749_v44, %v898_v0  ;;  %v1783_v53 = vadd.f32 %v1775_v28, %v1765_v34 }
 0x180   : > { %v1802_v47 = vmul.f32 %v1790_v2, %v1778_v42  ;;  %v1780_v39 = vadd.f32 %v2318_v43, %v1771_v24  ;;  %v1806_v56 = vmul.f32 %v1800_v52, %v1782_v51  ;;  %v1886_v43 = vld [vmem:[%s3229_s4] sm:$0x3] }
 0x181   : > { %v1803_v48 = vmul.f32 %v1790_v2, %v1779_v45  ;;  %v1781_v35 = vadd.f32 %v2319_v46, %v1775_v28  ;;  %v1807_v37 = vmul.f32 %v1800_v52, %v1783_v53  ;;  %v1891_v46 = vrot.slane %v1886_v43, %v3199_v21 }
 0x182   : > { %v1804_v50 = vmul.f32 %v1795_v49, %v1780_v39 }
 0x183   : > { %v1808_v32 = vadd.f32 %v1803_v48, %v1802_v47  ;;  %v1805_v54 = vmul.f32 %v1795_v49, %v1781_v35  ;;  %v1895_v47 = vrot.slane %v1886_v43, %v3204_v23 }
 0x185   : > { %v1809_v55 = vadd.f32 %v1808_v32, %v1804_v50 }
 0x187   : > { %v1810_v57 = vadd.f32 %v1809_v55, %v1805_v54 }
 0x189   : > { %v1811_v58 = vadd.f32 %v1810_v57, %v1806_v56 }
 0x18b   : > { %v1812_v59 = vadd.f32 %v1811_v58, %v1807_v37 }
 0x18d   : > { %1813 = vadd.xlane.f32.xlu1 %v1812_v59 }
 0x21a   : > { %v1814_v60 = vpop.xlane.xlu1 %1813 }
 0x21b   : > { %v1815_v61 = vrot.slane %v1814_v60, 4 }
 0x21d   : > { %v1816_v62 = vadd.f32 %v1815_v61, %v1814_v60 }
 0x21f   : > { %v1817_v63 = vrot.slane %v1816_v62, 2 }
 0x221   : > { %v1818_v0 = vadd.f32 %v1817_v63, %v1816_v62 }
 0x223   : > { %v1819_v1 = vrot.slane %v1818_v0, 1 }
 0x225   : > { %v1820_v3 = vadd.f32 %v1819_v1, %v1818_v0 }
 0x227   : > { %2350 = vpush %v1820_v3 }
 0x258   : > { %s2351_s25 = spop %2350 }
 0x259   : > { %s1822_s26 = smul.f32 0.00024414063, %s2351_s25 }
 0x25b   : > { %v1823_v4 = vstv %s1822_s26 }
 0x25c   : > { %v1824_v33 = vsub.f32 %v1778_v42, %v1823_v4  ;;  %v1825_v5 = vsub.f32 %v1779_v45, %v1823_v4  ;;  %v1826_v6 = vsub.f32 %v1780_v39, %v1823_v4  ;;  %v1827_v8 = vsub.f32 %v1781_v35, %v1823_v4  ;;  %v1868_v42 = vld [vmem:[%s3228_s3] sm:$0x3] }
 0x25d   : > { %v1828_v11 = vsub.f32 %v1782_v51, %v1823_v4  ;;  %v1829_v40 = vsub.f32 %v1783_v53, %v1823_v4  ;;  %v1873_v44 = vrot.slane %v1868_v42, %v3199_v21  ;;  %v1877_v45 = vrot.slane %v1868_v42, %v3204_v23 }
 0x25e   : > { %v1830_v9 = vmul.f32 %v1824_v33, %v1824_v33  ;;  %v1831_v10 = vmul.f32 %v1825_v5, %v1825_v5  ;;  %v1832_v12 = vmul.f32 %v1826_v6, %v1826_v6  ;;  %v1833_v13 = vmul.f32 %v1827_v8, %v1827_v8 }
 0x25f   : > { %v1834_v16 = vmul.f32 %v1828_v11, %v1828_v11  ;;  %v1835_v19 = vmul.f32 %v1829_v40, %v1829_v40 }
 0x260   : > { %v1836_v14 = vmul.f32 %v1830_v9, %v1790_v2  ;;  %v1837_v15 = vmul.f32 %v1831_v10, %v1790_v2  ;;  %v1838_v17 = vmul.f32 %v1832_v12, %v1795_v49  ;;  %v1839_v20 = vmul.f32 %v1833_v13, %v1795_v49 }
 0x261   : > { %v1840_v24 = vmul.f32 %v1834_v16, %v1800_v52  ;;  %v1841_v26 = vmul.f32 %v1835_v19, %v1800_v52 }
 0x262   : > { %v1842_v18 = vadd.f32 %v1837_v15, %v1836_v14 }
 0x264   : > { %v1843_v22 = vadd.f32 %v1842_v18, %v1838_v17 }
 0x266   : > { %v1844_v25 = vadd.f32 %v1843_v22, %v1839_v20 }
 0x268   : > { %v1845_v27 = vadd.f32 %v1844_v25, %v1840_v24 }
 0x26a   : > { %v1846_v28 = vadd.f32 %v1845_v27, %v1841_v26 }
 0x26c   : > { %1847 = vadd.xlane.f32.xlu0 %v1846_v28 }
 0x2f9   : > { %v1848_v29 = vpop.xlane.xlu0 %1847 }
 0x2fa   : > { %v1849_v30 = vrot.slane %v1848_v29, 4 }
 0x2fc   : > { %v1850_v31 = vadd.f32 %v1849_v30, %v1848_v29 }
 0x2fe   : > { %v1851_v34 = vrot.slane %v1850_v31, 2 }
 0x300   : > { %v1852_v7 = vadd.f32 %v1851_v34, %v1850_v31 }
 0x302   : > { %v1853_v36 = vrot.slane %v1852_v7, 1 }
 0x304   : > { %v1854_v38 = vadd.f32 %v1853_v36, %v1852_v7 }
 0x306   : > { %2352 = vpush %v1854_v38 }
 0x337   : > { %s2353_s27 = spop %2352 }
 0x338   : > { %s1856_s28 = smul.f32 0.00024414063, %s2353_s27 }
 0x33a   : > { %s1857_s29 = sadd.f32 1e-05, %s1856_s28 }
 0x33c   : > { %v1858_v2 = vstv %s1857_s29 }
 0x33d   : > { %2596 = vrsqrt.f32 %v1858_v2 }
 0x347   : > { %v2597_v41 = vpop.eup %2596 }
 0x348   : > { %2354 = vpush %v2597_v41 }
 0x379   : > { %s2355_s11 = spop %2354 }
 0x37a   : > { %v1861_v39 = vstv %s2355_s11 }
 0x37b   : > { %v1862_v48 = vmul.f32 %v1861_v39, %v1824_v33  ;;  %v1863_v49 = vmul.f32 %v1861_v39, %v1825_v5  ;;  %v1864_v35 = vmul.f32 %v1861_v39, %v1826_v6  ;;  %v1865_v50 = vmul.f32 %v1861_v39, %v1827_v8 }
 0x37c   : > { %v1866_v51 = vmul.f32 %v1861_v39, %v1828_v11  ;;  %v1867_v32 = vmul.f32 %v1861_v39, %v1829_v40 }
 0x37d   : > { %v1880_v52 = vmul.f32 %v1873_v44, %v1862_v48  ;;  %v1881_v53 = vmul.f32 %v1877_v45, %v1863_v49  ;;  %v1882_v54 = vmul.f32 %v1873_v44, %v1864_v35  ;;  %v1883_v55 = vmul.f32 %v1877_v45, %v1865_v50 }
 0x37e   : > { %v1884_v56 = vmul.f32 %v1873_v44, %v1866_v51  ;;  %v1885_v57 = vmul.f32 %v1877_v45, %v1867_v32 }
 0x37f   : > { %v1898_v37 = vadd.f32 %v1891_v46, %v1880_v52  ;;  %v1899_v58 = vadd.f32 %v1895_v47, %v1881_v53  ;;  %v1900_v59 = vadd.f32 %v1891_v46, %v1882_v54  ;;  %v1901_v21 = vadd.f32 %v1895_v47, %v1883_v55 }
 0x380   : > { %v1902_v23 = vadd.f32 %v1891_v46, %v1884_v56  ;;  %v1903_v60 = vadd.f32 %v1895_v47, %v1885_v57 }
 0x381   : > { %vm1904_vm6 = vcmp.gt.f32.partialorder %v1898_v37, 0.0  ;;  %vm1905_vm7 = vcmp.gt.f32.partialorder %v1899_v58, 0.0  ;;  %vm1906_vm8 = vcmp.gt.f32.partialorder %v1900_v59, 0.0  ;;  %vm1907_vm9 = vcmp.gt.f32.partialorder %v1901_v21, 0.0 }
 0x382   : > { %vm1908_vm10 = vcmp.gt.f32.partialorder %v1902_v23, 0.0  ;;  %vm1909_vm11 = vcmp.gt.f32.partialorder %v1903_v60, 0.0  ;;  %v1910_v61 = vmul.f32 0.2, %v1898_v37  ;;  %v1911_v62 = vmul.f32 0.2, %v1899_v58 }
 0x383   : > { %v1912_v63 = vmul.f32 0.2, %v1900_v59  ;;  %v1913_v0 = vmul.f32 0.2, %v1901_v21  ;;  %v1914_v1 = vmul.f32 0.2, %v1902_v23 }
 0x384   : > { %v1915_v3 = vmul.f32 0.2, %v1903_v60  ;;  %v1916_v4 = vsel %vm1904_vm6, %v1898_v37, %v1910_v61  ;;  %v1917_v33 = vsel %vm1905_vm7, %v1899_v58, %v1911_v62 }
 0x385   : > { %v1918_v5 = vsel %vm1906_vm8, %v1900_v59, %v1912_v63  ;;  %v1919_v6 = vsel %vm1907_vm9, %v1901_v21, %v1913_v0  ;;  %v1920_v8 = vsel %vm1908_vm10, %v1902_v23, %v1914_v1  ;;  %v2297_v9 = vpack.c.bf16 %v1917_v33, %v1916_v4 }
 0x386   : > { %v1921_v10 = vsel %vm1909_vm11, %v1903_v60, %v1915_v3  ;;  %v2298_v11 = vpack.c.bf16 %v1919_v6, %v1918_v5 }
 0x387   : > { %v2299_v12 = vpack.c.bf16 %v1921_v10, %v1920_v8  ;;  %1942 = vst [vmem:[%s251_s15] sm:$0xff] %v2297_v9 }
 0x388   : > { %1943 = vst [vmem:[%s251_s15 + $0x8] sm:$0xff] %v2298_v11 }
 0x389   : > { %1944 = vst [vmem:[%s251_s15 + $0x10] sm:$0xff] %v2299_v12 }
 0x38a PF: > { %s16_s21 = sadd.s32 1, %s2604_s21  }
 0x38b   : > { %p13_p4 = scmp.ge.s32.totalorder %s16_s21, 4  }
 0x38d   :  { %15 = sbr.rel (!%p13_p4) target bundleno = 1 (0x1), region = 82 }

// kernel: discriminator_forward.12
= control target key start
LH: loop header
LB: loop body
LE: loop exit
PB: predicated region body
PF: predicated region fallthrough
CT: control target
= control target key end

     0   :  { %s4144_s21 = smov 0   ;;  %s5240_s0 = inlined_call_operand.vmem [shape: bf16[2,1,38,256], index: 0, kind: input, shape index: {}]   ;;  %s5241_s1 = inlined_call_operand.vmem [shape: bf16[9,256,256], index: 1, kind: input, shape index: {}]   ;;  %s5242_s2 = inlined_call_operand.vmem [shape: f32[1,256], index: 2, kind: input, shape index: {}]   ;;  %s5243_s3 = inlined_call_operand.vmem [shape: f32[1,256], index: 3, kind: input, shape index: {}]   ;;  %s5244_s4 = inlined_call_operand.vmem [shape: f32[1,256], index: 4, kind: input, shape index: {}]   ;;  %s5245_s5 = inlined_call_operand.vmem [shape: f32[24,1], index: 5, kind: input, shape index: {}]   ;;  %s5246_s6 = inlined_call_operand.vmem [shape: bf16[2,24,256], index: 6, kind: output, shape index: {}]  }
   0x1 LB: > { %s2969_s22 = sadd.s32 4294967295, %s4106_s21   ;;  %p2973_p0 = scmp.ge.s32.totalorder %s4106_s21, 1  ;;  %s4106_s21 = sphi %s4144_s21, %s16_s21  }
   0x2   : > { %p212_p1 = scmp.lt.s32.totalorder %s4106_s21, 3 }
   0x4   : > { %p213_p2 = pnand %p2973_p0, %p212_p1 }
   0x5   : > { %v3637_v0 = vld [vmem:[%s5241_s1 + $0x104] ss:$8 sps:$4 sm:$0xff] (!%p213_p2)   ;;  %v3641_v2 = vld [vmem:[%s5241_s1 + $0x100] ss:$8 sps:$4 sm:$0xff] (!%p213_p2)   ;;  %v3643_v4 = vld [vmem:[%s5241_s1 + $0x114] ss:$8 sps:$4 sm:$0xff] (!%p213_p2)  }
   0x6   : > { %216 = sbr.rel (%p213_p2) target bundleno = 1065 (0x429), region = 44  ;;  %v3639_v1 = vld [vmem:[%s5241_s1 + $0x404] ss:$8 sps:$4 sm:$0xff] (!%p213_p2)   ;;  %532 = vmatprep.subr.bf16.mxu1 (!%p213_p2), %v3637_v0  ;;  %v3642_v3 = vld [vmem:[%s5241_s1 + $0x400] ss:$8 sps:$4 sm:$0xff] (!%p213_p2)   ;;  %p242_p3 = scmp.lt.s32.totalorder (!%p213_p2), %s2969_s22, 1 }
   0x7   : > { %1578 = vmatprep.subr.bf16.mxu0 (!%p213_p2), %v3639_v1  ;;  %533 = vmatpush1.bf16.msra.mxu1 (!%p213_p2), %v3641_v2  ;;  %v3645_v5 = vld [vmem:[%s5241_s1 + $0x414] ss:$8 sps:$4 sm:$0xff] (!%p213_p2)   ;;  %v3647_v6 = vld [vmem:[%s5241_s1 + $0x110] ss:$8 sps:$4 sm:$0xff] (!%p213_p2)   ;;  %v3649_v8 = vld [vmem:[%s5241_s1 + $0x124] ss:$8 sps:$4 sm:$0xff] (!%p213_p2)  }
   0x8   : > { %1579 = vmatpush1.bf16.msra.mxu0 (!%p213_p2), %v3642_v3  ;;  %534 = vmatprep.subr.bf16.mxu1 (!%p213_p2), %v3643_v4  ;;  %v3648_v7 = vld [vmem:[%s5241_s1 + $0x410] ss:$8 sps:$4 sm:$0xff] (!%p213_p2)   ;;  %v3651_v9 = vld [vmem:[%s5241_s1 + $0x424] ss:$8 sps:$4 sm:$0xff] (!%p213_p2)   ;;  %v3653_v10 = vld [vmem:[%s5241_s1 + $0x120] ss:$8 sps:$4 sm:$0xff] (!%p213_p2)  }
   0x9   : > { %1580 = vmatprep.subr.bf16.mxu0 (!%p213_p2), %v3645_v5  ;;  %v3654_v11 = vld [vmem:[%s5241_s1 + $0x420] ss:$8 sps:$4 sm:$0xff] (!%p213_p2)   ;;  %v3655_v12 = vld [vmem:[%s5241_s1 + $0x134] ss:$8 sps:$4 sm:$0xff] (!%p213_p2)   ;;  %v3659_v14 = vld [vmem:[%s5241_s1 + $0x130] ss:$8 sps:$4 sm:$0xff] (!%p213_p2)  }
   0xa   : > { %v3657_v13 = vld [vmem:[%s5241_s1 + $0x434] ss:$8 sps:$4 sm:$0xff] (!%p213_p2)   ;;  %v3660_v15 = vld [vmem:[%s5241_s1 + $0x430] ss:$8 sps:$4 sm:$0xff] (!%p213_p2)   ;;  %v3661_v16 = vld [vmem:[%s5241_s1 + $0x144] ss:$8 sps:$4 sm:$0xff] (!%p213_p2)  }
   0xb   : > { %535 = vmatpush1.bf16.msra.mxu1 (!%p213_p2), %v3647_v6  ;;  %v3663_v17 = vld [vmem:[%s5241_s1 + $0x444] ss:$8 sps:$4 sm:$0xff] (!%p213_p2)   ;;  %v3665_v18 = vld [vmem:[%s5241_s1 + $0x140] ss:$8 sps:$4 sm:$0xff] (!%p213_p2)   ;;  %v3667_v20 = vld [vmem:[%s5241_s1 + $0x154] ss:$8 sps:$4 sm:$0xff] (!%p213_p2)  }
   0xc   : > { %1581 = vmatpush1.bf16.msra.mxu0 (!%p213_p2), %v3648_v7  ;;  %536 = vmatprep.subr.bf16.mxu1 (!%p213_p2), %v3649_v8  ;;  %v3666_v19 = vld [vmem:[%s5241_s1 + $0x440] ss:$8 sps:$4 sm:$0xff] (!%p213_p2)   ;;  %v3669_v21 = vld [vmem:[%s5241_s1 + $0x454] ss:$8 sps:$4 sm:$0xff] (!%p213_p2)   ;;  %v3671_v22 = vld [vmem:[%s5241_s1 + $0x150] ss:$8 sps:$4 sm:$0xff] (!%p213_p2)  }
   0xd   : > { %1582 = vmatprep.subr.bf16.mxu0 %v3651_v9  ;;  %v3672_v23 = vld [vmem:[%s5241_s1 + $0x450] ss:$8 sps:$4 sm:$0xff]   ;;  %v3673_v24 = vld [vmem:[%s5241_s1 + $0x164] ss:$8 sps:$4 sm:$0xff]   ;;  %v3677_v26 = vld [vmem:[%s5241_s1 + $0x160] ss:$8 sps:$4 sm:$0xff]  }
   0xe   : > { %v3675_v25 = vld [vmem:[%s5241_s1 + $0x464] ss:$8 sps:$4 sm:$0xff]   ;;  %v3678_v27 = vld [vmem:[%s5241_s1 + $0x460] ss:$8 sps:$4 sm:$0xff]   ;;  %v3679_v28 = vld [vmem:[%s5241_s1 + $0x174] ss:$8 sps:$4 sm:$0xff]  }
   0xf   : > { %537 = vmatpush1.bf16.msra.mxu1 %v3653_v10  ;;  %v3681_v29 = vld [vmem:[%s5241_s1 + $0x474] ss:$8 sps:$4 sm:$0xff]   ;;  %v3683_v30 = vld [vmem:[%s5241_s1 + $0x170] ss:$8 sps:$4 sm:$0xff]   ;;  %v3685_v32 = vld [vmem:[%s5241_s1 + $0x184] ss:$8 sps:$4 sm:$0xff]  }
  0x10   : > { %1583 = vmatpush1.bf16.msra.mxu0 %v3654_v11  ;;  %538 = vmatprep.subr.bf16.mxu1 %v3655_v12  ;;  %v3684_v31 = vld [vmem:[%s5241_s1 + $0x470] ss:$8 sps:$4 sm:$0xff]   ;;  %v3687_v33 = vld [vmem:[%s5241_s1 + $0x484] ss:$8 sps:$4 sm:$0xff]   ;;  %v3689_v34 = vld [vmem:[%s5241_s1 + $0x180] ss:$8 sps:$4 sm:$0xff]  }
  0x11   : > { %1584 = vmatprep.subr.bf16.mxu0 %v3657_v13  ;;  %v3690_v35 = vld [vmem:[%s5241_s1 + $0x480] ss:$8 sps:$4 sm:$0xff]   ;;  %s5248_s22 = smov (!%p242_p3, %s2969_s22), 1  ;;  %v3691_v36 = vld [vmem:[%s5241_s1 + $0x194] ss:$8 sps:$4 sm:$0xff]   ;;  %vm839_vm2 = vcmask 1046528  }
  0x12   : > { %v3693_v37 = vld [vmem:[%s5241_s1 + $0x494] ss:$8 sps:$4 sm:$0xff]   ;;  %v3695_v38 = vld [vmem:[%s5241_s1 + $0x190] ss:$8 sps:$4 sm:$0xff]   ;;  %s3618_s11 = smul.u32 40, %s5248_s22  ;;  %vm1946_vm3 = vcmask 1045504  }
  0x13   : > { %539 = vmatpush1.bf16.msra.mxu1 %v3659_v14  ;;  %v3696_v39 = vld [vmem:[%s5241_s1 + $0x490] ss:$8 sps:$4 sm:$0xff]   ;;  %v3697_v40 = vld [vmem:[%s5241_s1 + $0x1a4] ss:$8 sps:$4 sm:$0xff]   ;;  %v3701_v42 = vld [vmem:[%s5241_s1 + $0x1a0] ss:$8 sps:$4 sm:$0xff]  }
  0x14   : > { %1585 = vmatpush1.bf16.msra.mxu0 %v3660_v15  ;;  %540 = vmatprep.subr.bf16.mxu1 %v3661_v16  ;;  %v3699_v41 = vld [vmem:[%s5241_s1 + $0x4a4] ss:$8 sps:$4 sm:$0xff]   ;;  %v3702_v43 = vld [vmem:[%s5241_s1 + $0x4a0] ss:$8 sps:$4 sm:$0xff]   ;;  %s4294_s26 = scalar_lea.vmem %s5240_s0, %s3618_s11  ;;  %v3703_v44 = vld [vmem:[%s5241_s1 + $0x1b4] ss:$8 sps:$4 sm:$0xff]  }
  0x15   : > { %1586 = vmatprep.subr.bf16.mxu0 %v3663_v17  ;;  %v3705_v45 = vld [vmem:[%s5241_s1 + $0x4b4] ss:$8 sps:$4 sm:$0xff]   ;;  %v3707_v46 = vld [vmem:[%s5241_s1 + $0x1b0] ss:$8 sps:$4 sm:$0xff]   ;;  %v252_v48 = vld [vmem:[%s4294_s26] sm:$0xff]  ;;  %vm1112_vm4 = vcmask 1044480  }
  0x16   : > { %v3708_v47 = vld [vmem:[%s5241_s1 + $0x4b0] ss:$8 sps:$4 sm:$0xff]   ;;  %v4310_v49 = vld [vmem:[%s4294_s26 + $0x8] sm:$0xff]  ;;  %vm337_vm0 = vsmask.f32 7424  ;;  %s3619_s17 = smul.u32 24, %s5248_s22 }
  0x17   : > { %541 = vmatpush1.bf16.msra.mxu1 %v3665_v18  ;;  %v4313_v50 = vld [vmem:[%s4294_s26 + $0x10] sm:$0xff]  ;;  %v287_v51 = vld [vmem:[%s4294_s26 + $0x18] sm:$0x11]  ;;  %v3709_v52 = vld [vmem:[%s5241_s1 + $0x1c4] ss:$8 sps:$4 sm:$0xff]   ;;  %v4320_v53 = vcombine.high %v252_v48, %v4310_v49  ;;  %v4347_v1 = vcombine.low %v252_v48, %v4310_v49 }
  0x18   : > { %1587 = vmatpush1.bf16.msra.mxu0 %v3666_v19  ;;  %542 = vmatprep.subr.bf16.mxu1 %v3667_v20  ;;  %v4323_v54 = vcombine.high %v4313_v50, %v287_v51  ;;  %v3711_v55 = vld [vmem:[%s5241_s1 + $0x4c4] ss:$8 sps:$4 sm:$0xff]   ;;  %v4330_v57 = vld [vmem:[%s4294_s26 + $0x18] sm:$0xff]  ;;  %v3713_v62 = vld [vmem:[%s5241_s1 + $0x1c0] ss:$8 sps:$4 sm:$0xff]   ;;  %v4368_v18 = vcombine.low %v4313_v50, %v287_v51  ;;  %s251_s20 = scalar_lea.vmem %s5246_s6, %s3619_s17 }
  0x19   : > { %1588 = vmatprep.subr.bf16.mxu0 %v3669_v21  ;;  %v1067_v56 = vld [vmem:[%s4294_s26] sm:$0x88]  ;;  %v351_v58 = vshrl.u32 %v4320_v53, 16  ;;  %v353_v59 = vshll.u32 %v4320_v53, 16  ;;  %v3245_v0 = vcombine.high %v4313_v50, %v4330_v57  ;;  %vm1379_vm1 = vsmask.f32 4352 }
  0x1a   : > { %v358_v60 = vshll.u32 %v4323_v54, 16  ;;  %v4336_v61 = vcombine.high %v1067_v56, %v4310_v49  ;;  %v3714_v63 = vld [vmem:[%s5241_s1 + $0x4c0] ss:$8 sps:$4 sm:$0xff]   ;;  %v4350_v2 = vcombine.low %v1067_v56, %v4310_v49  ;;  %v3715_v7 = vld [vmem:[%s5241_s1 + $0x1d4] ss:$8 sps:$4 sm:$0xff]   ;;  %v3244_v14 = vcombine.low %v4313_v50, %v4330_v57 }
  0x1b   : > { %543 = vmatpush1.bf16.msra.mxu1 %v3671_v22  ;;  %v355_v3 = vrot.slane %v353_v59, 1  ;;  %v3717_v8 = vld [vmem:[%s5241_s1 + $0x4d4] ss:$8 sps:$4 sm:$0xff]   ;;  %v1406_v9 = vshrl.u32 %v3245_v0, 16  ;;  %v1409_v10 = vshll.u32 %v3245_v0, 16  ;;  %v341_v19 = vshll.u32 %v4347_v1, 16 }
  0x1c   : > { %1589 = vmatpush1.bf16.msra.mxu0 %v3672_v23  ;;  %544 = vmatprep.subr.bf16.mxu1 %v3673_v24  ;;  %v4352_v4 = vrot.slane %v358_v60, 1  ;;  %v1398_v5 = vshrl.u32 %v4336_v61, 16  ;;  %v1401_v6 = vshll.u32 %v4336_v61, 16  ;;  %v3719_v15 = vld [vmem:[%s5241_s1 + $0x1d0] ss:$8 sps:$4 sm:$0xff]   ;;  %v1381_v24 = vshrl.u32 %v4350_v2, 16 }
  0x1d   : > { %1590 = vmatprep.subr.bf16.mxu0 %v3675_v25  ;;  %v356_v11 = vor.u32 %v355_v3, %v351_v58  ;;  %v1408_v16 = vrot.slane %v1406_v9, 3  ;;  %v1411_v17 = vrot.slane %v1409_v10, 4  ;;  %v3720_v20 = vld [vmem:[%s5241_s1 + $0x4d0] ss:$8 sps:$4 sm:$0xff]   ;;  %v3721_v21 = vld [vmem:[%s5241_s1 + $0x1e4] ss:$8 sps:$4 sm:$0xff]  }
  0x1e   : > { %v1400_v12 = vrot.slane %v1398_v5, 3  ;;  %v1403_v13 = vrot.slane %v1401_v6, 4  ;;  %v1384_v25 = vshll.u32 %v4350_v2, 16  ;;  %v3737_v48 = vld [vmem:[%s5241_s1 + $0x4] ss:$8 sps:$4 sm:$0xff]   ;;  %v362_v3 = vshrl.u32 %v4368_v18, 16 }
  0x1f   : > { %545 = vmatpush1.bf16.msra.mxu1 %v3677_v26  ;;  %v361_v22 = vsel %vm337_vm0, %v356_v11, %v4352_v4  ;;  %v3723_v26 = vld [vmem:[%s5241_s1 + $0x4e4] ss:$8 sps:$4 sm:$0xff]   ;;  %v3740_v56 = vld [vmem:[%s5241_s1 + $0x500] ss:$8 sps:$4 sm:$0xff]   ;;  %v3749_v60 = vld [vmem:[%s5241_s1 + $0x14] ss:$8 sps:$4 sm:$0xff]  }
  0x20   : > { %1591 = vmatpush1.bf16.msra.mxu0 %v3678_v27  ;;  %546 = vmatprep.subr.bf16.mxu1 %v3679_v28  ;;  %v1404_v23 = vor.u32 %v1403_v13, %v1400_v12  ;;  %v1412_v27 = vor.u32 %v1411_v17, %v1408_v16  ;;  %v1389_v28 = vshrl.u32 %v3244_v14, 16  ;;  %v3742_v51 = vld [vmem:[%s5241_s1 + $0x504] ss:$8 sps:$4 sm:$0xff]   ;;  %v3747_v0 = vld [vmem:[%s5241_s1 + $0x10] ss:$8 sps:$4 sm:$0xff]   ;;  %v3311_v12 = vcombine.high %v4310_v49, %v4313_v50 }
  0x21   : > { %1592 = vmatprep.subr.bf16.mxu0 %v3681_v29  ;;  %v1392_v29 = vshll.u32 %v3244_v14, 16  ;;  %564 = vmatprep.mubr.bf16.mxu1 %v361_v22  ;;  %v3750_v5 = vld [vmem:[%s5241_s1 + $0x510] ss:$8 sps:$4 sm:$0xff]   ;;  %v3758_v6 = vld [vmem:[%s5241_s1 + $0x524] ss:$8 sps:$4 sm:$0xff]  }
  0x22   : > { %v3756_v9 = vld [vmem:[%s5241_s1 + $0x520] ss:$8 sps:$4 sm:$0xff]   ;;  %v3761_v10 = vld [vmem:[%s5241_s1 + $0x34] ss:$8 sps:$4 sm:$0xff]   ;;  %v3759_v13 = vld [vmem:[%s5241_s1 + $0x30] ss:$8 sps:$4 sm:$0xff]  }
  0x23   : > { %547 = vmatpush1.bf16.msra.mxu1 %v3683_v30  ;;  %v3725_v30 = vld [vmem:[%s5241_s1 + $0x1e0] ss:$8 sps:$4 sm:$0xff]   ;;  %v3764_v11 = vld [vmem:[%s5241_s1 + $0x534] ss:$8 sps:$4 sm:$0xff]   ;;  %v3762_v14 = vld [vmem:[%s5241_s1 + $0x530] ss:$8 sps:$4 sm:$0xff]  }
  0x24   : > { %1593 = vmatpush1.bf16.msra.mxu0 %v3684_v31  ;;  %548 = vmatprep.subr.bf16.mxu1 %v3685_v32  ;;  %v3726_v31 = vld [vmem:[%s5241_s1 + $0x4e0] ss:$8 sps:$4 sm:$0xff]   ;;  %v1413_v32 = vsel %vm1379_vm1, %v1404_v23, %v1412_v27  ;;  %v3770_v16 = vld [vmem:[%s5241_s1 + $0x544] ss:$8 sps:$4 sm:$0xff]   ;;  %v3774_v22 = vld [vmem:[%s5241_s1 + $0x550] ss:$8 sps:$4 sm:$0xff]  }
  0x25   : > { %1594 = vmatprep.subr.bf16.mxu0 %v3687_v33  ;;  %v339_v33 = vshrl.u32 %v4347_v1, 16  ;;  %1610 = vmatprep.mubr.bf16.mxu0 %v1413_v32  ;;  %v3765_v17 = vld [vmem:[%s5241_s1 + $0x40] ss:$8 sps:$4 sm:$0xff]   ;;  %v3779_v23 = vld [vmem:[%s5241_s1 + $0x64] ss:$8 sps:$4 sm:$0xff]  }
  0x26   : > { %v3794_v32 = vld [vmem:[%s5241_s1 + $0x584] ss:$8 sps:$4 sm:$0xff]   ;;  %vm2213_vm5 = vsmask.f32 5376 }
  0x27   : > { %549 = vmatpush1.bf16.msra.mxu1 %v3689_v34  ;;  %v343_v34 = vrot.slane %v341_v19, 1  ;;  %v3768_v19 = vld [vmem:[%s5241_s1 + $0x540] ss:$8 sps:$4 sm:$0xff]  }
  0x28   : > { %1595 = vmatpush1.bf16.msra.mxu0 %v3690_v35  ;;  %550 = vmatprep.subr.bf16.mxu1 %v3691_v36  ;;  %v346_v35 = vshll.u32 %v4368_v18, 16  ;;  %v1383_v36 = vrot.slane %v1381_v24, 3  ;;  %v3782_v24 = vld [vmem:[%s5241_s1 + $0x564] ss:$8 sps:$4 sm:$0xff]  }
  0x29   : > { %1596 = vmatprep.subr.bf16.mxu0 %v3693_v37  ;;  %v1386_v37 = vrot.slane %v1384_v25, 4  ;;  %v3777_v25 = vld [vmem:[%s5241_s1 + $0x60] ss:$8 sps:$4 sm:$0xff]  }
  0x2b   : > { %551 = vmatpush1.bf16.msra.mxu1 %v3695_v38  ;;  %v1391_v38 = vrot.slane %v1389_v28, 3  ;;  %v3788_v28 = vld [vmem:[%s5241_s1 + $0x574] ss:$8 sps:$4 sm:$0xff]  }
  0x2c   : > { %1597 = vmatpush1.bf16.msra.mxu0 %v3696_v39  ;;  %552 = vmatprep.subr.bf16.mxu1 %v3697_v40  ;;  %v1394_v39 = vrot.slane %v1392_v29, 4  ;;  %v3727_v40 = vld [vmem:[%s5241_s1 + $0x1f4] ss:$8 sps:$4 sm:$0xff]   ;;  %v3783_v29 = vld [vmem:[%s5241_s1 + $0x70] ss:$8 sps:$4 sm:$0xff]  }
  0x2d   : > { %1598 = vmatprep.subr.bf16.mxu0 %v3699_v41  ;;  %v3729_v41 = vld [vmem:[%s5241_s1 + $0x4f4] ss:$8 sps:$4 sm:$0xff]  }
  0x2f   : > { %553 = vmatpush1.bf16.msra.mxu1 %v3701_v42  ;;  %v3731_v42 = vld [vmem:[%s5241_s1 + $0x1f0] ss:$8 sps:$4 sm:$0xff]  }
  0x30   : > { %1599 = vmatpush1.bf16.msra.mxu0 %v3702_v43  ;;  %554 = vmatprep.subr.bf16.mxu1 %v3703_v44  ;;  %v3732_v43 = vld [vmem:[%s5241_s1 + $0x4f0] ss:$8 sps:$4 sm:$0xff]   ;;  %v344_v44 = vor.u32 %v343_v34, %v339_v33  ;;  %v3789_v33 = vld [vmem:[%s5241_s1 + $0x80] ss:$8 sps:$4 sm:$0xff]  }
  0x31   : > { %1600 = vmatprep.subr.bf16.mxu0 %v3705_v45  ;;  %v348_v45 = vrot.slane %v346_v35, 1  ;;  %v3792_v34 = vld [vmem:[%s5241_s1 + $0x580] ss:$8 sps:$4 sm:$0xff]   ;;  %v3797_v35 = vld [vmem:[%s5241_s1 + $0x94] ss:$8 sps:$4 sm:$0xff]  }
  0x33   : > { %555 = vmatpush1.bf16.msra.mxu1 %v3707_v46  ;;  %v1387_v46 = vor.u32 %v1386_v37, %v1383_v36  ;;  %v349_v58 = vsel %vm337_vm0, %v344_v44, %v348_v45  ;;  %v3800_v36 = vld [vmem:[%s5241_s1 + $0x594] ss:$8 sps:$4 sm:$0xff]   ;;  %v3795_v37 = vld [vmem:[%s5241_s1 + $0x90] ss:$8 sps:$4 sm:$0xff]  }
  0x34   : > { %1601 = vmatpush1.bf16.msra.mxu0 %v3708_v47  ;;  %556 = vmatprep.subr.bf16.mxu1 %v3709_v52  ;;  %v1395_v47 = vor.u32 %v1394_v39, %v1391_v38  ;;  %v365_v52 = vshrl.u32 %v4323_v54, 16  ;;  %v3798_v38 = vld [vmem:[%s5241_s1 + $0x590] ss:$8 sps:$4 sm:$0xff]   ;;  %v3803_v39 = vld [vmem:[%s5241_s1 + $0xa4] ss:$8 sps:$4 sm:$0xff]  }
  0x35   : > { %1602 = vmatprep.subr.bf16.mxu0 %v3711_v55  ;;  %v3735_v55 = vld [vmem:[%s5241_s1] ss:$8 sps:$4 sm:$0xff]   ;;  %v3812_v44 = vld [vmem:[%s5241_s1 + $0x5b4] ss:$8 sps:$4 sm:$0xff]  }
  0x36   : > { %v1396_v59 = vsel %vm1379_vm1, %v1387_v46, %v1395_v47  ;;  %v3810_v46 = vld [vmem:[%s5241_s1 + $0x5b0] ss:$8 sps:$4 sm:$0xff]  }
  0x37   : > { %557 = vmatpush1.bf16.msra.mxu1 %v3713_v62  ;;  %v3752_v62 = vld [vmem:[%s5241_s1 + $0x514] ss:$8 sps:$4 sm:$0xff]  }
  0x38   : > { %1603 = vmatpush1.bf16.msra.mxu0 %v3714_v63  ;;  %558 = vmatprep.subr.bf16.mxu1 %v3715_v7  ;;  %v367_v63 = vor.u32 %v365_v52, %v4352_v4  ;;  %v3755_v4 = vld [vmem:[%s5241_s1 + $0x24] ss:$8 sps:$4 sm:$0xff]   ;;  %v3753_v7 = vld [vmem:[%s5241_s1 + $0x20] ss:$8 sps:$4 sm:$0xff]  }
  0x39   : > { %1604 = vmatprep.subr.bf16.mxu0 %v3717_v8  ;;  %v364_v8 = vor.u32 %v362_v3, %v348_v45  ;;  %v3807_v45 = vld [vmem:[%s5241_s1 + $0xb0] ss:$8 sps:$4 sm:$0xff]   ;;  %v3816_v52 = vld [vmem:[%s5241_s1 + $0x5c0] ss:$8 sps:$4 sm:$0xff]   ;;  %v3833_v3 = vld [vmem:[%s5241_s1 + $0xf4] ss:$8 sps:$4 sm:$0xff]  }
  0x3b   : > { %559 = vmatpush1.bf16.msra.mxu1 %v3719_v15  ;;  %v3767_v15 = vld [vmem:[%s5241_s1 + $0x44] ss:$8 sps:$4 sm:$0xff]  }
  0x3c   : > { %1605 = vmatpush1.bf16.msra.mxu0 %v3720_v20  ;;  %560 = vmatprep.subr.bf16.mxu1 %v3721_v21  ;;  %v3773_v20 = vld [vmem:[%s5241_s1 + $0x54] ss:$8 sps:$4 sm:$0xff]   ;;  %v3771_v21 = vld [vmem:[%s5241_s1 + $0x50] ss:$8 sps:$4 sm:$0xff]  }
  0x3d   : > { %1606 = vmatprep.subr.bf16.mxu0 %v3723_v26  ;;  %v3780_v26 = vld [vmem:[%s5241_s1 + $0x560] ss:$8 sps:$4 sm:$0xff]  }
  0x3f   : > { %561 = vmatpush1.bf16.msra.mxu1 %v3725_v30  ;;  %v3786_v30 = vld [vmem:[%s5241_s1 + $0x570] ss:$8 sps:$4 sm:$0xff]  }
  0x40   : > { %1607 = vmatpush1.bf16.msra.mxu0 %v3726_v31  ;;  %562 = vmatprep.subr.bf16.mxu1 %v3727_v40  ;;  %v3791_v31 = vld [vmem:[%s5241_s1 + $0x84] ss:$8 sps:$4 sm:$0xff]  }
  0x41   : > { %1608 = vmatprep.subr.bf16.mxu0 %v3729_v41  ;;  %v3806_v40 = vld [vmem:[%s5241_s1 + $0x5a4] ss:$8 sps:$4 sm:$0xff]   ;;  %v3801_v41 = vld [vmem:[%s5241_s1 + $0xa0] ss:$8 sps:$4 sm:$0xff]  }
  0x43   : > { %563 = vmatpush1.bf16.msra.mxu1 %v3731_v42  ;;  %v3804_v42 = vld [vmem:[%s5241_s1 + $0x5a0] ss:$8 sps:$4 sm:$0xff]  }
  0x44   : > { %1609 = vmatpush1.bf16.msra.mxu0 %v3732_v43  ;;  %749 = vmatprep.subr.bf16.mxu1 %v3737_v48  ;;  %v3809_v43 = vld [vmem:[%s5241_s1 + $0xb4] ss:$8 sps:$4 sm:$0xff]   ;;  %v3818_v48 = vld [vmem:[%s5241_s1 + $0x5c4] ss:$8 sps:$4 sm:$0xff]  }
  0x45   : > { %1836 = vmatprep.subr.bf16.mxu0 %v3742_v51  ;;  %v3813_v51 = vld [vmem:[%s5241_s1 + $0xc0] ss:$8 sps:$4 sm:$0xff]  }
  0x46   : > { %565 = vmatmul.mubr.bf16.vlgmr.msra.gmra.mrb[0].mxu1 %v349_v58  ;;  %v3819_v58 = vld [vmem:[%s5241_s1 + $0xd0] ss:$8 sps:$4 sm:$0xff]  }
  0x47   : > { %1611 = vmatmul.mubr.bf16.vlgmr.msra.gmra.mrb[0].mxu0 %v1396_v59  ;;  %750 = vmatpush1.bf16.msra.mxu1 %v3735_v55  ;;  %v3821_v55 = vld [vmem:[%s5241_s1 + $0xd4] ss:$8 sps:$4 sm:$0xff]   ;;  %v3822_v59 = vld [vmem:[%s5241_s1 + $0x5d0] ss:$8 sps:$4 sm:$0xff]  }
  0x48   : > { %1837 = vmatpush1.bf16.msra.mxu0 %v3740_v56  ;;  %751 = vmatprep.subr.bf16.mxu1 %v3749_v60  ;;  %v3824_v56 = vld [vmem:[%s5241_s1 + $0x5d4] ss:$8 sps:$4 sm:$0xff]   ;;  %v3827_v60 = vld [vmem:[%s5241_s1 + $0xe4] ss:$8 sps:$4 sm:$0xff]  }
  0x49   : > { %1838 = vmatprep.subr.bf16.mxu0 %v3752_v62  ;;  %1620 = vmatprep.mubr.bf16.mxu0 %v1412_v27  ;;  %v3785_v27 = vld [vmem:[%s5241_s1 + $0x74] ss:$8 sps:$4 sm:$0xff]   ;;  %v3830_v62 = vld [vmem:[%s5241_s1 + $0x5e4] ss:$8 sps:$4 sm:$0xff]  }
  0x4a   : > { %574 = vmatprep.mubr.bf16.mxu1 %v367_v63  ;;  %v3825_v63 = vld [vmem:[%s5241_s1 + $0xe0] ss:$8 sps:$4 sm:$0xff]  }
  0x4b   : > { %752 = vmatpush1.bf16.msra.mxu1 %v3747_v0  ;;  %v3828_v0 = vld [vmem:[%s5241_s1 + $0x5e0] ss:$8 sps:$4 sm:$0xff]  }
  0x4c   : > { %1839 = vmatpush1.bf16.msra.mxu0 %v3750_v5  ;;  %753 = vmatprep.subr.bf16.mxu1 %v3755_v4  ;;  %v3836_v5 = vld [vmem:[%s5241_s1 + $0x5f4] ss:$8 sps:$4 sm:$0xff]   ;;  %v3831_v4 = vld [vmem:[%s5241_s1 + $0xf0] ss:$8 sps:$4 sm:$0xff]  }
  0x4d   : > { %1840 = vmatprep.subr.bf16.mxu0 %v3758_v6  ;;  %v3834_v6 = vld [vmem:[%s5241_s1 + $0x5f0] ss:$8 sps:$4 sm:$0xff]  }
  0x4e   : > { %575 = vmatmul.mubr.bf16.gmra.mrb[4].mxu1 %v364_v8  ;;  %v3843_v8 = vld [vmem:[%s5241_s1 + $0x604] ss:$8 sps:$4 sm:$0xff]  }
  0x4f   : > { %1621 = vmatmul.mubr.bf16.gmra.mrb[4].mxu0 %v1395_v47  ;;  %754 = vmatpush1.bf16.msra.mxu1 %v3753_v7  ;;  %v3815_v47 = vld [vmem:[%s5241_s1 + $0xc4] ss:$8 sps:$4 sm:$0xff]  }
  0x50   : > { %1841 = vmatpush1.bf16.msra.mxu0 %v3756_v9  ;;  %755 = vmatprep.subr.bf16.mxu1 %v3761_v10  ;;  %v3839_v7 = vld [vmem:[%s5241_s1 + $0x204] ss:$8 sps:$4 sm:$0xff]   ;;  %v3837_v9 = vld [vmem:[%s5241_s1 + $0x200] ss:$8 sps:$4 sm:$0xff]   ;;  %v3310_v10 = vcombine.low %v4310_v49, %v4313_v50 }
  0x51   : > { %1842 = vmatprep.subr.bf16.mxu0 %v3764_v11  ;;  %781 = vmatprep.mubr.bf16.mxu1 %v4320_v53  ;;  %v3776_v53 = vld [vmem:[%s5241_s1 + $0x554] ss:$8 sps:$4 sm:$0xff]   ;;  %v3841_v11 = vld [vmem:[%s5241_s1 + $0x600] ss:$8 sps:$4 sm:$0xff]  }
  0x52   : > { %1868 = vmatprep.mubr.bf16.mxu0 %v3311_v12  ;;  %v3847_v12 = vld [vmem:[%s5241_s1 + $0x214] ss:$8 sps:$4 sm:$0xff]  }
  0x53   : > { %756 = vmatpush1.bf16.msra.mxu1 %v3759_v13  ;;  %v3850_v13 = vld [vmem:[%s5241_s1 + $0x614] ss:$8 sps:$4 sm:$0xff]  }
  0x54   : > { %1843 = vmatpush1.bf16.msra.mxu0 %v3762_v14  ;;  %757 = vmatprep.subr.bf16.mxu1 %v3767_v15  ;;  %v3045_v14 = vcombine.high %v4313_v50, %v4313_v50  ;;  %v3313_v15 = vcombine.high %v4330_v57, %v4330_v57 }
  0x55   : > { %1844 = vmatprep.subr.bf16.mxu0 %v3770_v16  ;;  %v3845_v16 = vld [vmem:[%s5241_s1 + $0x210] ss:$8 sps:$4 sm:$0xff]  }
  0x57   : > { %758 = vmatpush1.bf16.msra.mxu1 %v3765_v17  ;;  %v3848_v17 = vld [vmem:[%s5241_s1 + $0x610] ss:$8 sps:$4 sm:$0xff]  }
  0x58   : > { %1845 = vmatpush1.bf16.msra.mxu0 %v3768_v19  ;;  %759 = vmatprep.subr.bf16.mxu1 %v3773_v20  ;;  %v4637_v19 = vld [vmem:[%s4294_s26] sm:$0xee] }
  0x59   : > { %1846 = vmatprep.subr.bf16.mxu0 %v3776_v53  ;;  %v3858_v20 = vld [vmem:[%s5241_s1 + $0x624] ss:$8 sps:$4 sm:$0xff]   ;;  %v3111_v53 = vcombine.high %v4637_v19, %v4310_v49 }
  0x5b   : > { %760 = vmatpush1.bf16.msra.mxu1 %v3771_v21  ;;  %v3044_v21 = vcombine.low %v4313_v50, %v4313_v50 }
  0x5c   : > { %1847 = vmatpush1.bf16.msra.mxu0 %v3774_v22  ;;  %761 = vmatprep.subr.bf16.mxu1 %v3779_v23  ;;  %v4650_v22 = vld [vmem:[%s4294_s26 + $0x8] sm:$0xcc]  ;;  %v4653_v23 = vld [vmem:[%s4294_s26 + $0x20] sm:$0x33] }
  0x5d   : > { %1848 = vmatprep.subr.bf16.mxu0 %v3782_v24  ;;  %v3853_v24 = vld [vmem:[%s5241_s1 + $0x220] ss:$8 sps:$4 sm:$0xff]   ;;  %v4663_v49 = vcombine.high %v4650_v22, %v4313_v50  ;;  %v3864_v50 = vld [vmem:[%s5241_s1 + $0x634] ss:$8 sps:$4 sm:$0xff]  }
  0x5f   : > { %762 = vmatpush1.bf16.msra.mxu1 %v3777_v25  ;;  %v3312_v25 = vcombine.low %v4330_v57, %v4330_v57 }
  0x60   : > { %1849 = vmatpush1.bf16.msra.mxu0 %v3780_v26  ;;  %763 = vmatprep.subr.bf16.mxu1 %v3785_v27  ;;  %v843_v26 = vrot.slane %v3111_v53, 1  ;;  %v844_v27 = vrot.slane %v4323_v54, 1  ;;  %v3929_v53 = vld [vmem:[%s5241_s1 + $0x2e4] ss:$8 sps:$4 sm:$0xff]   ;;  %v3957_v54 = vld [vmem:[%s5241_s1 + $0x320] ss:$8 sps:$4 sm:$0xff]  }
  0x61   : > { %1850 = vmatprep.subr.bf16.mxu0 %v3788_v28  ;;  %v3856_v28 = vld [vmem:[%s5241_s1 + $0x620] ss:$8 sps:$4 sm:$0xff]  }
  0x63   : > { %764 = vmatpush1.bf16.msra.mxu1 %v3783_v29  ;;  %v3861_v29 = vld [vmem:[%s5241_s1 + $0x234] ss:$8 sps:$4 sm:$0xff]  }
  0x64   : > { %1851 = vmatpush1.bf16.msra.mxu0 %v3786_v30  ;;  %765 = vmatprep.subr.bf16.mxu1 %v3791_v31  ;;  %v3381_v30 = vcombine.high %v4330_v57, %v4653_v23  ;;  %v1950_v31 = vrot.slane %v4663_v49, 2  ;;  %v845_v57 = vsel %vm839_vm2, %v843_v26, %v844_v27  ;;  %v4097_v26 = vld [vmem:[%s4294_s26 + $0x8] sm:$0xff] }
  0x65   : > { %1852 = vmatprep.subr.bf16.mxu0 %v3794_v32 }
  0x66   : > { %v4677_v32 = vrot.slane %v3381_v30, 2 }
  0x67   : > { %766 = vmatpush1.bf16.msra.mxu1 %v3789_v33  ;;  %v3859_v33 = vld [vmem:[%s5241_s1 + $0x230] ss:$8 sps:$4 sm:$0xff]  }
  0x68   : > { %1853 = vmatpush1.bf16.msra.mxu0 %v3792_v34  ;;  %767 = vmatprep.subr.bf16.mxu1 %v3797_v35  ;;  %v3862_v34 = vld [vmem:[%s5241_s1 + $0x630] ss:$8 sps:$4 sm:$0xff]   ;;  %v1952_v35 = vsel %vm1946_vm3, %v1950_v31, %v4677_v32 }
  0x69   : > { %1854 = vmatprep.subr.bf16.mxu0 %v3800_v36  ;;  %v3867_v36 = vld [vmem:[%s5241_s1 + $0x244] ss:$8 sps:$4 sm:$0xff]  }
  0x6b   : > { %768 = vmatpush1.bf16.msra.mxu1 %v3795_v37  ;;  %v3870_v37 = vld [vmem:[%s5241_s1 + $0x644] ss:$8 sps:$4 sm:$0xff]  }
  0x6c   : > { %1855 = vmatpush1.bf16.msra.mxu0 %v3798_v38  ;;  %769 = vmatprep.subr.bf16.mxu1 %v3803_v39  ;;  %v3865_v38 = vld [vmem:[%s5241_s1 + $0x240] ss:$8 sps:$4 sm:$0xff]  }
  0x6d   : > { %1856 = vmatprep.subr.bf16.mxu0 %v3806_v40  ;;  %v3868_v39 = vld [vmem:[%s5241_s1 + $0x640] ss:$8 sps:$4 sm:$0xff]   ;;  %v3873_v40 = vld [vmem:[%s5241_s1 + $0x254] ss:$8 sps:$4 sm:$0xff]  }
  0x6f   : > { %770 = vmatpush1.bf16.msra.mxu1 %v3801_v41  ;;  %v3876_v41 = vld [vmem:[%s5241_s1 + $0x654] ss:$8 sps:$4 sm:$0xff]  }
  0x70   : > { %1857 = vmatpush1.bf16.msra.mxu0 %v3804_v42  ;;  %771 = vmatprep.subr.bf16.mxu1 %v3809_v43  ;;  %v3871_v42 = vld [vmem:[%s5241_s1 + $0x250] ss:$8 sps:$4 sm:$0xff]  }
  0x71   : > { %1858 = vmatprep.subr.bf16.mxu0 %v3812_v44  ;;  %v3874_v43 = vld [vmem:[%s5241_s1 + $0x650] ss:$8 sps:$4 sm:$0xff]   ;;  %v3879_v44 = vld [vmem:[%s5241_s1 + $0x264] ss:$8 sps:$4 sm:$0xff]  }
  0x73   : > { %772 = vmatpush1.bf16.msra.mxu1 %v3807_v45  ;;  %v3882_v45 = vld [vmem:[%s5241_s1 + $0x664] ss:$8 sps:$4 sm:$0xff]  }
  0x74   : > { %1859 = vmatpush1.bf16.msra.mxu0 %v3810_v46  ;;  %773 = vmatprep.subr.bf16.mxu1 %v3815_v47  ;;  %v3877_v46 = vld [vmem:[%s5241_s1 + $0x260] ss:$8 sps:$4 sm:$0xff]  }
  0x75   : > { %1860 = vmatprep.subr.bf16.mxu0 %v3818_v48  ;;  %v3880_v47 = vld [vmem:[%s5241_s1 + $0x660] ss:$8 sps:$4 sm:$0xff]   ;;  %v3885_v48 = vld [vmem:[%s5241_s1 + $0x274] ss:$8 sps:$4 sm:$0xff]  }
  0x77   : > { %774 = vmatpush1.bf16.msra.mxu1 %v3813_v51  ;;  %v3888_v51 = vld [vmem:[%s5241_s1 + $0x674] ss:$8 sps:$4 sm:$0xff]  }
  0x78   : > { %1861 = vmatpush1.bf16.msra.mxu0 %v3816_v52  ;;  %775 = vmatprep.subr.bf16.mxu1 %v3821_v55  ;;  %v3883_v52 = vld [vmem:[%s5241_s1 + $0x270] ss:$8 sps:$4 sm:$0xff]  }
  0x79   : > { %1862 = vmatprep.subr.bf16.mxu0 %v3824_v56  ;;  %v3886_v55 = vld [vmem:[%s5241_s1 + $0x670] ss:$8 sps:$4 sm:$0xff]   ;;  %v3891_v56 = vld [vmem:[%s5241_s1 + $0x284] ss:$8 sps:$4 sm:$0xff]  }
  0x7b   : > { %776 = vmatpush1.bf16.msra.mxu1 %v3819_v58  ;;  %v3894_v58 = vld [vmem:[%s5241_s1 + $0x684] ss:$8 sps:$4 sm:$0xff]  }
  0x7c   : > { %1863 = vmatpush1.bf16.msra.mxu0 %v3822_v59  ;;  %777 = vmatprep.subr.bf16.mxu1 %v3827_v60  ;;  %v3889_v59 = vld [vmem:[%s5241_s1 + $0x280] ss:$8 sps:$4 sm:$0xff]  }
  0x7d   : > { %1864 = vmatprep.subr.bf16.mxu0 %v3830_v62  ;;  %v3892_v60 = vld [vmem:[%s5241_s1 + $0x680] ss:$8 sps:$4 sm:$0xff]   ;;  %v3897_v62 = vld [vmem:[%s5241_s1 + $0x294] ss:$8 sps:$4 sm:$0xff]  }
  0x7f   : > { %778 = vmatpush1.bf16.msra.mxu1 %v3825_v63  ;;  %v3900_v63 = vld [vmem:[%s5241_s1 + $0x694] ss:$8 sps:$4 sm:$0xff]  }
  0x80   : > { %1865 = vmatpush1.bf16.msra.mxu0 %v3828_v0  ;;  %779 = vmatprep.subr.bf16.mxu1 %v3833_v3  ;;  %v3895_v0 = vld [vmem:[%s5241_s1 + $0x290] ss:$8 sps:$4 sm:$0xff]  }
  0x81   : > { %1866 = vmatprep.subr.bf16.mxu0 %v3836_v5  ;;  %v3898_v3 = vld [vmem:[%s5241_s1 + $0x690] ss:$8 sps:$4 sm:$0xff]   ;;  %v3903_v5 = vld [vmem:[%s5241_s1 + $0x2a4] ss:$8 sps:$4 sm:$0xff]  }
  0x83   : > { %780 = vmatpush1.bf16.msra.mxu1 %v3831_v4  ;;  %v3906_v4 = vld [vmem:[%s5241_s1 + $0x6a4] ss:$8 sps:$4 sm:$0xff]  }
  0x84   : > { %1867 = vmatpush1.bf16.msra.mxu0 %v3834_v6  ;;  %1010 = vmatprep.subr.bf16.mxu1 %v3839_v7  ;;  %v3901_v6 = vld [vmem:[%s5241_s1 + $0x2a0] ss:$8 sps:$4 sm:$0xff]  }
  0x85   : > { %2117 = vmatprep.subr.bf16.mxu0 %v3843_v8  ;;  %v3904_v7 = vld [vmem:[%s5241_s1 + $0x6a0] ss:$8 sps:$4 sm:$0xff]   ;;  %v3909_v8 = vld [vmem:[%s5241_s1 + $0x2b4] ss:$8 sps:$4 sm:$0xff]  }
  0x86   : > { %782 = vmatmul.mubr.bf16.vlgmr.msra.gmra.mrb[0].mxu1 %v4347_v1  ;;  %v3855_v1 = vld [vmem:[%s5241_s1 + $0x224] ss:$8 sps:$4 sm:$0xff]  }
  0x87   : > { %1869 = vmatmul.mubr.bf16.vlgmr.msra.gmra.mrb[0].mxu0 %v3310_v10  ;;  %1011 = vmatpush1.bf16.msra.mxu1 %v3837_v9  ;;  %v3912_v9 = vld [vmem:[%s5241_s1 + $0x6b4] ss:$8 sps:$4 sm:$0xff]   ;;  %v3907_v10 = vld [vmem:[%s5241_s1 + $0x2b0] ss:$8 sps:$4 sm:$0xff]  }
  0x88   : > { %2118 = vmatpush1.bf16.msra.mxu0 %v3841_v11  ;;  %1012 = vmatprep.subr.bf16.mxu1 %v3847_v12  ;;  %v3910_v11 = vld [vmem:[%s5241_s1 + $0x6b0] ss:$8 sps:$4 sm:$0xff]   ;;  %v3915_v12 = vld [vmem:[%s5241_s1 + $0x2c4] ss:$8 sps:$4 sm:$0xff]  }
  0x89   : > { %2119 = vmatprep.subr.bf16.mxu0 %v3850_v13  ;;  %791 = vmatprep.mubr.bf16.mxu1 %v3045_v14  ;;  %v3918_v13 = vld [vmem:[%s5241_s1 + $0x6c4] ss:$8 sps:$4 sm:$0xff]   ;;  %v3913_v14 = vld [vmem:[%s5241_s1 + $0x2c0] ss:$8 sps:$4 sm:$0xff]  }
  0x8a   : > { %1878 = vmatprep.mubr.bf16.mxu0 %v3313_v15  ;;  %v3916_v15 = vld [vmem:[%s5241_s1 + $0x6c0] ss:$8 sps:$4 sm:$0xff]  }
  0x8b   : > { %1013 = vmatpush1.bf16.msra.mxu1 %v3845_v16  ;;  %v3921_v16 = vld [vmem:[%s5241_s1 + $0x2d4] ss:$8 sps:$4 sm:$0xff]  }
  0x8c   : > { %2120 = vmatpush1.bf16.msra.mxu0 %v3848_v17  ;;  %1014 = vmatprep.subr.bf16.mxu1 %v3855_v1  ;;  %v3924_v17 = vld [vmem:[%s5241_s1 + $0x6d4] ss:$8 sps:$4 sm:$0xff]   ;;  %v3919_v1 = vld [vmem:[%s5241_s1 + $0x2d0] ss:$8 sps:$4 sm:$0xff]  }
  0x8d   : > { %2121 = vmatprep.subr.bf16.mxu0 %v3858_v20  ;;  %v3922_v20 = vld [vmem:[%s5241_s1 + $0x6d0] ss:$8 sps:$4 sm:$0xff]  }
  0x8e   : > { %792 = vmatmul.mubr.bf16.gmra.mrb[8].mxu1 %v3044_v21  ;;  %v3932_v21 = vld [vmem:[%s5241_s1 + $0x6e4] ss:$8 sps:$4 sm:$0xff]  }
  0x8f   : > { %1879 = vmatmul.mubr.bf16.gmra.mrb[8].mxu0 %v3312_v25  ;;  %1015 = vmatpush1.bf16.msra.mxu1 %v3853_v24  ;;  %v3927_v24 = vld [vmem:[%s5241_s1 + $0x2e0] ss:$8 sps:$4 sm:$0xff]  }
  0x90   : > { %2122 = vmatpush1.bf16.msra.mxu0 %v3856_v28  ;;  %1016 = vmatprep.subr.bf16.mxu1 %v3861_v29  ;;  %v3930_v25 = vld [vmem:[%s5241_s1 + $0x6e0] ss:$8 sps:$4 sm:$0xff]   ;;  %v3110_v28 = vcombine.low %v4637_v19, %v4097_v26  ;;  %v4825_v29 = vld [vmem:[%s4294_s26 + $0x10] sm:$0xff] }
  0x91   : > { %2123 = vmatprep.subr.bf16.mxu0 %v3864_v50  ;;  %1042 = vmatprep.mubr.bf16.mxu1 %v845_v57  ;;  %v4829_v30 = vcombine.low %v4650_v22, %v4825_v29  ;;  %v4099_v50 = vld [vmem:[%s4294_s26 + $0x18] sm:$0xff]  ;;  %v841_v22 = vrot.slane %v4368_v18, 1  ;;  %v3972_v26 = vld [vmem:[%s5241_s1 + $0x740] ss:$8 sps:$4 sm:$0xff]  }
  0x92   : > { %2149 = vmatprep.mubr.bf16.mxu0 %v1952_v35  ;;  %v3380_v31 = vcombine.low %v4099_v50, %v4653_v23  ;;  %v3935_v57 = vld [vmem:[%s5241_s1 + $0x2f4] ss:$8 sps:$4 sm:$0xff]   ;;  %v3936_v23 = vld [vmem:[%s5241_s1 + $0x6f0] ss:$8 sps:$4 sm:$0xff]  }
  0x93   : > { %1017 = vmatpush1.bf16.msra.mxu1 %v3859_v33  ;;  %v2174_v33 = vld [vmem:[%s4294_s26 + $0x20] sm:$0x77]  ;;  %v3938_v19 = vld [vmem:[%s5241_s1 + $0x6f4] ss:$8 sps:$4 sm:$0xff]  }
  0x94   : > { %2124 = vmatpush1.bf16.msra.mxu0 %v3862_v34  ;;  %1018 = vmatprep.subr.bf16.mxu1 %v3867_v36  ;;  %v3933_v34 = vld [vmem:[%s5241_s1 + $0x2f0] ss:$8 sps:$4 sm:$0xff]   ;;  %v4844_v35 = vcombine.high %v4099_v50, %v2174_v33  ;;  %v840_v36 = vrot.slane %v3110_v28, 1  ;;  %v3977_v28 = vld [vmem:[%s5241_s1 + $0x354] ss:$8 sps:$4 sm:$0xff]  }
  0x95   : > { %2125 = vmatprep.subr.bf16.mxu0 %v3870_v37  ;;  %v1948_v37 = vrot.slane %v3380_v31, 2  ;;  %v3975_v31 = vld [vmem:[%s5241_s1 + $0x350] ss:$8 sps:$4 sm:$0xff]  }
  0x97   : > { %1019 = vmatpush1.bf16.msra.mxu1 %v3865_v38  ;;  %v1947_v38 = vrot.slane %v4829_v30, 2 }
  0x98   : > { %2126 = vmatpush1.bf16.msra.mxu0 %v3868_v39  ;;  %1020 = vmatprep.subr.bf16.mxu1 %v3873_v40  ;;  %v3943_v39 = vld [vmem:[%s5241_s1 + $0x304] ss:$8 sps:$4 sm:$0xff]  }
  0x99   : > { %2127 = vmatprep.subr.bf16.mxu0 %v3876_v41  ;;  %v3950_v40 = vld [vmem:[%s5241_s1 + $0x704] ss:$8 sps:$4 sm:$0xff]   ;;  %v3941_v41 = vld [vmem:[%s5241_s1 + $0x300] ss:$8 sps:$4 sm:$0xff]  }
  0x9b   : > { %1021 = vmatpush1.bf16.msra.mxu1 %v3871_v42  ;;  %v2232_v42 = vshrl.u32 %v4663_v49, 16 }
  0x9c   : > { %2128 = vmatpush1.bf16.msra.mxu0 %v3874_v43  ;;  %1022 = vmatprep.subr.bf16.mxu1 %v3879_v44  ;;  %v2235_v43 = vshll.u32 %v4663_v49, 16  ;;  %v2240_v44 = vshrl.u32 %v4844_v35, 16  ;;  %v3953_v49 = vld [vmem:[%s5241_s1 + $0x314] ss:$8 sps:$4 sm:$0xff]  }
  0x9d   : > { %2129 = vmatprep.subr.bf16.mxu0 %v3882_v45  ;;  %v2243_v45 = vshll.u32 %v4844_v35, 16 }
  0x9f   : > { %1023 = vmatpush1.bf16.msra.mxu1 %v3877_v46  ;;  %v842_v46 = vsel %vm839_vm2, %v840_v36, %v841_v22  ;;  %v3992_v36 = vld [vmem:[%s5241_s1 + $0x774] ss:$8 sps:$4 sm:$0xff]  }
  0xa0   : > { %2130 = vmatpush1.bf16.msra.mxu0 %v3880_v47  ;;  %1024 = vmatprep.subr.bf16.mxu1 %v3885_v48  ;;  %v3948_v47 = vld [vmem:[%s5241_s1 + $0x700] ss:$8 sps:$4 sm:$0xff]   ;;  %v1949_v48 = vsel %vm1946_vm3, %v1947_v38, %v1948_v37  ;;  %v3990_v38 = vld [vmem:[%s5241_s1 + $0x770] ss:$8 sps:$4 sm:$0xff]  }
  0xa1   : > { %2131 = vmatprep.subr.bf16.mxu0 %v3888_v51  ;;  %v4871_v51 = vld [vmem:[%s4294_s26 + $0x18] sm:$0x77] }
  0xa3   : > { %1025 = vmatpush1.bf16.msra.mxu1 %v3883_v52  ;;  %v3956_v52 = vld [vmem:[%s5241_s1 + $0x714] ss:$8 sps:$4 sm:$0xff]  }
  0xa4   : > { %2132 = vmatpush1.bf16.msra.mxu0 %v3886_v55  ;;  %1026 = vmatprep.subr.bf16.mxu1 %v3891_v56  ;;  %v2234_v55 = vrot.slane %v2232_v42, 2  ;;  %v3179_v56 = vcombine.high %v4825_v29, %v4871_v51  ;;  %v3996_v42 = vld [vmem:[%s5241_s1 + $0x780] ss:$8 sps:$4 sm:$0xff]  }
  0xa5   : > { %2133 = vmatprep.subr.bf16.mxu0 %v3894_v58  ;;  %v2237_v58 = vrot.slane %v2235_v43, 3  ;;  %v4001_v43 = vld [vmem:[%s5241_s1 + $0x394] ss:$8 sps:$4 sm:$0xff]  }
  0xa7   : > { %1027 = vmatpush1.bf16.msra.mxu1 %v3889_v59  ;;  %v2242_v59 = vrot.slane %v2240_v44, 2  ;;  %v4004_v44 = vld [vmem:[%s5241_s1 + $0x794] ss:$8 sps:$4 sm:$0xff]  }
  0xa8   : > { %2134 = vmatpush1.bf16.msra.mxu0 %v3892_v60  ;;  %1028 = vmatprep.subr.bf16.mxu1 %v3897_v62  ;;  %v2245_v60 = vrot.slane %v2243_v45, 3  ;;  %v3951_v62 = vld [vmem:[%s5241_s1 + $0x310] ss:$8 sps:$4 sm:$0xff]   ;;  %v2753_v45 = vld [vmem:[%s5245_s5] sm:$0xff] }
  0xa9   : > { %2135 = vmatprep.subr.bf16.mxu0 %v3900_v63  ;;  %v3954_v63 = vld [vmem:[%s5241_s1 + $0x710] ss:$8 sps:$4 sm:$0xff]  }
  0xab   : > { %1029 = vmatpush1.bf16.msra.mxu1 %v3895_v0  ;;  %v3959_v0 = vld [vmem:[%s5241_s1 + $0x324] ss:$8 sps:$4 sm:$0xff]  }
  0xac   : > { %2136 = vmatpush1.bf16.msra.mxu0 %v3898_v3  ;;  %1030 = vmatprep.subr.bf16.mxu1 %v3903_v5  ;;  %v3962_v3 = vld [vmem:[%s5241_s1 + $0x724] ss:$8 sps:$4 sm:$0xff]   ;;  %v1116_v5 = vrot.slane %v4336_v61, 3 }
  0xad   : > { %2137 = vmatprep.subr.bf16.mxu0 %v3906_v4  ;;  %v4897_v4 = vcombine.low %v4099_v50, %v2174_v33  ;;  %v3980_v50 = vld [vmem:[%s5241_s1 + $0x754] ss:$8 sps:$4 sm:$0xff]   ;;  %v3978_v33 = vld [vmem:[%s5241_s1 + $0x750] ss:$8 sps:$4 sm:$0xff]  }
  0xaf   : > { %1031 = vmatpush1.bf16.msra.mxu1 %v3901_v6  ;;  %v4899_v6 = vrot.slane %v3179_v56, 3  ;;  %v4010_v56 = vld [vmem:[%s5241_s1 + $0x7a4] ss:$8 sps:$4 sm:$0xff]  }
  0xb0   : > { %2138 = vmatpush1.bf16.msra.mxu0 %v3904_v7  ;;  %1032 = vmatprep.subr.bf16.mxu1 %v3909_v8  ;;  %v2238_v7 = vor.u32 %v2237_v58, %v2234_v55  ;;  %v4901_v8 = vor.u32 %v2245_v60, %v2242_v59  ;;  %v4007_v55 = vld [vmem:[%s5241_s1 + $0x3a4] ss:$8 sps:$4 sm:$0xff]   ;;  %v4005_v58 = vld [vmem:[%s5241_s1 + $0x3a0] ss:$8 sps:$4 sm:$0xff]   ;;  %v4013_v60 = vld [vmem:[%s5241_s1 + $0x3b4] ss:$8 sps:$4 sm:$0xff]  }
  0xb1   : > { %2139 = vmatprep.subr.bf16.mxu0 %v3912_v9  ;;  %v2469_v9 = vld [vmem:[%s4294_s26 + $0x8] sm:$0x88] }
  0xb2   : > { %v3512_v61 = vcombine.low %v2469_v9, %v4825_v29  ;;  %v4008_v59 = vld [vmem:[%s5241_s1 + $0x7a0] ss:$8 sps:$4 sm:$0xff]  }
  0xb3   : > { %1033 = vmatpush1.bf16.msra.mxu1 %v3907_v10  ;;  %v2512_v10 = vrot.slane %v4844_v35, 3  ;;  %v4065_v35 = vld [vmem:[%s5241_s1 + $0x864] ss:$8 sps:$4 sm:$0xff]  }
  0xb4   : > { %2140 = vmatpush1.bf16.msra.mxu0 %v3910_v11  ;;  %1034 = vmatprep.subr.bf16.mxu1 %v3915_v12  ;;  %v2509_v11 = vrot.slane %v4897_v4, 3  ;;  %v3965_v12 = vld [vmem:[%s5241_s1 + $0x334] ss:$8 sps:$4 sm:$0xff]  }
  0xb5   : > { %2141 = vmatprep.subr.bf16.mxu0 %v3918_v13  ;;  %v3968_v13 = vld [vmem:[%s5241_s1 + $0x734] ss:$8 sps:$4 sm:$0xff]  }
  0xb7   : > { %1035 = vmatpush1.bf16.msra.mxu1 %v3913_v14  ;;  %v2508_v14 = vrot.slane %v3512_v61, 3  ;;  %v2215_v61 = vshrl.u32 %v4829_v30, 16 }
  0xb8   : > { %2142 = vmatpush1.bf16.msra.mxu0 %v3916_v15  ;;  %1036 = vmatprep.subr.bf16.mxu1 %v3921_v16  ;;  %v1118_v16 = vsel %vm1112_vm4, %v1116_v5, %v4899_v6  ;;  %v4022_v5 = vld [vmem:[%s5241_s1 + $0x7c4] ss:$8 sps:$4 sm:$0xff]  }
  0xb9   : > { %2143 = vmatprep.subr.bf16.mxu0 %v3924_v17  ;;  %v2247_v17 = vsel %vm2213_vm5, %v2238_v7, %v4901_v8  ;;  %v4017_v7 = vld [vmem:[%s5241_s1 + $0x3c0] ss:$8 sps:$4 sm:$0xff]  }
  0xbb   : > { %1037 = vmatpush1.bf16.msra.mxu1 %v3919_v1  ;;  %v3963_v1 = vld [vmem:[%s5241_s1 + $0x330] ss:$8 sps:$4 sm:$0xff]  }
  0xbc   : > { %2144 = vmatpush1.bf16.msra.mxu0 %v3922_v20  ;;  %1038 = vmatprep.subr.bf16.mxu1 %v3929_v53  ;;  %v3966_v20 = vld [vmem:[%s5241_s1 + $0x730] ss:$8 sps:$4 sm:$0xff]   ;;  %v4940_v53 = vsel %vm1112_vm4, %v2508_v14, %v2509_v11  ;;  %v2223_v14 = vshrl.u32 %v4897_v4, 16 }
  0xbd   : > { %2145 = vmatprep.subr.bf16.mxu0 %v3932_v21  ;;  %v3971_v21 = vld [vmem:[%s5241_s1 + $0x344] ss:$8 sps:$4 sm:$0xff]  }
  0xbf   : > { %1039 = vmatpush1.bf16.msra.mxu1 %v3927_v24  ;;  %v3974_v24 = vld [vmem:[%s5241_s1 + $0x744] ss:$8 sps:$4 sm:$0xff]  }
  0xc0   : > { %2146 = vmatpush1.bf16.msra.mxu0 %v3930_v25  ;;  %1040 = vmatprep.subr.bf16.mxu1 %v3935_v57  ;;  %v3969_v25 = vld [vmem:[%s5241_s1 + $0x340] ss:$8 sps:$4 sm:$0xff]   ;;  %v3983_v57 = vld [vmem:[%s5241_s1 + $0x364] ss:$8 sps:$4 sm:$0xff]  }
  0xc1   : > { %2147 = vmatprep.subr.bf16.mxu0 %v3938_v19  ;;  %v3986_v19 = vld [vmem:[%s5241_s1 + $0x764] ss:$8 sps:$4 sm:$0xff]  }
  0xc3   : > { %1041 = vmatpush1.bf16.msra.mxu1 %v3933_v34  ;;  %v3981_v34 = vld [vmem:[%s5241_s1 + $0x360] ss:$8 sps:$4 sm:$0xff]  }
  0xc4   : > { %2148 = vmatpush1.bf16.msra.mxu0 %v3936_v23  ;;  %1283 = vmatprep.subr.bf16.mxu1 %v3943_v39  ;;  %v3989_v23 = vld [vmem:[%s5241_s1 + $0x374] ss:$8 sps:$4 sm:$0xff]   ;;  %v3995_v39 = vld [vmem:[%s5241_s1 + $0x384] ss:$8 sps:$4 sm:$0xff]  }
  0xc5   : > { %2412 = vmatprep.subr.bf16.mxu0 %v3950_v40  ;;  %v3998_v40 = vld [vmem:[%s5241_s1 + $0x784] ss:$8 sps:$4 sm:$0xff]  }
  0xc6   : > { %1043 = vmatmul.mubr.bf16.vlgmr.msra.gmra.mrb[0].mxu1 %v842_v46  ;;  %v2755_v46 = vld [vmem:[%s5245_s5 + $0x10] sm:$0xff] }
  0xc7   : > { %2150 = vmatmul.mubr.bf16.vlgmr.msra.gmra.mrb[0].mxu0 %v1949_v48  ;;  %1284 = vmatpush1.bf16.msra.mxu1 %v3941_v41  ;;  %v3993_v41 = vld [vmem:[%s5241_s1 + $0x380] ss:$8 sps:$4 sm:$0xff]   ;;  %v3999_v48 = vld [vmem:[%s5241_s1 + $0x390] ss:$8 sps:$4 sm:$0xff]  }
  0xc8   : > { %2413 = vmatpush1.bf16.msra.mxu0 %v3948_v47  ;;  %1285 = vmatprep.subr.bf16.mxu1 %v3953_v49  ;;  %v4108_v47 = vmov 0   ;;  %v4002_v49 = vld [vmem:[%s5241_s1 + $0x790] ss:$8 sps:$4 sm:$0xff]  }
  0xc9   : > { %2414 = vmatprep.subr.bf16.mxu0 %v3956_v52  ;;  %1052 = vmatprep.mubr.bf16.mxu1 %v844_v27  ;;  %v3960_v27 = vld [vmem:[%s5241_s1 + $0x720] ss:$8 sps:$4 sm:$0xff]  }
  0xca   : > { %2159 = vmatprep.mubr.bf16.mxu0 %v4677_v32  ;;  %v3513_v32 = vcombine.high %v2469_v9, %v4825_v29  ;;  %3635 = vset.pattern.permute.xlu0 %v4108_v47  ;;  %v2754_v52 = vld [vmem:[%s5245_s5 + $0x8] sm:$0xff] }
  0xcb   : > { %1286 = vmatpush1.bf16.msra.mxu1 %v3951_v62  ;;  %3636 = vset.pattern.permute.xlu1 %v4108_v47  ;;  %v4016_v62 = vld [vmem:[%s5241_s1 + $0x7b4] ss:$8 sps:$4 sm:$0xff]   ;;  %v4020_v9 = vld [vmem:[%s5241_s1 + $0x7c0] ss:$8 sps:$4 sm:$0xff]  }
  0xcc   : > { %2415 = vmatpush1.bf16.msra.mxu0 %v3954_v63  ;;  %1287 = vmatprep.subr.bf16.mxu1 %v3959_v0  ;;  %v2511_v15 = vrot.slane %v3513_v32, 3  ;;  %v4011_v63 = vld [vmem:[%s5241_s1 + $0x3b0] ss:$8 sps:$4 sm:$0xff]   ;;  %v2218_v32 = vshll.u32 %v4829_v30, 16  ;;  %v4031_v30 = vld [vmem:[%s5241_s1 + $0x3e4] ss:$8 sps:$4 sm:$0xff]  }
  0xcd   : > { %2416 = vmatprep.subr.bf16.mxu0 %v3962_v3  ;;  %2758 = vperm.xlu0 %3635, %v2753_v45   ;;  %v4014_v0 = vld [vmem:[%s5241_s1 + $0x7b0] ss:$8 sps:$4 sm:$0xff]   ;;  %v4019_v3 = vld [vmem:[%s5241_s1 + $0x3c4] ss:$8 sps:$4 sm:$0xff]  }
  0xce   : > { %1053 = vmatmul.mubr.bf16.gmra.mrb[12].mxu1 %v841_v22  ;;  %v4935_v18 = vsel %vm1112_vm4, %v2511_v15, %v2512_v10  ;;  %v3984_v22 = vld [vmem:[%s5241_s1 + $0x760] ss:$8 sps:$4 sm:$0xff]   ;;  %2768 = vperm.xlu1 %3636, %v2755_v46   ;;  %v2226_v15 = vshll.u32 %v4897_v4, 16  ;;  %v4071_v45 = vld [vmem:[%s5241_s1 + $0x884] ss:$8 sps:$4 sm:$0xff]  }
  0xcf   : > { %2160 = vmatmul.mubr.bf16.gmra.mrb[12].mxu0 %v1948_v37  ;;  %1288 = vmatpush1.bf16.msra.mxu1 %v3957_v54  ;;  %v3987_v37 = vld [vmem:[%s5241_s1 + $0x370] ss:$8 sps:$4 sm:$0xff]   ;;  %v4025_v54 = vld [vmem:[%s5241_s1 + $0x3d4] ss:$8 sps:$4 sm:$0xff]  }
  0xd0   : > { %2417 = vmatpush1.bf16.msra.mxu0 %v3960_v27  ;;  %1289 = vmatprep.subr.bf16.mxu1 %v3965_v12  ;;  %v4028_v27 = vld [vmem:[%s5241_s1 + $0x7d4] ss:$8 sps:$4 sm:$0xff]   ;;  %v4023_v12 = vld [vmem:[%s5241_s1 + $0x3d0] ss:$8 sps:$4 sm:$0xff]  }
  0xd1   : > { %2418 = vmatprep.subr.bf16.mxu0 %v3968_v13  ;;  %1315 = vmatprep.mubr.bf16.mxu1 %v1118_v16  ;;  %v4026_v13 = vld [vmem:[%s5241_s1 + $0x7d0] ss:$8 sps:$4 sm:$0xff]   ;;  %v4034_v16 = vld [vmem:[%s5241_s1 + $0x7e4] ss:$8 sps:$4 sm:$0xff]  }
  0xd2   : > { %2444 = vmatprep.mubr.bf16.mxu0 %v2247_v17  ;;  %2763 = vperm.xlu0 %3635, %v2754_v52   ;;  %v2217_v17 = vrot.slane %v2215_v61, 2  ;;  %v4069_v52 = vld [vmem:[%s5241_s1 + $0x880] ss:$8 sps:$4 sm:$0xff]   ;;  %v4089_v61 = vld [vmem:[%s5241_s1 + $0x8e4] ss:$8 sps:$4 sm:$0xff]  }
  0xd3   : > { %1290 = vmatpush1.bf16.msra.mxu1 %v3963_v1  ;;  %v2220_v1 = vrot.slane %v2218_v32, 3  ;;  %v4087_v32 = vld [vmem:[%s5241_s1 + $0x8e0] ss:$8 sps:$4 sm:$0xff]  }
  0xd4   : > { %2419 = vmatpush1.bf16.msra.mxu0 %v3966_v20  ;;  %1291 = vmatprep.subr.bf16.mxu1 %v3971_v21  ;;  %v4029_v20 = vld [vmem:[%s5241_s1 + $0x3e0] ss:$8 sps:$4 sm:$0xff]  }
  0xd5   : > { %2420 = vmatprep.subr.bf16.mxu0 %v3974_v24  ;;  %v4032_v21 = vld [vmem:[%s5241_s1 + $0x7e0] ss:$8 sps:$4 sm:$0xff]   ;;  %v3178_v24 = vcombine.low %v4825_v29, %v4871_v51  ;;  %v4038_v29 = vld [vmem:[%s5241_s1 + $0x7f0] ss:$8 sps:$4 sm:$0xff]  }
  0xd7   : > { %1292 = vmatpush1.bf16.msra.mxu1 %v3969_v25  ;;  %v2225_v25 = vrot.slane %v2223_v14, 2  ;;  %v1114_v51 = vrot.slane %v3178_v24, 3 }
  0xd8   : > { %2421 = vmatpush1.bf16.msra.mxu0 %v3972_v26  ;;  %1293 = vmatprep.subr.bf16.mxu1 %v3977_v28  ;;  %v2228_v26 = vrot.slane %v2226_v15, 3  ;;  %v4037_v28 = vld [vmem:[%s5241_s1 + $0x3f4] ss:$8 sps:$4 sm:$0xff]  }
  0xd9   : > { %2422 = vmatprep.subr.bf16.mxu0 %v3980_v50  ;;  %v4040_v50 = vld [vmem:[%s5241_s1 + $0x7f4] ss:$8 sps:$4 sm:$0xff]  }
  0xdb   : > { %1294 = vmatpush1.bf16.msra.mxu1 %v3975_v31  ;;  %v4035_v31 = vld [vmem:[%s5241_s1 + $0x3f0] ss:$8 sps:$4 sm:$0xff]  }
  0xdc   : > { %2423 = vmatpush1.bf16.msra.mxu0 %v3978_v33  ;;  %1295 = vmatprep.subr.bf16.mxu1 %v3983_v57  ;;  %v1113_v33 = vrot.slane %v4350_v2, 3  ;;  %v2221_v57 = vor.u32 %v2220_v1, %v2217_v17  ;;  %v4050_v2 = vld [vmem:[%s5241_s1 + $0x814] ss:$8 sps:$4 sm:$0xff]  }
  0xdd   : > { %2424 = vmatprep.subr.bf16.mxu0 %v3986_v19  ;;  %v2229_v19 = vor.u32 %v2228_v26, %v2225_v25 }
  0xdf   : > { %1296 = vmatpush1.bf16.msra.mxu1 %v3981_v34  ;;  %v4047_v34 = vld [vmem:[%s5241_s1 + $0x804] ss:$8 sps:$4 sm:$0xff]  }
  0xe0   : > { %2425 = vmatpush1.bf16.msra.mxu0 %v3984_v22  ;;  %1297 = vmatprep.subr.bf16.mxu1 %v3989_v23  ;;  %v1115_v22 = vsel %vm1112_vm4, %v1113_v33, %v1114_v51  ;;  %v4045_v23 = vld [vmem:[%s5241_s1 + $0x800] ss:$8 sps:$4 sm:$0xff]  }
  0xe1   : > { %2426 = vmatprep.subr.bf16.mxu0 %v3992_v36  ;;  %v2230_v36 = vsel %vm2213_vm5, %v2221_v57, %v2229_v19 }
  0xe3   : > { %1298 = vmatpush1.bf16.msra.mxu1 %v3987_v37  ;;  %v4048_v37 = vld [vmem:[%s5241_s1 + $0x810] ss:$8 sps:$4 sm:$0xff]  }
  0xe4   : > { %2427 = vmatpush1.bf16.msra.mxu0 %v3990_v38  ;;  %1299 = vmatprep.subr.bf16.mxu1 %v3995_v39  ;;  %v4053_v38 = vld [vmem:[%s5241_s1 + $0x824] ss:$8 sps:$4 sm:$0xff]   ;;  %v4051_v39 = vld [vmem:[%s5241_s1 + $0x820] ss:$8 sps:$4 sm:$0xff]  }
  0xe5   : > { %2428 = vmatprep.subr.bf16.mxu0 %v3998_v40  ;;  %v4056_v40 = vld [vmem:[%s5241_s1 + $0x834] ss:$8 sps:$4 sm:$0xff]  }
  0xe7   : > { %1300 = vmatpush1.bf16.msra.mxu1 %v3993_v41  ;;  %v4057_v41 = vld [vmem:[%s5241_s1 + $0x840] ss:$8 sps:$4 sm:$0xff]  }
  0xe8   : > { %2429 = vmatpush1.bf16.msra.mxu0 %v3996_v42  ;;  %1301 = vmatprep.subr.bf16.mxu1 %v4001_v43  ;;  %v4062_v42 = vld [vmem:[%s5241_s1 + $0x854] ss:$8 sps:$4 sm:$0xff]  }
  0xe9   : > { %2430 = vmatprep.subr.bf16.mxu0 %v4004_v44  ;;  %v4068_v43 = vld [vmem:[%s5241_s1 + $0x874] ss:$8 sps:$4 sm:$0xff]   ;;  %v4066_v44 = vld [vmem:[%s5241_s1 + $0x870] ss:$8 sps:$4 sm:$0xff]  }
  0xeb   : > { %1302 = vmatpush1.bf16.msra.mxu1 %v3999_v48 }
  0xec   : > { %2431 = vmatpush1.bf16.msra.mxu0 %v4002_v49  ;;  %1303 = vmatprep.subr.bf16.mxu1 %v4007_v55 }
  0xed   : > { %2432 = vmatprep.subr.bf16.mxu0 %v4010_v56 }
  0xef   : > { %1304 = vmatpush1.bf16.msra.mxu1 %v4005_v58  ;;  %v4074_v58 = vld [vmem:[%s5241_s1 + $0x894] ss:$8 sps:$4 sm:$0xff]  }
  0xf0   : > { %2433 = vmatpush1.bf16.msra.mxu0 %v4008_v59  ;;  %1305 = vmatprep.subr.bf16.mxu1 %v4013_v60 }
  0xf1   : > { %2434 = vmatprep.subr.bf16.mxu0 %v4016_v62  ;;  %v4072_v62 = vld [vmem:[%s5241_s1 + $0x890] ss:$8 sps:$4 sm:$0xff]  }
  0xf3   : > { %1306 = vmatpush1.bf16.msra.mxu1 %v4011_v63  ;;  %v4077_v63 = vld [vmem:[%s5241_s1 + $0x8a4] ss:$8 sps:$4 sm:$0xff]  }
  0xf4   : > { %2435 = vmatpush1.bf16.msra.mxu0 %v4014_v0  ;;  %1307 = vmatprep.subr.bf16.mxu1 %v4019_v3  ;;  %v4075_v0 = vld [vmem:[%s5241_s1 + $0x8a0] ss:$8 sps:$4 sm:$0xff]   ;;  %v4080_v3 = vld [vmem:[%s5241_s1 + $0x8b4] ss:$8 sps:$4 sm:$0xff]  }
  0xf5   : > { %2436 = vmatprep.subr.bf16.mxu0 %v4022_v5  ;;  %v4078_v5 = vld [vmem:[%s5241_s1 + $0x8b0] ss:$8 sps:$4 sm:$0xff]  }
  0xf7   : > { %1308 = vmatpush1.bf16.msra.mxu1 %v4017_v7  ;;  %v4083_v7 = vld [vmem:[%s5241_s1 + $0x8c4] ss:$8 sps:$4 sm:$0xff]  }
  0xf8   : > { %2437 = vmatpush1.bf16.msra.mxu0 %v4020_v9  ;;  %1309 = vmatprep.subr.bf16.mxu1 %v4025_v54  ;;  %v4081_v9 = vld [vmem:[%s5241_s1 + $0x8c0] ss:$8 sps:$4 sm:$0xff]   ;;  %v4086_v54 = vld [vmem:[%s5241_s1 + $0x8d4] ss:$8 sps:$4 sm:$0xff]  }
  0xf9   : > { %2438 = vmatprep.subr.bf16.mxu0 %v4028_v27  ;;  %v4084_v27 = vld [vmem:[%s5241_s1 + $0x8d0] ss:$8 sps:$4 sm:$0xff]  }
  0xfb   : > { %1310 = vmatpush1.bf16.msra.mxu1 %v4023_v12  ;;  %v4092_v12 = vld [vmem:[%s5241_s1 + $0x8f4] ss:$8 sps:$4 sm:$0xff]  }
  0xfc   : > { %2439 = vmatpush1.bf16.msra.mxu0 %v4026_v13  ;;  %1311 = vmatprep.subr.bf16.mxu1 %v4031_v30  ;;  %v4090_v13 = vld [vmem:[%s5241_s1 + $0x8f0] ss:$8 sps:$4 sm:$0xff]  }
  0xfd   : > { %2440 = vmatprep.subr.bf16.mxu0 %v4034_v16 }
  0xff   : > { %1312 = vmatpush1.bf16.msra.mxu1 %v4029_v20 }
 0x100   : > { %2441 = vmatpush1.bf16.msra.mxu0 %v4032_v21  ;;  %1313 = vmatprep.subr.bf16.mxu1 %v4037_v28 }
 0x101   : > { %2442 = vmatprep.subr.bf16.mxu0 %v4040_v50 }
 0x103   : > { %1314 = vmatpush1.bf16.msra.mxu1 %v4035_v31 }
 0x104   : > { %2443 = vmatpush1.bf16.msra.mxu0 %v4038_v29  ;;  %3554 = vmatprep.subr.bf16.mxu1 %v4047_v34 }
 0x105   : > { %2678 = vmatprep.subr.bf16.mxu0 %v4047_v34 }
 0x106   : > { %1316 = vmatmul.mubr.bf16.vlgmr.msra.gmra.mrb[0].mxu1 %v1115_v22 }
 0x107   : > { %2445 = vmatmul.mubr.bf16.vlgmr.msra.gmra.mrb[0].mxu0 %v2230_v36  ;;  %3570 = vmatpush1.bf16.msra.mxu1 %v4045_v23 }
 0x108   : > { %2679 = vmatpush1.bf16.msra.mxu0 %v4045_v23  ;;  %3555 = vmatprep.subr.bf16.mxu1 %v4050_v2 }
 0x109   : > { %2680 = vmatprep.subr.bf16.mxu0 %v4050_v2  ;;  %1325 = vmatprep.mubr.bf16.mxu1 %v4899_v6  ;;  %v4054_v6 = vld [vmem:[%s5241_s1 + $0x830] ss:$8 sps:$4 sm:$0xff]  }
 0x10a   : > { %2454 = vmatprep.mubr.bf16.mxu0 %v4901_v8  ;;  %v4059_v8 = vld [vmem:[%s5241_s1 + $0x844] ss:$8 sps:$4 sm:$0xff]  }
 0x10b   : > { %3571 = vmatpush1.bf16.msra.mxu1 %v4048_v37 }
 0x10c   : > { %2681 = vmatpush1.bf16.msra.mxu0 %v4048_v37  ;;  %3556 = vmatprep.subr.bf16.mxu1 %v4053_v38 }
 0x10d   : > { %2682 = vmatprep.subr.bf16.mxu0 %v4053_v38 }
 0x10e   : > { %1326 = vmatmul.mubr.bf16.gmra.mrb[16].mxu1 %v1114_v51 }
 0x10f   : > { %2455 = vmatmul.mubr.bf16.gmra.mrb[16].mxu0 %v2229_v19  ;;  %3572 = vmatpush1.bf16.msra.mxu1 %v4051_v39 }
 0x110   : > { %2683 = vmatpush1.bf16.msra.mxu0 %v4051_v39  ;;  %3557 = vmatprep.subr.bf16.mxu1 %v4056_v40 }
 0x111   : > { %2684 = vmatprep.subr.bf16.mxu0 %v4056_v40  ;;  %2710 = vmatprep.mubr.bf16.mxu0 %v4935_v18  ;;  %v4060_v18 = vld [vmem:[%s5241_s1 + $0x850] ss:$8 sps:$4 sm:$0xff]  }
 0x112   : > { %2720 = vmatprep.mubr.bf16.mxu1 %v2512_v10  ;;  %v4063_v10 = vld [vmem:[%s5241_s1 + $0x860] ss:$8 sps:$4 sm:$0xff]  }
 0x113   : > { %3573 = vmatpush1.bf16.msra.mxu1 %v4054_v6 }
 0x114   : > { %2685 = vmatpush1.bf16.msra.mxu0 %v4054_v6  ;;  %3558 = vmatprep.subr.bf16.mxu1 %v4059_v8 }
 0x115   : > { %2686 = vmatprep.subr.bf16.mxu0 %v4059_v8 }
 0x117   : > { %3574 = vmatpush1.bf16.msra.mxu1 %v4057_v41 }
 0x118   : > { %2687 = vmatpush1.bf16.msra.mxu0 %v4057_v41  ;;  %3559 = vmatprep.subr.bf16.mxu1 %v4062_v42 }
 0x119   : > { %2688 = vmatprep.subr.bf16.mxu0 %v4062_v42 }
 0x11b   : > { %3575 = vmatpush1.bf16.msra.mxu1 %v4060_v18 }
 0x11c   : > { %2689 = vmatpush1.bf16.msra.mxu0 %v4060_v18  ;;  %3560 = vmatprep.subr.bf16.mxu1 %v4065_v35 }
 0x11d   : > { %2690 = vmatprep.subr.bf16.mxu0 %v4065_v35 }
 0x11f   : > { %3576 = vmatpush1.bf16.msra.mxu1 %v4063_v10 }
 0x120   : > { %2691 = vmatpush1.bf16.msra.mxu0 %v4063_v10  ;;  %3561 = vmatprep.subr.bf16.mxu1 %v4068_v43 }
 0x121   : > { %2692 = vmatprep.subr.bf16.mxu0 %v4068_v43  ;;  %v576_v47 = vpop.f32.mrb[4].mxu1 }
 0x122   : > { %v5160_v46 = vpop.f32.mrb[4].mxu0  ;;  %v578_v49 = vpop.f32.mrb[5].mxu1 }
 0x123   : > { %v5162_v48 = vpop.f32.mrb[5].mxu0  ;;  %3577 = vmatpush1.bf16.msra.mxu1 %v4066_v44  ;;  %v580_v56 = vpop.f32.mrb[6].mxu1 }
 0x124   : > { %2693 = vmatpush1.bf16.msra.mxu0 %v4066_v44  ;;  %v1626_v55 = vpop.f32.mrb[6].mxu0  ;;  %3562 = vmatprep.subr.bf16.mxu1 %v4071_v45  ;;  %v581_v60 = vpop.f32.mrb[7].mxu1  ;;  %v2735_v56 = vld [vmem:[%s5242_s2] sm:$0x3] }
 0x125   : > { %2694 = vmatprep.subr.bf16.mxu0 %v4071_v45  ;;  %v1627_v59 = vpop.f32.mrb[7].mxu0 }
 0x127   : > { %3578 = vmatpush1.bf16.msra.mxu1 %v4069_v52 }
 0x128   : > { %2695 = vmatpush1.bf16.msra.mxu0 %v4069_v52  ;;  %3563 = vmatprep.subr.bf16.mxu1 %v4074_v58 }
 0x129   : > { %2696 = vmatprep.subr.bf16.mxu0 %v4074_v58 }
 0x12b   : > { %3579 = vmatpush1.bf16.msra.mxu1 %v4072_v62 }
 0x12c   : > { %2697 = vmatpush1.bf16.msra.mxu0 %v4072_v62  ;;  %3564 = vmatprep.subr.bf16.mxu1 %v4077_v63 }
 0x12d   : > { %2698 = vmatprep.subr.bf16.mxu0 %v4077_v63 }
 0x12f   : > { %3580 = vmatpush1.bf16.msra.mxu1 %v4075_v0 }
 0x130   : > { %2699 = vmatpush1.bf16.msra.mxu0 %v4075_v0  ;;  %3565 = vmatprep.subr.bf16.mxu1 %v4080_v3 }
 0x131   : > { %2700 = vmatprep.subr.bf16.mxu0 %v4080_v3 }
 0x133   : > { %3581 = vmatpush1.bf16.msra.mxu1 %v4078_v5 }
 0x134   : > { %2701 = vmatpush1.bf16.msra.mxu0 %v4078_v5  ;;  %3566 = vmatprep.subr.bf16.mxu1 %v4083_v7 }
 0x135   : > { %2702 = vmatprep.subr.bf16.mxu0 %v4083_v7 }
 0x137   : > { %3582 = vmatpush1.bf16.msra.mxu1 %v4081_v9 }
 0x138   : > { %2703 = vmatpush1.bf16.msra.mxu0 %v4081_v9  ;;  %3567 = vmatprep.subr.bf16.mxu1 %v4086_v54 }
 0x139   : > { %2704 = vmatprep.subr.bf16.mxu0 %v4086_v54 }
 0x13b   : > { %3583 = vmatpush1.bf16.msra.mxu1 %v4084_v27 }
 0x13c   : > { %2705 = vmatpush1.bf16.msra.mxu0 %v4084_v27  ;;  %3568 = vmatprep.subr.bf16.mxu1 %v4089_v61 }
 0x13d   : > { %2706 = vmatprep.subr.bf16.mxu0 %v4089_v61 }
 0x13f   : > { %3584 = vmatpush1.bf16.msra.mxu1 %v4087_v32 }
 0x140   : > { %2707 = vmatpush1.bf16.msra.mxu0 %v4087_v32  ;;  %3569 = vmatprep.subr.bf16.mxu1 %v4092_v12 }
 0x141   : > { %2708 = vmatprep.subr.bf16.mxu0 %v4092_v12 }
 0x143   : > { %3585 = vmatpush1.bf16.msra.mxu1 %v4090_v13 }
 0x144   : > { %2709 = vmatpush1.bf16.msra.mxu0 %v4090_v13 }
 0x146   : > { %2721 = vmatmul.mubr.bf16.vlgmr.msra.gmra.mrb[20].mxu1 %v2509_v11 }
 0x147   : > { %2711 = vmatmul.mubr.bf16.vlgmr.msra.gmra.mrb[0].mxu0 %v4940_v53 }
 0x161   : > { %v793_v14 = vpop.f32.mrb[8].mxu1 }
 0x162   : > { %v1880_v15 = vpop.f32.mrb[8].mxu0  ;;  %v794_v30 = vadd.f32 %v793_v14, %v576_v47  ;;  %v795_v16 = vpop.f32.mrb[9].mxu1 }
 0x163   : > { %v1882_v17 = vpop.f32.mrb[9].mxu0  ;;  %v796_v1 = vadd.f32 %v795_v16, %v578_v49  ;;  %v797_v21 = vpop.f32.mrb[10].mxu1  ;;  %v2737_v49 = vlaneseq }
 0x164   : > { %v1884_v20 = vpop.f32.mrb[10].mxu0  ;;  %v798_v25 = vpop.f32.mrb[11].mxu1 }
 0x165   : > { %v1885_v24 = vpop.f32.mrb[11].mxu0  ;;  %v2738_v52 = vshrl.u32 %v2737_v49, 7 }
 0x167   : > { %v5214_v55 = vsub.s32 0, %v2738_v52  ;;  %v5219_v58 = vsub.s32 1, %v2738_v52 }
 0x169   : > { %v2740_v59 = vrot.slane %v2735_v56, %v5214_v55  ;;  %v2744_v62 = vrot.slane %v2735_v56, %v5219_v58 }
 0x1a1   : > { %v1054_v26 = vpop.f32.mrb[12].mxu1 }
 0x1a2   : > { %v2161_v28 = vpop.f32.mrb[12].mxu0  ;;  %v1065_v50 = vadd.f32 %v1054_v26, %v794_v30  ;;  %v1056_v31 = vpop.f32.mrb[13].mxu1 }
 0x1a3   : > { %v2163_v29 = vpop.f32.mrb[13].mxu0  ;;  %v1066_v51 = vadd.f32 %v1056_v31, %v796_v1  ;;  %v1058_v33 = vpop.f32.mrb[14].mxu1 }
 0x1a4   : > { %v2165_v53 = vpop.f32.mrb[14].mxu0  ;;  %v1059_v11 = vpop.f32.mrb[15].mxu1 }
 0x1a5   : > { %v2166_v4 = vpop.f32.mrb[15].mxu0  ;;  %v2769_v26 = vpop.permute.xlu1 %2768 }
 0x1d9   : > { %v1317_v57 = vpop.f32.mrb[0].mxu1 }
 0x1da   : > { %v1319_v19 = vpop.f32.mrb[1].mxu1 }
 0x1db   : > { %v1321_v34 = vpop.f32.mrb[2].mxu1 }
 0x1dc   : > { %v1323_v22 = vpop.f32.mrb[3].mxu1 }
 0x1e1   : > { %v1327_v23 = vpop.f32.mrb[16].mxu1 }
 0x1e2   : > { %v2456_v36 = vpop.f32.mrb[16].mxu0  ;;  %v1338_v2 = vadd.f32 %v1327_v23, %v1065_v50  ;;  %v1329_v37 = vpop.f32.mrb[17].mxu1 }
 0x1e3   : > { %v2458_v38 = vpop.f32.mrb[17].mxu0  ;;  %v1339_v39 = vadd.f32 %v1329_v37, %v1066_v51  ;;  %v1331_v6 = vpop.f32.mrb[18].mxu1 }
 0x1e4   : > { %v2460_v40 = vpop.f32.mrb[18].mxu0  ;;  %v1633_v8 = vadd.f32 %v5160_v46, %v1338_v2  ;;  %v1332_v42 = vpop.f32.mrb[19].mxu1 }
 0x1e5   : > { %v2461_v41 = vpop.f32.mrb[19].mxu0  ;;  %v1634_v18 = vadd.f32 %v5162_v48, %v1339_v39  ;;  %v2759_v46 = vpop.permute.xlu0 %2758 }
 0x1e6   : > { %v1891_v35 = vadd.f32 %v1880_v15, %v1633_v8 }
 0x1e7   : > { %v1892_v10 = vadd.f32 %v1882_v17, %v1634_v18 }
 0x1e8   : > { %v2172_v43 = vadd.f32 %v2161_v28, %v1891_v35 }
 0x1e9   : > { %v2173_v44 = vadd.f32 %v2163_v29, %v1892_v10  ;;  %v2764_v1 = vpop.permute.xlu0 %2763 }
 0x1ea   : > { %v2467_v45 = vadd.f32 %v2456_v36, %v2172_v43 }
 0x1eb   : > { %v2468_v47 = vadd.f32 %v2458_v38, %v2173_v44 }
 0x219   : > { %v2722_v60 = vpop.f32.mrb[20].mxu1 }
 0x21a   : > { %v2712_v48 = vpop.f32.mrb[0].mxu0  ;;  %v2733_v0 = vadd.f32 %v2722_v60, %v2467_v45  ;;  %v2724_v5 = vpop.f32.mrb[21].mxu1 }
 0x21b   : > { %v3586_v63 = vadd.f32 %v2712_v48, %v1317_v57  ;;  %v2714_v3 = vpop.f32.mrb[1].mxu0  ;;  %v2734_v9 = vadd.f32 %v2724_v5, %v2468_v47  ;;  %v2726_v27 = vpop.f32.mrb[22].mxu1 }
 0x21c   : > { %v3587_v7 = vadd.f32 %v2714_v3, %v1319_v19  ;;  %v2716_v54 = vpop.f32.mrb[2].mxu0  ;;  %v2727_v13 = vpop.f32.mrb[23].mxu1  ;;  %v2751_v24 = vadd.f32 %v2740_v59, %v2733_v0 }
 0x21d   : > { %v2747_v61 = vadd.f32 %v3586_v63, %v2740_v59  ;;  %v3588_v32 = vadd.f32 %v2716_v54, %v1321_v34  ;;  %v2718_v12 = vpop.f32.mrb[3].mxu0  ;;  %v2752_v28 = vadd.f32 %v2744_v62, %v2734_v9 }
 0x21e   : > { %v2748_v14 = vadd.f32 %v3587_v7, %v2744_v62  ;;  %v3589_v15 = vadd.f32 %v2718_v12, %v1323_v22  ;;  %v2775_v29 = vmul.f32 %v2769_v26, %v2751_v24  ;;  %v2855_v12 = vld [vmem:[%s5244_s4] sm:$0x3] }
 0x21f   : > { %v2771_v30 = vmul.f32 %v2759_v46, %v2747_v61  ;;  %v2749_v16 = vadd.f32 %v3588_v32, %v2740_v59  ;;  %v2776_v53 = vmul.f32 %v2769_v26, %v2752_v28  ;;  %v2837_v32 = vld [vmem:[%s5243_s3] sm:$0x3] }
 0x220   : > { %v2772_v17 = vmul.f32 %v2759_v46, %v2748_v14  ;;  %v2750_v20 = vadd.f32 %v3589_v15, %v2744_v62  ;;  %v2842_v13 = vrot.slane %v2837_v32, %v5214_v55  ;;  %v2860_v15 = vrot.slane %v2855_v12, %v5214_v55 }
 0x221   : > { %v2773_v21 = vmul.f32 %v2764_v1, %v2749_v16 }
 0x222   : > { %v2777_v25 = vadd.f32 %v2772_v17, %v2771_v30  ;;  %v2774_v50 = vmul.f32 %v2764_v1, %v2750_v20  ;;  %v2864_v30 = vrot.slane %v2855_v12, %v5219_v58 }
 0x224   : > { %v2778_v31 = vadd.f32 %v2777_v25, %v2773_v21 }
 0x226   : > { %v2779_v51 = vadd.f32 %v2778_v31, %v2774_v50 }
 0x228   : > { %v2780_v33 = vadd.f32 %v2779_v51, %v2775_v29 }
 0x22a   : > { %v2781_v4 = vadd.f32 %v2780_v33, %v2776_v53 }
 0x22c   : > { %2782 = vadd.xlane.f32.xlu1 %v2781_v4 }
 0x2b9   : > { %v2783_v11 = vpop.xlane.xlu1 %2782 }
 0x2ba   : > { %v2784_v57 = vrot.slane %v2783_v11, 4 }
 0x2bc   : > { %v2785_v19 = vadd.f32 %v2784_v57, %v2783_v11 }
 0x2be   : > { %v2786_v34 = vrot.slane %v2785_v19, 2 }
 0x2c0   : > { %v2787_v22 = vadd.f32 %v2786_v34, %v2785_v19 }
 0x2c2   : > { %v2788_v23 = vrot.slane %v2787_v22, 1 }
 0x2c4   : > { %v2789_v36 = vadd.f32 %v2788_v23, %v2787_v22 }
 0x2c6   : > { %3620 = vpush %v2789_v36 }
 0x2f7   : > { %s3621_s26 = spop %3620 }
 0x2f8   : > { %s2791_s8 = smul.f32 0.00024414063, %s3621_s26 }
 0x2fa   : > { %v2792_v2 = vstv %s2791_s8 }
 0x2fb   : > { %v2793_v37 = vsub.f32 %v2747_v61, %v2792_v2  ;;  %v2794_v38 = vsub.f32 %v2748_v14, %v2792_v2  ;;  %v2795_v39 = vsub.f32 %v2749_v16, %v2792_v2  ;;  %v2796_v40 = vsub.f32 %v2750_v20, %v2792_v2 }
 0x2fc   : > { %v2797_v41 = vsub.f32 %v2751_v24, %v2792_v2  ;;  %v2798_v18 = vsub.f32 %v2752_v28, %v2792_v2  ;;  %v2846_v14 = vrot.slane %v2837_v32, %v5219_v58 }
 0x2fd   : > { %v2799_v6 = vmul.f32 %v2793_v37, %v2793_v37  ;;  %v2800_v8 = vmul.f32 %v2794_v38, %v2794_v38  ;;  %v2801_v42 = vmul.f32 %v2795_v39, %v2795_v39  ;;  %v2802_v35 = vmul.f32 %v2796_v40, %v2796_v40 }
 0x2fe   : > { %v2803_v44 = vmul.f32 %v2797_v41, %v2797_v41  ;;  %v2804_v49 = vmul.f32 %v2798_v18, %v2798_v18 }
 0x2ff   : > { %v2805_v10 = vmul.f32 %v2799_v6, %v2759_v46  ;;  %v2806_v43 = vmul.f32 %v2800_v8, %v2759_v46  ;;  %v2807_v45 = vmul.f32 %v2801_v42, %v2764_v1  ;;  %v2808_v52 = vmul.f32 %v2802_v35, %v2764_v1 }
 0x300   : > { %v2809_v59 = vmul.f32 %v2803_v44, %v2769_v26  ;;  %v2810_v60 = vmul.f32 %v2804_v49, %v2769_v26 }
 0x301   : > { %v2811_v47 = vadd.f32 %v2806_v43, %v2805_v10 }
 0x303   : > { %v2812_v56 = vadd.f32 %v2811_v47, %v2807_v45 }
 0x305   : > { %v2813_v48 = vadd.f32 %v2812_v56, %v2808_v52 }
 0x307   : > { %v2814_v62 = vadd.f32 %v2813_v48, %v2809_v59 }
 0x309   : > { %v2815_v63 = vadd.f32 %v2814_v62, %v2810_v60 }
 0x30b   : > { %2816 = vadd.xlane.f32.xlu0 %v2815_v63 }
 0x398   : > { %v2817_v0 = vpop.xlane.xlu0 %2816 }
 0x399   : > { %v2818_v3 = vrot.slane %v2817_v0, 4 }
 0x39b   : > { %v2819_v5 = vadd.f32 %v2818_v3, %v2817_v0 }
 0x39d   : > { %v2820_v7 = vrot.slane %v2819_v5, 2 }
 0x39f   : > { %v2821_v9 = vadd.f32 %v2820_v7, %v2819_v5 }
 0x3a1   : > { %v2822_v54 = vrot.slane %v2821_v9, 1 }
 0x3a3   : > { %v2823_v27 = vadd.f32 %v2822_v54, %v2821_v9 }
 0x3a5   : > { %3622 = vpush %v2823_v27 }
 0x3d6   : > { %s3623_s9 = spop %3622 }
 0x3d7   : > { %s2825_s10 = smul.f32 0.00024414063, %s3623_s9 }
 0x3d9   : > { %s2826_s11 = sadd.f32 1e-05, %s2825_s10 }
 0x3db   : > { %v2827_v46 = vstv %s2826_s11 }
 0x3dc   : > { %4095 = vrsqrt.f32 %v2827_v46 }
 0x3e6   : > { %v4096_v61 = vpop.eup %4095 }
 0x3e7   : > { %3624 = vpush %v4096_v61 }
 0x418   : > { %s3625_s16 = spop %3624 }
 0x419   : > { %v2830_v16 = vstv %s3625_s16 }
 0x41a   : > { %v2831_v17 = vmul.f32 %v2830_v16, %v2793_v37  ;;  %v2832_v1 = vmul.f32 %v2830_v16, %v2794_v38  ;;  %v2833_v20 = vmul.f32 %v2830_v16, %v2795_v39  ;;  %v2834_v21 = vmul.f32 %v2830_v16, %v2796_v40 }
 0x41b   : > { %v2835_v24 = vmul.f32 %v2830_v16, %v2797_v41  ;;  %v2836_v25 = vmul.f32 %v2830_v16, %v2798_v18 }
 0x41c   : > { %v2849_v26 = vmul.f32 %v2842_v13, %v2831_v17  ;;  %v2850_v28 = vmul.f32 %v2846_v14, %v2832_v1  ;;  %v2851_v50 = vmul.f32 %v2842_v13, %v2833_v20  ;;  %v2852_v31 = vmul.f32 %v2846_v14, %v2834_v21 }
 0x41d   : > { %v2853_v29 = vmul.f32 %v2842_v13, %v2835_v24  ;;  %v2854_v51 = vmul.f32 %v2846_v14, %v2836_v25 }
 0x41e   : > { %v2867_v53 = vadd.f32 %v2860_v15, %v2849_v26  ;;  %v2868_v33 = vadd.f32 %v2864_v30, %v2850_v28  ;;  %v2869_v4 = vadd.f32 %v2860_v15, %v2851_v50  ;;  %v2870_v55 = vadd.f32 %v2864_v30, %v2852_v31 }
 0x41f   : > { %v2871_v58 = vadd.f32 %v2860_v15, %v2853_v29  ;;  %v2872_v11 = vadd.f32 %v2864_v30, %v2854_v51 }
 0x420   : > { %vm2873_vm6 = vcmp.gt.f32.partialorder %v2867_v53, 0.0  ;;  %vm2874_vm7 = vcmp.gt.f32.partialorder %v2868_v33, 0.0  ;;  %vm2875_vm8 = vcmp.gt.f32.partialorder %v2869_v4, 0.0  ;;  %vm2876_vm9 = vcmp.gt.f32.partialorder %v2870_v55, 0.0 }
 0x421   : > { %vm2877_vm10 = vcmp.gt.f32.partialorder %v2871_v58, 0.0  ;;  %vm2878_vm11 = vcmp.gt.f32.partialorder %v2872_v11, 0.0  ;;  %v2879_v57 = vmul.f32 0.2, %v2867_v53  ;;  %v2880_v19 = vmul.f32 0.2, %v2868_v33 }
 0x422   : > { %v2881_v34 = vmul.f32 0.2, %v2869_v4  ;;  %v2882_v22 = vmul.f32 0.2, %v2870_v55  ;;  %v2883_v23 = vmul.f32 0.2, %v2871_v58 }
 0x423   : > { %v2884_v36 = vmul.f32 0.2, %v2872_v11  ;;  %v2885_v2 = vsel %vm2873_vm6, %v2867_v53, %v2879_v57  ;;  %v2886_v37 = vsel %vm2874_vm7, %v2868_v33, %v2880_v19 }
 0x424   : > { %v2887_v38 = vsel %vm2875_vm8, %v2869_v4, %v2881_v34  ;;  %v2888_v39 = vsel %vm2876_vm9, %v2870_v55, %v2882_v22  ;;  %v2889_v40 = vsel %vm2877_vm10, %v2871_v58, %v2883_v23  ;;  %v3551_v6 = vpack.c.bf16 %v2886_v37, %v2885_v2 }
 0x425   : > { %v2890_v8 = vsel %vm2878_vm11, %v2872_v11, %v2884_v36  ;;  %v3552_v41 = vpack.c.bf16 %v2888_v39, %v2887_v38 }
 0x426   : > { %v3553_v42 = vpack.c.bf16 %v2890_v8, %v2889_v40  ;;  %2911 = vst [vmem:[%s251_s20] sm:$0xff] %v3551_v6 }
 0x427   : > { %2912 = vst [vmem:[%s251_s20 + $0x8] sm:$0xff] %v3552_v41 }
 0x428   : > { %2913 = vst [vmem:[%s251_s20 + $0x10] sm:$0xff] %v3553_v42 }
 0x429 PF: > { %s16_s21 = sadd.s32 1, %s4106_s21  }
 0x42a   : > { %p13_p4 = scmp.ge.s32.totalorder %s16_s21, 4  }
 0x42c   :  { %15 = sbr.rel (!%p13_p4) target bundleno = 1 (0x1), region = 82 }

// kernel: discriminator_forward.13
= control target key start
LH: loop header
LB: loop body
LE: loop exit
PB: predicated region body
PF: predicated region fallthrough
CT: control target
= control target key end

     0   :  { %s3118_s23 = smov 0   ;;  %s3672_s0 = inlined_call_operand.vmem [shape: bf16[2,1,38,256], index: 0, kind: input, shape index: {}]   ;;  %s3673_s1 = inlined_call_operand.vmem [shape: bf16[9,256,1], index: 1, kind: input, shape index: {}]   ;;  %s3674_s2 = inlined_call_operand.<no memory space> [shape: f32[1,1], index: 2, kind: input, shape index: {}]   ;;  %s3675_s5 = inlined_call_operand.vmem [shape: f32[24,1], index: 5, kind: input, shape index: {}]   ;;  %s3676_s6 = inlined_call_operand.vmem [shape: f32[2,24,1], index: 6, kind: output, shape index: {}]   ;;  %s3677_s3 = inlined_call_operand.<no memory space> [shape: f32[1,1], index: 3, kind: input, shape index: {}]   ;;  %s3678_s4 = inlined_call_operand.<no memory space> [shape: f32[1,1], index: 4, kind: input, shape index: {}]  }
   0x1   :  { %v11_v0 = vstv %s3674_s2 }
   0x2   :  { %12 = vst [vmem:[#allocation2] sm:$0x1] %v11_v0 }
   0x3 LB: > { %s2187_s5 = sadd.s32 4294967295, %s3078_s23   ;;  %p2191_p0 = scmp.ge.s32.totalorder %s3078_s23, 1  ;;  %s3078_s23 = sphi %s3118_s23, %s22_s23  }
   0x4   : > { %p218_p1 = scmp.lt.s32.totalorder %s3078_s23, 3 }
   0x6   : > { %p219_p2 = pnand %p2191_p0, %p218_p1 }
   0x7   : > { %v2901_v1 = vld [vmem:[%s3673_s1 + $0xc0] sm:$0xff] (!%p219_p2)   ;;  %v2905_v5 = vld [vmem:[%s3673_s1 + $0xc8] sm:$0xff] (!%p219_p2)   ;;  %v2909_v9 = vld [vmem:[%s3673_s1 + $0xd0] sm:$0xff] (!%p219_p2)   ;;  %p248_p3 = scmp.lt.s32.totalorder (!%p219_p2), %s2187_s5, 1  ;;  %vm344_vm0 = vsmask.f32 (!%p219_p2), 7424 }
   0x8   : > { %222 = sbr.rel (%p219_p2) target bundleno = 391 (0x187), region = 44  ;;  %v2902_v2 = vld [vmem:[%s3673_s1 + $0x40] sm:$0xff] (!%p219_p2)   ;;  %2623 = vmatprep.subr.bf16.mxu0 (!%p219_p2), %v2901_v1  ;;  %v2906_v6 = vld [vmem:[%s3673_s1 + $0x48] sm:$0xff] (!%p219_p2)   ;;  %v2910_v10 = vld [vmem:[%s3673_s1 + $0x50] sm:$0xff] (!%p219_p2)   ;;  %vm712_vm1 = vcmask (!%p219_p2), 1046528   ;;  %vm915_vm2 = vcmask (!%p219_p2), 1044480  }
   0x9   : > { %v2903_v3 = vld [vmem:[%s3673_s1 + $0x80] sm:$0xff] (!%p219_p2)   ;;  %2651 = vmatprep.subr.bf16.mxu1 (!%p219_p2), %v2902_v2  ;;  %v2907_v7 = vld [vmem:[%s3673_s1 + $0x88] sm:$0xff] (!%p219_p2)   ;;  %v2911_v11 = vld [vmem:[%s3673_s1 + $0x90] sm:$0xff] (!%p219_p2)   ;;  %vm1112_vm3 = vsmask.f32 (!%p219_p2), 4352  ;;  %vm1539_vm4 = vcmask (!%p219_p2), 1045504  }
   0xa   : > { %v2904_v4 = vld [vmem:[%s3673_s1] sm:$0xff] (!%p219_p2)   ;;  %2624 = vmatpush3.bf16.msra.mxu0 (!%p219_p2), %v2903_v3  ;;  %v2908_v8 = vld [vmem:[%s3673_s1 + $0x8] sm:$0xff] (!%p219_p2)   ;;  %v2912_v12 = vld [vmem:[%s3673_s1 + $0x10] sm:$0xff] (!%p219_p2)   ;;  %vm1736_vm5 = vsmask.f32 (!%p219_p2), 5376  ;;  %vm2128_vm6 = vcmask (!%p219_p2), 7168  }
   0xb   : > { %2652 = vmatpush3.bf16.msra.mxu1 (!%p219_p2), %v2904_v4  ;;  %2625 = vmatprep.subr.bf16.mxu0 (!%p219_p2), %v2905_v5  ;;  %v2913_v13 = vld [vmem:[%s3673_s1 + $0xd8] sm:$0xff] (!%p219_p2)   ;;  %v2917_v17 = vld [vmem:[%s3673_s1 + $0xe0] sm:$0xff] (!%p219_p2)   ;;  %v2921_v21 = vld [vmem:[%s3673_s1 + $0xe8] sm:$0xff] (!%p219_p2)  }
   0xc   : > { %2653 = vmatprep.subr.bf16.mxu1 (!%p219_p2), %v2906_v6  ;;  %v2914_v14 = vld [vmem:[%s3673_s1 + $0x58] sm:$0xff] (!%p219_p2)   ;;  %v2918_v18 = vld [vmem:[%s3673_s1 + $0x60] sm:$0xff] (!%p219_p2)   ;;  %v2922_v22 = vld [vmem:[%s3673_s1 + $0x68] sm:$0xff] (!%p219_p2)  }
   0xd   : > { %v2915_v15 = vld [vmem:[%s3673_s1 + $0x98] sm:$0xff] (!%p219_p2)   ;;  %v2919_v19 = vld [vmem:[%s3673_s1 + $0xa0] sm:$0xff] (!%p219_p2)   ;;  %v2923_v23 = vld [vmem:[%s3673_s1 + $0xa8] sm:$0xff] (!%p219_p2)  }
   0xe   : > { %2626 = vmatpush3.bf16.msra.mxu0 (!%p219_p2), %v2907_v7  ;;  %v2916_v16 = vld [vmem:[%s3673_s1 + $0x18] sm:$0xff] (!%p219_p2)   ;;  %v2920_v20 = vld [vmem:[%s3673_s1 + $0x20] sm:$0xff] (!%p219_p2)   ;;  %v2924_v24 = vld [vmem:[%s3673_s1 + $0x28] sm:$0xff] (!%p219_p2)  }
   0xf   : > { %2654 = vmatpush3.bf16.msra.mxu1 %v2908_v8  ;;  %2627 = vmatprep.subr.bf16.mxu0 %v2909_v9  ;;  %s3680_s5 = smov (!%p248_p3, %s2187_s5), 1  ;;  %v2925_v25 = vld [vmem:[%s3673_s1 + $0xf0] sm:$0xff]   ;;  %v2929_v29 = vld [vmem:[%s3673_s1 + $0xf8] sm:$0xff]   ;;  %v2937_v42 = vld [vmem:[%s3673_s1 + $0x140] sm:$0xff]  }
  0x10   : > { %2655 = vmatprep.subr.bf16.mxu1 %v2910_v10  ;;  %v2926_v26 = vld [vmem:[%s3673_s1 + $0x70] sm:$0xff]   ;;  %s2891_s3 = smul.u32 40, %s3680_s5  ;;  %v2930_v30 = vld [vmem:[%s3673_s1 + $0x78] sm:$0xff]   ;;  %v2938_v47 = vld [vmem:[%s3673_s1 + $0x1c0] sm:$0xff]  }
  0x11   : > { %v2927_v27 = vld [vmem:[%s3673_s1 + $0xb0] sm:$0xff]   ;;  %v2931_v31 = vld [vmem:[%s3673_s1 + $0xb8] sm:$0xff]   ;;  %v2939_v54 = vld [vmem:[%s3673_s1 + $0x100] sm:$0xff]   ;;  %s2892_s11 = smul.u32 24, %s3680_s5 }
  0x12   : > { %2628 = vmatpush3.bf16.msra.mxu0 %v2911_v11  ;;  %v2928_v28 = vld [vmem:[%s3673_s1 + $0x30] sm:$0xff]   ;;  %s3226_s8 = scalar_lea.vmem %s3672_s0, %s2891_s3  ;;  %v2932_v32 = vld [vmem:[%s3673_s1 + $0x38] sm:$0xff]   ;;  %v2940_v55 = vld [vmem:[%s3673_s1 + $0x180] sm:$0xff]  }
  0x13   : > { %2656 = vmatpush3.bf16.msra.mxu1 %v2912_v12  ;;  %2629 = vmatprep.subr.bf16.mxu0 %v2913_v13  ;;  %v259_v33 = vld [vmem:[%s3226_s8] sm:$0xff]  ;;  %v3236_v34 = vld [vmem:[%s3226_s8 + $0x8] sm:$0xff]  ;;  %v3239_v35 = vld [vmem:[%s3226_s8 + $0x10] sm:$0xff]  ;;  %s257_s14 = scalar_lea.vmem %s3676_s6, %s2892_s11 }
  0x14   : > { %2657 = vmatprep.subr.bf16.mxu1 %v2914_v14  ;;  %v294_v36 = vld [vmem:[%s3226_s8 + $0x18] sm:$0x11]  ;;  %v2227_v37 = vcombine.high %v259_v33, %v3236_v34  ;;  %v2226_v38 = vcombine.low %v259_v33, %v3236_v34  ;;  %v2247_v39 = vcombine.high %v3239_v35, %v3239_v35  ;;  %v2942_v58 = vld [vmem:[%s3673_s1 + $0x1c8] sm:$0xff]   ;;  %v2246_v1 = vcombine.low %v3239_v35, %v3239_v35  ;;  %v2946_v4 = vld [vmem:[%s3673_s1 + $0x1d0] sm:$0xff]  }
  0x15   : > { %v3247_v40 = vcombine.high %v3239_v35, %v294_v36  ;;  %v3250_v41 = vcombine.low %v3239_v35, %v294_v36  ;;  %v2941_v62 = vld [vmem:[%s3673_s1 + $0x148] sm:$0xff]   ;;  %v2945_v5 = vld [vmem:[%s3673_s1 + $0x150] sm:$0xff]   ;;  %v2950_v9 = vld [vmem:[%s3673_s1 + $0x1d8] sm:$0xff]  }
  0x16   : > { %2630 = vmatpush3.bf16.msra.mxu0 %v2915_v15  ;;  %v358_v43 = vshrl.u32 %v2227_v37, 16  ;;  %v360_v44 = vshll.u32 %v2227_v37, 16  ;;  %657 = vmatprep.mubr.bf16.mxu1 %v2227_v37  ;;  %v346_v45 = vshrl.u32 %v2226_v38, 16  ;;  %v348_v46 = vshll.u32 %v2226_v38, 16  ;;  %v2944_v63 = vld [vmem:[%s3673_s1 + $0x188] sm:$0xff]   ;;  %v2948_v6 = vld [vmem:[%s3673_s1 + $0x190] sm:$0xff]  }
  0x17   : > { %2658 = vmatpush3.bf16.msra.mxu1 %v2916_v16  ;;  %2631 = vmatprep.subr.bf16.mxu0 %v2917_v17  ;;  %v365_v48 = vshll.u32 %v3247_v40, 16  ;;  %v353_v49 = vshll.u32 %v3250_v41, 16  ;;  %v372_v59 = vshrl.u32 %v3247_v40, 16  ;;  %v2943_v2 = vld [vmem:[%s3673_s1 + $0x108] sm:$0xff]   ;;  %v369_v3 = vshrl.u32 %v3250_v41, 16  ;;  %v2947_v7 = vld [vmem:[%s3673_s1 + $0x110] sm:$0xff]  }
  0x18   : > { %2659 = vmatprep.subr.bf16.mxu1 %v2918_v18  ;;  %v362_v50 = vrot.slane %v360_v44, 1  ;;  %v350_v51 = vrot.slane %v348_v46, 1  ;;  %v2949_v10 = vld [vmem:[%s3673_s1 + $0x158] sm:$0xff]   ;;  %v2954_v13 = vld [vmem:[%s3673_s1 + $0x1e0] sm:$0xff]   ;;  %v2958_v17 = vld [vmem:[%s3673_s1 + $0x1e8] sm:$0xff]  }
  0x19   : > { %v367_v52 = vrot.slane %v365_v48, 1  ;;  %v355_v53 = vrot.slane %v353_v49, 1  ;;  %v2952_v11 = vld [vmem:[%s3673_s1 + $0x198] sm:$0xff]   ;;  %v2953_v14 = vld [vmem:[%s3673_s1 + $0x160] sm:$0xff]   ;;  %v2957_v18 = vld [vmem:[%s3673_s1 + $0x168] sm:$0xff]  }
  0x1a   : > { %2632 = vmatpush3.bf16.msra.mxu0 %v2919_v19  ;;  %v363_v56 = vor.u32 %v362_v50, %v358_v43  ;;  %v351_v57 = vor.u32 %v350_v51, %v346_v45  ;;  %v2951_v12 = vld [vmem:[%s3673_s1 + $0x118] sm:$0xff]   ;;  %v2956_v15 = vld [vmem:[%s3673_s1 + $0x1a0] sm:$0xff]   ;;  %v2960_v19 = vld [vmem:[%s3673_s1 + $0x1a8] sm:$0xff]  }
  0x1b   : > { %2660 = vmatpush3.bf16.msra.mxu1 %v2920_v20  ;;  %2633 = vmatprep.subr.bf16.mxu0 %v2921_v21  ;;  %v374_v0 = vor.u32 %v372_v59, %v367_v52  ;;  %v371_v8 = vor.u32 %v369_v3, %v355_v53  ;;  %v2955_v16 = vld [vmem:[%s3673_s1 + $0x120] sm:$0xff]   ;;  %v2959_v20 = vld [vmem:[%s3673_s1 + $0x128] sm:$0xff]   ;;  %v2964_v21 = vld [vmem:[%s3673_s1 + $0x1f0] sm:$0xff]  }
  0x1c   : > { %2661 = vmatprep.subr.bf16.mxu1 %v2922_v22  ;;  %v368_v60 = vsel %vm344_vm0, %v363_v56, %v367_v52  ;;  %v356_v61 = vsel %vm344_vm0, %v351_v57, %v355_v53  ;;  %v2963_v22 = vld [vmem:[%s3673_s1 + $0x170] sm:$0xff]   ;;  %v871_v33 = vld [vmem:[%s3226_s8 + $0x18] sm:$0x77]  ;;  %v2978_v48 = vld [vmem:[%s3673_s1 + $0x2c0] sm:$0xff]  }
  0x1d   : > { %507 = vmatprep.mubr.bf16.mxu0 %v368_v60  ;;  %v2980_v52 = vld [vmem:[%s3673_s1 + $0x280] sm:$0xff]   ;;  %v2981_v56 = vld [vmem:[%s3673_s1 + $0x248] sm:$0xff]   ;;  %v2985_v60 = vld [vmem:[%s3673_s1 + $0x250] sm:$0xff]  }
  0x1e   : > { %2634 = vmatpush3.bf16.msra.mxu0 %v2923_v23  ;;  %v2966_v23 = vld [vmem:[%s3673_s1 + $0x1b0] sm:$0xff]   ;;  %v2982_v57 = vld [vmem:[%s3673_s1 + $0x2c8] sm:$0xff]   ;;  %v2991_v3 = vld [vmem:[%s3673_s1 + $0x218] sm:$0xff]  }
  0x1f   : > { %2662 = vmatpush3.bf16.msra.mxu1 %v2924_v24  ;;  %2635 = vmatprep.subr.bf16.mxu0 %v2925_v25  ;;  %v2965_v24 = vld [vmem:[%s3673_s1 + $0x130] sm:$0xff]   ;;  %v2968_v25 = vld [vmem:[%s3673_s1 + $0x1f8] sm:$0xff]   ;;  %v2984_v59 = vld [vmem:[%s3673_s1 + $0x288] sm:$0xff]  }
  0x20   : > { %2663 = vmatprep.subr.bf16.mxu1 %v2926_v26  ;;  %v2967_v26 = vld [vmem:[%s3673_s1 + $0x178] sm:$0xff]  }
  0x22   : > { %2636 = vmatpush3.bf16.msra.mxu0 %v2927_v27  ;;  %v2970_v27 = vld [vmem:[%s3673_s1 + $0x1b8] sm:$0xff]  }
  0x23   : > { %2664 = vmatpush3.bf16.msra.mxu1 %v2928_v28  ;;  %2637 = vmatprep.subr.bf16.mxu0 %v2929_v29  ;;  %v673_v28 = vld [vmem:[%s3226_s8] sm:$0xee]  ;;  %v717_v29 = vrot.slane %v3247_v40, 1  ;;  %v2349_v40 = vcombine.high %v3239_v35, %v871_v33 }
  0x24   : > { %2665 = vmatprep.subr.bf16.mxu1 %v2930_v30  ;;  %v870_v30 = vld [vmem:[%s3226_s8] sm:$0x88] }
  0x25   : > { %v3360_v36 = vcombine.low %v870_v30, %v3236_v34  ;;  %v3363_v37 = vcombine.high %v870_v30, %v3236_v34  ;;  %v920_v50 = vrot.slane %v2349_v40, 3  ;;  %v3013_v30 = vld [vmem:[%s3673_s1 + $0x340] sm:$0xff]  }
  0x26   : > { %2638 = vmatpush3.bf16.msra.mxu0 %v2931_v31  ;;  %v2296_v31 = vcombine.low %v673_v28, %v3236_v34 }
  0x27   : > { %2666 = vmatpush3.bf16.msra.mxu1 %v2932_v32  ;;  %2679 = vmatprep.subr.bf16.mxu0 %v2937_v42  ;;  %v2297_v32 = vcombine.high %v673_v28, %v3236_v34  ;;  %v714_v42 = vrot.slane %v3250_v41, 1  ;;  %v919_v45 = vrot.slane %v3363_v37, 3  ;;  %v916_v46 = vrot.slane %v3360_v36, 3  ;;  %v2979_v41 = vld [vmem:[%s3673_s1 + $0x200] sm:$0xff]  }
  0x28   : > { %2707 = vmatprep.subr.bf16.mxu1 %v2938_v47  ;;  %v713_v43 = vrot.slane %v2296_v31, 1  ;;  %v2977_v47 = vld [vmem:[%s3673_s1 + $0x240] sm:$0xff]  }
  0x29   : > { %508 = vmatmul.mubr.bf16.vlgmr.msra.gmra.mrb[0].mxu0 %v356_v61  ;;  %v716_v44 = vrot.slane %v2297_v32, 1  ;;  %v921_v53 = vsel %vm915_vm2, %v919_v45, %v920_v50  ;;  %v2986_v61 = vld [vmem:[%s3673_s1 + $0x2d0] sm:$0xff]  }
  0x2a   : > { %658 = vmatmul.mubr.bf16.vlgmr.msra.gmra.mrb[0].mxu1 %v2226_v38  ;;  %2680 = vmatpush3.bf16.msra.mxu0 %v2939_v54  ;;  %v2969_v38 = vld [vmem:[%s3673_s1 + $0x138] sm:$0xff]   ;;  %v715_v54 = vsel %vm712_vm1, %v713_v43, %v714_v42  ;;  %v3016_v43 = vld [vmem:[%s3673_s1 + $0x380] sm:$0xff]  }
  0x2b   : > { %665 = vmatprep.mubr.bf16.mxu1 %v2247_v39  ;;  %2708 = vmatpush3.bf16.msra.mxu1 %v2940_v55  ;;  %v2348_v39 = vcombine.low %v3239_v35, %v871_v33  ;;  %v718_v51 = vsel %vm712_vm1, %v716_v44, %v717_v29  ;;  %v2448_v33 = vcombine.low %v3236_v34, %v3239_v35 }
  0x2c   : > { %2709 = vmatprep.subr.bf16.mxu1 %v2942_v58  ;;  %2681 = vmatprep.subr.bf16.mxu0 %v2941_v62  ;;  %v2983_v58 = vld [vmem:[%s3673_s1 + $0x208] sm:$0xff]   ;;  %v2987_v62 = vld [vmem:[%s3673_s1 + $0x210] sm:$0xff]  }
  0x2d   : > { %515 = vmatprep.mubr.bf16.mxu0 %v374_v0  ;;  %v917_v49 = vrot.slane %v2348_v39, 3  ;;  %v2989_v0 = vld [vmem:[%s3673_s1 + $0x258] sm:$0xff]  }
  0x2e   : > { %2682 = vmatpush3.bf16.msra.mxu0 %v2943_v2  ;;  %v2449_v2 = vcombine.high %v3236_v34, %v3239_v35 }
  0x2f   : > { %2710 = vmatpush3.bf16.msra.mxu1 %v2944_v63  ;;  %2683 = vmatprep.subr.bf16.mxu0 %v2945_v5  ;;  %v918_v55 = vsel %vm915_vm2, %v916_v46, %v917_v49  ;;  %v2988_v63 = vld [vmem:[%s3673_s1 + $0x290] sm:$0xff]   ;;  %v2993_v5 = vld [vmem:[%s3673_s1 + $0x260] sm:$0xff]  }
  0x30   : > { %2711 = vmatprep.subr.bf16.mxu1 %v2946_v4  ;;  %v2992_v4 = vld [vmem:[%s3673_s1 + $0x298] sm:$0xff]  }
  0x31   : > { %516 = vmatmul.mubr.bf16.gmra.mrb[4].mxu0 %v371_v8  ;;  %v2996_v8 = vld [vmem:[%s3673_s1 + $0x2a0] sm:$0xff]  }
  0x32   : > { %666 = vmatmul.mubr.bf16.gmra.mrb[4].mxu1 %v2246_v1  ;;  %2684 = vmatpush3.bf16.msra.mxu0 %v2947_v7  ;;  %v2990_v1 = vld [vmem:[%s3673_s1 + $0x2d8] sm:$0xff]   ;;  %v2995_v7 = vld [vmem:[%s3673_s1 + $0x220] sm:$0xff]  }
  0x33   : > { %2712 = vmatpush3.bf16.msra.mxu1 %v2948_v6  ;;  %2685 = vmatprep.subr.bf16.mxu0 %v2949_v10  ;;  %v2994_v6 = vld [vmem:[%s3673_s1 + $0x2e0] sm:$0xff]   ;;  %v2998_v10 = vld [vmem:[%s3673_s1 + $0x2e8] sm:$0xff]  }
  0x34   : > { %2713 = vmatprep.subr.bf16.mxu1 %v2950_v9  ;;  %851 = vmatprep.mubr.bf16.mxu0 %v718_v51  ;;  %v2997_v9 = vld [vmem:[%s3673_s1 + $0x268] sm:$0xff]  }
  0x35   : > { %1054 = vmatprep.mubr.bf16.mxu1 %v921_v53  ;;  %v3018_v51 = vld [vmem:[%s3673_s1 + $0x3c8] sm:$0xff]  }
  0x36   : > { %2686 = vmatpush3.bf16.msra.mxu0 %v2951_v12  ;;  %v3000_v12 = vld [vmem:[%s3673_s1 + $0x2a8] sm:$0xff]  }
  0x37   : > { %2714 = vmatpush3.bf16.msra.mxu1 %v2952_v11  ;;  %2687 = vmatprep.subr.bf16.mxu0 %v2953_v14  ;;  %v2999_v11 = vld [vmem:[%s3673_s1 + $0x228] sm:$0xff]   ;;  %v1131_v14 = vshrl.u32 %v3363_v37, 16 }
  0x38   : > { %2715 = vmatprep.subr.bf16.mxu1 %v2954_v13  ;;  %v3001_v13 = vld [vmem:[%s3673_s1 + $0x270] sm:$0xff]  }
  0x3a   : > { %2688 = vmatpush3.bf16.msra.mxu0 %v2955_v16  ;;  %v1134_v16 = vshll.u32 %v3363_v37, 16 }
  0x3b   : > { %2716 = vmatpush3.bf16.msra.mxu1 %v2956_v15  ;;  %2689 = vmatprep.subr.bf16.mxu0 %v2957_v18  ;;  %v3002_v15 = vld [vmem:[%s3673_s1 + $0x2f0] sm:$0xff]   ;;  %v1114_v18 = vshrl.u32 %v3360_v36, 16 }
  0x3c   : > { %2717 = vmatprep.subr.bf16.mxu1 %v2958_v17  ;;  %v3003_v17 = vld [vmem:[%s3673_s1 + $0x230] sm:$0xff]  }
  0x3e   : > { %2690 = vmatpush3.bf16.msra.mxu0 %v2959_v20  ;;  %v1117_v20 = vshll.u32 %v3360_v36, 16  ;;  %v3014_v36 = vld [vmem:[%s3673_s1 + $0x3c0] sm:$0xff]  }
  0x3f   : > { %2718 = vmatpush3.bf16.msra.mxu1 %v2960_v19  ;;  %2691 = vmatprep.subr.bf16.mxu0 %v2963_v22  ;;  %v3004_v19 = vld [vmem:[%s3673_s1 + $0x2b0] sm:$0xff]   ;;  %v1133_v22 = vrot.slane %v1131_v14, 3  ;;  %v3044_v14 = vld [vmem:[%s3673_s1 + $0x3f8] sm:$0xff]  }
  0x40   : > { %2719 = vmatprep.subr.bf16.mxu1 %v2964_v21  ;;  %v3005_v21 = vld [vmem:[%s3673_s1 + $0x278] sm:$0xff]   ;;  %v1119_v28 = vrot.slane %v1117_v20, 4 }
  0x42   : > { %2692 = vmatpush3.bf16.msra.mxu0 %v2965_v24  ;;  %v1136_v24 = vrot.slane %v1134_v16, 4  ;;  %v3046_v16 = vld [vmem:[%s3673_s1 + $0x3b8] sm:$0xff]  }
  0x43   : > { %2720 = vmatpush3.bf16.msra.mxu1 %v2966_v23  ;;  %2693 = vmatprep.subr.bf16.mxu0 %v2967_v26  ;;  %v3006_v23 = vld [vmem:[%s3673_s1 + $0x2f8] sm:$0xff]   ;;  %v1116_v26 = vrot.slane %v1114_v18, 3  ;;  %v1489_v18 = vld [vmem:[%s3226_s8 + $0x20] sm:$0x33] }
  0x44   : > { %2721 = vmatprep.subr.bf16.mxu1 %v2968_v25  ;;  %v3007_v25 = vld [vmem:[%s3673_s1 + $0x238] sm:$0xff]   ;;  %v1137_v44 = vor.u32 %v1136_v24, %v1133_v22 }
  0x45   : > { %v1120_v45 = vor.u32 %v1119_v28, %v1116_v26  ;;  %v3045_v24 = vld [vmem:[%s3673_s1 + $0x338] sm:$0xff]  }
  0x46   : > { %2694 = vmatpush3.bf16.msra.mxu0 %v2969_v38 }
  0x47   : > { %2722 = vmatpush3.bf16.msra.mxu1 %v2970_v27  ;;  %2735 = vmatprep.subr.bf16.mxu0 %v2977_v47  ;;  %v3008_v27 = vld [vmem:[%s3673_s1 + $0x2b8] sm:$0xff]  }
  0x48   : > { %2763 = vmatprep.subr.bf16.mxu1 %v2978_v48 }
  0x49   : > { %852 = vmatmul.mubr.bf16.vlgmr.msra.gmra.mrb[8].mxu0 %v715_v54 }
  0x4a   : > { %1055 = vmatmul.mubr.bf16.vlgmr.msra.gmra.mrb[8].mxu1 %v918_v55  ;;  %2736 = vmatpush3.bf16.msra.mxu0 %v2979_v41  ;;  %v3020_v55 = vld [vmem:[%s3673_s1 + $0x388] sm:$0xff]  }
  0x4b   : > { %2764 = vmatpush3.bf16.msra.mxu1 %v2980_v52  ;;  %2737 = vmatprep.subr.bf16.mxu0 %v2981_v56  ;;  %v3017_v52 = vld [vmem:[%s3673_s1 + $0x348] sm:$0xff]  }
  0x4c   : > { %2765 = vmatprep.subr.bf16.mxu1 %v2982_v57  ;;  %859 = vmatprep.mubr.bf16.mxu0 %v717_v29  ;;  %v3480_v29 = vld [vmem:[%s3226_s8 + $0x18] sm:$0xff]  ;;  %v3019_v56 = vld [vmem:[%s3673_s1 + $0x308] sm:$0xff]  }
  0x4d   : > { %1062 = vmatprep.mubr.bf16.mxu1 %v920_v50  ;;  %v2399_v31 = vcombine.high %v3239_v35, %v3480_v29  ;;  %v2398_v32 = vcombine.low %v3239_v35, %v3480_v29  ;;  %v2451_v37 = vcombine.high %v3480_v29, %v3480_v29  ;;  %v2450_v57 = vcombine.low %v3480_v29, %v3480_v29 }
  0x4e   : > { %2738 = vmatpush3.bf16.msra.mxu0 %v2983_v58  ;;  %v3022_v58 = vld [vmem:[%s3673_s1 + $0x3d0] sm:$0xff]   ;;  %v2503_v22 = vcombine.high %v3480_v29, %v1489_v18 }
  0x4f   : > { %2766 = vmatpush3.bf16.msra.mxu1 %v2984_v59  ;;  %2739 = vmatprep.subr.bf16.mxu0 %v2985_v60  ;;  %v1139_v38 = vshrl.u32 %v2399_v31, 16  ;;  %v1142_v39 = vshll.u32 %v2399_v31, 16  ;;  %v1122_v40 = vshrl.u32 %v2398_v32, 16  ;;  %v3021_v59 = vld [vmem:[%s3673_s1 + $0x350] sm:$0xff]  }
  0x50   : > { %2767 = vmatprep.subr.bf16.mxu1 %v2986_v61  ;;  %v3025_v60 = vld [vmem:[%s3673_s1 + $0x390] sm:$0xff]  }
  0x51   : > { %860 = vmatmul.mubr.bf16.gmra.mrb[12].mxu0 %v714_v42  ;;  %v1125_v42 = vshll.u32 %v2398_v32, 16  ;;  %v1141_v34 = vrot.slane %v1139_v38, 3  ;;  %v1144_v46 = vrot.slane %v1142_v39, 4  ;;  %v1124_v47 = vrot.slane %v1122_v40, 3  ;;  %v3024_v61 = vld [vmem:[%s3673_s1 + $0x310] sm:$0xff]  }
  0x52   : > { %1063 = vmatmul.mubr.bf16.gmra.mrb[12].mxu1 %v917_v49  ;;  %2740 = vmatpush3.bf16.msra.mxu0 %v2987_v62  ;;  %v3015_v49 = vld [vmem:[%s3673_s1 + $0x300] sm:$0xff]   ;;  %v3028_v62 = vld [vmem:[%s3673_s1 + $0x3d8] sm:$0xff]  }
  0x53   : > { %2768 = vmatpush3.bf16.msra.mxu1 %v2988_v63  ;;  %2741 = vmatprep.subr.bf16.mxu0 %v2989_v0  ;;  %v1127_v48 = vrot.slane %v1125_v42, 4  ;;  %v1145_v50 = vor.u32 %v1144_v46, %v1141_v34  ;;  %v3027_v63 = vld [vmem:[%s3673_s1 + $0x358] sm:$0xff]   ;;  %v3054_v34 = vld [vmem:[%s3673_s1 + $0x400] sm:$0xff]  }
  0x54   : > { %2769 = vmatprep.subr.bf16.mxu1 %v2990_v1  ;;  %1467 = vmatprep.mubr.bf16.mxu1 %v2449_v2  ;;  %v3030_v0 = vld [vmem:[%s3673_s1 + $0x398] sm:$0xff]   ;;  %v3032_v2 = vld [vmem:[%s3673_s1 + $0x3e0] sm:$0xff]  }
  0x55   : > { %v1128_v41 = vor.u32 %v1127_v48, %v1124_v47  ;;  %v1146_v53 = vsel %vm1112_vm3, %v1137_v44, %v1145_v50  ;;  %v3029_v1 = vld [vmem:[%s3673_s1 + $0x318] sm:$0xff]  }
  0x56   : > { %2742 = vmatpush3.bf16.msra.mxu0 %v2991_v3  ;;  %1279 = vmatprep.mubr.bf16.mxu0 %v1146_v53  ;;  %v3031_v3 = vld [vmem:[%s3673_s1 + $0x360] sm:$0xff]  }
  0x57   : > { %2770 = vmatpush3.bf16.msra.mxu1 %v2992_v4  ;;  %2743 = vmatprep.subr.bf16.mxu0 %v2993_v5  ;;  %v1129_v54 = vsel %vm1112_vm3, %v1120_v45, %v1128_v41  ;;  %v3034_v4 = vld [vmem:[%s3673_s1 + $0x3a0] sm:$0xff]  }
  0x58   : > { %2771 = vmatprep.subr.bf16.mxu1 %v2994_v6  ;;  %v3033_v5 = vld [vmem:[%s3673_s1 + $0x320] sm:$0xff]   ;;  %v3036_v6 = vld [vmem:[%s3673_s1 + $0x3e8] sm:$0xff]  }
  0x5a   : > { %2744 = vmatpush3.bf16.msra.mxu0 %v2995_v7  ;;  %v3035_v7 = vld [vmem:[%s3673_s1 + $0x368] sm:$0xff]  }
  0x5b   : > { %2772 = vmatpush3.bf16.msra.mxu1 %v2996_v8  ;;  %2745 = vmatprep.subr.bf16.mxu0 %v2997_v9  ;;  %v3038_v8 = vld [vmem:[%s3673_s1 + $0x3a8] sm:$0xff]  }
  0x5c   : > { %2773 = vmatprep.subr.bf16.mxu1 %v2998_v10  ;;  %v3037_v9 = vld [vmem:[%s3673_s1 + $0x328] sm:$0xff]   ;;  %v3040_v10 = vld [vmem:[%s3673_s1 + $0x3f0] sm:$0xff]  }
  0x5e   : > { %2746 = vmatpush3.bf16.msra.mxu0 %v2999_v11  ;;  %v3039_v11 = vld [vmem:[%s3673_s1 + $0x370] sm:$0xff]  }
  0x5f   : > { %2774 = vmatpush3.bf16.msra.mxu1 %v3000_v12  ;;  %2747 = vmatprep.subr.bf16.mxu0 %v3001_v13  ;;  %v3042_v12 = vld [vmem:[%s3673_s1 + $0x3b0] sm:$0xff]  }
  0x60   : > { %2775 = vmatprep.subr.bf16.mxu1 %v3002_v15  ;;  %v3041_v13 = vld [vmem:[%s3673_s1 + $0x330] sm:$0xff]   ;;  %v3043_v15 = vld [vmem:[%s3673_s1 + $0x378] sm:$0xff]  }
  0x62   : > { %2748 = vmatpush3.bf16.msra.mxu0 %v3003_v17  ;;  %v1486_v17 = vld [vmem:[%s3226_s8 + $0x8] sm:$0xcc] }
  0x63   : > { %2776 = vmatpush3.bf16.msra.mxu1 %v3004_v19  ;;  %2749 = vmatprep.subr.bf16.mxu0 %v3005_v21  ;;  %v2500_v19 = vcombine.low %v1486_v17, %v3239_v35  ;;  %v2501_v20 = vcombine.high %v1486_v17, %v3239_v35  ;;  %v2502_v21 = vcombine.low %v3480_v29, %v1489_v18  ;;  %v3053_v35 = vld [vmem:[%s3673_s1 + $0x440] sm:$0xff]  }
  0x64   : > { %2777 = vmatprep.subr.bf16.mxu1 %v3006_v23  ;;  %v1697_v23 = vld [vmem:[%s3226_s8 + $0x20] sm:$0x77] }
  0x65   : > { %v3601_v26 = vcombine.high %v3480_v29, %v1697_v23  ;;  %v1543_v28 = vrot.slane %v2501_v20, 2  ;;  %v1755_v31 = vshrl.u32 %v2501_v20, 16  ;;  %v1758_v32 = vshll.u32 %v2501_v20, 16 }
  0x66   : > { %2750 = vmatpush3.bf16.msra.mxu0 %v3007_v25  ;;  %v3598_v25 = vcombine.low %v3480_v29, %v1697_v23  ;;  %v1738_v39 = vshrl.u32 %v2500_v19, 16  ;;  %v1741_v40 = vshll.u32 %v2500_v19, 16 }
  0x67   : > { %2778 = vmatpush3.bf16.msra.mxu1 %v3008_v27  ;;  %2791 = vmatprep.subr.bf16.mxu0 %v3013_v30  ;;  %v1541_v27 = vrot.slane %v2502_v21, 2  ;;  %v1544_v30 = vrot.slane %v2503_v22, 2  ;;  %v1757_v38 = vrot.slane %v1755_v31, 2  ;;  %v1760_v42 = vrot.slane %v1758_v32, 3 }
  0x68   : > { %2819 = vmatprep.subr.bf16.mxu1 %v3014_v36  ;;  %v1766_v36 = vshll.u32 %v3601_v26, 16  ;;  %v1740_v46 = vrot.slane %v1738_v39, 2  ;;  %v1743_v47 = vrot.slane %v1741_v40, 3  ;;  %v1746_v48 = vshrl.u32 %v3598_v25, 16 }
  0x69   : > { %1280 = vmatmul.mubr.bf16.vlgmr.msra.gmra.mrb[16].mxu0 %v1129_v54  ;;  %v1545_v29 = vsel %vm1539_vm4, %v1543_v28, %v1544_v30 }
  0x6a   : > { %1468 = vmatmul.mubr.bf16.vlgmr.msra.gmra.mrb[16].mxu1 %v2448_v33  ;;  %2792 = vmatpush3.bf16.msra.mxu0 %v3015_v49  ;;  %v1763_v33 = vshrl.u32 %v3601_v26, 16  ;;  %v1768_v44 = vrot.slane %v1766_v36, 3  ;;  %v1749_v49 = vshll.u32 %v3598_v25, 16  ;;  %v1748_v53 = vrot.slane %v1746_v48, 2 }
  0x6b   : > { %2820 = vmatpush3.bf16.msra.mxu1 %v3016_v43  ;;  %1475 = vmatprep.mubr.bf16.mxu1 %v2451_v37  ;;  %v1540_v37 = vrot.slane %v2500_v19, 2 }
  0x6c   : > { %2821 = vmatprep.subr.bf16.mxu1 %v3018_v51  ;;  %1287 = vmatprep.mubr.bf16.mxu0 %v1145_v50  ;;  %v1765_v43 = vrot.slane %v1763_v33, 2  ;;  %v1761_v50 = vor.u32 %v1760_v42, %v1757_v38  ;;  %v3055_v51 = vld [vmem:[%s3673_s1 + $0x448] sm:$0xff]   ;;  %v1751_v54 = vrot.slane %v1749_v49, 3 }
  0x6d   : > { %2793 = vmatprep.subr.bf16.mxu0 %v3017_v52  ;;  %v1542_v45 = vsel %vm1539_vm4, %v1540_v37, %v1541_v27  ;;  %v1744_v52 = vor.u32 %v1743_v47, %v1740_v46 }
  0x6e   : > { %2794 = vmatpush3.bf16.msra.mxu0 %v3019_v56  ;;  %v1752_v56 = vor.u32 %v1751_v54, %v1748_v53 }
  0x6f   : > { %2822 = vmatpush3.bf16.msra.mxu1 %v3020_v55  ;;  %2795 = vmatprep.subr.bf16.mxu0 %v3021_v59 }
  0x70   : > { %2823 = vmatprep.subr.bf16.mxu1 %v3022_v58  ;;  %v3057_v58 = vld [vmem:[%s3673_s1 + $0x450] sm:$0xff]   ;;  %v1753_v59 = vsel %vm1736_vm5, %v1744_v52, %v1752_v56 }
  0x71   : > { %1288 = vmatmul.mubr.bf16.gmra.mrb[20].mxu0 %v1128_v41  ;;  %v1769_v41 = vor.u32 %v1768_v44, %v1765_v43 }
  0x72   : > { %1476 = vmatmul.mubr.bf16.gmra.mrb[20].mxu1 %v2450_v57  ;;  %2796 = vmatpush3.bf16.msra.mxu0 %v3024_v61  ;;  %v3056_v57 = vld [vmem:[%s3673_s1 + $0x408] sm:$0xff]   ;;  %v3059_v61 = vld [vmem:[%s3673_s1 + $0x458] sm:$0xff]  }
  0x73   : > { %2824 = vmatpush3.bf16.msra.mxu1 %v3025_v60  ;;  %2797 = vmatprep.subr.bf16.mxu0 %v3027_v63  ;;  %v1770_v55 = vsel %vm1736_vm5, %v1761_v50, %v1769_v41  ;;  %v3058_v60 = vld [vmem:[%s3673_s1 + $0x410] sm:$0xff]   ;;  %v3061_v63 = vld [vmem:[%s3673_s1 + $0x460] sm:$0xff]  }
  0x74   : > { %2825 = vmatprep.subr.bf16.mxu1 %v3028_v62  ;;  %1678 = vmatprep.mubr.bf16.mxu0 %v1545_v29  ;;  %v3060_v62 = vld [vmem:[%s3673_s1 + $0x418] sm:$0xff]  }
  0x75   : > { %1903 = vmatprep.mubr.bf16.mxu1 %v1770_v55 }
  0x76   : > { %2798 = vmatpush3.bf16.msra.mxu0 %v3029_v1  ;;  %v3071_v1 = vld [vmem:[%s3226_s8 + $0x10] sm:$0xff] }
  0x77   : > { %2826 = vmatpush3.bf16.msra.mxu1 %v3030_v0  ;;  %2799 = vmatprep.subr.bf16.mxu0 %v3031_v3  ;;  %v1922_v0 = vld [vmem:[%s3226_s8 + $0x8] sm:$0x88]  ;;  %v1965_v3 = vrot.slane %v3601_v26, 3 }
  0x78   : > { %2827 = vmatprep.subr.bf16.mxu1 %v3032_v2  ;;  %v2603_v2 = vcombine.high %v1922_v0, %v3071_v1 }
  0x7a   : > { %2800 = vmatpush3.bf16.msra.mxu0 %v3033_v5  ;;  %v1964_v5 = vrot.slane %v2603_v2, 3 }
  0x7b   : > { %2828 = vmatpush3.bf16.msra.mxu1 %v3034_v4  ;;  %2801 = vmatprep.subr.bf16.mxu0 %v3035_v7  ;;  %v3062_v4 = vld [vmem:[%s3673_s1 + $0x420] sm:$0xff]  }
  0x7c   : > { %2829 = vmatprep.subr.bf16.mxu1 %v3036_v6  ;;  %v3063_v6 = vld [vmem:[%s3673_s1 + $0x468] sm:$0xff]   ;;  %v1966_v7 = vsel %vm915_vm2, %v1964_v5, %v1965_v3 }
  0x7e   : > { %2802 = vmatpush3.bf16.msra.mxu0 %v3037_v9  ;;  %v3065_v9 = vld [vmem:[%s3673_s1 + $0x470] sm:$0xff]  }
  0x7f   : > { %2830 = vmatpush3.bf16.msra.mxu1 %v3038_v8  ;;  %2803 = vmatprep.subr.bf16.mxu0 %v3039_v11  ;;  %v3064_v8 = vld [vmem:[%s3673_s1 + $0x428] sm:$0xff]   ;;  %v2602_v11 = vcombine.low %v1922_v0, %v3071_v1 }
  0x80   : > { %2831 = vmatprep.subr.bf16.mxu1 %v3040_v10  ;;  %v3066_v10 = vld [vmem:[%s3673_s1 + $0x430] sm:$0xff]  }
  0x82   : > { %2804 = vmatpush3.bf16.msra.mxu0 %v3041_v13  ;;  %v3068_v13 = vld [vmem:[%s3673_s1 + $0x438] sm:$0xff]  }
  0x83   : > { %2832 = vmatpush3.bf16.msra.mxu1 %v3042_v12  ;;  %2805 = vmatprep.subr.bf16.mxu0 %v3043_v15  ;;  %v3067_v12 = vld [vmem:[%s3673_s1 + $0x478] sm:$0xff]   ;;  %v1962_v15 = vrot.slane %v3598_v25, 3 }
  0x84   : > { %2833 = vmatprep.subr.bf16.mxu1 %v3044_v14  ;;  %v1961_v14 = vrot.slane %v2602_v11, 3 }
  0x86   : > { %2806 = vmatpush3.bf16.msra.mxu0 %v3045_v24 }
  0x87   : > { %2834 = vmatpush3.bf16.msra.mxu1 %v3046_v16  ;;  %2847 = vmatprep.subr.bf16.mxu0 %v3053_v35  ;;  %v1963_v16 = vsel %vm915_vm2, %v1961_v14, %v1962_v15 }
  0x88   : > { %2875 = vmatprep.subr.bf16.mxu1 %v3053_v35 }
  0x89   : > { %1679 = vmatmul.mubr.bf16.vlgmr.msra.gmra.mrb[24].mxu0 %v1542_v45 }
  0x8a   : > { %2848 = vmatpush3.bf16.msra.mxu0 %v3054_v34  ;;  %1686 = vmatprep.mubr.bf16.mxu0 %v1544_v30 }
  0x8b   : > { %2849 = vmatprep.subr.bf16.mxu0 %v3055_v51  ;;  %1904 = vmatmul.mubr.bf16.vlgmr.msra.gmra.mrb[24].mxu1 %v1753_v59 }
  0x8c   : > { %2883 = vmatpush3.bf16.msra.mxu1 %v3054_v34  ;;  %1911 = vmatprep.mubr.bf16.mxu1 %v1769_v41 }
  0x8d   : > { %2876 = vmatprep.subr.bf16.mxu1 %v3055_v51 }
  0x8e   : > { %2850 = vmatpush3.bf16.msra.mxu0 %v3056_v57 }
  0x8f   : > { %2851 = vmatprep.subr.bf16.mxu0 %v3057_v58 }
  0x90   : > { %2884 = vmatpush3.bf16.msra.mxu1 %v3056_v57 }
  0x91   : > { %1687 = vmatmul.mubr.bf16.gmra.mrb[28].mxu0 %v1541_v27  ;;  %2877 = vmatprep.subr.bf16.mxu1 %v3057_v58 }
  0x92   : > { %2852 = vmatpush3.bf16.msra.mxu0 %v3058_v60  ;;  %2099 = vmatprep.mubr.bf16.mxu0 %v1966_v7 }
  0x93   : > { %2853 = vmatprep.subr.bf16.mxu0 %v3059_v61  ;;  %1912 = vmatmul.mubr.bf16.gmra.mrb[28].mxu1 %v1752_v56 }
  0x94   : > { %2885 = vmatpush3.bf16.msra.mxu1 %v3058_v60  ;;  %2107 = vmatprep.mubr.bf16.mxu1 %v1965_v3 }
  0x95   : > { %2878 = vmatprep.subr.bf16.mxu1 %v3059_v61 }
  0x96   : > { %2854 = vmatpush3.bf16.msra.mxu0 %v3060_v62 }
  0x97   : > { %2855 = vmatprep.subr.bf16.mxu0 %v3061_v63 }
  0x98   : > { %2886 = vmatpush3.bf16.msra.mxu1 %v3060_v62 }
  0x99   : > { %2879 = vmatprep.subr.bf16.mxu1 %v3061_v63 }
  0x9a   : > { %2856 = vmatpush3.bf16.msra.mxu0 %v3062_v4 }
  0x9b   : > { %2857 = vmatprep.subr.bf16.mxu0 %v3063_v6 }
  0x9c   : > { %2887 = vmatpush3.bf16.msra.mxu1 %v3062_v4 }
  0x9d   : > { %2880 = vmatprep.subr.bf16.mxu1 %v3063_v6 }
  0x9e   : > { %2858 = vmatpush3.bf16.msra.mxu0 %v3064_v8 }
  0x9f   : > { %2859 = vmatprep.subr.bf16.mxu0 %v3065_v9 }
  0xa0   : > { %2888 = vmatpush3.bf16.msra.mxu1 %v3064_v8 }
  0xa1   : > { %2881 = vmatprep.subr.bf16.mxu1 %v3065_v9 }
  0xa2   : > { %2860 = vmatpush3.bf16.msra.mxu0 %v3066_v10 }
  0xa3   : > { %2861 = vmatprep.subr.bf16.mxu0 %v3067_v12 }
  0xa4   : > { %2889 = vmatpush3.bf16.msra.mxu1 %v3066_v10 }
  0xa5   : > { %2882 = vmatprep.subr.bf16.mxu1 %v3067_v12 }
  0xa6   : > { %2862 = vmatpush3.bf16.msra.mxu0 %v3068_v13 }
  0xa8   : > { %2890 = vmatpush3.bf16.msra.mxu1 %v3068_v13 }
  0xa9   : > { %2100 = vmatmul.mubr.bf16.vlgmr.msra.gmra.mrb[32].mxu0 %v1963_v16 }
  0xab   : > { %2108 = vmatmul.mubr.bf16.vlgmr.msra.gmra.mrb[32].mxu1 %v1962_v15 }
  0xfc   : > { %v2639_v23 = vpop.f32.mrb[0].mxu0 }
  0xfd   : > { %v2667_v17 = vpop.f32.mrb[0].mxu1  ;;  %v2640_v24 = vpop.f32.mrb[1].mxu0 }
  0xfe   : > { %v2668_v18 = vpop.f32.mrb[1].mxu1  ;;  %v2641_v26 = vadd.f32 %v2640_v24, %v2639_v23  ;;  %v2642_v25 = vpop.f32.mrb[2].mxu0 }
  0xff   : > { %v2669_v19 = vadd.f32 %v2668_v18, %v2667_v17  ;;  %v2670_v20 = vpop.f32.mrb[2].mxu1  ;;  %v2643_v35 = vpop.f32.mrb[3].mxu0 }
 0x100   : > { %v2671_v21 = vpop.f32.mrb[3].mxu1  ;;  %v2644_v30 = vadd.f32 %v2643_v35, %v2642_v25 }
 0x101   : > { %v2672_v22 = vadd.f32 %v2671_v21, %v2670_v20  ;;  %v660_v28 = vadd.f32 %v2669_v19, %v2641_v26 }
 0x103   : > { %v663_v36 = vadd.f32 %v2672_v22, %v2644_v30 }
 0x104   : > { %v2645_v29 = vpop.f32.mrb[4].mxu0 }
 0x105   : > { %v2673_v27 = vpop.f32.mrb[4].mxu1  ;;  %v2646_v38 = vpop.f32.mrb[5].mxu0 }
 0x106   : > { %v2674_v31 = vpop.f32.mrb[5].mxu1  ;;  %v2647_v39 = vadd.f32 %v2646_v38, %v2645_v29  ;;  %v2648_v40 = vpop.f32.mrb[6].mxu0 }
 0x107   : > { %v2675_v32 = vadd.f32 %v2674_v31, %v2673_v27  ;;  %v2676_v33 = vpop.f32.mrb[6].mxu1  ;;  %v2649_v42 = vpop.f32.mrb[7].mxu0 }
 0x108   : > { %v2677_v37 = vpop.f32.mrb[7].mxu1 }
 0x109   : > { %v668_v43 = vadd.f32 %v2675_v32, %v2647_v39 }
 0x11c   : > { %v2695_v45 = vpop.f32.mrb[8].mxu0 }
 0x11d   : > { %v2723_v44 = vpop.f32.mrb[8].mxu1  ;;  %v2696_v46 = vpop.f32.mrb[9].mxu0 }
 0x11e   : > { %v2724_v34 = vpop.f32.mrb[9].mxu1  ;;  %v2697_v49 = vadd.f32 %v2696_v46, %v2695_v45  ;;  %v2698_v50 = vpop.f32.mrb[10].mxu0 }
 0x11f   : > { %v2725_v47 = vadd.f32 %v2724_v34, %v2723_v44  ;;  %v2726_v48 = vpop.f32.mrb[10].mxu1  ;;  %v2699_v51 = vpop.f32.mrb[11].mxu0 }
 0x120   : > { %v2727_v41 = vpop.f32.mrb[11].mxu1  ;;  %v867_v53 = vadd.f32 %v2697_v49, %v660_v28  ;;  %v2700_v54 = vadd.f32 %v2699_v51, %v2698_v50 }
 0x121   : > { %v2728_v52 = vadd.f32 %v2727_v41, %v2726_v48 }
 0x122   : > { %v1070_v55 = vadd.f32 %v2725_v47, %v867_v53  ;;  %v868_v56 = vadd.f32 %v2700_v54, %v663_v36 }
 0x124   : > { %v1071_v58 = vadd.f32 %v2728_v52, %v868_v56  ;;  %v2701_v59 = vpop.f32.mrb[12].mxu0 }
 0x125   : > { %v2729_v57 = vpop.f32.mrb[12].mxu1  ;;  %v2702_v61 = vpop.f32.mrb[13].mxu0 }
 0x126   : > { %v2730_v60 = vpop.f32.mrb[13].mxu1  ;;  %v2703_v0 = vadd.f32 %v2702_v61, %v2701_v59  ;;  %v2704_v1 = vpop.f32.mrb[14].mxu0 }
 0x127   : > { %v2731_v62 = vadd.f32 %v2730_v60, %v2729_v57  ;;  %v2732_v63 = vpop.f32.mrb[14].mxu1  ;;  %v2705_v3 = vpop.f32.mrb[15].mxu0 }
 0x128   : > { %v2733_v2 = vpop.f32.mrb[15].mxu1  ;;  %v869_v4 = vadd.f32 %v2703_v0, %v668_v43 }
 0x129   : > { %v2620_v2 = vld [vmem:[#allocation2] ss:$0 sm:$0xff] }
 0x12a   : > { %v1072_v5 = vadd.f32 %v2731_v62, %v869_v4 }
 0x13c   : > { %v2751_v12 = vpop.f32.mrb[16].mxu0 }
 0x13d   : > { %v2779_v6 = vpop.f32.mrb[16].mxu1  ;;  %v2752_v13 = vpop.f32.mrb[17].mxu0 }
 0x13e   : > { %v2780_v7 = vpop.f32.mrb[17].mxu1  ;;  %v2753_v14 = vadd.f32 %v2752_v13, %v2751_v12  ;;  %v2754_v15 = vpop.f32.mrb[18].mxu0 }
 0x13f   : > { %v2781_v8 = vadd.f32 %v2780_v7, %v2779_v6  ;;  %v2782_v9 = vpop.f32.mrb[18].mxu1  ;;  %v2755_v16 = vpop.f32.mrb[19].mxu0 }
 0x140   : > { %v2783_v10 = vpop.f32.mrb[19].mxu1  ;;  %v1295_v18 = vadd.f32 %v2753_v14, %v1070_v55  ;;  %v2756_v19 = vadd.f32 %v2755_v16, %v2754_v15 }
 0x141   : > { %v2784_v11 = vadd.f32 %v2783_v10, %v2782_v9 }
 0x142   : > { %v1483_v23 = vadd.f32 %v2781_v8, %v1295_v18  ;;  %v1296_v24 = vadd.f32 %v2756_v19, %v1071_v58 }
 0x144   : > { %v1484_v25 = vadd.f32 %v2784_v11, %v1296_v24  ;;  %v2757_v35 = vpop.f32.mrb[20].mxu0 }
 0x145   : > { %v2785_v17 = vpop.f32.mrb[20].mxu1  ;;  %v2758_v27 = vpop.f32.mrb[21].mxu0 }
 0x146   : > { %v2786_v20 = vpop.f32.mrb[21].mxu1  ;;  %v2759_v28 = vadd.f32 %v2758_v27, %v2757_v35  ;;  %v2760_v30 = vpop.f32.mrb[22].mxu0 }
 0x147   : > { %v2787_v21 = vadd.f32 %v2786_v20, %v2785_v17  ;;  %v2788_v22 = vpop.f32.mrb[22].mxu1  ;;  %v2761_v31 = vpop.f32.mrb[23].mxu0 }
 0x148   : > { %v2789_v26 = vpop.f32.mrb[23].mxu1  ;;  %v1297_v32 = vadd.f32 %v2759_v28, %v1072_v5 }
 0x14a   : > { %v1485_v33 = vadd.f32 %v2787_v21, %v1297_v32 }
 0x15c   : > { %v2807_v36 = vpop.f32.mrb[24].mxu0 }
 0x15d   : > { %v2808_v37 = vpop.f32.mrb[25].mxu0 }
 0x15e   : > { %v2809_v29 = vadd.f32 %v2808_v37, %v2807_v36  ;;  %v2810_v38 = vpop.f32.mrb[26].mxu0  ;;  %v2835_v40 = vpop.f32.mrb[24].mxu1 }
 0x15f   : > { %v2811_v39 = vpop.f32.mrb[27].mxu0  ;;  %v2836_v44 = vpop.f32.mrb[25].mxu1 }
 0x160   : > { %v1694_v42 = vadd.f32 %v2809_v29, %v1483_v23  ;;  %v2812_v43 = vadd.f32 %v2811_v39, %v2810_v38  ;;  %v2837_v45 = vadd.f32 %v2836_v44, %v2835_v40  ;;  %v2838_v34 = vpop.f32.mrb[26].mxu1 }
 0x161   : > { %v2839_v47 = vpop.f32.mrb[27].mxu1 }
 0x162   : > { %v1695_v46 = vadd.f32 %v2812_v43, %v1484_v25  ;;  %v1919_v48 = vadd.f32 %v2837_v45, %v1694_v42  ;;  %v2840_v49 = vadd.f32 %v2839_v47, %v2838_v34 }
 0x164   : > { %v2813_v50 = vpop.f32.mrb[28].mxu0  ;;  %v1920_v51 = vadd.f32 %v2840_v49, %v1695_v46 }
 0x165   : > { %v2814_v41 = vpop.f32.mrb[29].mxu0 }
 0x166   : > { %v2815_v52 = vadd.f32 %v2814_v41, %v2813_v50  ;;  %v2816_v53 = vpop.f32.mrb[30].mxu0  ;;  %v2841_v56 = vpop.f32.mrb[28].mxu1 }
 0x167   : > { %v2817_v54 = vpop.f32.mrb[31].mxu0  ;;  %v2842_v57 = vpop.f32.mrb[29].mxu1 }
 0x168   : > { %v1696_v55 = vadd.f32 %v2815_v52, %v1485_v33  ;;  %v2843_v58 = vadd.f32 %v2842_v57, %v2841_v56  ;;  %v2844_v59 = vpop.f32.mrb[30].mxu1 }
 0x169   : > { %v2845_v60 = vpop.f32.mrb[31].mxu1 }
 0x16a   : > { %v1921_v61 = vadd.f32 %v2843_v58, %v1696_v55 }
 0x17c   : > { %v2863_v62 = vpop.f32.mrb[32].mxu0 }
 0x17d   : > { %v2864_v63 = vpop.f32.mrb[33].mxu0 }
 0x17e   : > { %v2865_v0 = vadd.f32 %v2864_v63, %v2863_v62  ;;  %v2866_v1 = vpop.f32.mrb[34].mxu0  ;;  %v2869_v4 = vpop.f32.mrb[32].mxu1 }
 0x17f   : > { %v2867_v3 = vpop.f32.mrb[35].mxu0  ;;  %v2870_v7 = vpop.f32.mrb[33].mxu1 }
 0x180   : > { %v2115_v5 = vadd.f32 %v2865_v0, %v1919_v48  ;;  %v2868_v6 = vadd.f32 %v2867_v3, %v2866_v1  ;;  %v2871_v9 = vadd.f32 %v2870_v7, %v2869_v4  ;;  %v2872_v10 = vpop.f32.mrb[34].mxu1 }
 0x181   : > { %v2873_v12 = vpop.f32.mrb[35].mxu1 }
 0x182   : > { %v2125_v8 = vadd.f32 %v2620_v2, %v2115_v5  ;;  %v2116_v11 = vadd.f32 %v2868_v6, %v1920_v51  ;;  %v2117_v13 = vadd.f32 %v2871_v9, %v1921_v61 }
 0x184   : > { %2129 = vst.msk [vmem:[%s257_s14] sm:$0xff] %vm2128_vm6, %v2125_v8  ;;  %v2126_v14 = vadd.f32 %v2620_v2, %v2116_v11  ;;  %v2127_v15 = vadd.f32 %v2620_v2, %v2117_v13 }
 0x186   : > { %2130 = vst.msk [vmem:[%s257_s14 + $0x8] sm:$0xff] %vm2128_vm6, %v2126_v14  ;;  %2131 = vst.msk [vmem:[%s257_s14 + $0x10] sm:$0xff] %vm2128_vm6, %v2127_v15 }
 0x187 PF: > { %s22_s23 = sadd.s32 1, %s3078_s23  }
 0x188   : > { %p19_p4 = scmp.ge.s32.totalorder %s22_s23, 4  }
 0x18a   :  { %21 = sbr.rel (!%p19_p4) target bundleno = 3 (0x3), region = 82 }

</bundles_post_ra>
